<compile_context>
chip_gen: v5e
topology: v5e:2x2
jax: 0.10.0
libtpu: 0.0.40
codegen_flags: <defaults>
</compile_context>

<pallas_src>
import functools

import jax
import jax.numpy as jnp
from jax.experimental import pallas as pl
from jax.experimental.pallas import tpu as pltpu

NEG = -1e30   # "-inf" stand-in, safely below any real logit
POS = 1e30    # "+inf" stand-in for the min-removal top-k path


# ----------------------------- in-kernel helpers -----------------------------

def _erf(x):
    # Abramowitz & Stegun 7.1.26 rational approximation (|err| < 1.5e-7).
    a1, a2, a3, a4, a5 = 0.254829592, -0.284496736, 1.421413741, -1.453152027, 1.061405429
    p = 0.3275911
    s = jnp.where(x >= 0.0, 1.0, -1.0)
    z = jnp.abs(x)
    t = 1.0 / (1.0 + p * z)
    poly = t * (a1 + t * (a2 + t * (a3 + t * (a4 + t * a5))))
    return s * (1.0 - poly * jnp.exp(-z * z))


def _gelu(x):
    # torch.nn.GELU() default = exact (erf) gelu.
    # TODO(synk): switch to tanh-approx GELU (EUP tanh) if a bundle dump shows
    # the VALU slot saturating on the erf polynomial at realistic dims.
    return 0.5 * x * (1.0 + _erf(x * 0.7071067811865476))


def _layernorm(x, gamma, beta, eps):
    mu = jnp.mean(x, axis=-1, keepdims=True)
    var = jnp.mean(jnp.square(x - mu), axis=-1, keepdims=True)
    return (x - mu) * jax.lax.rsqrt(var + eps) * gamma + beta


# ------------------------- fused Swin-block kernel ----------------------------

def make_swin_block_kernel(wpb, N, num_heads, head_dim, hid, hchunk,
                           topk, scale, eps, cdt):
    """wpb windows per grid step; cdt = MXU operand dtype (bf16, f32 accum)."""
    C = num_heads * head_dim
    rows = wpb * N

    def kernel(x_ref, g1_ref, b1_ref,
               wqkv_ref, bqkv_ref, rpb_ref, wp_ref, bp_ref,
               g2_ref, b2_ref, w1_ref, bf1_ref, w2_ref, bf2_ref,
               o_ref):
        # ---- LN1 (f32), MXU operands cast to bf16 ----
        xn = _layernorm(x_ref[...].astype(jnp.float32),
                        g1_ref[...], b1_ref[...], eps).astype(cdt)

        # ---- fused QKV: one lane-dense (rows, C) @ (C, 3C) matmul ----
        qkv = jnp.dot(xn, wqkv_ref[...],
                      preferred_element_type=jnp.float32) + bqkv_ref[...]
        q_all = (qkv[:, :C] * scale).astype(cdt)          # scale after bias (torch order)
        k_all = qkv[:, C:2 * C].astype(cdt)
        v_all = qkv[:, 2 * C:].astype(cdt)

        # ---- per-head, window-batched attention ----
        ctx_heads = []
        for h in range(num_heads):                         # static loop, nh small
            sl = slice(h * head_dim, (h + 1) * head_dim)
            qh = q_all[:, sl].reshape(wpb, N, head_dim)
            kh = k_all[:, sl].reshape(wpb, N, head_dim)
            vh = v_all[:, sl].reshape(wpb, N, head_dim)

            s = jnp.einsum('wnd,wmd->wnm', qh, kh,
                           preferred_element_type=jnp.float32)   # (wpb, N, N)
            s = s + rpb_ref[h]                             # (N,N) bias, bcast over wpb

            m = jnp.max(s, axis=-1, keepdims=True)

            # ---- top-k threshold: kth-largest == (N-k+1)th-smallest; pick the
            # cheaper removal side at trace time.
            # TODO(synk): torch.topk tie-breaking not reproduced for exactly
            # equal logits (measure-zero for float inputs); a log-depth binary
            # search would replace this serial XLU chain if it ever binds.
            if topk < N:
                work = s
                if (N - topk) < (topk - 1):
                    for _ in range(N - topk):
                        rmin = jnp.min(work, axis=-1, keepdims=True)
                        work = jnp.where(work <= rmin, POS, work)
                    thresh = jnp.min(work, axis=-1, keepdims=True)
                else:
                    for _ in range(topk - 1):
                        rmax = jnp.max(work, axis=-1, keepdims=True)
                        work = jnp.where(work >= rmax, NEG, work)
                    thresh = jnp.max(work, axis=-1, keepdims=True)
                # always keep at least the row max (guards degenerate ties)
                keep = s >= jnp.minimum(thresh, m)
            else:
                keep = None

            # ---- softmax restricted to kept entries (exact division) ----
            e = jnp.exp(s - m)
            if keep is not None:
                e = jnp.where(keep, e, 0.0)
            p = e / jnp.sum(e, axis=-1, keepdims=True)

            ctx_h = jnp.einsum('wnm,wmd->wnd', p.astype(cdt), vh,
                               preferred_element_type=jnp.float32)  # (wpb, N, hd)
            ctx_heads.append(ctx_h.reshape(rows, head_dim))

        # ---- head concat -> single lane-dense output projection ----
        ctx = jnp.concatenate(ctx_heads, axis=-1).astype(cdt)       # (rows, C)
        attn_out = jnp.dot(ctx, wp_ref[...],
                           preferred_element_type=jnp.float32) + bp_ref[...]

        # ---- residual 1 (x re-read here: short live range across attention) --
        xr = x_ref[...].astype(jnp.float32) + attn_out

        # ---- LN2 + hidden-chunked MLP + residual 2 ----
        xn2 = _layernorm(xr, g2_ref[...], b2_ref[...], eps).astype(cdt)
        y = jnp.zeros((rows, C), jnp.float32)
        for c0 in range(0, hid, hchunk):                   # static chunk loop
            hblk = jnp.dot(xn2, w1_ref[:, c0:c0 + hchunk],
                           preferred_element_type=jnp.float32)
            hblk = _gelu(hblk + bf1_ref[:, c0:c0 + hchunk]).astype(cdt)
            y = y + jnp.dot(hblk, w2_ref[c0:c0 + hchunk, :],
                            preferred_element_type=jnp.float32)
        o_ref[...] = (xr + y + bf2_ref[...]).astype(o_ref.dtype)

    return kernel


# ------------------------------ JAX-side glue --------------------------------

def window_partition(x, ws):
    # x: (B, H, W, C) -> (num_windows*B, ws*ws, C)
    B, H, W, C = x.shape
    x = x.reshape(B, H // ws, ws, W // ws, ws, C)
    x = jnp.transpose(x, (0, 1, 3, 2, 4, 5))
    return x.reshape(-1, ws * ws, C)


def window_reverse(windows, ws, H, W):
    # windows: (num_windows*B, ws*ws, C) -> (B, H, W, C)
    C = windows.shape[-1]
    B = windows.shape[0] // ((H // ws) * (W // ws))
    x = windows.reshape(B, H // ws, W // ws, ws, ws, C)
    x = jnp.transpose(x, (0, 1, 3, 2, 4, 5))
    return x.reshape(B, H, W, C)


def relative_position_bias(table, window_size, num_heads):
    ws = window_size
    N = ws * ws
    coords = jnp.stack(jnp.meshgrid(jnp.arange(ws), jnp.arange(ws), indexing="ij"))
    cf = coords.reshape(2, -1)                                # (2, N)
    rc = cf[:, :, None] - cf[:, None, :]                      # (2, N, N)
    idx = (rc[0] + ws - 1) * (2 * ws - 1) + (rc[1] + ws - 1)  # (N, N)
    bias = table[idx.reshape(-1)].reshape(N, N, num_heads)
    return jnp.transpose(bias, (2, 0, 1)).astype(jnp.float32)  # (nh, N, N)


def _device_kind():
    try:
        return jax.devices()[0].device_kind.lower()
    except Exception:
        return ""


def _matmul_dtype():
    # bf16 MXU operands on all TPU generations (f32 accumulation via
    # preferred_element_type); elementwise LN/softmax/top-k/GELU stay f32.
    return jnp.bfloat16


def _vmem_limit_bytes():
    kind = _device_kind()
    if any(t in kind for t in ("v7", "tpu7")):
        return 48 * 1024 * 1024          # 64 MiB physical on v7x
    if any(t in kind for t in ("v5", "v6")):
        return 96 * 1024 * 1024          # 128 MiB physical on v5e/v6e
    return None


def _choose_windows_per_block(Bw, N, C):
    """Batch windows per grid step; keep >= 2 grid steps (megacore) and a
    generation-aware per-step row cap (tighter on v7x's 64 MiB VMEM)."""
    if Bw <= 1:
        return 1
    kind = _device_kind()
    is_v7 = any(t in kind for t in ("v7", "tpu7"))
    max_rows = 512 if (is_v7 and C >= 512) else 1024
    wpb = max(1, min(Bw // 2, max(1, max_rows // N)))
    while wpb > 1 and Bw % wpb != 0:
        wpb -= 1
    return wpb


def _mlp_hidden_chunk(hid):
    for c in (512, 384, 256, 128):
        if hid % c == 0:
            return c
    return hid


def _full_spec(arr, single_buffer):
    """Whole-array block, constant index map (grid-invariant input).
    single_buffer requests no double buffering (pipeline_mode=pl.Buffered(1))."""
    shp = arr.shape
    imap = lambda *args, n=len(shp): (0,) * n
    if single_buffer and hasattr(pl, "Buffered"):
        try:
            return pl.BlockSpec(shp, imap, pipeline_mode=pl.Buffered(1))
        except TypeError:
            pass
    return pl.BlockSpec(shp, imap)


def init_params(key, dim, num_heads, window_size, mlp_ratio):
    hid = int(dim * mlp_ratio)
    ks = jax.random.split(key, 9)

    def trunc(k, shape, std=0.02):
        return std * jax.random.truncated_normal(k, -2.0, 2.0, shape, jnp.float32)

    return dict(
        ln1_g=jnp.ones((1, dim), jnp.float32),
        ln1_b=jnp.zeros((1, dim), jnp.float32),
        ln2_g=jnp.ones((1, dim), jnp.float32),
        ln2_b=jnp.zeros((1, dim), jnp.float32),
        w_qkv=trunc(ks[0], (dim, 3 * dim)),
        b_qkv=0.02 * jax.random.normal(ks[1], (1, 3 * dim), jnp.float32),
        w_proj=trunc(ks[2], (dim, dim)),
        b_proj=0.02 * jax.random.normal(ks[3], (1, dim), jnp.float32),
        w_fc1=trunc(ks[4], (dim, hid)),
        b_fc1=0.02 * jax.random.normal(ks[5], (1, hid), jnp.float32),
        w_fc2=trunc(ks[6], (hid, dim)),
        b_fc2=0.02 * jax.random.normal(ks[7], (1, dim), jnp.float32),
        rpb_table=trunc(ks[8], ((2 * window_size - 1) ** 2, num_heads)),
    )


def basic_layer_forward(x, params, H, W, num_heads, window_size,
                        k_rate=0.75, eps=1e-5, single_buffer_weights=True):
    # depth=1 block, shift_size=0 -> no roll, attn_mask is None
    B, L, C = x.shape
    ws = window_size
    N = ws * ws
    assert L == H * W and C % num_heads == 0
    head_dim = C // num_heads
    scale = head_dim ** (-0.5)
    topk = max(1, int(N * k_rate))
    cdt = _matmul_dtype()

    # Window layout is a token permutation; LN1/LN2/MLP/residuals are per-token,
    # so the whole block runs in window layout and the permutation is reversed
    # exactly once at the end (no attention->MLP HBM round trip).
    xw = window_partition(x.reshape(B, H, W, C), ws)          # (Bw, N, C)
    Bw = xw.shape[0]
    x_flat = xw.reshape(Bw * N, C)

    wpb = _choose_windows_per_block(Bw, N, C)
    nblk = Bw // wpb
    rows_blk = wpb * N

    wqkv = params["w_qkv"].astype(cdt)                         # (C, 3C)
    bqkv = params["b_qkv"].astype(jnp.float32)                 # (1, 3C)
    wp = params["w_proj"].astype(cdt)                          # (C, C)
    bp = params["b_proj"].astype(jnp.float32)                  # (1, C)
    rpb = relative_position_bias(params["rpb_table"], ws, num_heads)  # (nh,N,N)
    w1 = params["w_fc1"].astype(cdt)                           # (C, hid)
    bf1 = params["b_fc1"].astype(jnp.float32)
    w2 = params["w_fc2"].astype(cdt)                           # (hid, C)
    bf2 = params["b_fc2"].astype(jnp.float32)
    g1, b1 = params["ln1_g"], params["ln1_b"]
    g2, b2 = params["ln2_g"], params["ln2_b"]

    hid = w1.shape[1]
    hchunk = _mlp_hidden_chunk(hid)

    kernel = make_swin_block_kernel(wpb, N, num_heads, head_dim, hid, hchunk,
                                    topk, scale, eps, cdt)

    inv = lambda a: _full_spec(a, single_buffer_weights)

    grid_spec = pltpu.PrefetchScalarGridSpec(
        num_scalar_prefetch=0,
        grid=(nblk,),
        in_specs=[
            pl.BlockSpec((rows_blk, C), lambda i: (i, 0)),     # tokens (window layout)
            inv(g1), inv(b1),
            inv(wqkv), inv(bqkv), inv(rpb), inv(wp), inv(bp),
            inv(g2), inv(b2), inv(w1), inv(bf1), inv(w2), inv(bf2),
        ],
        out_specs=pl.BlockSpec((rows_blk, C), lambda i: (i, 0)),
    )

    cp_kwargs = dict(dimension_semantics=("parallel",))
    vmem_limit = _vmem_limit_bytes()
    if vmem_limit is not None:
        cp_kwargs["vmem_limit_bytes"] = vmem_limit

    # TODO(synk): at toy C=32 the output store is not lane-dense (<128 lanes);
    # at realistic Swin dims (C >= 128) this same spec is 128-aligned.
    out_flat = pl.pallas_call(
        kernel,
        out_shape=jax.ShapeDtypeStruct((Bw * N, C), x.dtype),
        grid_spec=grid_spec,
        compiler_params=pltpu.CompilerParams(**cp_kwargs),
    )(x_flat, g1, b1, wqkv, bqkv, rpb, wp, bp, g2, b2, w1, bf1, w2, bf2)

    out = window_reverse(out_flat.reshape(Bw, N, C), ws, H, W)
    return out.reshape(B, L, C)


# ----------------------------------- main -------------------------------------

if __name__ == "__main__":
    dim = 32
    H = W = 8
    num_heads = 4
    window_size = 4
    mlp_ratio = 4.0
    B = 2

    key = jax.random.PRNGKey(0)
    kx, kp = jax.random.split(key)
    x = jax.random.normal(kx, (B, H * W, dim), jnp.float32)
    params = init_params(kp, dim, num_heads, window_size, mlp_ratio)

    def run(single_buffer):
        fwd = jax.jit(functools.partial(
            basic_layer_forward, H=H, W=W, num_heads=num_heads,
            window_size=window_size, single_buffer_weights=single_buffer))
        return jax.block_until_ready(fwd(x, params))

    try:
        out = run(True)
    except Exception:
        # TODO(synk): fall back to default double-buffered weight blocks if this
        # jax build rejects pipeline_mode=pl.Buffered(1) on grid-invariant inputs.
        out = run(False)

    assert out.shape == (B, H * W, dim)
    assert bool(jnp.all(jnp.isfinite(out)))
    print("KERNEL_OK")
</pallas_src>

<mosaic_0001>
module attributes {stable_mosaic.version = 11 : i64} {
  func.func @kernel(%arg0: i32, %arg1: memref<64x32xf32, #tpu.memory_space<vmem>>, %arg2: memref<1x32xf32, #tpu.memory_space<vmem>>, %arg3: memref<1x32xf32, #tpu.memory_space<vmem>>, %arg4: memref<32x96xbf16, #tpu.memory_space<vmem>>, %arg5: memref<1x96xf32, #tpu.memory_space<vmem>>, %arg6: memref<4x16x16xf32, #tpu.memory_space<vmem>>, %arg7: memref<32x32xbf16, #tpu.memory_space<vmem>>, %arg8: memref<1x32xf32, #tpu.memory_space<vmem>>, %arg9: memref<1x32xf32, #tpu.memory_space<vmem>>, %arg10: memref<1x32xf32, #tpu.memory_space<vmem>>, %arg11: memref<32x128xbf16, #tpu.memory_space<vmem>>, %arg12: memref<1x128xf32, #tpu.memory_space<vmem>>, %arg13: memref<128x32xbf16, #tpu.memory_space<vmem>>, %arg14: memref<1x32xf32, #tpu.memory_space<vmem>>, %arg15: memref<64x32xf32, #tpu.memory_space<vmem>>) attributes {dimension_semantics = [#tpu.dimension_semantics<parallel>], iteration_bounds = array<i64: 2>, scalar_prefetch = 0 : i64, scratch_operands = 0 : i64, tpu.core_type = #tpu.core_type<tc>, window_params = [{transform_indices = @transform_0, window_bounds = array<i64: 64, 32>}, {pipeline_mode = #tpu.pipeline_mode<synchronous>, transform_indices = @transform_1, window_bounds = array<i64: 1, 32>}, {pipeline_mode = #tpu.pipeline_mode<synchronous>, transform_indices = @transform_2, window_bounds = array<i64: 1, 32>}, {pipeline_mode = #tpu.pipeline_mode<synchronous>, transform_indices = @transform_3, window_bounds = array<i64: 32, 96>}, {pipeline_mode = #tpu.pipeline_mode<synchronous>, transform_indices = @transform_4, window_bounds = array<i64: 1, 96>}, {pipeline_mode = #tpu.pipeline_mode<synchronous>, transform_indices = @transform_5, window_bounds = array<i64: 4, 16, 16>}, {pipeline_mode = #tpu.pipeline_mode<synchronous>, transform_indices = @transform_6, window_bounds = array<i64: 32, 32>}, {pipeline_mode = #tpu.pipeline_mode<synchronous>, transform_indices = @transform_7, window_bounds = array<i64: 1, 32>}, {pipeline_mode = #tpu.pipeline_mode<synchronous>, transform_indices = @transform_8, window_bounds = array<i64: 1, 32>}, {pipeline_mode = #tpu.pipeline_mode<synchronous>, transform_indices = @transform_9, window_bounds = array<i64: 1, 32>}, {pipeline_mode = #tpu.pipeline_mode<synchronous>, transform_indices = @transform_10, window_bounds = array<i64: 32, 128>}, {pipeline_mode = #tpu.pipeline_mode<synchronous>, transform_indices = @transform_11, window_bounds = array<i64: 1, 128>}, {pipeline_mode = #tpu.pipeline_mode<synchronous>, transform_indices = @transform_12, window_bounds = array<i64: 128, 32>}, {pipeline_mode = #tpu.pipeline_mode<synchronous>, transform_indices = @transform_13, window_bounds = array<i64: 1, 32>}, {transform_indices = @transform_14, window_bounds = array<i64: 64, 32>}]} {
    %c0 = arith.constant 0 : index
    %c0_0 = arith.constant 0 : index
    %0 = vector.load %arg1[%c0, %c0_0] : memref<64x32xf32, #tpu.memory_space<vmem>>, vector<64x32xf32>
    %c0_1 = arith.constant 0 : index
    %c0_2 = arith.constant 0 : index
    %1 = vector.load %arg2[%c0_1, %c0_2] : memref<1x32xf32, #tpu.memory_space<vmem>>, vector<1x32xf32>
    %c0_3 = arith.constant 0 : index
    %c0_4 = arith.constant 0 : index
    %2 = vector.load %arg3[%c0_3, %c0_4] : memref<1x32xf32, #tpu.memory_space<vmem>>, vector<1x32xf32>
    %cst = arith.constant dense<0.000000e+00> : vector<64xf32>
    %3 = vector.multi_reduction <add>, %0, %cst [1] : vector<64x32xf32> to vector<64xf32>
    %4 = vector.shape_cast %3 : vector<64xf32> to vector<64x1xf32>
    %cst_5 = arith.constant 3.200000e+01 : f32
    %5 = vector.broadcast %cst_5 : f32 to vector<64x1xf32>
    %6 = arith.divf %4, %5 : vector<64x1xf32>
    %7 = vector.broadcast %6 : vector<64x1xf32> to vector<64x32xf32>
    %8 = arith.subf %0, %7 : vector<64x32xf32>
    %9 = arith.mulf %8, %8 : vector<64x32xf32>
    %cst_6 = arith.constant dense<0.000000e+00> : vector<64xf32>
    %10 = vector.multi_reduction <add>, %9, %cst_6 [1] : vector<64x32xf32> to vector<64xf32>
    %11 = vector.shape_cast %10 : vector<64xf32> to vector<64x1xf32>
    %cst_7 = arith.constant 3.200000e+01 : f32
    %12 = vector.broadcast %cst_7 : f32 to vector<64x1xf32>
    %13 = arith.divf %11, %12 : vector<64x1xf32>
    %14 = vector.broadcast %6 : vector<64x1xf32> to vector<64x32xf32>
    %15 = arith.subf %0, %14 : vector<64x32xf32>
    %cst_8 = arith.constant 9.99999974E-6 : f32
    %16 = vector.broadcast %cst_8 : f32 to vector<64x1xf32>
    %17 = arith.addf %13, %16 : vector<64x1xf32>
    %18 = math.rsqrt %17 : vector<64x1xf32>
    %19 = vector.broadcast %18 : vector<64x1xf32> to vector<64x32xf32>
    %20 = arith.mulf %15, %19 : vector<64x32xf32>
    %21 = vector.broadcast %1 : vector<1x32xf32> to vector<64x32xf32>
    %22 = arith.mulf %20, %21 : vector<64x32xf32>
    %23 = vector.broadcast %2 : vector<1x32xf32> to vector<64x32xf32>
    %24 = arith.addf %22, %23 : vector<64x32xf32>
    %25 = arith.truncf %24 : vector<64x32xf32> to vector<64x32xbf16>
    %c0_9 = arith.constant 0 : index
    %c0_10 = arith.constant 0 : index
    %26 = vector.load %arg4[%c0_9, %c0_10] : memref<32x96xbf16, #tpu.memory_space<vmem>>, vector<32x96xbf16>
    %cst_11 = arith.constant dense<0.000000e+00> : vector<64x96xf32>
    %27 = tpu.matmul %25, %26, %cst_11 {dimension_numbers = #tpu.dot_dimension_numbers<[1], [0], [0], [1], [0, 0, 1, 1], [], []>} : vector<64x32xbf16>, vector<32x96xbf16>, vector<64x96xf32> -> vector<64x96xf32>
    %c0_12 = arith.constant 0 : index
    %c0_13 = arith.constant 0 : index
    %28 = vector.load %arg5[%c0_12, %c0_13] : memref<1x96xf32, #tpu.memory_space<vmem>>, vector<1x96xf32>
    %29 = vector.broadcast %28 : vector<1x96xf32> to vector<64x96xf32>
    %30 = arith.addf %27, %29 : vector<64x96xf32>
    %31 = vector.extract_strided_slice %30 {offsets = [0, 0], sizes = [64, 32], strides = [1, 1]} : vector<64x96xf32> to vector<64x32xf32>
    %cst_14 = arith.constant 0.353553385 : f32
    %32 = vector.broadcast %cst_14 : f32 to vector<64x32xf32>
    %33 = arith.mulf %31, %32 : vector<64x32xf32>
    %34 = arith.truncf %33 : vector<64x32xf32> to vector<64x32xbf16>
    %35 = vector.extract_strided_slice %30 {offsets = [0, 32], sizes = [64, 32], strides = [1, 1]} : vector<64x96xf32> to vector<64x32xf32>
    %36 = arith.truncf %35 : vector<64x32xf32> to vector<64x32xbf16>
    %37 = vector.extract_strided_slice %30 {offsets = [0, 64], sizes = [64, 32], strides = [1, 1]} : vector<64x96xf32> to vector<64x32xf32>
    %38 = arith.truncf %37 : vector<64x32xf32> to vector<64x32xbf16>
    %39 = vector.extract_strided_slice %34 {offsets = [0, 0], sizes = [64, 8], strides = [1, 1]} : vector<64x32xbf16> to vector<64x8xbf16>
    %40 = vector.shape_cast %39 : vector<64x8xbf16> to vector<4x16x8xbf16>
    %41 = vector.extract_strided_slice %36 {offsets = [0, 0], sizes = [64, 8], strides = [1, 1]} : vector<64x32xbf16> to vector<64x8xbf16>
    %42 = vector.shape_cast %41 : vector<64x8xbf16> to vector<4x16x8xbf16>
    %43 = vector.extract_strided_slice %38 {offsets = [0, 0], sizes = [64, 8], strides = [1, 1]} : vector<64x32xbf16> to vector<64x8xbf16>
    %44 = vector.shape_cast %43 : vector<64x8xbf16> to vector<4x16x8xbf16>
    "tpu.trace_start"() <{level = 10 : i32, message = "wnd,wmd->wnm"}> : () -> ()
    %cst_15 = arith.constant dense<0.000000e+00> : vector<4x16x16xf32>
    %45 = tpu.matmul %40, %42, %cst_15 {dimension_numbers = #tpu.dot_dimension_numbers<[2], [2], [1], [1], [0, 0, 0, 1, 1, 1], [0], [0]>} : vector<4x16x8xbf16>, vector<4x16x8xbf16>, vector<4x16x16xf32> -> vector<4x16x16xf32>
    "tpu.trace_stop"() : () -> ()
    %c0_16 = arith.constant 0 : index
    %c0_17 = arith.constant 0 : index
    %c0_18 = arith.constant 0 : index
    %46 = vector.load %arg6[%c0_16, %c0_17, %c0_18] : memref<4x16x16xf32, #tpu.memory_space<vmem>>, vector<1x16x16xf32>
    %47 = vector.shape_cast %46 : vector<1x16x16xf32> to vector<16x16xf32>
    %48 = vector.shape_cast %47 : vector<16x16xf32> to vector<1x16x16xf32>
    %49 = vector.broadcast %48 : vector<1x16x16xf32> to vector<4x16x16xf32>
    %50 = arith.addf %45, %49 : vector<4x16x16xf32>
    %cst_19 = arith.constant dense<0xFF800000> : vector<4x16xf32>
    %51 = vector.multi_reduction <maximumf>, %50, %cst_19 [2] : vector<4x16x16xf32> to vector<4x16xf32>
    %52 = vector.shape_cast %51 : vector<4x16xf32> to vector<4x16x1xf32>
    %cst_20 = arith.constant dense<0x7F800000> : vector<4x16xf32>
    %53 = vector.multi_reduction <minimumf>, %50, %cst_20 [2] : vector<4x16x16xf32> to vector<4x16xf32>
    %54 = vector.shape_cast %53 : vector<4x16xf32> to vector<4x16x1xf32>
    %55 = vector.broadcast %54 : vector<4x16x1xf32> to vector<4x16x16xf32>
    %56 = arith.cmpf ole, %50, %55 : vector<4x16x16xf32>
    %cst_21 = arith.constant 1.000000e+30 : f32
    %57 = vector.broadcast %cst_21 : f32 to vector<4x16x16xf32>
    %58 = arith.select %56, %57, %50 : vector<4x16x16xi1>, vector<4x16x16xf32>
    %cst_22 = arith.constant dense<0x7F800000> : vector<4x16xf32>
    %59 = vector.multi_reduction <minimumf>, %58, %cst_22 [2] : vector<4x16x16xf32> to vector<4x16xf32>
    %60 = vector.shape_cast %59 : vector<4x16xf32> to vector<4x16x1xf32>
    %61 = vector.broadcast %60 : vector<4x16x1xf32> to vector<4x16x16xf32>
    %62 = arith.cmpf ole, %58, %61 : vector<4x16x16xf32>
    %cst_23 = arith.constant 1.000000e+30 : f32
    %63 = vector.broadcast %cst_23 : f32 to vector<4x16x16xf32>
    %64 = arith.select %62, %63, %58 : vector<4x16x16xi1>, vector<4x16x16xf32>
    %cst_24 = arith.constant dense<0x7F800000> : vector<4x16xf32>
    %65 = vector.multi_reduction <minimumf>, %64, %cst_24 [2] : vector<4x16x16xf32> to vector<4x16xf32>
    %66 = vector.shape_cast %65 : vector<4x16xf32> to vector<4x16x1xf32>
    %67 = vector.broadcast %66 : vector<4x16x1xf32> to vector<4x16x16xf32>
    %68 = arith.cmpf ole, %64, %67 : vector<4x16x16xf32>
    %cst_25 = arith.constant 1.000000e+30 : f32
    %69 = vector.broadcast %cst_25 : f32 to vector<4x16x16xf32>
    %70 = arith.select %68, %69, %64 : vector<4x16x16xi1>, vector<4x16x16xf32>
    %cst_26 = arith.constant dense<0x7F800000> : vector<4x16xf32>
    %71 = vector.multi_reduction <minimumf>, %70, %cst_26 [2] : vector<4x16x16xf32> to vector<4x16xf32>
    %72 = vector.shape_cast %71 : vector<4x16xf32> to vector<4x16x1xf32>
    %73 = vector.broadcast %72 : vector<4x16x1xf32> to vector<4x16x16xf32>
    %74 = arith.cmpf ole, %70, %73 : vector<4x16x16xf32>
    %cst_27 = arith.constant 1.000000e+30 : f32
    %75 = vector.broadcast %cst_27 : f32 to vector<4x16x16xf32>
    %76 = arith.select %74, %75, %70 : vector<4x16x16xi1>, vector<4x16x16xf32>
    %cst_28 = arith.constant dense<0x7F800000> : vector<4x16xf32>
    %77 = vector.multi_reduction <minimumf>, %76, %cst_28 [2] : vector<4x16x16xf32> to vector<4x16xf32>
    %78 = vector.shape_cast %77 : vector<4x16xf32> to vector<4x16x1xf32>
    %79 = arith.minimumf %78, %52 : vector<4x16x1xf32>
    %80 = vector.broadcast %79 : vector<4x16x1xf32> to vector<4x16x16xf32>
    %81 = arith.cmpf oge, %50, %80 : vector<4x16x16xf32>
    %82 = vector.broadcast %52 : vector<4x16x1xf32> to vector<4x16x16xf32>
    %83 = arith.subf %50, %82 : vector<4x16x16xf32>
    %84 = math.exp %83 : vector<4x16x16xf32>
    %cst_29 = arith.constant 0.000000e+00 : f32
    %85 = vector.broadcast %cst_29 : f32 to vector<4x16x16xf32>
    %86 = arith.select %81, %84, %85 : vector<4x16x16xi1>, vector<4x16x16xf32>
    %cst_30 = arith.constant dense<0.000000e+00> : vector<4x16xf32>
    %87 = vector.multi_reduction <add>, %86, %cst_30 [2] : vector<4x16x16xf32> to vector<4x16xf32>
    %88 = vector.shape_cast %87 : vector<4x16xf32> to vector<4x16x1xf32>
    %89 = vector.broadcast %88 : vector<4x16x1xf32> to vector<4x16x16xf32>
    %90 = arith.divf %86, %89 : vector<4x16x16xf32>
    %91 = arith.truncf %90 : vector<4x16x16xf32> to vector<4x16x16xbf16>
    "tpu.trace_start"() <{level = 10 : i32, message = "wnm,wmd->wnd"}> : () -> ()
    %cst_31 = arith.constant dense<0.000000e+00> : vector<4x16x8xf32>
    %92 = tpu.matmul %91, %44, %cst_31 {dimension_numbers = #tpu.dot_dimension_numbers<[2], [1], [1], [2], [0, 0, 0, 1, 1, 2], [0], [0]>} : vector<4x16x16xbf16>, vector<4x16x8xbf16>, vector<4x16x8xf32> -> vector<4x16x8xf32>
    "tpu.trace_stop"() : () -> ()
    %93 = vector.shape_cast %92 : vector<4x16x8xf32> to vector<64x8xf32>
    %94 = vector.extract_strided_slice %34 {offsets = [0, 8], sizes = [64, 8], strides = [1, 1]} : vector<64x32xbf16> to vector<64x8xbf16>
    %95 = vector.shape_cast %94 : vector<64x8xbf16> to vector<4x16x8xbf16>
    %96 = vector.extract_strided_slice %36 {offsets = [0, 8], sizes = [64, 8], strides = [1, 1]} : vector<64x32xbf16> to vector<64x8xbf16>
    %97 = vector.shape_cast %96 : vector<64x8xbf16> to vector<4x16x8xbf16>
    %98 = vector.extract_strided_slice %38 {offsets = [0, 8], sizes = [64, 8], strides = [1, 1]} : vector<64x32xbf16> to vector<64x8xbf16>
    %99 = vector.shape_cast %98 : vector<64x8xbf16> to vector<4x16x8xbf16>
    "tpu.trace_start"() <{level = 10 : i32, message = "wnd,wmd->wnm"}> : () -> ()
    %cst_32 = arith.constant dense<0.000000e+00> : vector<4x16x16xf32>
    %100 = tpu.matmul %95, %97, %cst_32 {dimension_numbers = #tpu.dot_dimension_numbers<[2], [2], [1], [1], [0, 0, 0, 1, 1, 1], [0], [0]>} : vector<4x16x8xbf16>, vector<4x16x8xbf16>, vector<4x16x16xf32> -> vector<4x16x16xf32>
    "tpu.trace_stop"() : () -> ()
    %c1 = arith.constant 1 : index
    %c0_33 = arith.constant 0 : index
    %c0_34 = arith.constant 0 : index
    %101 = vector.load %arg6[%c1, %c0_33, %c0_34] : memref<4x16x16xf32, #tpu.memory_space<vmem>>, vector<1x16x16xf32>
    %102 = vector.shape_cast %101 : vector<1x16x16xf32> to vector<16x16xf32>
    %103 = vector.shape_cast %102 : vector<16x16xf32> to vector<1x16x16xf32>
    %104 = vector.broadcast %103 : vector<1x16x16xf32> to vector<4x16x16xf32>
    %105 = arith.addf %100, %104 : vector<4x16x16xf32>
    %cst_35 = arith.constant dense<0xFF800000> : vector<4x16xf32>
    %106 = vector.multi_reduction <maximumf>, %105, %cst_35 [2] : vector<4x16x16xf32> to vector<4x16xf32>
    %107 = vector.shape_cast %106 : vector<4x16xf32> to vector<4x16x1xf32>
    %cst_36 = arith.constant dense<0x7F800000> : vector<4x16xf32>
    %108 = vector.multi_reduction <minimumf>, %105, %cst_36 [2] : vector<4x16x16xf32> to vector<4x16xf32>
    %109 = vector.shape_cast %108 : vector<4x16xf32> to vector<4x16x1xf32>
    %110 = vector.broadcast %109 : vector<4x16x1xf32> to vector<4x16x16xf32>
    %111 = arith.cmpf ole, %105, %110 : vector<4x16x16xf32>
    %cst_37 = arith.constant 1.000000e+30 : f32
    %112 = vector.broadcast %cst_37 : f32 to vector<4x16x16xf32>
    %113 = arith.select %111, %112, %105 : vector<4x16x16xi1>, vector<4x16x16xf32>
    %cst_38 = arith.constant dense<0x7F800000> : vector<4x16xf32>
    %114 = vector.multi_reduction <minimumf>, %113, %cst_38 [2] : vector<4x16x16xf32> to vector<4x16xf32>
    %115 = vector.shape_cast %114 : vector<4x16xf32> to vector<4x16x1xf32>
    %116 = vector.broadcast %115 : vector<4x16x1xf32> to vector<4x16x16xf32>
    %117 = arith.cmpf ole, %113, %116 : vector<4x16x16xf32>
    %cst_39 = arith.constant 1.000000e+30 : f32
    %118 = vector.broadcast %cst_39 : f32 to vector<4x16x16xf32>
    %119 = arith.select %117, %118, %113 : vector<4x16x16xi1>, vector<4x16x16xf32>
    %cst_40 = arith.constant dense<0x7F800000> : vector<4x16xf32>
    %120 = vector.multi_reduction <minimumf>, %119, %cst_40 [2] : vector<4x16x16xf32> to vector<4x16xf32>
    %121 = vector.shape_cast %120 : vector<4x16xf32> to vector<4x16x1xf32>
    %122 = vector.broadcast %121 : vector<4x16x1xf32> to vector<4x16x16xf32>
    %123 = arith.cmpf ole, %119, %122 : vector<4x16x16xf32>
    %cst_41 = arith.constant 1.000000e+30 : f32
    %124 = vector.broadcast %cst_41 : f32 to vector<4x16x16xf32>
    %125 = arith.select %123, %124, %119 : vector<4x16x16xi1>, vector<4x16x16xf32>
    %cst_42 = arith.constant dense<0x7F800000> : vector<4x16xf32>
    %126 = vector.multi_reduction <minimumf>, %125, %cst_42 [2] : vector<4x16x16xf32> to vector<4x16xf32>
    %127 = vector.shape_cast %126 : vector<4x16xf32> to vector<4x16x1xf32>
    %128 = vector.broadcast %127 : vector<4x16x1xf32> to vector<4x16x16xf32>
    %129 = arith.cmpf ole, %125, %128 : vector<4x16x16xf32>
    %cst_43 = arith.constant 1.000000e+30 : f32
    %130 = vector.broadcast %cst_43 : f32 to vector<4x16x16xf32>
    %131 = arith.select %129, %130, %125 : vector<4x16x16xi1>, vector<4x16x16xf32>
    %cst_44 = arith.constant dense<0x7F800000> : vector<4x16xf32>
    %132 = vector.multi_reduction <minimumf>, %131, %cst_44 [2] : vector<4x16x16xf32> to vector<4x16xf32>
    %133 = vector.shape_cast %132 : vector<4x16xf32> to vector<4x16x1xf32>
    %134 = arith.minimumf %133, %107 : vector<4x16x1xf32>
    %135 = vector.broadcast %134 : vector<4x16x1xf32> to vector<4x16x16xf32>
    %136 = arith.cmpf oge, %105, %135 : vector<4x16x16xf32>
    %137 = vector.broadcast %107 : vector<4x16x1xf32> to vector<4x16x16xf32>
    %138 = arith.subf %105, %137 : vector<4x16x16xf32>
    %139 = math.exp %138 : vector<4x16x16xf32>
    %cst_45 = arith.constant 0.000000e+00 : f32
    %140 = vector.broadcast %cst_45 : f32 to vector<4x16x16xf32>
    %141 = arith.select %136, %139, %140 : vector<4x16x16xi1>, vector<4x16x16xf32>
    %cst_46 = arith.constant dense<0.000000e+00> : vector<4x16xf32>
    %142 = vector.multi_reduction <add>, %141, %cst_46 [2] : vector<4x16x16xf32> to vector<4x16xf32>
    %143 = vector.shape_cast %142 : vector<4x16xf32> to vector<4x16x1xf32>
    %144 = vector.broadcast %143 : vector<4x16x1xf32> to vector<4x16x16xf32>
    %145 = arith.divf %141, %144 : vector<4x16x16xf32>
    %146 = arith.truncf %145 : vector<4x16x16xf32> to vector<4x16x16xbf16>
    "tpu.trace_start"() <{level = 10 : i32, message = "wnm,wmd->wnd"}> : () -> ()
    %cst_47 = arith.constant dense<0.000000e+00> : vector<4x16x8xf32>
    %147 = tpu.matmul %146, %99, %cst_47 {dimension_numbers = #tpu.dot_dimension_numbers<[2], [1], [1], [2], [0, 0, 0, 1, 1, 2], [0], [0]>} : vector<4x16x16xbf16>, vector<4x16x8xbf16>, vector<4x16x8xf32> -> vector<4x16x8xf32>
    "tpu.trace_stop"() : () -> ()
    %148 = vector.shape_cast %147 : vector<4x16x8xf32> to vector<64x8xf32>
    %149 = vector.extract_strided_slice %34 {offsets = [0, 16], sizes = [64, 8], strides = [1, 1]} : vector<64x32xbf16> to vector<64x8xbf16>
    %150 = vector.shape_cast %149 : vector<64x8xbf16> to vector<4x16x8xbf16>
    %151 = vector.extract_strided_slice %36 {offsets = [0, 16], sizes = [64, 8], strides = [1, 1]} : vector<64x32xbf16> to vector<64x8xbf16>
    %152 = vector.shape_cast %151 : vector<64x8xbf16> to vector<4x16x8xbf16>
    %153 = vector.extract_strided_slice %38 {offsets = [0, 16], sizes = [64, 8], strides = [1, 1]} : vector<64x32xbf16> to vector<64x8xbf16>
    %154 = vector.shape_cast %153 : vector<64x8xbf16> to vector<4x16x8xbf16>
    "tpu.trace_start"() <{level = 10 : i32, message = "wnd,wmd->wnm"}> : () -> ()
    %cst_48 = arith.constant dense<0.000000e+00> : vector<4x16x16xf32>
    %155 = tpu.matmul %150, %152, %cst_48 {dimension_numbers = #tpu.dot_dimension_numbers<[2], [2], [1], [1], [0, 0, 0, 1, 1, 1], [0], [0]>} : vector<4x16x8xbf16>, vector<4x16x8xbf16>, vector<4x16x16xf32> -> vector<4x16x16xf32>
    "tpu.trace_stop"() : () -> ()
    %c2 = arith.constant 2 : index
    %c0_49 = arith.constant 0 : index
    %c0_50 = arith.constant 0 : index
    %156 = vector.load %arg6[%c2, %c0_49, %c0_50] : memref<4x16x16xf32, #tpu.memory_space<vmem>>, vector<1x16x16xf32>
    %157 = vector.shape_cast %156 : vector<1x16x16xf32> to vector<16x16xf32>
    %158 = vector.shape_cast %157 : vector<16x16xf32> to vector<1x16x16xf32>
    %159 = vector.broadcast %158 : vector<1x16x16xf32> to vector<4x16x16xf32>
    %160 = arith.addf %155, %159 : vector<4x16x16xf32>
    %cst_51 = arith.constant dense<0xFF800000> : vector<4x16xf32>
    %161 = vector.multi_reduction <maximumf>, %160, %cst_51 [2] : vector<4x16x16xf32> to vector<4x16xf32>
    %162 = vector.shape_cast %161 : vector<4x16xf32> to vector<4x16x1xf32>
    %cst_52 = arith.constant dense<0x7F800000> : vector<4x16xf32>
    %163 = vector.multi_reduction <minimumf>, %160, %cst_52 [2] : vector<4x16x16xf32> to vector<4x16xf32>
    %164 = vector.shape_cast %163 : vector<4x16xf32> to vector<4x16x1xf32>
    %165 = vector.broadcast %164 : vector<4x16x1xf32> to vector<4x16x16xf32>
    %166 = arith.cmpf ole, %160, %165 : vector<4x16x16xf32>
    %cst_53 = arith.constant 1.000000e+30 : f32
    %167 = vector.broadcast %cst_53 : f32 to vector<4x16x16xf32>
    %168 = arith.select %166, %167, %160 : vector<4x16x16xi1>, vector<4x16x16xf32>
    %cst_54 = arith.constant dense<0x7F800000> : vector<4x16xf32>
    %169 = vector.multi_reduction <minimumf>, %168, %cst_54 [2] : vector<4x16x16xf32> to vector<4x16xf32>
    %170 = vector.shape_cast %169 : vector<4x16xf32> to vector<4x16x1xf32>
    %171 = vector.broadcast %170 : vector<4x16x1xf32> to vector<4x16x16xf32>
    %172 = arith.cmpf ole, %168, %171 : vector<4x16x16xf32>
    %cst_55 = arith.constant 1.000000e+30 : f32
    %173 = vector.broadcast %cst_55 : f32 to vector<4x16x16xf32>
    %174 = arith.select %172, %173, %168 : vector<4x16x16xi1>, vector<4x16x16xf32>
    %cst_56 = arith.constant dense<0x7F800000> : vector<4x16xf32>
    %175 = vector.multi_reduction <minimumf>, %174, %cst_56 [2] : vector<4x16x16xf32> to vector<4x16xf32>
    %176 = vector.shape_cast %175 : vector<4x16xf32> to vector<4x16x1xf32>
    %177 = vector.broadcast %176 : vector<4x16x1xf32> to vector<4x16x16xf32>
    %178 = arith.cmpf ole, %174, %177 : vector<4x16x16xf32>
    %cst_57 = arith.constant 1.000000e+30 : f32
    %179 = vector.broadcast %cst_57 : f32 to vector<4x16x16xf32>
    %180 = arith.select %178, %179, %174 : vector<4x16x16xi1>, vector<4x16x16xf32>
    %cst_58 = arith.constant dense<0x7F800000> : vector<4x16xf32>
    %181 = vector.multi_reduction <minimumf>, %180, %cst_58 [2] : vector<4x16x16xf32> to vector<4x16xf32>
    %182 = vector.shape_cast %181 : vector<4x16xf32> to vector<4x16x1xf32>
    %183 = vector.broadcast %182 : vector<4x16x1xf32> to vector<4x16x16xf32>
    %184 = arith.cmpf ole, %180, %183 : vector<4x16x16xf32>
    %cst_59 = arith.constant 1.000000e+30 : f32
    %185 = vector.broadcast %cst_59 : f32 to vector<4x16x16xf32>
    %186 = arith.select %184, %185, %180 : vector<4x16x16xi1>, vector<4x16x16xf32>
    %cst_60 = arith.constant dense<0x7F800000> : vector<4x16xf32>
    %187 = vector.multi_reduction <minimumf>, %186, %cst_60 [2] : vector<4x16x16xf32> to vector<4x16xf32>
    %188 = vector.shape_cast %187 : vector<4x16xf32> to vector<4x16x1xf32>
    %189 = arith.minimumf %188, %162 : vector<4x16x1xf32>
    %190 = vector.broadcast %189 : vector<4x16x1xf32> to vector<4x16x16xf32>
    %191 = arith.cmpf oge, %160, %190 : vector<4x16x16xf32>
    %192 = vector.broadcast %162 : vector<4x16x1xf32> to vector<4x16x16xf32>
    %193 = arith.subf %160, %192 : vector<4x16x16xf32>
    %194 = math.exp %193 : vector<4x16x16xf32>
    %cst_61 = arith.constant 0.000000e+00 : f32
    %195 = vector.broadcast %cst_61 : f32 to vector<4x16x16xf32>
    %196 = arith.select %191, %194, %195 : vector<4x16x16xi1>, vector<4x16x16xf32>
    %cst_62 = arith.constant dense<0.000000e+00> : vector<4x16xf32>
    %197 = vector.multi_reduction <add>, %196, %cst_62 [2] : vector<4x16x16xf32> to vector<4x16xf32>
    %198 = vector.shape_cast %197 : vector<4x16xf32> to vector<4x16x1xf32>
    %199 = vector.broadcast %198 : vector<4x16x1xf32> to vector<4x16x16xf32>
    %200 = arith.divf %196, %199 : vector<4x16x16xf32>
    %201 = arith.truncf %200 : vector<4x16x16xf32> to vector<4x16x16xbf16>
    "tpu.trace_start"() <{level = 10 : i32, message = "wnm,wmd->wnd"}> : () -> ()
    %cst_63 = arith.constant dense<0.000000e+00> : vector<4x16x8xf32>
    %202 = tpu.matmul %201, %154, %cst_63 {dimension_numbers = #tpu.dot_dimension_numbers<[2], [1], [1], [2], [0, 0, 0, 1, 1, 2], [0], [0]>} : vector<4x16x16xbf16>, vector<4x16x8xbf16>, vector<4x16x8xf32> -> vector<4x16x8xf32>
    "tpu.trace_stop"() : () -> ()
    %203 = vector.shape_cast %202 : vector<4x16x8xf32> to vector<64x8xf32>
    %204 = vector.extract_strided_slice %34 {offsets = [0, 24], sizes = [64, 8], strides = [1, 1]} : vector<64x32xbf16> to vector<64x8xbf16>
    %205 = vector.shape_cast %204 : vector<64x8xbf16> to vector<4x16x8xbf16>
    %206 = vector.extract_strided_slice %36 {offsets = [0, 24], sizes = [64, 8], strides = [1, 1]} : vector<64x32xbf16> to vector<64x8xbf16>
    %207 = vector.shape_cast %206 : vector<64x8xbf16> to vector<4x16x8xbf16>
    %208 = vector.extract_strided_slice %38 {offsets = [0, 24], sizes = [64, 8], strides = [1, 1]} : vector<64x32xbf16> to vector<64x8xbf16>
    %209 = vector.shape_cast %208 : vector<64x8xbf16> to vector<4x16x8xbf16>
    "tpu.trace_start"() <{level = 10 : i32, message = "wnd,wmd->wnm"}> : () -> ()
    %cst_64 = arith.constant dense<0.000000e+00> : vector<4x16x16xf32>
    %210 = tpu.matmul %205, %207, %cst_64 {dimension_numbers = #tpu.dot_dimension_numbers<[2], [2], [1], [1], [0, 0, 0, 1, 1, 1], [0], [0]>} : vector<4x16x8xbf16>, vector<4x16x8xbf16>, vector<4x16x16xf32> -> vector<4x16x16xf32>
    "tpu.trace_stop"() : () -> ()
    %c3 = arith.constant 3 : index
    %c0_65 = arith.constant 0 : index
    %c0_66 = arith.constant 0 : index
    %211 = vector.load %arg6[%c3, %c0_65, %c0_66] : memref<4x16x16xf32, #tpu.memory_space<vmem>>, vector<1x16x16xf32>
    %212 = vector.shape_cast %211 : vector<1x16x16xf32> to vector<16x16xf32>
    %213 = vector.shape_cast %212 : vector<16x16xf32> to vector<1x16x16xf32>
    %214 = vector.broadcast %213 : vector<1x16x16xf32> to vector<4x16x16xf32>
    %215 = arith.addf %210, %214 : vector<4x16x16xf32>
    %cst_67 = arith.constant dense<0xFF800000> : vector<4x16xf32>
    %216 = vector.multi_reduction <maximumf>, %215, %cst_67 [2] : vector<4x16x16xf32> to vector<4x16xf32>
    %217 = vector.shape_cast %216 : vector<4x16xf32> to vector<4x16x1xf32>
    %cst_68 = arith.constant dense<0x7F800000> : vector<4x16xf32>
    %218 = vector.multi_reduction <minimumf>, %215, %cst_68 [2] : vector<4x16x16xf32> to vector<4x16xf32>
    %219 = vector.shape_cast %218 : vector<4x16xf32> to vector<4x16x1xf32>
    %220 = vector.broadcast %219 : vector<4x16x1xf32> to vector<4x16x16xf32>
    %221 = arith.cmpf ole, %215, %220 : vector<4x16x16xf32>
    %cst_69 = arith.constant 1.000000e+30 : f32
    %222 = vector.broadcast %cst_69 : f32 to vector<4x16x16xf32>
    %223 = arith.select %221, %222, %215 : vector<4x16x16xi1>, vector<4x16x16xf32>
    %cst_70 = arith.constant dense<0x7F800000> : vector<4x16xf32>
    %224 = vector.multi_reduction <minimumf>, %223, %cst_70 [2] : vector<4x16x16xf32> to vector<4x16xf32>
    %225 = vector.shape_cast %224 : vector<4x16xf32> to vector<4x16x1xf32>
    %226 = vector.broadcast %225 : vector<4x16x1xf32> to vector<4x16x16xf32>
    %227 = arith.cmpf ole, %223, %226 : vector<4x16x16xf32>
    %cst_71 = arith.constant 1.000000e+30 : f32
    %228 = vector.broadcast %cst_71 : f32 to vector<4x16x16xf32>
    %229 = arith.select %227, %228, %223 : vector<4x16x16xi1>, vector<4x16x16xf32>
    %cst_72 = arith.constant dense<0x7F800000> : vector<4x16xf32>
    %230 = vector.multi_reduction <minimumf>, %229, %cst_72 [2] : vector<4x16x16xf32> to vector<4x16xf32>
    %231 = vector.shape_cast %230 : vector<4x16xf32> to vector<4x16x1xf32>
    %232 = vector.broadcast %231 : vector<4x16x1xf32> to vector<4x16x16xf32>
    %233 = arith.cmpf ole, %229, %232 : vector<4x16x16xf32>
    %cst_73 = arith.constant 1.000000e+30 : f32
    %234 = vector.broadcast %cst_73 : f32 to vector<4x16x16xf32>
    %235 = arith.select %233, %234, %229 : vector<4x16x16xi1>, vector<4x16x16xf32>
    %cst_74 = arith.constant dense<0x7F800000> : vector<4x16xf32>
    %236 = vector.multi_reduction <minimumf>, %235, %cst_74 [2] : vector<4x16x16xf32> to vector<4x16xf32>
    %237 = vector.shape_cast %236 : vector<4x16xf32> to vector<4x16x1xf32>
    %238 = vector.broadcast %237 : vector<4x16x1xf32> to vector<4x16x16xf32>
    %239 = arith.cmpf ole, %235, %238 : vector<4x16x16xf32>
    %cst_75 = arith.constant 1.000000e+30 : f32
    %240 = vector.broadcast %cst_75 : f32 to vector<4x16x16xf32>
    %241 = arith.select %239, %240, %235 : vector<4x16x16xi1>, vector<4x16x16xf32>
    %cst_76 = arith.constant dense<0x7F800000> : vector<4x16xf32>
    %242 = vector.multi_reduction <minimumf>, %241, %cst_76 [2] : vector<4x16x16xf32> to vector<4x16xf32>
    %243 = vector.shape_cast %242 : vector<4x16xf32> to vector<4x16x1xf32>
    %244 = arith.minimumf %243, %217 : vector<4x16x1xf32>
    %245 = vector.broadcast %244 : vector<4x16x1xf32> to vector<4x16x16xf32>
    %246 = arith.cmpf oge, %215, %245 : vector<4x16x16xf32>
    %247 = vector.broadcast %217 : vector<4x16x1xf32> to vector<4x16x16xf32>
    %248 = arith.subf %215, %247 : vector<4x16x16xf32>
    %249 = math.exp %248 : vector<4x16x16xf32>
    %cst_77 = arith.constant 0.000000e+00 : f32
    %250 = vector.broadcast %cst_77 : f32 to vector<4x16x16xf32>
    %251 = arith.select %246, %249, %250 : vector<4x16x16xi1>, vector<4x16x16xf32>
    %cst_78 = arith.constant dense<0.000000e+00> : vector<4x16xf32>
    %252 = vector.multi_reduction <add>, %251, %cst_78 [2] : vector<4x16x16xf32> to vector<4x16xf32>
    %253 = vector.shape_cast %252 : vector<4x16xf32> to vector<4x16x1xf32>
    %254 = vector.broadcast %253 : vector<4x16x1xf32> to vector<4x16x16xf32>
    %255 = arith.divf %251, %254 : vector<4x16x16xf32>
    %256 = arith.truncf %255 : vector<4x16x16xf32> to vector<4x16x16xbf16>
    "tpu.trace_start"() <{level = 10 : i32, message = "wnm,wmd->wnd"}> : () -> ()
    %cst_79 = arith.constant dense<0.000000e+00> : vector<4x16x8xf32>
    %257 = tpu.matmul %256, %209, %cst_79 {dimension_numbers = #tpu.dot_dimension_numbers<[2], [1], [1], [2], [0, 0, 0, 1, 1, 2], [0], [0]>} : vector<4x16x16xbf16>, vector<4x16x8xbf16>, vector<4x16x8xf32> -> vector<4x16x8xf32>
    "tpu.trace_stop"() : () -> ()
    %258 = vector.shape_cast %257 : vector<4x16x8xf32> to vector<64x8xf32>
    %259 = tpu.concatenate %93, %148, %203, %258 in 1 : vector<64x8xf32>, vector<64x8xf32>, vector<64x8xf32>, vector<64x8xf32> -> vector<64x32xf32>
    %260 = arith.truncf %259 : vector<64x32xf32> to vector<64x32xbf16>
    %c0_80 = arith.constant 0 : index
    %c0_81 = arith.constant 0 : index
    %261 = vector.load %arg7[%c0_80, %c0_81] : memref<32x32xbf16, #tpu.memory_space<vmem>>, vector<32x32xbf16>
    %cst_82 = arith.constant dense<0.000000e+00> : vector<64x32xf32>
    %262 = tpu.matmul %260, %261, %cst_82 {dimension_numbers = #tpu.dot_dimension_numbers<[1], [0], [0], [1], [0, 0, 1, 1], [], []>} : vector<64x32xbf16>, vector<32x32xbf16>, vector<64x32xf32> -> vector<64x32xf32>
    %c0_83 = arith.constant 0 : index
    %c0_84 = arith.constant 0 : index
    %263 = vector.load %arg8[%c0_83, %c0_84] : memref<1x32xf32, #tpu.memory_space<vmem>>, vector<1x32xf32>
    %264 = vector.broadcast %263 : vector<1x32xf32> to vector<64x32xf32>
    %265 = arith.addf %262, %264 : vector<64x32xf32>
    %c0_85 = arith.constant 0 : index
    %c0_86 = arith.constant 0 : index
    %266 = vector.load %arg1[%c0_85, %c0_86] : memref<64x32xf32, #tpu.memory_space<vmem>>, vector<64x32xf32>
    %267 = arith.addf %266, %265 : vector<64x32xf32>
    %c0_87 = arith.constant 0 : index
    %c0_88 = arith.constant 0 : index
    %268 = vector.load %arg9[%c0_87, %c0_88] : memref<1x32xf32, #tpu.memory_space<vmem>>, vector<1x32xf32>
    %c0_89 = arith.constant 0 : index
    %c0_90 = arith.constant 0 : index
    %269 = vector.load %arg10[%c0_89, %c0_90] : memref<1x32xf32, #tpu.memory_space<vmem>>, vector<1x32xf32>
    %cst_91 = arith.constant dense<0.000000e+00> : vector<64xf32>
    %270 = vector.multi_reduction <add>, %267, %cst_91 [1] : vector<64x32xf32> to vector<64xf32>
    %271 = vector.shape_cast %270 : vector<64xf32> to vector<64x1xf32>
    %cst_92 = arith.constant 3.200000e+01 : f32
    %272 = vector.broadcast %cst_92 : f32 to vector<64x1xf32>
    %273 = arith.divf %271, %272 : vector<64x1xf32>
    %274 = vector.broadcast %273 : vector<64x1xf32> to vector<64x32xf32>
    %275 = arith.subf %267, %274 : vector<64x32xf32>
    %276 = arith.mulf %275, %275 : vector<64x32xf32>
    %cst_93 = arith.constant dense<0.000000e+00> : vector<64xf32>
    %277 = vector.multi_reduction <add>, %276, %cst_93 [1] : vector<64x32xf32> to vector<64xf32>
    %278 = vector.shape_cast %277 : vector<64xf32> to vector<64x1xf32>
    %cst_94 = arith.constant 3.200000e+01 : f32
    %279 = vector.broadcast %cst_94 : f32 to vector<64x1xf32>
    %280 = arith.divf %278, %279 : vector<64x1xf32>
    %281 = vector.broadcast %273 : vector<64x1xf32> to vector<64x32xf32>
    %282 = arith.subf %267, %281 : vector<64x32xf32>
    %cst_95 = arith.constant 9.99999974E-6 : f32
    %283 = vector.broadcast %cst_95 : f32 to vector<64x1xf32>
    %284 = arith.addf %280, %283 : vector<64x1xf32>
    %285 = math.rsqrt %284 : vector<64x1xf32>
    %286 = vector.broadcast %285 : vector<64x1xf32> to vector<64x32xf32>
    %287 = arith.mulf %282, %286 : vector<64x32xf32>
    %288 = vector.broadcast %268 : vector<1x32xf32> to vector<64x32xf32>
    %289 = arith.mulf %287, %288 : vector<64x32xf32>
    %290 = vector.broadcast %269 : vector<1x32xf32> to vector<64x32xf32>
    %291 = arith.addf %289, %290 : vector<64x32xf32>
    %292 = arith.truncf %291 : vector<64x32xf32> to vector<64x32xbf16>
    %cst_96 = arith.constant 0.000000e+00 : f32
    %293 = vector.broadcast %cst_96 : f32 to vector<64x32xf32>
    %c0_97 = arith.constant 0 : index
    %c0_98 = arith.constant 0 : index
    %294 = vector.load %arg11[%c0_97, %c0_98] : memref<32x128xbf16, #tpu.memory_space<vmem>>, vector<32x128xbf16>
    %cst_99 = arith.constant dense<0.000000e+00> : vector<64x128xf32>
    %295 = tpu.matmul %292, %294, %cst_99 {dimension_numbers = #tpu.dot_dimension_numbers<[1], [0], [0], [1], [0, 0, 1, 1], [], []>} : vector<64x32xbf16>, vector<32x128xbf16>, vector<64x128xf32> -> vector<64x128xf32>
    %c0_100 = arith.constant 0 : index
    %c0_101 = arith.constant 0 : index
    %296 = vector.load %arg12[%c0_100, %c0_101] : memref<1x128xf32, #tpu.memory_space<vmem>>, vector<1x128xf32>
    %297 = vector.broadcast %296 : vector<1x128xf32> to vector<64x128xf32>
    %298 = arith.addf %295, %297 : vector<64x128xf32>
    %cst_102 = arith.constant 5.000000e-01 : f32
    %299 = vector.broadcast %cst_102 : f32 to vector<64x128xf32>
    %300 = arith.mulf %299, %298 : vector<64x128xf32>
    %cst_103 = arith.constant 0.707106769 : f32
    %301 = vector.broadcast %cst_103 : f32 to vector<64x128xf32>
    %302 = arith.mulf %298, %301 : vector<64x128xf32>
    %cst_104 = arith.constant 0.000000e+00 : f32
    %303 = vector.broadcast %cst_104 : f32 to vector<64x128xf32>
    %304 = arith.cmpf oge, %302, %303 : vector<64x128xf32>
    %cst_105 = arith.constant 1.000000e+00 : f32
    %cst_106 = arith.constant -1.000000e+00 : f32
    %305 = vector.broadcast %cst_105 : f32 to vector<64x128xf32>
    %306 = vector.broadcast %cst_106 : f32 to vector<64x128xf32>
    %307 = arith.select %304, %305, %306 : vector<64x128xi1>, vector<64x128xf32>
    %308 = math.absf %302 : vector<64x128xf32>
    %cst_107 = arith.constant 0.327591091 : f32
    %309 = vector.broadcast %cst_107 : f32 to vector<64x128xf32>
    %310 = arith.mulf %309, %308 : vector<64x128xf32>
    %cst_108 = arith.constant 1.000000e+00 : f32
    %311 = vector.broadcast %cst_108 : f32 to vector<64x128xf32>
    %312 = arith.addf %311, %310 : vector<64x128xf32>
    %cst_109 = arith.constant 1.000000e+00 : f32
    %313 = vector.broadcast %cst_109 : f32 to vector<64x128xf32>
    %314 = arith.divf %313, %312 : vector<64x128xf32>
    %cst_110 = arith.constant 1.06140542 : f32
    %315 = vector.broadcast %cst_110 : f32 to vector<64x128xf32>
    %316 = arith.mulf %314, %315 : vector<64x128xf32>
    %cst_111 = arith.constant -1.45315206 : f32
    %317 = vector.broadcast %cst_111 : f32 to vector<64x128xf32>
    %318 = arith.addf %317, %316 : vector<64x128xf32>
    %319 = arith.mulf %314, %318 : vector<64x128xf32>
    %cst_112 = arith.constant 1.42141378 : f32
    %320 = vector.broadcast %cst_112 : f32 to vector<64x128xf32>
    %321 = arith.addf %320, %319 : vector<64x128xf32>
    %322 = arith.mulf %314, %321 : vector<64x128xf32>
    %cst_113 = arith.constant -0.284496725 : f32
    %323 = vector.broadcast %cst_113 : f32 to vector<64x128xf32>
    %324 = arith.addf %323, %322 : vector<64x128xf32>
    %325 = arith.mulf %314, %324 : vector<64x128xf32>
    %cst_114 = arith.constant 0.254829586 : f32
    %326 = vector.broadcast %cst_114 : f32 to vector<64x128xf32>
    %327 = arith.addf %326, %325 : vector<64x128xf32>
    %328 = arith.mulf %314, %327 : vector<64x128xf32>
    %cst_115 = arith.constant 0.000000e+00 : f32
    %329 = vector.broadcast %cst_115 : f32 to vector<64x128xf32>
    %330 = arith.subf %329, %308 : vector<64x128xf32>
    %331 = arith.mulf %330, %308 : vector<64x128xf32>
    %332 = math.exp %331 : vector<64x128xf32>
    %333 = arith.mulf %328, %332 : vector<64x128xf32>
    %cst_116 = arith.constant 1.000000e+00 : f32
    %334 = vector.broadcast %cst_116 : f32 to vector<64x128xf32>
    %335 = arith.subf %334, %333 : vector<64x128xf32>
    %336 = arith.mulf %307, %335 : vector<64x128xf32>
    %cst_117 = arith.constant 1.000000e+00 : f32
    %337 = vector.broadcast %cst_117 : f32 to vector<64x128xf32>
    %338 = arith.addf %337, %336 : vector<64x128xf32>
    %339 = arith.mulf %300, %338 : vector<64x128xf32>
    %340 = arith.truncf %339 : vector<64x128xf32> to vector<64x128xbf16>
    %c0_118 = arith.constant 0 : index
    %c0_119 = arith.constant 0 : index
    %341 = vector.load %arg13[%c0_118, %c0_119] : memref<128x32xbf16, #tpu.memory_space<vmem>>, vector<128x32xbf16>
    %cst_120 = arith.constant dense<0.000000e+00> : vector<64x32xf32>
    %342 = tpu.matmul %340, %341, %cst_120 {dimension_numbers = #tpu.dot_dimension_numbers<[1], [0], [0], [1], [0, 0, 1, 1], [], []>} : vector<64x128xbf16>, vector<128x32xbf16>, vector<64x32xf32> -> vector<64x32xf32>
    %343 = arith.addf %293, %342 : vector<64x32xf32>
    %344 = arith.addf %267, %343 : vector<64x32xf32>
    %c0_121 = arith.constant 0 : index
    %c0_122 = arith.constant 0 : index
    %345 = vector.load %arg14[%c0_121, %c0_122] : memref<1x32xf32, #tpu.memory_space<vmem>>, vector<1x32xf32>
    %346 = vector.broadcast %345 : vector<1x32xf32> to vector<64x32xf32>
    %347 = arith.addf %344, %346 : vector<64x32xf32>
    %c0_123 = arith.constant 0 : index
    %c0_124 = arith.constant 0 : index
    %348 = vector.load %arg15[%c0_123, %c0_124] : memref<64x32xf32, #tpu.memory_space<vmem>>, vector<64x32xf32>
    tpu.vector_store %arg15[%c0_123, %c0_124], %347 {strides = array<i32>} : memref<64x32xf32, #tpu.memory_space<vmem>>, vector<64x32xf32>,
    return
  }
  func.func @transform_0(%arg0: i32) -> (i32, i32) {
    %c0_i32 = arith.constant 0 : i32
    %c0_i32_0 = arith.constant 0 : i32
    return %arg0, %c0_i32 : i32, i32
  }
  func.func @transform_1(%arg0: i32) -> (i32, i32) {
    %c0_i32 = arith.constant 0 : i32
    %c0_i32_0 = arith.constant 0 : i32
    %c0_i32_1 = arith.constant 0 : i32
    return %c0_i32, %c0_i32_0 : i32, i32
  }
  func.func @transform_2(%arg0: i32) -> (i32, i32) {
    %c0_i32 = arith.constant 0 : i32
    %c0_i32_0 = arith.constant 0 : i32
    %c0_i32_1 = arith.constant 0 : i32
    return %c0_i32, %c0_i32_0 : i32, i32
  }
  func.func @transform_3(%arg0: i32) -> (i32, i32) {
    %c0_i32 = arith.constant 0 : i32
    %c0_i32_0 = arith.constant 0 : i32
    %c0_i32_1 = arith.constant 0 : i32
    return %c0_i32, %c0_i32_0 : i32, i32
  }
  func.func @transform_4(%arg0: i32) -> (i32, i32) {
    %c0_i32 = arith.constant 0 : i32
    %c0_i32_0 = arith.constant 0 : i32
    %c0_i32_1 = arith.constant 0 : i32
    return %c0_i32, %c0_i32_0 : i32, i32
  }
  func.func @transform_5(%arg0: i32) -> (i32, i32, i32) {
    %c0_i32 = arith.constant 0 : i32
    %c0_i32_0 = arith.constant 0 : i32
    %c0_i32_1 = arith.constant 0 : i32
    %c0_i32_2 = arith.constant 0 : i32
    return %c0_i32, %c0_i32_0, %c0_i32_1 : i32, i32, i32
  }
  func.func @transform_6(%arg0: i32) -> (i32, i32) {
    %c0_i32 = arith.constant 0 : i32
    %c0_i32_0 = arith.constant 0 : i32
    %c0_i32_1 = arith.constant 0 : i32
    return %c0_i32, %c0_i32_0 : i32, i32
  }
  func.func @transform_7(%arg0: i32) -> (i32, i32) {
    %c0_i32 = arith.constant 0 : i32
    %c0_i32_0 = arith.constant 0 : i32
    %c0_i32_1 = arith.constant 0 : i32
    return %c0_i32, %c0_i32_0 : i32, i32
  }
  func.func @transform_8(%arg0: i32) -> (i32, i32) {
    %c0_i32 = arith.constant 0 : i32
    %c0_i32_0 = arith.constant 0 : i32
    %c0_i32_1 = arith.constant 0 : i32
    return %c0_i32, %c0_i32_0 : i32, i32
  }
  func.func @transform_9(%arg0: i32) -> (i32, i32) {
    %c0_i32 = arith.constant 0 : i32
    %c0_i32_0 = arith.constant 0 : i32
    %c0_i32_1 = arith.constant 0 : i32
    return %c0_i32, %c0_i32_0 : i32, i32
  }
  func.func @transform_10(%arg0: i32) -> (i32, i32) {
    %c0_i32 = arith.constant 0 : i32
    %c0_i32_0 = arith.constant 0 : i32
    %c0_i32_1 = arith.constant 0 : i32
    return %c0_i32, %c0_i32_0 : i32, i32
  }
  func.func @transform_11(%arg0: i32) -> (i32, i32) {
    %c0_i32 = arith.constant 0 : i32
    %c0_i32_0 = arith.constant 0 : i32
    %c0_i32_1 = arith.constant 0 : i32
    return %c0_i32, %c0_i32_0 : i32, i32
  }
  func.func @transform_12(%arg0: i32) -> (i32, i32) {
    %c0_i32 = arith.constant 0 : i32
    %c0_i32_0 = arith.constant 0 : i32
    %c0_i32_1 = arith.constant 0 : i32
    return %c0_i32, %c0_i32_0 : i32, i32
  }
  func.func @transform_13(%arg0: i32) -> (i32, i32) {
    %c0_i32 = arith.constant 0 : i32
    %c0_i32_0 = arith.constant 0 : i32
    %c0_i32_1 = arith.constant 0 : i32
    return %c0_i32, %c0_i32_0 : i32, i32
  }
  func.func @transform_14(%arg0: i32) -> (i32, i32) {
    %c0_i32 = arith.constant 0 : i32
    %c0_i32_0 = arith.constant 0 : i32
    return %arg0, %c0_i32 : i32, i32
  }
}

module attributes {stable_mosaic.version = 11 : i64} {
  func.func @kernel(%arg0: i32, %arg1: memref<64x32xf32, #tpu.memory_space<vmem>>, %arg2: memref<1x32xf32, #tpu.memory_space<vmem>>, %arg3: memref<1x32xf32, #tpu.memory_space<vmem>>, %arg4: memref<32x96xbf16, #tpu.memory_space<vmem>>, %arg5: memref<1x96xf32, #tpu.memory_space<vmem>>, %arg6: memref<4x16x16xf32, #tpu.memory_space<vmem>>, %arg7: memref<32x32xbf16, #tpu.memory_space<vmem>>, %arg8: memref<1x32xf32, #tpu.memory_space<vmem>>, %arg9: memref<1x32xf32, #tpu.memory_space<vmem>>, %arg10: memref<1x32xf32, #tpu.memory_space<vmem>>, %arg11: memref<32x128xbf16, #tpu.memory_space<vmem>>, %arg12: memref<1x128xf32, #tpu.memory_space<vmem>>, %arg13: memref<128x32xbf16, #tpu.memory_space<vmem>>, %arg14: memref<1x32xf32, #tpu.memory_space<vmem>>, %arg15: memref<64x32xf32, #tpu.memory_space<vmem>>) attributes {dimension_semantics = [#tpu.dimension_semantics<parallel>], iteration_bounds = array<i64: 2>, scalar_prefetch = 0 : i64, scratch_operands = 0 : i64, tpu.core_type = #tpu.core_type<tc>, window_params = [{transform_indices = @transform_0, window_bounds = array<i64: 64, 32>}, {pipeline_mode = #tpu.pipeline_mode<synchronous>, transform_indices = @transform_1, window_bounds = array<i64: 1, 32>}, {pipeline_mode = #tpu.pipeline_mode<synchronous>, transform_indices = @transform_2, window_bounds = array<i64: 1, 32>}, {pipeline_mode = #tpu.pipeline_mode<synchronous>, transform_indices = @transform_3, window_bounds = array<i64: 32, 96>}, {pipeline_mode = #tpu.pipeline_mode<synchronous>, transform_indices = @transform_4, window_bounds = array<i64: 1, 96>}, {pipeline_mode = #tpu.pipeline_mode<synchronous>, transform_indices = @transform_5, window_bounds = array<i64: 4, 16, 16>}, {pipeline_mode = #tpu.pipeline_mode<synchronous>, transform_indices = @transform_6, window_bounds = array<i64: 32, 32>}, {pipeline_mode = #tpu.pipeline_mode<synchronous>, transform_indices = @transform_7, window_bounds = array<i64: 1, 32>}, {pipeline_mode = #tpu.pipeline_mode<synchronous>, transform_indices = @transform_8, window_bounds = array<i64: 1, 32>}, {pipeline_mode = #tpu.pipeline_mode<synchronous>, transform_indices = @transform_9, window_bounds = array<i64: 1, 32>}, {pipeline_mode = #tpu.pipeline_mode<synchronous>, transform_indices = @transform_10, window_bounds = array<i64: 32, 128>}, {pipeline_mode = #tpu.pipeline_mode<synchronous>, transform_indices = @transform_11, window_bounds = array<i64: 1, 128>}, {pipeline_mode = #tpu.pipeline_mode<synchronous>, transform_indices = @transform_12, window_bounds = array<i64: 128, 32>}, {pipeline_mode = #tpu.pipeline_mode<synchronous>, transform_indices = @transform_13, window_bounds = array<i64: 1, 32>}, {transform_indices = @transform_14, window_bounds = array<i64: 64, 32>}]} {
    %c0 = arith.constant 0 : index
    %c0_0 = arith.constant 0 : index
    %0 = vector.load %arg1[%c0, %c0_0] : memref<64x32xf32, #tpu.memory_space<vmem>>, vector<64x32xf32>
    %c0_1 = arith.constant 0 : index
    %c0_2 = arith.constant 0 : index
    %1 = vector.load %arg2[%c0_1, %c0_2] : memref<1x32xf32, #tpu.memory_space<vmem>>, vector<1x32xf32>
    %c0_3 = arith.constant 0 : index
    %c0_4 = arith.constant 0 : index
    %2 = vector.load %arg3[%c0_3, %c0_4] : memref<1x32xf32, #tpu.memory_space<vmem>>, vector<1x32xf32>
    %cst = arith.constant dense<0.000000e+00> : vector<64xf32>
    %3 = vector.multi_reduction <add>, %0, %cst [1] : vector<64x32xf32> to vector<64xf32>
    %4 = vector.shape_cast %3 : vector<64xf32> to vector<64x1xf32>
    %cst_5 = arith.constant 3.200000e+01 : f32
    %5 = vector.broadcast %cst_5 : f32 to vector<64x1xf32>
    %6 = arith.divf %4, %5 : vector<64x1xf32>
    %7 = vector.broadcast %6 : vector<64x1xf32> to vector<64x32xf32>
    %8 = arith.subf %0, %7 : vector<64x32xf32>
    %9 = arith.mulf %8, %8 : vector<64x32xf32>
    %cst_6 = arith.constant dense<0.000000e+00> : vector<64xf32>
    %10 = vector.multi_reduction <add>, %9, %cst_6 [1] : vector<64x32xf32> to vector<64xf32>
    %11 = vector.shape_cast %10 : vector<64xf32> to vector<64x1xf32>
    %cst_7 = arith.constant 3.200000e+01 : f32
    %12 = vector.broadcast %cst_7 : f32 to vector<64x1xf32>
    %13 = arith.divf %11, %12 : vector<64x1xf32>
    %14 = vector.broadcast %6 : vector<64x1xf32> to vector<64x32xf32>
    %15 = arith.subf %0, %14 : vector<64x32xf32>
    %cst_8 = arith.constant 9.99999974E-6 : f32
    %16 = vector.broadcast %cst_8 : f32 to vector<64x1xf32>
    %17 = arith.addf %13, %16 : vector<64x1xf32>
    %18 = math.rsqrt %17 : vector<64x1xf32>
    %19 = vector.broadcast %18 : vector<64x1xf32> to vector<64x32xf32>
    %20 = arith.mulf %15, %19 : vector<64x32xf32>
    %21 = vector.broadcast %1 : vector<1x32xf32> to vector<64x32xf32>
    %22 = arith.mulf %20, %21 : vector<64x32xf32>
    %23 = vector.broadcast %2 : vector<1x32xf32> to vector<64x32xf32>
    %24 = arith.addf %22, %23 : vector<64x32xf32>
    %25 = arith.truncf %24 : vector<64x32xf32> to vector<64x32xbf16>
    %c0_9 = arith.constant 0 : index
    %c0_10 = arith.constant 0 : index
    %26 = vector.load %arg4[%c0_9, %c0_10] : memref<32x96xbf16, #tpu.memory_space<vmem>>, vector<32x96xbf16>
    %cst_11 = arith.constant dense<0.000000e+00> : vector<64x96xf32>
    %27 = tpu.matmul %25, %26, %cst_11 {dimension_numbers = #tpu.dot_dimension_numbers<[1], [0], [0], [1], [0, 0, 1, 1], [], []>} : vector<64x32xbf16>, vector<32x96xbf16>, vector<64x96xf32> -> vector<64x96xf32>
    %c0_12 = arith.constant 0 : index
    %c0_13 = arith.constant 0 : index
    %28 = vector.load %arg5[%c0_12, %c0_13] : memref<1x96xf32, #tpu.memory_space<vmem>>, vector<1x96xf32>
    %29 = vector.broadcast %28 : vector<1x96xf32> to vector<64x96xf32>
    %30 = arith.addf %27, %29 : vector<64x96xf32>
    %31 = vector.extract_strided_slice %30 {offsets = [0, 0], sizes = [64, 32], strides = [1, 1]} : vector<64x96xf32> to vector<64x32xf32>
    %cst_14 = arith.constant 0.353553385 : f32
    %32 = vector.broadcast %cst_14 : f32 to vector<64x32xf32>
    %33 = arith.mulf %31, %32 : vector<64x32xf32>
    %34 = arith.truncf %33 : vector<64x32xf32> to vector<64x32xbf16>
    %35 = vector.extract_strided_slice %30 {offsets = [0, 32], sizes = [64, 32], strides = [1, 1]} : vector<64x96xf32> to vector<64x32xf32>
    %36 = arith.truncf %35 : vector<64x32xf32> to vector<64x32xbf16>
    %37 = vector.extract_strided_slice %30 {offsets = [0, 64], sizes = [64, 32], strides = [1, 1]} : vector<64x96xf32> to vector<64x32xf32>
    %38 = arith.truncf %37 : vector<64x32xf32> to vector<64x32xbf16>
    %39 = vector.extract_strided_slice %34 {offsets = [0, 0], sizes = [64, 8], strides = [1, 1]} : vector<64x32xbf16> to vector<64x8xbf16>
    %40 = vector.shape_cast %39 : vector<64x8xbf16> to vector<4x16x8xbf16>
    %41 = vector.extract_strided_slice %36 {offsets = [0, 0], sizes = [64, 8], strides = [1, 1]} : vector<64x32xbf16> to vector<64x8xbf16>
    %42 = vector.shape_cast %41 : vector<64x8xbf16> to vector<4x16x8xbf16>
    %43 = vector.extract_strided_slice %38 {offsets = [0, 0], sizes = [64, 8], strides = [1, 1]} : vector<64x32xbf16> to vector<64x8xbf16>
    %44 = vector.shape_cast %43 : vector<64x8xbf16> to vector<4x16x8xbf16>
    "tpu.trace_start"() <{level = 10 : i32, message = "wnd,wmd->wnm"}> : () -> ()
    %cst_15 = arith.constant dense<0.000000e+00> : vector<4x16x16xf32>
    %45 = tpu.matmul %40, %42, %cst_15 {dimension_numbers = #tpu.dot_dimension_numbers<[2], [2], [1], [1], [0, 0, 0, 1, 1, 1], [0], [0]>} : vector<4x16x8xbf16>, vector<4x16x8xbf16>, vector<4x16x16xf32> -> vector<4x16x16xf32>
    "tpu.trace_stop"() : () -> ()
    %c0_16 = arith.constant 0 : index
    %c0_17 = arith.constant 0 : index
    %c0_18 = arith.constant 0 : index
    %46 = vector.load %arg6[%c0_16, %c0_17, %c0_18] : memref<4x16x16xf32, #tpu.memory_space<vmem>>, vector<1x16x16xf32>
    %47 = vector.shape_cast %46 : vector<1x16x16xf32> to vector<16x16xf32>
    %48 = vector.shape_cast %47 : vector<16x16xf32> to vector<1x16x16xf32>
    %49 = vector.broadcast %48 : vector<1x16x16xf32> to vector<4x16x16xf32>
    %50 = arith.addf %45, %49 : vector<4x16x16xf32>
    %cst_19 = arith.constant dense<0xFF800000> : vector<4x16xf32>
    %51 = vector.multi_reduction <maximumf>, %50, %cst_19 [2] : vector<4x16x16xf32> to vector<4x16xf32>
    %52 = vector.shape_cast %51 : vector<4x16xf32> to vector<4x16x1xf32>
    %cst_20 = arith.constant dense<0x7F800000> : vector<4x16xf32>
    %53 = vector.multi_reduction <minimumf>, %50, %cst_20 [2] : vector<4x16x16xf32> to vector<4x16xf32>
    %54 = vector.shape_cast %53 : vector<4x16xf32> to vector<4x16x1xf32>
    %55 = vector.broadcast %54 : vector<4x16x1xf32> to vector<4x16x16xf32>
    %56 = arith.cmpf ole, %50, %55 : vector<4x16x16xf32>
    %cst_21 = arith.constant 1.000000e+30 : f32
    %57 = vector.broadcast %cst_21 : f32 to vector<4x16x16xf32>
    %58 = arith.select %56, %57, %50 : vector<4x16x16xi1>, vector<4x16x16xf32>
    %cst_22 = arith.constant dense<0x7F800000> : vector<4x16xf32>
    %59 = vector.multi_reduction <minimumf>, %58, %cst_22 [2] : vector<4x16x16xf32> to vector<4x16xf32>
    %60 = vector.shape_cast %59 : vector<4x16xf32> to vector<4x16x1xf32>
    %61 = vector.broadcast %60 : vector<4x16x1xf32> to vector<4x16x16xf32>
    %62 = arith.cmpf ole, %58, %61 : vector<4x16x16xf32>
    %cst_23 = arith.constant 1.000000e+30 : f32
    %63 = vector.broadcast %cst_23 : f32 to vector<4x16x16xf32>
    %64 = arith.select %62, %63, %58 : vector<4x16x16xi1>, vector<4x16x16xf32>
    %cst_24 = arith.constant dense<0x7F800000> : vector<4x16xf32>
    %65 = vector.multi_reduction <minimumf>, %64, %cst_24 [2] : vector<4x16x16xf32> to vector<4x16xf32>
    %66 = vector.shape_cast %65 : vector<4x16xf32> to vector<4x16x1xf32>
    %67 = vector.broadcast %66 : vector<4x16x1xf32> to vector<4x16x16xf32>
    %68 = arith.cmpf ole, %64, %67 : vector<4x16x16xf32>
    %cst_25 = arith.constant 1.000000e+30 : f32
    %69 = vector.broadcast %cst_25 : f32 to vector<4x16x16xf32>
    %70 = arith.select %68, %69, %64 : vector<4x16x16xi1>, vector<4x16x16xf32>
    %cst_26 = arith.constant dense<0x7F800000> : vector<4x16xf32>
    %71 = vector.multi_reduction <minimumf>, %70, %cst_26 [2] : vector<4x16x16xf32> to vector<4x16xf32>
    %72 = vector.shape_cast %71 : vector<4x16xf32> to vector<4x16x1xf32>
    %73 = vector.broadcast %72 : vector<4x16x1xf32> to vector<4x16x16xf32>
    %74 = arith.cmpf ole, %70, %73 : vector<4x16x16xf32>
    %cst_27 = arith.constant 1.000000e+30 : f32
    %75 = vector.broadcast %cst_27 : f32 to vector<4x16x16xf32>
    %76 = arith.select %74, %75, %70 : vector<4x16x16xi1>, vector<4x16x16xf32>
    %cst_28 = arith.constant dense<0x7F800000> : vector<4x16xf32>
    %77 = vector.multi_reduction <minimumf>, %76, %cst_28 [2] : vector<4x16x16xf32> to vector<4x16xf32>
    %78 = vector.shape_cast %77 : vector<4x16xf32> to vector<4x16x1xf32>
    %79 = arith.minimumf %78, %52 : vector<4x16x1xf32>
    %80 = vector.broadcast %79 : vector<4x16x1xf32> to vector<4x16x16xf32>
    %81 = arith.cmpf oge, %50, %80 : vector<4x16x16xf32>
    %82 = vector.broadcast %52 : vector<4x16x1xf32> to vector<4x16x16xf32>
    %83 = arith.subf %50, %82 : vector<4x16x16xf32>
    %84 = math.exp %83 : vector<4x16x16xf32>
    %cst_29 = arith.constant 0.000000e+00 : f32
    %85 = vector.broadcast %cst_29 : f32 to vector<4x16x16xf32>
    %86 = arith.select %81, %84, %85 : vector<4x16x16xi1>, vector<4x16x16xf32>
    %cst_30 = arith.constant dense<0.000000e+00> : vector<4x16xf32>
    %87 = vector.multi_reduction <add>, %86, %cst_30 [2] : vector<4x16x16xf32> to vector<4x16xf32>
    %88 = vector.shape_cast %87 : vector<4x16xf32> to vector<4x16x1xf32>
    %89 = vector.broadcast %88 : vector<4x16x1xf32> to vector<4x16x16xf32>
    %90 = arith.divf %86, %89 : vector<4x16x16xf32>
    %91 = arith.truncf %90 : vector<4x16x16xf32> to vector<4x16x16xbf16>
    "tpu.trace_start"() <{level = 10 : i32, message = "wnm,wmd->wnd"}> : () -> ()
    %cst_31 = arith.constant dense<0.000000e+00> : vector<4x16x8xf32>
    %92 = tpu.matmul %91, %44, %cst_31 {dimension_numbers = #tpu.dot_dimension_numbers<[2], [1], [1], [2], [0, 0, 0, 1, 1, 2], [0], [0]>} : vector<4x16x16xbf16>, vector<4x16x8xbf16>, vector<4x16x8xf32> -> vector<4x16x8xf32>
    "tpu.trace_stop"() : () -> ()
    %93 = vector.shape_cast %92 : vector<4x16x8xf32> to vector<64x8xf32>
    %94 = vector.extract_strided_slice %34 {offsets = [0, 8], sizes = [64, 8], strides = [1, 1]} : vector<64x32xbf16> to vector<64x8xbf16>
    %95 = vector.shape_cast %94 : vector<64x8xbf16> to vector<4x16x8xbf16>
    %96 = vector.extract_strided_slice %36 {offsets = [0, 8], sizes = [64, 8], strides = [1, 1]} : vector<64x32xbf16> to vector<64x8xbf16>
    %97 = vector.shape_cast %96 : vector<64x8xbf16> to vector<4x16x8xbf16>
    %98 = vector.extract_strided_slice %38 {offsets = [0, 8], sizes = [64, 8], strides = [1, 1]} : vector<64x32xbf16> to vector<64x8xbf16>
    %99 = vector.shape_cast %98 : vector<64x8xbf16> to vector<4x16x8xbf16>
    "tpu.trace_start"() <{level = 10 : i32, message = "wnd,wmd->wnm"}> : () -> ()
    %cst_32 = arith.constant dense<0.000000e+00> : vector<4x16x16xf32>
    %100 = tpu.matmul %95, %97, %cst_32 {dimension_numbers = #tpu.dot_dimension_numbers<[2], [2], [1], [1], [0, 0, 0, 1, 1, 1], [0], [0]>} : vector<4x16x8xbf16>, vector<4x16x8xbf16>, vector<4x16x16xf32> -> vector<4x16x16xf32>
    "tpu.trace_stop"() : () -> ()
    %c1 = arith.constant 1 : index
    %c0_33 = arith.constant 0 : index
    %c0_34 = arith.constant 0 : index
    %101 = vector.load %arg6[%c1, %c0_33, %c0_34] : memref<4x16x16xf32, #tpu.memory_space<vmem>>, vector<1x16x16xf32>
    %102 = vector.shape_cast %101 : vector<1x16x16xf32> to vector<16x16xf32>
    %103 = vector.shape_cast %102 : vector<16x16xf32> to vector<1x16x16xf32>
    %104 = vector.broadcast %103 : vector<1x16x16xf32> to vector<4x16x16xf32>
    %105 = arith.addf %100, %104 : vector<4x16x16xf32>
    %cst_35 = arith.constant dense<0xFF800000> : vector<4x16xf32>
    %106 = vector.multi_reduction <maximumf>, %105, %cst_35 [2] : vector<4x16x16xf32> to vector<4x16xf32>
    %107 = vector.shape_cast %106 : vector<4x16xf32> to vector<4x16x1xf32>
    %cst_36 = arith.constant dense<0x7F800000> : vector<4x16xf32>
    %108 = vector.multi_reduction <minimumf>, %105, %cst_36 [2] : vector<4x16x16xf32> to vector<4x16xf32>
    %109 = vector.shape_cast %108 : vector<4x16xf32> to vector<4x16x1xf32>
    %110 = vector.broadcast %109 : vector<4x16x1xf32> to vector<4x16x16xf32>
    %111 = arith.cmpf ole, %105, %110 : vector<4x16x16xf32>
    %cst_37 = arith.constant 1.000000e+30 : f32
    %112 = vector.broadcast %cst_37 : f32 to vector<4x16x16xf32>
    %113 = arith.select %111, %112, %105 : vector<4x16x16xi1>, vector<4x16x16xf32>
    %cst_38 = arith.constant dense<0x7F800000> : vector<4x16xf32>
    %114 = vector.multi_reduction <minimumf>, %113, %cst_38 [2] : vector<4x16x16xf32> to vector<4x16xf32>
    %115 = vector.shape_cast %114 : vector<4x16xf32> to vector<4x16x1xf32>
    %116 = vector.broadcast %115 : vector<4x16x1xf32> to vector<4x16x16xf32>
    %117 = arith.cmpf ole, %113, %116 : vector<4x16x16xf32>
    %cst_39 = arith.constant 1.000000e+30 : f32
    %118 = vector.broadcast %cst_39 : f32 to vector<4x16x16xf32>
    %119 = arith.select %117, %118, %113 : vector<4x16x16xi1>, vector<4x16x16xf32>
    %cst_40 = arith.constant dense<0x7F800000> : vector<4x16xf32>
    %120 = vector.multi_reduction <minimumf>, %119, %cst_40 [2] : vector<4x16x16xf32> to vector<4x16xf32>
    %121 = vector.shape_cast %120 : vector<4x16xf32> to vector<4x16x1xf32>
    %122 = vector.broadcast %121 : vector<4x16x1xf32> to vector<4x16x16xf32>
    %123 = arith.cmpf ole, %119, %122 : vector<4x16x16xf32>
    %cst_41 = arith.constant 1.000000e+30 : f32
    %124 = vector.broadcast %cst_41 : f32 to vector<4x16x16xf32>
    %125 = arith.select %123, %124, %119 : vector<4x16x16xi1>, vector<4x16x16xf32>
    %cst_42 = arith.constant dense<0x7F800000> : vector<4x16xf32>
    %126 = vector.multi_reduction <minimumf>, %125, %cst_42 [2] : vector<4x16x16xf32> to vector<4x16xf32>
    %127 = vector.shape_cast %126 : vector<4x16xf32> to vector<4x16x1xf32>
    %128 = vector.broadcast %127 : vector<4x16x1xf32> to vector<4x16x16xf32>
    %129 = arith.cmpf ole, %125, %128 : vector<4x16x16xf32>
    %cst_43 = arith.constant 1.000000e+30 : f32
    %130 = vector.broadcast %cst_43 : f32 to vector<4x16x16xf32>
    %131 = arith.select %129, %130, %125 : vector<4x16x16xi1>, vector<4x16x16xf32>
    %cst_44 = arith.constant dense<0x7F800000> : vector<4x16xf32>
    %132 = vector.multi_reduction <minimumf>, %131, %cst_44 [2] : vector<4x16x16xf32> to vector<4x16xf32>
    %133 = vector.shape_cast %132 : vector<4x16xf32> to vector<4x16x1xf32>
    %134 = arith.minimumf %133, %107 : vector<4x16x1xf32>
    %135 = vector.broadcast %134 : vector<4x16x1xf32> to vector<4x16x16xf32>
    %136 = arith.cmpf oge, %105, %135 : vector<4x16x16xf32>
    %137 = vector.broadcast %107 : vector<4x16x1xf32> to vector<4x16x16xf32>
    %138 = arith.subf %105, %137 : vector<4x16x16xf32>
    %139 = math.exp %138 : vector<4x16x16xf32>
    %cst_45 = arith.constant 0.000000e+00 : f32
    %140 = vector.broadcast %cst_45 : f32 to vector<4x16x16xf32>
    %141 = arith.select %136, %139, %140 : vector<4x16x16xi1>, vector<4x16x16xf32>
    %cst_46 = arith.constant dense<0.000000e+00> : vector<4x16xf32>
    %142 = vector.multi_reduction <add>, %141, %cst_46 [2] : vector<4x16x16xf32> to vector<4x16xf32>
    %143 = vector.shape_cast %142 : vector<4x16xf32> to vector<4x16x1xf32>
    %144 = vector.broadcast %143 : vector<4x16x1xf32> to vector<4x16x16xf32>
    %145 = arith.divf %141, %144 : vector<4x16x16xf32>
    %146 = arith.truncf %145 : vector<4x16x16xf32> to vector<4x16x16xbf16>
    "tpu.trace_start"() <{level = 10 : i32, message = "wnm,wmd->wnd"}> : () -> ()
    %cst_47 = arith.constant dense<0.000000e+00> : vector<4x16x8xf32>
    %147 = tpu.matmul %146, %99, %cst_47 {dimension_numbers = #tpu.dot_dimension_numbers<[2], [1], [1], [2], [0, 0, 0, 1, 1, 2], [0], [0]>} : vector<4x16x16xbf16>, vector<4x16x8xbf16>, vector<4x16x8xf32> -> vector<4x16x8xf32>
    "tpu.trace_stop"() : () -> ()
    %148 = vector.shape_cast %147 : vector<4x16x8xf32> to vector<64x8xf32>
    %149 = vector.extract_strided_slice %34 {offsets = [0, 16], sizes = [64, 8], strides = [1, 1]} : vector<64x32xbf16> to vector<64x8xbf16>
    %150 = vector.shape_cast %149 : vector<64x8xbf16> to vector<4x16x8xbf16>
    %151 = vector.extract_strided_slice %36 {offsets = [0, 16], sizes = [64, 8], strides = [1, 1]} : vector<64x32xbf16> to vector<64x8xbf16>
    %152 = vector.shape_cast %151 : vector<64x8xbf16> to vector<4x16x8xbf16>
    %153 = vector.extract_strided_slice %38 {offsets = [0, 16], sizes = [64, 8], strides = [1, 1]} : vector<64x32xbf16> to vector<64x8xbf16>
    %154 = vector.shape_cast %153 : vector<64x8xbf16> to vector<4x16x8xbf16>
    "tpu.trace_start"() <{level = 10 : i32, message = "wnd,wmd->wnm"}> : () -> ()
    %cst_48 = arith.constant dense<0.000000e+00> : vector<4x16x16xf32>
    %155 = tpu.matmul %150, %152, %cst_48 {dimension_numbers = #tpu.dot_dimension_numbers<[2], [2], [1], [1], [0, 0, 0, 1, 1, 1], [0], [0]>} : vector<4x16x8xbf16>, vector<4x16x8xbf16>, vector<4x16x16xf32> -> vector<4x16x16xf32>
    "tpu.trace_stop"() : () -> ()
    %c2 = arith.constant 2 : index
    %c0_49 = arith.constant 0 : index
    %c0_50 = arith.constant 0 : index
    %156 = vector.load %arg6[%c2, %c0_49, %c0_50] : memref<4x16x16xf32, #tpu.memory_space<vmem>>, vector<1x16x16xf32>
    %157 = vector.shape_cast %156 : vector<1x16x16xf32> to vector<16x16xf32>
    %158 = vector.shape_cast %157 : vector<16x16xf32> to vector<1x16x16xf32>
    %159 = vector.broadcast %158 : vector<1x16x16xf32> to vector<4x16x16xf32>
    %160 = arith.addf %155, %159 : vector<4x16x16xf32>
    %cst_51 = arith.constant dense<0xFF800000> : vector<4x16xf32>
    %161 = vector.multi_reduction <maximumf>, %160, %cst_51 [2] : vector<4x16x16xf32> to vector<4x16xf32>
    %162 = vector.shape_cast %161 : vector<4x16xf32> to vector<4x16x1xf32>
    %cst_52 = arith.constant dense<0x7F800000> : vector<4x16xf32>
    %163 = vector.multi_reduction <minimumf>, %160, %cst_52 [2] : vector<4x16x16xf32> to vector<4x16xf32>
    %164 = vector.shape_cast %163 : vector<4x16xf32> to vector<4x16x1xf32>
    %165 = vector.broadcast %164 : vector<4x16x1xf32> to vector<4x16x16xf32>
    %166 = arith.cmpf ole, %160, %165 : vector<4x16x16xf32>
    %cst_53 = arith.constant 1.000000e+30 : f32
    %167 = vector.broadcast %cst_53 : f32 to vector<4x16x16xf32>
    %168 = arith.select %166, %167, %160 : vector<4x16x16xi1>, vector<4x16x16xf32>
    %cst_54 = arith.constant dense<0x7F800000> : vector<4x16xf32>
    %169 = vector.multi_reduction <minimumf>, %168, %cst_54 [2] : vector<4x16x16xf32> to vector<4x16xf32>
    %170 = vector.shape_cast %169 : vector<4x16xf32> to vector<4x16x1xf32>
    %171 = vector.broadcast %170 : vector<4x16x1xf32> to vector<4x16x16xf32>
    %172 = arith.cmpf ole, %168, %171 : vector<4x16x16xf32>
    %cst_55 = arith.constant 1.000000e+30 : f32
    %173 = vector.broadcast %cst_55 : f32 to vector<4x16x16xf32>
    %174 = arith.select %172, %173, %168 : vector<4x16x16xi1>, vector<4x16x16xf32>
    %cst_56 = arith.constant dense<0x7F800000> : vector<4x16xf32>
    %175 = vector.multi_reduction <minimumf>, %174, %cst_56 [2] : vector<4x16x16xf32> to vector<4x16xf32>
    %176 = vector.shape_cast %175 : vector<4x16xf32> to vector<4x16x1xf32>
    %177 = vector.broadcast %176 : vector<4x16x1xf32> to vector<4x16x16xf32>
    %178 = arith.cmpf ole, %174, %177 : vector<4x16x16xf32>
    %cst_57 = arith.constant 1.000000e+30 : f32
    %179 = vector.broadcast %cst_57 : f32 to vector<4x16x16xf32>
    %180 = arith.select %178, %179, %174 : vector<4x16x16xi1>, vector<4x16x16xf32>
    %cst_58 = arith.constant dense<0x7F800000> : vector<4x16xf32>
    %181 = vector.multi_reduction <minimumf>, %180, %cst_58 [2] : vector<4x16x16xf32> to vector<4x16xf32>
    %182 = vector.shape_cast %181 : vector<4x16xf32> to vector<4x16x1xf32>
    %183 = vector.broadcast %182 : vector<4x16x1xf32> to vector<4x16x16xf32>
    %184 = arith.cmpf ole, %180, %183 : vector<4x16x16xf32>
    %cst_59 = arith.constant 1.000000e+30 : f32
    %185 = vector.broadcast %cst_59 : f32 to vector<4x16x16xf32>
    %186 = arith.select %184, %185, %180 : vector<4x16x16xi1>, vector<4x16x16xf32>
    %cst_60 = arith.constant dense<0x7F800000> : vector<4x16xf32>
    %187 = vector.multi_reduction <minimumf>, %186, %cst_60 [2] : vector<4x16x16xf32> to vector<4x16xf32>
    %188 = vector.shape_cast %187 : vector<4x16xf32> to vector<4x16x1xf32>
    %189 = arith.minimumf %188, %162 : vector<4x16x1xf32>
    %190 = vector.broadcast %189 : vector<4x16x1xf32> to vector<4x16x16xf32>
    %191 = arith.cmpf oge, %160, %190 : vector<4x16x16xf32>
    %192 = vector.broadcast %162 : vector<4x16x1xf32> to vector<4x16x16xf32>
    %193 = arith.subf %160, %192 : vector<4x16x16xf32>
    %194 = math.exp %193 : vector<4x16x16xf32>
    %cst_61 = arith.constant 0.000000e+00 : f32
    %195 = vector.broadcast %cst_61 : f32 to vector<4x16x16xf32>
    %196 = arith.select %191, %194, %195 : vector<4x16x16xi1>, vector<4x16x16xf32>
    %cst_62 = arith.constant dense<0.000000e+00> : vector<4x16xf32>
    %197 = vector.multi_reduction <add>, %196, %cst_62 [2] : vector<4x16x16xf32> to vector<4x16xf32>
    %198 = vector.shape_cast %197 : vector<4x16xf32> to vector<4x16x1xf32>
    %199 = vector.broadcast %198 : vector<4x16x1xf32> to vector<4x16x16xf32>
    %200 = arith.divf %196, %199 : vector<4x16x16xf32>
    %201 = arith.truncf %200 : vector<4x16x16xf32> to vector<4x16x16xbf16>
    "tpu.trace_start"() <{level = 10 : i32, message = "wnm,wmd->wnd"}> : () -> ()
    %cst_63 = arith.constant dense<0.000000e+00> : vector<4x16x8xf32>
    %202 = tpu.matmul %201, %154, %cst_63 {dimension_numbers = #tpu.dot_dimension_numbers<[2], [1], [1], [2], [0, 0, 0, 1, 1, 2], [0], [0]>} : vector<4x16x16xbf16>, vector<4x16x8xbf16>, vector<4x16x8xf32> -> vector<4x16x8xf32>
    "tpu.trace_stop"() : () -> ()
    %203 = vector.shape_cast %202 : vector<4x16x8xf32> to vector<64x8xf32>
    %204 = vector.extract_strided_slice %34 {offsets = [0, 24], sizes = [64, 8], strides = [1, 1]} : vector<64x32xbf16> to vector<64x8xbf16>
    %205 = vector.shape_cast %204 : vector<64x8xbf16> to vector<4x16x8xbf16>
    %206 = vector.extract_strided_slice %36 {offsets = [0, 24], sizes = [64, 8], strides = [1, 1]} : vector<64x32xbf16> to vector<64x8xbf16>
    %207 = vector.shape_cast %206 : vector<64x8xbf16> to vector<4x16x8xbf16>
    %208 = vector.extract_strided_slice %38 {offsets = [0, 24], sizes = [64, 8], strides = [1, 1]} : vector<64x32xbf16> to vector<64x8xbf16>
    %209 = vector.shape_cast %208 : vector<64x8xbf16> to vector<4x16x8xbf16>
    "tpu.trace_start"() <{level = 10 : i32, message = "wnd,wmd->wnm"}> : () -> ()
    %cst_64 = arith.constant dense<0.000000e+00> : vector<4x16x16xf32>
    %210 = tpu.matmul %205, %207, %cst_64 {dimension_numbers = #tpu.dot_dimension_numbers<[2], [2], [1], [1], [0, 0, 0, 1, 1, 1], [0], [0]>} : vector<4x16x8xbf16>, vector<4x16x8xbf16>, vector<4x16x16xf32> -> vector<4x16x16xf32>
    "tpu.trace_stop"() : () -> ()
    %c3 = arith.constant 3 : index
    %c0_65 = arith.constant 0 : index
    %c0_66 = arith.constant 0 : index
    %211 = vector.load %arg6[%c3, %c0_65, %c0_66] : memref<4x16x16xf32, #tpu.memory_space<vmem>>, vector<1x16x16xf32>
    %212 = vector.shape_cast %211 : vector<1x16x16xf32> to vector<16x16xf32>
    %213 = vector.shape_cast %212 : vector<16x16xf32> to vector<1x16x16xf32>
    %214 = vector.broadcast %213 : vector<1x16x16xf32> to vector<4x16x16xf32>
    %215 = arith.addf %210, %214 : vector<4x16x16xf32>
    %cst_67 = arith.constant dense<0xFF800000> : vector<4x16xf32>
    %216 = vector.multi_reduction <maximumf>, %215, %cst_67 [2] : vector<4x16x16xf32> to vector<4x16xf32>
    %217 = vector.shape_cast %216 : vector<4x16xf32> to vector<4x16x1xf32>
    %cst_68 = arith.constant dense<0x7F800000> : vector<4x16xf32>
    %218 = vector.multi_reduction <minimumf>, %215, %cst_68 [2] : vector<4x16x16xf32> to vector<4x16xf32>
    %219 = vector.shape_cast %218 : vector<4x16xf32> to vector<4x16x1xf32>
    %220 = vector.broadcast %219 : vector<4x16x1xf32> to vector<4x16x16xf32>
    %221 = arith.cmpf ole, %215, %220 : vector<4x16x16xf32>
    %cst_69 = arith.constant 1.000000e+30 : f32
    %222 = vector.broadcast %cst_69 : f32 to vector<4x16x16xf32>
    %223 = arith.select %221, %222, %215 : vector<4x16x16xi1>, vector<4x16x16xf32>
    %cst_70 = arith.constant dense<0x7F800000> : vector<4x16xf32>
    %224 = vector.multi_reduction <minimumf>, %223, %cst_70 [2] : vector<4x16x16xf32> to vector<4x16xf32>
    %225 = vector.shape_cast %224 : vector<4x16xf32> to vector<4x16x1xf32>
    %226 = vector.broadcast %225 : vector<4x16x1xf32> to vector<4x16x16xf32>
    %227 = arith.cmpf ole, %223, %226 : vector<4x16x16xf32>
    %cst_71 = arith.constant 1.000000e+30 : f32
    %228 = vector.broadcast %cst_71 : f32 to vector<4x16x16xf32>
    %229 = arith.select %227, %228, %223 : vector<4x16x16xi1>, vector<4x16x16xf32>
    %cst_72 = arith.constant dense<0x7F800000> : vector<4x16xf32>
    %230 = vector.multi_reduction <minimumf>, %229, %cst_72 [2] : vector<4x16x16xf32> to vector<4x16xf32>
    %231 = vector.shape_cast %230 : vector<4x16xf32> to vector<4x16x1xf32>
    %232 = vector.broadcast %231 : vector<4x16x1xf32> to vector<4x16x16xf32>
    %233 = arith.cmpf ole, %229, %232 : vector<4x16x16xf32>
    %cst_73 = arith.constant 1.000000e+30 : f32
    %234 = vector.broadcast %cst_73 : f32 to vector<4x16x16xf32>
    %235 = arith.select %233, %234, %229 : vector<4x16x16xi1>, vector<4x16x16xf32>
    %cst_74 = arith.constant dense<0x7F800000> : vector<4x16xf32>
    %236 = vector.multi_reduction <minimumf>, %235, %cst_74 [2] : vector<4x16x16xf32> to vector<4x16xf32>
    %237 = vector.shape_cast %236 : vector<4x16xf32> to vector<4x16x1xf32>
    %238 = vector.broadcast %237 : vector<4x16x1xf32> to vector<4x16x16xf32>
    %239 = arith.cmpf ole, %235, %238 : vector<4x16x16xf32>
    %cst_75 = arith.constant 1.000000e+30 : f32
    %240 = vector.broadcast %cst_75 : f32 to vector<4x16x16xf32>
    %241 = arith.select %239, %240, %235 : vector<4x16x16xi1>, vector<4x16x16xf32>
    %cst_76 = arith.constant dense<0x7F800000> : vector<4x16xf32>
    %242 = vector.multi_reduction <minimumf>, %241, %cst_76 [2] : vector<4x16x16xf32> to vector<4x16xf32>
    %243 = vector.shape_cast %242 : vector<4x16xf32> to vector<4x16x1xf32>
    %244 = arith.minimumf %243, %217 : vector<4x16x1xf32>
    %245 = vector.broadcast %244 : vector<4x16x1xf32> to vector<4x16x16xf32>
    %246 = arith.cmpf oge, %215, %245 : vector<4x16x16xf32>
    %247 = vector.broadcast %217 : vector<4x16x1xf32> to vector<4x16x16xf32>
    %248 = arith.subf %215, %247 : vector<4x16x16xf32>
    %249 = math.exp %248 : vector<4x16x16xf32>
    %cst_77 = arith.constant 0.000000e+00 : f32
    %250 = vector.broadcast %cst_77 : f32 to vector<4x16x16xf32>
    %251 = arith.select %246, %249, %250 : vector<4x16x16xi1>, vector<4x16x16xf32>
    %cst_78 = arith.constant dense<0.000000e+00> : vector<4x16xf32>
    %252 = vector.multi_reduction <add>, %251, %cst_78 [2] : vector<4x16x16xf32> to vector<4x16xf32>
    %253 = vector.shape_cast %252 : vector<4x16xf32> to vector<4x16x1xf32>
    %254 = vector.broadcast %253 : vector<4x16x1xf32> to vector<4x16x16xf32>
    %255 = arith.divf %251, %254 : vector<4x16x16xf32>
    %256 = arith.truncf %255 : vector<4x16x16xf32> to vector<4x16x16xbf16>
    "tpu.trace_start"() <{level = 10 : i32, message = "wnm,wmd->wnd"}> : () -> ()
    %cst_79 = arith.constant dense<0.000000e+00> : vector<4x16x8xf32>
    %257 = tpu.matmul %256, %209, %cst_79 {dimension_numbers = #tpu.dot_dimension_numbers<[2], [1], [1], [2], [0, 0, 0, 1, 1, 2], [0], [0]>} : vector<4x16x16xbf16>, vector<4x16x8xbf16>, vector<4x16x8xf32> -> vector<4x16x8xf32>
    "tpu.trace_stop"() : () -> ()
    %258 = vector.shape_cast %257 : vector<4x16x8xf32> to vector<64x8xf32>
    %259 = tpu.concatenate %93, %148, %203, %258 in 1 : vector<64x8xf32>, vector<64x8xf32>, vector<64x8xf32>, vector<64x8xf32> -> vector<64x32xf32>
    %260 = arith.truncf %259 : vector<64x32xf32> to vector<64x32xbf16>
    %c0_80 = arith.constant 0 : index
    %c0_81 = arith.constant 0 : index
    %261 = vector.load %arg7[%c0_80, %c0_81] : memref<32x32xbf16, #tpu.memory_space<vmem>>, vector<32x32xbf16>
    %cst_82 = arith.constant dense<0.000000e+00> : vector<64x32xf32>
    %262 = tpu.matmul %260, %261, %cst_82 {dimension_numbers = #tpu.dot_dimension_numbers<[1], [0], [0], [1], [0, 0, 1, 1], [], []>} : vector<64x32xbf16>, vector<32x32xbf16>, vector<64x32xf32> -> vector<64x32xf32>
    %c0_83 = arith.constant 0 : index
    %c0_84 = arith.constant 0 : index
    %263 = vector.load %arg8[%c0_83, %c0_84] : memref<1x32xf32, #tpu.memory_space<vmem>>, vector<1x32xf32>
    %264 = vector.broadcast %263 : vector<1x32xf32> to vector<64x32xf32>
    %265 = arith.addf %262, %264 : vector<64x32xf32>
    %c0_85 = arith.constant 0 : index
    %c0_86 = arith.constant 0 : index
    %266 = vector.load %arg1[%c0_85, %c0_86] : memref<64x32xf32, #tpu.memory_space<vmem>>, vector<64x32xf32>
    %267 = arith.addf %266, %265 : vector<64x32xf32>
    %c0_87 = arith.constant 0 : index
    %c0_88 = arith.constant 0 : index
    %268 = vector.load %arg9[%c0_87, %c0_88] : memref<1x32xf32, #tpu.memory_space<vmem>>, vector<1x32xf32>
    %c0_89 = arith.constant 0 : index
    %c0_90 = arith.constant 0 : index
    %269 = vector.load %arg10[%c0_89, %c0_90] : memref<1x32xf32, #tpu.memory_space<vmem>>, vector<1x32xf32>
    %cst_91 = arith.constant dense<0.000000e+00> : vector<64xf32>
    %270 = vector.multi_reduction <add>, %267, %cst_91 [1] : vector<64x32xf32> to vector<64xf32>
    %271 = vector.shape_cast %270 : vector<64xf32> to vector<64x1xf32>
    %cst_92 = arith.constant 3.200000e+01 : f32
    %272 = vector.broadcast %cst_92 : f32 to vector<64x1xf32>
    %273 = arith.divf %271, %272 : vector<64x1xf32>
    %274 = vector.broadcast %273 : vector<64x1xf32> to vector<64x32xf32>
    %275 = arith.subf %267, %274 : vector<64x32xf32>
    %276 = arith.mulf %275, %275 : vector<64x32xf32>
    %cst_93 = arith.constant dense<0.000000e+00> : vector<64xf32>
    %277 = vector.multi_reduction <add>, %276, %cst_93 [1] : vector<64x32xf32> to vector<64xf32>
    %278 = vector.shape_cast %277 : vector<64xf32> to vector<64x1xf32>
    %cst_94 = arith.constant 3.200000e+01 : f32
    %279 = vector.broadcast %cst_94 : f32 to vector<64x1xf32>
    %280 = arith.divf %278, %279 : vector<64x1xf32>
    %281 = vector.broadcast %273 : vector<64x1xf32> to vector<64x32xf32>
    %282 = arith.subf %267, %281 : vector<64x32xf32>
    %cst_95 = arith.constant 9.99999974E-6 : f32
    %283 = vector.broadcast %cst_95 : f32 to vector<64x1xf32>
    %284 = arith.addf %280, %283 : vector<64x1xf32>
    %285 = math.rsqrt %284 : vector<64x1xf32>
    %286 = vector.broadcast %285 : vector<64x1xf32> to vector<64x32xf32>
    %287 = arith.mulf %282, %286 : vector<64x32xf32>
    %288 = vector.broadcast %268 : vector<1x32xf32> to vector<64x32xf32>
    %289 = arith.mulf %287, %288 : vector<64x32xf32>
    %290 = vector.broadcast %269 : vector<1x32xf32> to vector<64x32xf32>
    %291 = arith.addf %289, %290 : vector<64x32xf32>
    %292 = arith.truncf %291 : vector<64x32xf32> to vector<64x32xbf16>
    %cst_96 = arith.constant 0.000000e+00 : f32
    %293 = vector.broadcast %cst_96 : f32 to vector<64x32xf32>
    %c0_97 = arith.constant 0 : index
    %c0_98 = arith.constant 0 : index
    %294 = vector.load %arg11[%c0_97, %c0_98] : memref<32x128xbf16, #tpu.memory_space<vmem>>, vector<32x128xbf16>
    %cst_99 = arith.constant dense<0.000000e+00> : vector<64x128xf32>
    %295 = tpu.matmul %292, %294, %cst_99 {dimension_numbers = #tpu.dot_dimension_numbers<[1], [0], [0], [1], [0, 0, 1, 1], [], []>} : vector<64x32xbf16>, vector<32x128xbf16>, vector<64x128xf32> -> vector<64x128xf32>
    %c0_100 = arith.constant 0 : index
    %c0_101 = arith.constant 0 : index
    %296 = vector.load %arg12[%c0_100, %c0_101] : memref<1x128xf32, #tpu.memory_space<vmem>>, vector<1x128xf32>
    %297 = vector.broadcast %296 : vector<1x128xf32> to vector<64x128xf32>
    %298 = arith.addf %295, %297 : vector<64x128xf32>
    %cst_102 = arith.constant 5.000000e-01 : f32
    %299 = vector.broadcast %cst_102 : f32 to vector<64x128xf32>
    %300 = arith.mulf %299, %298 : vector<64x128xf32>
    %cst_103 = arith.constant 0.707106769 : f32
    %301 = vector.broadcast %cst_103 : f32 to vector<64x128xf32>
    %302 = arith.mulf %298, %301 : vector<64x128xf32>
    %cst_104 = arith.constant 0.000000e+00 : f32
    %303 = vector.broadcast %cst_104 : f32 to vector<64x128xf32>
    %304 = arith.cmpf oge, %302, %303 : vector<64x128xf32>
    %cst_105 = arith.constant 1.000000e+00 : f32
    %cst_106 = arith.constant -1.000000e+00 : f32
    %305 = vector.broadcast %cst_105 : f32 to vector<64x128xf32>
    %306 = vector.broadcast %cst_106 : f32 to vector<64x128xf32>
    %307 = arith.select %304, %305, %306 : vector<64x128xi1>, vector<64x128xf32>
    %308 = math.absf %302 : vector<64x128xf32>
    %cst_107 = arith.constant 0.327591091 : f32
    %309 = vector.broadcast %cst_107 : f32 to vector<64x128xf32>
    %310 = arith.mulf %309, %308 : vector<64x128xf32>
    %cst_108 = arith.constant 1.000000e+00 : f32
    %311 = vector.broadcast %cst_108 : f32 to vector<64x128xf32>
    %312 = arith.addf %311, %310 : vector<64x128xf32>
    %cst_109 = arith.constant 1.000000e+00 : f32
    %313 = vector.broadcast %cst_109 : f32 to vector<64x128xf32>
    %314 = arith.divf %313, %312 : vector<64x128xf32>
    %cst_110 = arith.constant 1.06140542 : f32
    %315 = vector.broadcast %cst_110 : f32 to vector<64x128xf32>
    %316 = arith.mulf %314, %315 : vector<64x128xf32>
    %cst_111 = arith.constant -1.45315206 : f32
    %317 = vector.broadcast %cst_111 : f32 to vector<64x128xf32>
    %318 = arith.addf %317, %316 : vector<64x128xf32>
    %319 = arith.mulf %314, %318 : vector<64x128xf32>
    %cst_112 = arith.constant 1.42141378 : f32
    %320 = vector.broadcast %cst_112 : f32 to vector<64x128xf32>
    %321 = arith.addf %320, %319 : vector<64x128xf32>
    %322 = arith.mulf %314, %321 : vector<64x128xf32>
    %cst_113 = arith.constant -0.284496725 : f32
    %323 = vector.broadcast %cst_113 : f32 to vector<64x128xf32>
    %324 = arith.addf %323, %322 : vector<64x128xf32>
    %325 = arith.mulf %314, %324 : vector<64x128xf32>
    %cst_114 = arith.constant 0.254829586 : f32
    %326 = vector.broadcast %cst_114 : f32 to vector<64x128xf32>
    %327 = arith.addf %326, %325 : vector<64x128xf32>
    %328 = arith.mulf %314, %327 : vector<64x128xf32>
    %cst_115 = arith.constant 0.000000e+00 : f32
    %329 = vector.broadcast %cst_115 : f32 to vector<64x128xf32>
    %330 = arith.subf %329, %308 : vector<64x128xf32>
    %331 = arith.mulf %330, %308 : vector<64x128xf32>
    %332 = math.exp %331 : vector<64x128xf32>
    %333 = arith.mulf %328, %332 : vector<64x128xf32>
    %cst_116 = arith.constant 1.000000e+00 : f32
    %334 = vector.broadcast %cst_116 : f32 to vector<64x128xf32>
    %335 = arith.subf %334, %333 : vector<64x128xf32>
    %336 = arith.mulf %307, %335 : vector<64x128xf32>
    %cst_117 = arith.constant 1.000000e+00 : f32
    %337 = vector.broadcast %cst_117 : f32 to vector<64x128xf32>
    %338 = arith.addf %337, %336 : vector<64x128xf32>
    %339 = arith.mulf %300, %338 : vector<64x128xf32>
    %340 = arith.truncf %339 : vector<64x128xf32> to vector<64x128xbf16>
    %c0_118 = arith.constant 0 : index
    %c0_119 = arith.constant 0 : index
    %341 = vector.load %arg13[%c0_118, %c0_119] : memref<128x32xbf16, #tpu.memory_space<vmem>>, vector<128x32xbf16>
    %cst_120 = arith.constant dense<0.000000e+00> : vector<64x32xf32>
    %342 = tpu.matmul %340, %341, %cst_120 {dimension_numbers = #tpu.dot_dimension_numbers<[1], [0], [0], [1], [0, 0, 1, 1], [], []>} : vector<64x128xbf16>, vector<128x32xbf16>, vector<64x32xf32> -> vector<64x32xf32>
    %343 = arith.addf %293, %342 : vector<64x32xf32>
    %344 = arith.addf %267, %343 : vector<64x32xf32>
    %c0_121 = arith.constant 0 : index
    %c0_122 = arith.constant 0 : index
    %345 = vector.load %arg14[%c0_121, %c0_122] : memref<1x32xf32, #tpu.memory_space<vmem>>, vector<1x32xf32>
    %346 = vector.broadcast %345 : vector<1x32xf32> to vector<64x32xf32>
    %347 = arith.addf %344, %346 : vector<64x32xf32>
    %c0_123 = arith.constant 0 : index
    %c0_124 = arith.constant 0 : index
    %348 = vector.load %arg15[%c0_123, %c0_124] : memref<64x32xf32, #tpu.memory_space<vmem>>, vector<64x32xf32>
    tpu.vector_store %arg15[%c0_123, %c0_124], %347 {strides = array<i32>} : memref<64x32xf32, #tpu.memory_space<vmem>>, vector<64x32xf32>,
    return
  }
  func.func @transform_0(%arg0: i32) -> (i32, i32) {
    %c0_i32 = arith.constant 0 : i32
    %c0_i32_0 = arith.constant 0 : i32
    return %arg0, %c0_i32 : i32, i32
  }
  func.func @transform_1(%arg0: i32) -> (i32, i32) {
    %c0_i32 = arith.constant 0 : i32
    %c0_i32_0 = arith.constant 0 : i32
    %c0_i32_1 = arith.constant 0 : i32
    return %c0_i32, %c0_i32_0 : i32, i32
  }
  func.func @transform_2(%arg0: i32) -> (i32, i32) {
    %c0_i32 = arith.constant 0 : i32
    %c0_i32_0 = arith.constant 0 : i32
    %c0_i32_1 = arith.constant 0 : i32
    return %c0_i32, %c0_i32_0 : i32, i32
  }
  func.func @transform_3(%arg0: i32) -> (i32, i32) {
    %c0_i32 = arith.constant 0 : i32
    %c0_i32_0 = arith.constant 0 : i32
    %c0_i32_1 = arith.constant 0 : i32
    return %c0_i32, %c0_i32_0 : i32, i32
  }
  func.func @transform_4(%arg0: i32) -> (i32, i32) {
    %c0_i32 = arith.constant 0 : i32
    %c0_i32_0 = arith.constant 0 : i32
    %c0_i32_1 = arith.constant 0 : i32
    return %c0_i32, %c0_i32_0 : i32, i32
  }
  func.func @transform_5(%arg0: i32) -> (i32, i32, i32) {
    %c0_i32 = arith.constant 0 : i32
    %c0_i32_0 = arith.constant 0 : i32
    %c0_i32_1 = arith.constant 0 : i32
    %c0_i32_2 = arith.constant 0 : i32
    return %c0_i32, %c0_i32_0, %c0_i32_1 : i32, i32, i32
  }
  func.func @transform_6(%arg0: i32) -> (i32, i32) {
    %c0_i32 = arith.constant 0 : i32
    %c0_i32_0 = arith.constant 0 : i32
    %c0_i32_1 = arith.constant 0 : i32
    return %c0_i32, %c0_i32_0 : i32, i32
  }
  func.func @transform_7(%arg0: i32) -> (i32, i32) {
    %c0_i32 = arith.constant 0 : i32
    %c0_i32_0 = arith.constant 0 : i32
    %c0_i32_1 = arith.constant 0 : i32
    return %c0_i32, %c0_i32_0 : i32, i32
  }
  func.func @transform_8(%arg0: i32) -> (i32, i32) {
    %c0_i32 = arith.constant 0 : i32
    %c0_i32_0 = arith.constant 0 : i32
    %c0_i32_1 = arith.constant 0 : i32
    return %c0_i32, %c0_i32_0 : i32, i32
  }
  func.func @transform_9(%arg0: i32) -> (i32, i32) {
    %c0_i32 = arith.constant 0 : i32
    %c0_i32_0 = arith.constant 0 : i32
    %c0_i32_1 = arith.constant 0 : i32
    return %c0_i32, %c0_i32_0 : i32, i32
  }
  func.func @transform_10(%arg0: i32) -> (i32, i32) {
    %c0_i32 = arith.constant 0 : i32
    %c0_i32_0 = arith.constant 0 : i32
    %c0_i32_1 = arith.constant 0 : i32
    return %c0_i32, %c0_i32_0 : i32, i32
  }
  func.func @transform_11(%arg0: i32) -> (i32, i32) {
    %c0_i32 = arith.constant 0 : i32
    %c0_i32_0 = arith.constant 0 : i32
    %c0_i32_1 = arith.constant 0 : i32
    return %c0_i32, %c0_i32_0 : i32, i32
  }
  func.func @transform_12(%arg0: i32) -> (i32, i32) {
    %c0_i32 = arith.constant 0 : i32
    %c0_i32_0 = arith.constant 0 : i32
    %c0_i32_1 = arith.constant 0 : i32
    return %c0_i32, %c0_i32_0 : i32, i32
  }
  func.func @transform_13(%arg0: i32) -> (i32, i32) {
    %c0_i32 = arith.constant 0 : i32
    %c0_i32_0 = arith.constant 0 : i32
    %c0_i32_1 = arith.constant 0 : i32
    return %c0_i32, %c0_i32_0 : i32, i32
  }
  func.func @transform_14(%arg0: i32) -> (i32, i32) {
    %c0_i32 = arith.constant 0 : i32
    %c0_i32_0 = arith.constant 0 : i32
    return %arg0, %c0_i32 : i32, i32
  }
}

</mosaic_0001>

<bundles_post_ra>
// kernel: sub.10
= control target key start
LH: loop header
LB: loop body
LE: loop exit
PB: predicated region body
PF: predicated region fallthrough
CT: control target
= control target key end

     0   :  { %s29_s10 = smov 3  ;;  %s45_s11 = smov 12   ;;  %vm12_vm0 = vcmask 31744   ;;  %vm19_vm1 = vcmask 130144   ;;  %vm26_vm2 = vcmask 97344   ;;  %vm33_vm3 = vcmask 64544   ;;  %s67_s0 = inlined_call_operand.vmem [shape: s32[2,4,4], index: 0, kind: input, shape index: {}]   ;;  %s68_s1 = inlined_call_operand.vmem [shape: s32[2,16], index: 1, kind: output, shape index: {}]  }
   0x1   :  { %v41_v0 = vld [vmem:[%s67_s0 + $0x4] sm:$0xf]  ;;  %v8_v1 = vld [vmem:[%s67_s0] sm:$0xf]  ;;  %s15_s0 = smov 3  ;;  %s46_s12 = smov 4  }
   0x2   :  { %7 = vst [vmem:[#allocation1 + $0x8] sm:$0xf] %v41_v0  ;;  %s22_s13 = smov 3  ;;  %s47_s14 = smov 8  }
   0x3   :  { %9 = vst [vmem:[#allocation1] sm:$0xf] %v8_v1  ;;  %s10_s15 = smov 3 }
   0xa   :  { %v16_v2 = vld [vmem:[#allocation1 + $0x3] ss:$8 sm:%s15_s0]   ;;  %v30_v3 = vld [vmem:[#allocation1 + $0x1] ss:$8 sm:%s29_s10]   ;;  %v23_v4 = vld [vmem:[#allocation1 + $0x2] ss:$8 sm:%s22_s13]  }
   0xb   :  { %17 = vrot.lane.b32.xlu0 %v16_v2, %s45_s11  ;;  %31 = vrot.lane.b32.xlu1 %v30_v3, %s46_s12  ;;  %v11_v5 = vld [vmem:[#allocation1] ss:$8 sm:%s10_s15]  }
   0xc   :  { %13 = vst.msk [vmem:[#allocation0] sm:$0x3] %vm12_vm0, %v11_v5  }
  0x13   :  { %24 = vrot.lane.b32.xlu0 %v23_v4, %s47_s14 }
  0x7d   :  { %v18_v6 = vpop.permute.xlu0 %17   ;;  %v32_v7 = vpop.permute.xlu1 %31  }
  0x7e   :  { %20 = vst.msk [vmem:[#allocation0] sm:$0x3] %vm19_vm1, %v18_v6  }
  0x85   :  { %v25_v8 = vpop.permute.xlu0 %24  }
  0x86   :  { %27 = vst.msk [vmem:[#allocation0] sm:$0x3] %vm26_vm2, %v25_v8  }
  0x87   :  { %34 = vst.msk [vmem:[#allocation0] sm:$0x3] %vm33_vm3, %v32_v7  }
  0x8e   :  { %v37_v9 = vld [vmem:[#allocation0] sm:$0x3] }
  0x8f   :  { %40 = vst [vmem:[%s68_s1] sm:$0x3] %v37_v9 }

// kernel: basic_layer_forward.1
= control target key start
LH: loop header
LB: loop body
LE: loop exit
PB: predicated region body
PF: predicated region fallthrough
CT: control target
= control target key end

     0   :  { %s4722_s29 = smov 0   ;;  %s6301_s0 = inlined_call_operand.vmem [shape: f32[128,32], index: 0, kind: input, shape index: {}]   ;;  %s6302_s1 = inlined_call_operand.vmem [shape: f32[1,32], index: 1, kind: input, shape index: {}]   ;;  %s6303_s2 = inlined_call_operand.vmem [shape: f32[1,32], index: 2, kind: input, shape index: {}]   ;;  %s6304_s3 = inlined_call_operand.vmem [shape: bf16[32,96], index: 3, kind: input, shape index: {}]   ;;  %s6305_s4 = inlined_call_operand.vmem [shape: f32[1,96], index: 4, kind: input, shape index: {}]   ;;  %s6306_s5 = inlined_call_operand.vmem [shape: f32[4,16,16], index: 5, kind: input, shape index: {}]   ;;  %s6307_s6 = inlined_call_operand.vmem [shape: bf16[32,32], index: 6, kind: input, shape index: {}]   ;;  %s6308_s7 = inlined_call_operand.vmem [shape: f32[1,32], index: 7, kind: input, shape index: {}]   ;;  %s6309_s8 = inlined_call_operand.vmem [shape: f32[1,32], index: 8, kind: input, shape index: {}]   ;;  %s6310_s9 = inlined_call_operand.vmem [shape: f32[1,32], index: 9, kind: input, shape index: {}]   ;;  %s6311_s10 = inlined_call_operand.vmem [shape: bf16[32,128], index: 10, kind: input, shape index: {}]   ;;  %s6312_s11 = inlined_call_operand.vmem [shape: f32[1,128], index: 11, kind: input, shape index: {}]   ;;  %s6313_s12 = inlined_call_operand.vmem [shape: bf16[128,32], index: 12, kind: input, shape index: {}]   ;;  %s6314_s13 = inlined_call_operand.vmem [shape: f32[1,32], index: 13, kind: input, shape index: {}]   ;;  %s6315_s14 = inlined_call_operand.vmem [shape: f32[128,32], index: 14, kind: output, shape index: {}]  }
   0x1 LB: > { %s4206_s30 = sadd.s32 4294967295, %s4629_s29   ;;  %p4210_p0 = scmp.ge.s32.totalorder %s4629_s29, 1  ;;  %s4629_s29 = sphi %s4722_s29, %s24_s29  }
   0x2   : > { %p413_p1 = scmp.lt.s32.totalorder %s4629_s29, 3 }
   0x4   : > { %p414_p2 = pnand %p4210_p0, %p413_p1 }
   0x5   : > { %s4211_s15 = sshll.u32 (!%p414_p2), %s4206_s30, 3  ;;  %s4632_s17 = smov (!%p414_p2), 96  }
   0x6   : > { %417 = sbr.rel (%p414_p2) target bundleno = 5452 (0x154c), region = 76  ;;  %p460_p3 = scmp.lt.s32.totalorder (!%p414_p2), %s4211_s15, 15 }
   0x7   : > { %s4633_s23 = smov (!%p414_p2), 64   ;;  %s4634_s24 = smov (!%p414_p2), 88  }
   0x8   : > { %s4635_s25 = smov (!%p414_p2), 120   ;;  %s4637_s18 = smov (!%p414_p2), 56  }
   0x9   : > { %s4638_s20 = smov (!%p414_p2), 112   ;;  %s4640_s26 = smov (!%p414_p2), 72  }
   0xa   : > { %s4641_s27 = smov (!%p414_p2), 104   ;;  %s4643_s21 = smov (!%p414_p2), 16  }
   0xb   : > { %s6331_s15 = smov (!%p460_p3, %s4211_s15), 15  ;;  %vm482_vm0 = vcmask 261120   ;;  %v4631_v14 = vmov 32.0   ;;  %v4324_v58 = vld [vmem:[%s6304_s3 + $0x8] sm:$0xff]  ;;  %v4323_v62 = vld [vmem:[%s6304_s3] sm:$0xff]  ;;  %s4644_s22 = smov 8  }
   0xc   : > { %s4212_s16 = sshll.u32 %s6331_s15, 3  ;;  %4429 = vrcp.f32 %v4631_v14  ;;  %730 = vmatpush.bf16.msra.mxu0 %v4324_v58 }
   0xd   : > { %s4738_s19 = scalar_lea.vmem %s6301_s0, %s4212_s16 }
   0xe   : > { %v476_v0 = vld [vmem:[%s4738_s19 + $0x20] sm:$0xff]  ;;  %v474_v1 = vld [vmem:[%s4738_s19 + $0x10] sm:$0xff]  ;;  %v477_v6 = vld [vmem:[%s4738_s19 + $0x28] sm:$0xff] }
   0xf   : > { %v472_v2 = vld [vmem:[%s4738_s19] sm:$0xff]  ;;  %v495_v3 = vsel %vm482_vm0, %v476_v0, 0.0  ;;  %v489_v4 = vsel %vm482_vm0, %v474_v1, 0.0  ;;  %v475_v7 = vld [vmem:[%s4738_s19 + $0x18] sm:$0xff]  ;;  %v473_v8 = vld [vmem:[%s4738_s19 + $0x8] sm:$0xff]  ;;  %v498_v9 = vsel %vm482_vm0, %v477_v6, 0.0 }
  0x10   : > { %v483_v5 = vsel %vm482_vm0, %v472_v2, 0.0  ;;  %496 = vadd.xlane.f32.xlu2 %v495_v3  ;;  %490 = vadd.xlane.f32.xlu1 %v489_v4  ;;  %v492_v10 = vsel %vm482_vm0, %v475_v7, 0.0  ;;  %v486_v11 = vsel %vm482_vm0, %v473_v8, 0.0  ;;  %v478_v12 = vld [vmem:[%s4738_s19 + $0x30] sm:$0xff]  ;;  %v479_v36 = vld [vmem:[%s4738_s19 + $0x38] sm:$0xff] }
  0x11   : > { %484 = vadd.xlane.f32.xlu0 %v483_v5  ;;  %v501_v13 = vsel %vm482_vm0, %v478_v12, 0.0  ;;  %v504_v41 = vsel %vm482_vm0, %v479_v36, 0.0  ;;  %731 = vmatpush.bf16.msra.mxu0 %v4323_v62 }
  0x12   : > { %v4430_v15 = vpop.eup %4429 }
  0x13   : > { %v508_v16 = vmul.f32 32.0, %v4430_v15  ;;  %vm512_vm1 = vweird.f32 %v4430_v15 }
  0x15   : > { %v509_v17 = vsub.f32 1.0, %v508_v16 }
  0x17   : > { %v510_v18 = vmul.f32 %v4430_v15, %v509_v17 }
  0x18   : > { %499 = vadd.xlane.f32.xlu2 %v498_v9  ;;  %493 = vadd.xlane.f32.xlu1 %v492_v10 }
  0x19   : > { %487 = vadd.xlane.f32.xlu0 %v486_v11  ;;  %v511_v19 = vadd.f32 %v4430_v15, %v510_v18 }
  0x1b   : > { %v4754_v20 = vsel %vm512_vm1, %v4430_v15, %v511_v19 }
  0x20   : > { %502 = vadd.xlane.f32.xlu2 %v501_v13 }
  0x83   : > { %v497_v21 = vpop.xlane.xlu2 %496  ;;  %v491_v22 = vpop.xlane.xlu1 %490 }
  0x84   : > { %v485_v23 = vpop.xlane.xlu0 %484  ;;  %v518_v32 = vmul.f32 %v4754_v20, %v497_v21  ;;  %v516_v33 = vmul.f32 %v4754_v20, %v491_v22 }
  0x85   : > { %v514_v24 = vmul.f32 %v4754_v20, %v485_v23 }
  0x86   : > { %v4773_v39 = vsub.f32 %v476_v0, %v518_v32  ;;  %v4775_v40 = vsub.f32 %v474_v1, %v516_v33 }
  0x87   : > { %v4757_v25 = vsub.f32 %v472_v2, %v514_v24 }
  0x88   : > { %v534_v48 = vmul.f32 %v4773_v39, %v4773_v39  ;;  %v532_v49 = vmul.f32 %v4775_v40, %v4775_v40 }
  0x89   : > { %v530_v26 = vmul.f32 %v4757_v25, %v4757_v25 }
  0x8a   : > { %v550_v53 = vsel %vm482_vm0, %v534_v48, 0.0  ;;  %v544_v54 = vsel %vm482_vm0, %v532_v49, 0.0 }
  0x8b   : > { %v500_v27 = vpop.xlane.xlu2 %499  ;;  %v494_v28 = vpop.xlane.xlu1 %493  ;;  %v538_v29 = vsel %vm482_vm0, %v530_v26, 0.0 }
  0x8c   : > { %v517_v30 = vmul.f32 %v4754_v20, %v494_v28  ;;  %539 = vadd.xlane.f32.xlu0 %v538_v29  ;;  %v488_v31 = vpop.xlane.xlu0 %487  ;;  %v519_v47 = vmul.f32 %v4754_v20, %v500_v27 }
  0x8d   : > { %v515_v34 = vmul.f32 %v4754_v20, %v488_v31 }
  0x8e   : > { %v4766_v35 = vsub.f32 %v475_v7, %v517_v30  ;;  %v4792_v52 = vsub.f32 %v477_v6, %v519_v47 }
  0x8f   : > { %v4769_v37 = vsub.f32 %v473_v8, %v515_v34 }
  0x90   : > { %v533_v38 = vmul.f32 %v4766_v35, %v4766_v35  ;;  %v535_v56 = vmul.f32 %v4792_v52, %v4792_v52 }
  0x91   : > { %v531_v42 = vmul.f32 %v4769_v37, %v4769_v37 }
  0x92   : > { %v547_v43 = vsel %vm482_vm0, %v533_v38, 0.0  ;;  %v553_v57 = vsel %vm482_vm0, %v535_v56, 0.0 }
  0x93   : > { %v503_v44 = vpop.xlane.xlu2 %502  ;;  %548 = vadd.xlane.f32.xlu2 %v547_v43  ;;  %v541_v45 = vsel %vm482_vm0, %v531_v42, 0.0 }
  0x94   : > { %v520_v46 = vmul.f32 %v4754_v20, %v503_v44  ;;  %505 = vadd.xlane.f32.xlu0 %v504_v41  ;;  %542 = vadd.xlane.f32.xlu1 %v541_v45  ;;  %v4836_v45 = vld [vmem:[%s6302_s1] ss:$0 sm:$0xff] }
  0x96   : > { %v4788_v50 = vsub.f32 %v478_v12, %v520_v46 }
  0x98   : > { %v536_v51 = vmul.f32 %v4788_v50, %v4788_v50 }
  0x9a   : > { %v556_v55 = vsel %vm482_vm0, %v536_v51, 0.0 }
  0x9b   : > { %557 = vadd.xlane.f32.xlu2 %v556_v55 }
  0x9c   : > { %551 = vadd.xlane.f32.xlu0 %v550_v53  ;;  %545 = vadd.xlane.f32.xlu1 %v544_v54  ;;  %v4843_v54 = vld [vmem:[%s6303_s2] ss:$0 sm:$0xff] }
  0xa4   : > { %554 = vadd.xlane.f32.xlu1 %v553_v57 }
  0xff   : > { %v540_v59 = vpop.xlane.xlu0 %539 }
 0x100   : > { %v562_v60 = vmul.f32 %v540_v59, %v4754_v20 }
 0x102   : > { %v570_v61 = vadd.f32 1e-05, %v562_v60 }
 0x104   : > { %4431 = vrsqrt.f32 %v570_v61  ;;  %vm584_vm3 = vweird.f32 %v570_v61 }
 0x106   : > { %v549_v63 = vpop.xlane.xlu2 %548 }
 0x107   : > { %v565_v0 = vmul.f32 %v549_v63, %v4754_v20  ;;  %v543_v1 = vpop.xlane.xlu1 %542  ;;  %v506_v2 = vpop.xlane.xlu0 %505 }
 0x108   : > { %v563_v3 = vmul.f32 %v543_v1, %v4754_v20  ;;  %v521_v4 = vmul.f32 %v4754_v20, %v506_v2 }
 0x109   : > { %v4810_v5 = vadd.f32 1e-05, %v565_v0 }
 0x10a   : > { %v4432_v6 = vpop.eup %4431  ;;  %v571_v7 = vadd.f32 1e-05, %v563_v3  ;;  %v4812_v8 = vsub.f32 %v479_v36, %v521_v4 }
 0x10b   : > { %v579_v9 = vmul.f32 %v4432_v6, %v570_v61  ;;  %4433 = vrsqrt.f32 %v4810_v5  ;;  %vm585_vm2 = vweird.f32 %v4432_v6  ;;  %vm614_vm10 = vweird.f32 %v4810_v5 }
 0x10c   : > { %4435 = vrsqrt.f32 %v571_v7  ;;  %v537_v10 = vmul.f32 %v4812_v8, %v4812_v8  ;;  %vm4824_vm4 = vmor %vm584_vm3, %vm585_vm2  ;;  %vm594_vm5 = vweird.f32 %v571_v7 }
 0x10d   : > { %v580_v11 = vmul.f32 %v4432_v6, %v579_v9 }
 0x10e   : > { %v559_v12 = vsel %vm482_vm0, %v537_v10, 0.0  ;;  %v558_v28 = vpop.xlane.xlu2 %557 }
 0x10f   : > { %v581_v13 = vmul.f32 0.5, %v580_v11  ;;  %v546_v14 = vpop.xlane.xlu1 %545  ;;  %560 = vadd.xlane.f32.xlu0 %v559_v12  ;;  %v552_v16 = vpop.xlane.xlu0 %551 }
 0x110   : > { %v564_v15 = vmul.f32 %v546_v14, %v4754_v20  ;;  %v566_v23 = vmul.f32 %v552_v16, %v4754_v20 }
 0x111   : > { %v4819_v17 = vpop.eup %4433  ;;  %v582_v18 = vsub.f32 1.5, %v581_v13 }
 0x112   : > { %v4436_v19 = vpop.eup %4435  ;;  %v572_v21 = vadd.f32 1e-05, %v564_v15  ;;  %v609_v26 = vmul.f32 %v4819_v17, %v4810_v5  ;;  %v574_v30 = vadd.f32 1e-05, %v566_v23  ;;  %vm615_vm11 = vweird.f32 %v4819_v17 }
 0x113   : > { %v589_v22 = vmul.f32 %v4436_v19, %v571_v7  ;;  %v583_v24 = vmul.f32 %v4432_v6, %v582_v18  ;;  %vm595_vm6 = vweird.f32 %v4436_v19  ;;  %vm616_vm13 = vmor %vm614_vm10, %vm615_vm11  ;;  %vm791_vm11 = vcmask 64512  }
 0x114   : > { %4437 = vrsqrt.f32 %v572_v21  ;;  %v610_v33 = vmul.f32 %v4819_v17, %v609_v26  ;;  %vm596_vm7 = vmor %vm594_vm5, %vm595_vm6  ;;  %vm604_vm8 = vweird.f32 %v572_v21  ;;  %vm624_vm1 = vweird.f32 %v574_v30 }
 0x115   : > { %v590_v27 = vmul.f32 %v4436_v19, %v589_v22  ;;  %v587_v32 = vsel %vm4824_vm4, %v4432_v6, %v583_v24  ;;  %4439 = vrsqrt.f32 %v574_v30 }
 0x116   : > { %v658_v44 = vmul.f32 %v587_v32, %v4757_v25  ;;  %v611_v46 = vmul.f32 0.5, %v610_v33 }
 0x117   : > { %v591_v29 = vmul.f32 0.5, %v590_v27  ;;  %v555_v31 = vpop.xlane.xlu1 %554 }
 0x118   : > { %v567_v34 = vmul.f32 %v555_v31, %v4754_v20  ;;  %v669_v53 = vmul.f32 %v4836_v45, %v658_v44  ;;  %v612_v25 = vsub.f32 1.5, %v611_v46 }
 0x119   : > { %v592_v36 = vsub.f32 1.5, %v591_v29  ;;  %v568_v29 = vmul.f32 %v558_v28, %v4754_v20 }
 0x11a   : > { %v4438_v38 = vpop.eup %4437  ;;  %v575_v41 = vadd.f32 1e-05, %v567_v34  ;;  %v680_v60 = vadd.f32 %v4843_v54, %v669_v53  ;;  %v613_v61 = vmul.f32 %v4819_v17, %v612_v25 }
 0x11b   : > { %v593_v42 = vmul.f32 %v4436_v19, %v592_v36  ;;  %v599_v43 = vmul.f32 %v4438_v38, %v572_v21  ;;  %vm605_vm9 = vweird.f32 %v4438_v38  ;;  %v4440_v56 = vpop.eup %4439 }
 0x11c   : > { %4441 = vrsqrt.f32 %v575_v41  ;;  %vm606_vm12 = vmor %vm604_vm8, %vm605_vm9  ;;  %v619_v62 = vmul.f32 %v4440_v56, %v574_v30  ;;  %v617_v3 = vsel %vm616_vm13, %v4819_v17, %v613_v61  ;;  %vm634_vm14 = vweird.f32 %v575_v41 }
 0x11d   : > { %v597_v47 = vsel %vm596_vm7, %v4436_v19, %v593_v42  ;;  %v600_v48 = vmul.f32 %v4438_v38, %v599_v43  ;;  %v661_v7 = vmul.f32 %v617_v3, %v4766_v35  ;;  %vm625_vm2 = vweird.f32 %v4440_v56 }
 0x11e   : > { %v659_v49 = vmul.f32 %v597_v47, %v4769_v37  ;;  %v620_v4 = vmul.f32 %v4440_v56, %v619_v62  ;;  %vm626_vm4 = vmor %vm624_vm1, %vm625_vm2  ;;  %v576_v30 = vadd.f32 1e-05, %v568_v29 }
 0x11f   : > { %v601_v51 = vmul.f32 0.5, %v600_v48  ;;  %v672_v12 = vmul.f32 %v4836_v45, %v661_v7 }
 0x120   : > { %v670_v55 = vmul.f32 %v4836_v45, %v659_v49  ;;  %v621_v9 = vmul.f32 0.5, %v620_v4  ;;  %4443 = vrsqrt.f32 %v576_v30  ;;  %vm644_vm5 = vweird.f32 %v576_v30 }
 0x121   : > { %v602_v57 = vsub.f32 1.5, %v601_v51 }
 0x122   : > { %v681_v37 = vadd.f32 %v4843_v54, %v670_v55  ;;  %v4442_v58 = vpop.eup %4441  ;;  %v622_v13 = vsub.f32 1.5, %v621_v9 }
 0x123   : > { %v603_v59 = vmul.f32 %v4438_v38, %v602_v57  ;;  %v629_v63 = vmul.f32 %v4442_v58, %v575_v41  ;;  %vm635_vm15 = vweird.f32 %v4442_v58 }
 0x124   : > { %v688_v0 = vpack.c.bf16 %v681_v37, %v680_v60  ;;  %vm636_vm3 = vmor %vm634_vm14, %vm635_vm15  ;;  %v623_v16 = vmul.f32 %v4440_v56, %v622_v13 }
 0x125   : > { %v607_v1 = vsel %vm606_vm12, %v4438_v38, %v603_v59  ;;  %v630_v2 = vmul.f32 %v4442_v58, %v629_v63  ;;  %vm908_vm12 = vcmask 130048  }
 0x126   : > { %4223 = vmatmul.msk.bf16.vlgmr.msra.gmra.mxu0 %vm482_vm0, %v688_v0  ;;  %v660_v5 = vmul.f32 %v607_v1, %v4775_v40  ;;  %v683_v40 = vadd.f32 %v4843_v54, %v672_v12  ;;  %v627_v18 = vsel %vm626_vm4, %v4440_v56, %v623_v16  ;;  %v4444_v31 = vpop.eup %4443 }
 0x127   : > { %v631_v6 = vmul.f32 0.5, %v630_v2  ;;  %v662_v21 = vmul.f32 %v627_v18, %v4773_v39  ;;  %vm645_vm6 = vweird.f32 %v4444_v31 }
 0x128   : > { %v671_v10 = vmul.f32 %v4836_v45, %v660_v5  ;;  %vm646_vm7 = vmor %vm644_vm5, %vm645_vm6 }
 0x129   : > { %v632_v11 = vsub.f32 1.5, %v631_v6  ;;  %v673_v23 = vmul.f32 %v4836_v45, %v662_v21 }
 0x12a   : > { %v682_v14 = vadd.f32 %v4843_v54, %v671_v10 }
 0x12b   : > { %v633_v15 = vmul.f32 %v4442_v58, %v632_v11  ;;  %v684_v26 = vadd.f32 %v4843_v54, %v673_v23 }
 0x12c   : > { %v689_v35 = vpack.c.bf16 %v683_v40, %v682_v14 }
 0x12d   : > { %v637_v17 = vsel %vm636_vm3, %v4442_v58, %v633_v15 }
 0x12e   : > { %v663_v19 = vmul.f32 %v637_v17, %v4792_v52  ;;  %v639_v52 = vmul.f32 %v4444_v31, %v576_v30 }
 0x130   : > { %v674_v22 = vmul.f32 %v4836_v45, %v663_v19  ;;  %v640_v32 = vmul.f32 %v4444_v31, %v639_v52 }
 0x132   : > { %v685_v24 = vadd.f32 %v4843_v54, %v674_v22  ;;  %v641_v36 = vmul.f32 0.5, %v640_v32 }
 0x134   : > { %v690_v27 = vpack.c.bf16 %v685_v24, %v684_v26  ;;  %v642_v38 = vsub.f32 1.5, %v641_v36 }
 0x136   : > { %4224 = vmatmul.msk.bf16.gmra.mxu0 %vm482_vm0, %v689_v35  ;;  %v643_v42 = vmul.f32 %v4444_v31, %v642_v38 }
 0x138   : > { %v647_v46 = vsel %vm646_vm7, %v4444_v31, %v643_v42 }
 0x139   : > { %v664_v49 = vmul.f32 %v647_v46, %v4788_v50  ;;  %v4423_v50 = vld [vmem:[%s6305_s4] ss:$0 sm:$0xff] }
 0x13b   : > { %v675_v55 = vmul.f32 %v4836_v45, %v664_v49 }
 0x13d   : > { %v686_v57 = vadd.f32 %v4843_v54, %v675_v55 }
 0x146   : > { %4225 = vmatmul.msk.bf16.gmra.mxu0 %vm482_vm0, %v690_v27 }
 0x182   : > { %v561_v39 = vpop.xlane.xlu0 %560 }
 0x183   : > { %v569_v33 = vmul.f32 %v561_v39, %v4754_v20 }
 0x185   : > { %v577_v34 = vadd.f32 1e-05, %v569_v33 }
 0x187   : > { %4445 = vrsqrt.f32 %v577_v34  ;;  %vm654_vm9 = vweird.f32 %v577_v34 }
 0x18d   : > { %v4446_v41 = vpop.eup %4445 }
 0x18e   : > { %v649_v43 = vmul.f32 %v4446_v41, %v577_v34  ;;  %vm655_vm8 = vweird.f32 %v4446_v41 }
 0x18f   : > { %vm656_vm10 = vmor %vm654_vm9, %vm655_vm8 }
 0x190   : > { %v650_v44 = vmul.f32 %v4446_v41, %v649_v43 }
 0x192   : > { %v651_v47 = vmul.f32 0.5, %v650_v44 }
 0x194   : > { %v652_v48 = vsub.f32 1.5, %v651_v47 }
 0x196   : > { %v653_v51 = vmul.f32 %v4446_v41, %v652_v48 }
 0x198   : > { %v657_v53 = vsel %vm656_vm10, %v4446_v41, %v653_v51 }
 0x199   : > { %v665_v25 = vmul.f32 %v657_v53, %v4812_v8 }
 0x19b   : > { %v676_v56 = vmul.f32 %v4836_v45, %v665_v25 }
 0x19d   : > { %v687_v37 = vadd.f32 %v4843_v54, %v676_v56 }
 0x19f   : > { %v691_v58 = vpack.c.bf16 %v687_v37, %v686_v57 }
 0x1a1   : > { %4226 = vmatmul.msk.bf16.gmra.mxu0 %vm482_vm0, %v691_v58 }
 0x1a3   : > { %v733_v59 = vpop.f32.mrf.mxu0 }
 0x1a4   : > { %v734_v60 = vadd.f32 %v4423_v50, %v733_v59 }
 0x1a6   : > { %v753_v61 = vmul.f32 0.35355338, %v734_v60  ;;  %v769_v8 = vpack.c.bf16 %v734_v60, %v734_v60 }
 0x1a8   : > { %v761_v0 = vpack.c.bf16 %v753_v61, %v753_v61  ;;  %v786_v2 = vunpack.c.l.b16 %v769_v8 }
 0x1aa   : > { %v781_v54 = vunpack.c.l.b16 %v761_v0 }
 0x1ab   : > { %v735_v62 = vpop.f32.mrf.mxu0 }
 0x1ac   : > { %v736_v63 = vadd.f32 %v4423_v50, %v735_v62 }
 0x1ae   : > { %v754_v1 = vmul.f32 0.35355338, %v736_v63  ;;  %v770_v45 = vpack.c.bf16 %v736_v63, %v736_v63 }
 0x1b0   : > { %v762_v3 = vpack.c.bf16 %v754_v1, %v754_v1  ;;  %v787_v4 = vunpack.c.l.b16 %v770_v45 }
 0x1b2   : > { %v782_v5 = vunpack.c.l.b16 %v762_v3  ;;  %v4879_v6 = vpack.c.b16 %v787_v4, %v786_v2  ;;  %v777_v2 = vld [vmem:[%s6306_s5] sm:$0xff] }
 0x1b3   : > { %v738_v7 = vpop.f32.mrf.mxu0 }
 0x1b4   : > { %v4881_v9 = vpack.c.b16 %v782_v5, %v781_v54  ;;  %789 = vrot.lane.b32.xlu1 %v4879_v6, %s4632_s17  ;;  %v739_v10 = vadd.f32 %v4423_v50, %v738_v7  ;;  %v778_v5 = vld [vmem:[%s6306_s5 + $0x8] sm:$0xff] }
 0x1b6   : > { %v755_v11 = vmul.f32 0.35355338, %v739_v10  ;;  %v771_v13 = vpack.c.bf16 %v739_v10, %v739_v10 }
 0x1b8   : > { %v763_v15 = vpack.c.bf16 %v755_v11, %v755_v11  ;;  %v819_v35 = vunpack.c.l.b16 %v771_v13 }
 0x1ba   : > { %v814_v19 = vunpack.c.l.b16 %v763_v15 }
 0x1bb   : > { %v740_v12 = vpop.f32.mrf.mxu0 }
 0x1bc   : > { %v741_v14 = vadd.f32 %v4423_v50, %v740_v12 }
 0x1be   : > { %v756_v40 = vmul.f32 0.35355338, %v741_v14  ;;  %v772_v16 = vpack.c.bf16 %v741_v14, %v741_v14 }
 0x1c0   : > { %v764_v17 = vpack.c.bf16 %v756_v40, %v756_v40  ;;  %v820_v18 = vunpack.c.l.b16 %v772_v16 }
 0x1c2   : > { %v815_v21 = vunpack.c.l.b16 %v764_v17  ;;  %v4885_v22 = vpack.c.b16 %v820_v18, %v819_v35 }
 0x1c3   : > { %v743_v23 = vpop.f32.mrf.mxu0 }
 0x1c4   : > { %v4887_v24 = vpack.c.b16 %v815_v21, %v814_v19  ;;  %822 = vrot.lane.b32.xlu2 %v4885_v22, %s4632_s17  ;;  %v744_v26 = vadd.f32 %v4423_v50, %v743_v23 }
 0x1c6   : > { %v757_v27 = vmul.f32 0.35355338, %v744_v26  ;;  %v773_v29 = vpack.c.bf16 %v744_v26, %v744_v26 }
 0x1c8   : > { %v765_v31 = vpack.c.bf16 %v757_v27, %v757_v27  ;;  %v851_v39 = vunpack.c.l.b16 %v773_v29 }
 0x1ca   : > { %v846_v36 = vunpack.c.l.b16 %v765_v31 }
 0x1cb   : > { %v745_v28 = vpop.f32.mrf.mxu0 }
 0x1cc   : > { %v746_v30 = vadd.f32 %v4423_v50, %v745_v28 }
 0x1ce   : > { %v758_v52 = vmul.f32 0.35355338, %v746_v30  ;;  %v774_v32 = vpack.c.bf16 %v746_v30, %v746_v30 }
 0x1d0   : > { %v766_v33 = vpack.c.bf16 %v758_v52, %v758_v52  ;;  %v852_v34 = vunpack.c.l.b16 %v774_v32 }
 0x1d2   : > { %v847_v38 = vunpack.c.l.b16 %v766_v33  ;;  %v4891_v41 = vpack.c.b16 %v852_v34, %v851_v39 }
 0x1d4   : > { %v4893_v42 = vpack.c.b16 %v847_v38, %v846_v36  ;;  %854 = vrot.lane.b32.xlu2 %v4891_v41, %s4632_s17 }
 0x21e   : > { %v748_v43 = vpop.f32.mrf.mxu0  ;;  %v823_v47 = vpop.permute.xlu2 %822 }
 0x21f   : > { %v749_v44 = vadd.f32 %v4423_v50, %v748_v43  ;;  %v828_v37 = vsel %vm791_vm11, %v823_v47, 0 }
 0x221   : > { %v759_v46 = vmul.f32 0.35355338, %v749_v44  ;;  %v775_v49 = vpack.c.bf16 %v749_v44, %v749_v44 }
 0x223   : > { %v767_v55 = vpack.c.bf16 %v759_v46, %v759_v46  ;;  %v883_v58 = vunpack.c.l.b16 %v775_v49 }
 0x225   : > { %v878_v61 = vunpack.c.l.b16 %v767_v55 }
 0x226   : > { %v750_v48 = vpop.f32.mrf.mxu0  ;;  %v790_v51 = vpop.permute.xlu1 %789 }
 0x227   : > { %v751_v53 = vadd.f32 %v4423_v50, %v750_v48  ;;  %v796_v25 = vsel %vm791_vm11, %v790_v51, 0 }
 0x228   : > { %805 = vmatpush.bf16.xpose.msra.mxu3 %v796_v25 }
 0x229   : > { %v760_v56 = vmul.f32 0.35355338, %v751_v53  ;;  %v776_v57 = vpack.c.bf16 %v751_v53, %v751_v53 }
 0x22b   : > { %v768_v59 = vpack.c.bf16 %v760_v56, %v760_v56  ;;  %v884_v60 = vunpack.c.l.b16 %v776_v57 }
 0x22d   : > { %v879_v62 = vunpack.c.l.b16 %v768_v59  ;;  %v4899_v8 = vpack.c.b16 %v884_v60, %v883_v58 }
 0x22e   : > { %v855_v0 = vpop.permute.xlu2 %854 }
 0x22f   : > { %v4901_v63 = vpack.c.b16 %v879_v62, %v878_v61  ;;  %886 = vrot.lane.b32.xlu0 %v4899_v8, %s4632_s17  ;;  %v860_v50 = vsel %vm791_vm11, %v855_v0, 0  ;;  %4227 = vmatmul.msk.bf16.vlgmr.msra.gmra.mxu3 %vm791_vm11, %v4881_v9  ;;  %s4636_s17 = smov 80  }
 0x230   : > { %837 = vmatpush.bf16.xpose.msrb.mxu3 %v828_v37 }
 0x238   : > { %869 = vmatpush.bf16.xpose.msra.mxu3 %v860_v50 }
 0x23f   : > { %4228 = vmatmul.msk.bf16.vlgmr.msrb.gmra.mxu3 %vm791_vm11, %v4887_v24 }
 0x24f   : > { %4229 = vmatmul.msk.bf16.vlgmr.msra.gmra.mxu3 %vm791_vm11, %v4893_v42 }
 0x2a1   : > { %v887_v1 = vpop.permute.xlu0 %886 }
 0x2a2   : > { %v892_v45 = vsel %vm791_vm11, %v887_v1, 0 }
 0x2a3   : > { %901 = vmatpush.bf16.xpose.msra.mxu1 %v892_v45 }
 0x2aa   : > { %4230 = vmatmul.msk.bf16.vlgmr.msra.gmra.mxu1 %vm791_vm11, %v4901_v63 }
 0x2b2   : > { %v807_v3 = vpop.f32.mrf.mxu3 }
 0x2b3   : > { %v4918_v4 = vadd.f32 %v807_v3, %v777_v2 }
 0x2b5   : > { %v933_v54 = vsel %vm908_vm12, %v4918_v4, inf }
 0x2b6   : > { %934 = vmin.xlane.f32.xlu1 %v933_v54 }
 0x2ba   : > { %v809_v7 = vpop.f32.mrf.mxu3 }
 0x2bb   : > { %v4925_v10 = vadd.f32 %v809_v7, %v778_v5 }
 0x2bd   : > { %v936_v11 = vsel %vm908_vm12, %v4925_v10, inf }
 0x2be   : > { %937 = vmin.xlane.f32.xlu0 %v936_v11 }
 0x2c2   : > { %v839_v12 = vpop.f32.mrf.mxu3 }
 0x2c3   : > { %v4929_v13 = vadd.f32 %v839_v12, %v777_v2 }
 0x2c5   : > { %v939_v14 = vsel %vm908_vm12, %v4929_v13, inf }
 0x2c6   : > { %940 = vmin.xlane.f32.xlu2 %v939_v14 }
 0x2ca   : > { %v841_v15 = vpop.f32.mrf.mxu3 }
 0x2cb   : > { %v4933_v40 = vadd.f32 %v841_v15, %v778_v5 }
 0x2cd   : > { %v942_v16 = vsel %vm908_vm12, %v4933_v40, inf }
 0x2ce   : > { %943 = vmin.xlane.f32.xlu1 %v942_v16 }
 0x2d2   : > { %v871_v35 = vpop.f32.mrf.mxu3 }
 0x2d3   : > { %v4937_v17 = vadd.f32 %v871_v35, %v777_v2 }
 0x2d5   : > { %v945_v18 = vsel %vm908_vm12, %v4937_v17, inf }
 0x2d6   : > { %946 = vmin.xlane.f32.xlu1 %v945_v18 }
 0x2da   : > { %v873_v26 = vpop.f32.mrf.mxu3 }
 0x2db   : > { %v4945_v27 = vadd.f32 %v873_v26, %v778_v5 }
 0x2dd   : > { %v948_v32 = vsel %vm908_vm12, %v4945_v27, inf }
 0x327   : > { %v903_v19 = vpop.f32.mrf.mxu1 }
 0x328   : > { %v4941_v21 = vadd.f32 %v903_v19, %v777_v2 }
 0x329   : > { %v935_v30 = vpop.xlane.xlu1 %934 }
 0x32a   : > { %v951_v23 = vsel %vm908_vm12, %v4941_v21, inf  ;;  %vm957_vm14 = vcmp.le.f32.partialorder %v4918_v4, %v935_v30 }
 0x32b   : > { %952 = vmin.xlane.f32.xlu0 %v951_v23  ;;  %v965_v34 = vsel %vm957_vm14, 1e+30, %v4918_v4 }
 0x32c   : > { %v973_v38 = vsel %vm908_vm12, %v965_v34, inf }
 0x32f   : > { %v905_v28 = vpop.f32.mrf.mxu1 }
 0x330   : > { %v4947_v29 = vadd.f32 %v905_v28, %v778_v5 }
 0x331   : > { %v938_v31 = vpop.xlane.xlu0 %937 }
 0x332   : > { %v954_v52 = vsel %vm908_vm12, %v4947_v29, inf  ;;  %vm958_vm13 = vcmp.le.f32.partialorder %v4925_v10, %v938_v31 }
 0x333   : > { %955 = vmin.xlane.f32.xlu2 %v954_v52  ;;  %949 = vmin.xlane.f32.xlu0 %v948_v32  ;;  %v966_v39 = vsel %vm958_vm13, 1e+30, %v4925_v10 }
 0x334   : > { %v976_v33 = vsel %vm908_vm12, %v966_v39, inf }
 0x335   : > { %977 = vmin.xlane.f32.xlu1 %v976_v33 }
 0x339   : > { %v941_v36 = vpop.xlane.xlu2 %940 }
 0x33a   : > { %vm959_vm15 = vcmp.le.f32.partialorder %v4929_v13, %v941_v36 }
 0x33b   : > { %974 = vmin.xlane.f32.xlu2 %v973_v38  ;;  %v967_v43 = vsel %vm959_vm15, 1e+30, %v4929_v13 }
 0x33c   : > { %v979_v44 = vsel %vm908_vm12, %v967_v43, inf }
 0x33d   : > { %980 = vmin.xlane.f32.xlu0 %v979_v44 }
 0x341   : > { %v944_v46 = vpop.xlane.xlu1 %943 }
 0x342   : > { %vm960_vm1 = vcmp.le.f32.partialorder %v4933_v40, %v944_v46 }
 0x343   : > { %v968_v47 = vsel %vm960_vm1, 1e+30, %v4933_v40 }
 0x344   : > { %v982_v48 = vsel %vm908_vm12, %v968_v47, inf }
 0x345   : > { %983 = vmin.xlane.f32.xlu2 %v982_v48 }
 0x349   : > { %v947_v49 = vpop.xlane.xlu1 %946 }
 0x34a   : > { %vm961_vm2 = vcmp.le.f32.partialorder %v4937_v17, %v947_v49 }
 0x34b   : > { %v969_v51 = vsel %vm961_vm2, 1e+30, %v4937_v17 }
 0x34c   : > { %v985_v53 = vsel %vm908_vm12, %v969_v51, inf }
 0x34d   : > { %986 = vmin.xlane.f32.xlu2 %v985_v53 }
 0x39e   : > { %v953_v25 = vpop.xlane.xlu0 %952 }
 0x39f   : > { %vm963_vm3 = vcmp.le.f32.partialorder %v4941_v21, %v953_v25 }
 0x3a0   : > { %v971_v55 = vsel %vm963_vm3, 1e+30, %v4941_v21 }
 0x3a1   : > { %v991_v56 = vsel %vm908_vm12, %v971_v55, inf }
 0x3a2   : > { %992 = vmin.xlane.f32.xlu1 %v991_v56  ;;  %v915_v56 = vsel %vm908_vm12, %v4929_v13, -inf }
 0x3a6   : > { %v956_v57 = vpop.xlane.xlu2 %955  ;;  %v950_v37 = vpop.xlane.xlu0 %949 }
 0x3a7   : > { %vm964_vm4 = vcmp.le.f32.partialorder %v4947_v29, %v956_v57  ;;  %vm962_vm5 = vcmp.le.f32.partialorder %v4945_v27, %v950_v37  ;;  %v930_v57 = vsel %vm908_vm12, %v4947_v29, -inf }
 0x3a8   : > { %v972_v58 = vsel %vm964_vm4, 1e+30, %v4947_v29  ;;  %v970_v59 = vsel %vm962_vm5, 1e+30, %v4945_v27  ;;  %v978_v60 = vpop.xlane.xlu1 %977 }
 0x3a9   : > { %v994_v61 = vsel %vm908_vm12, %v972_v58, inf  ;;  %v988_v62 = vsel %vm908_vm12, %v970_v59, inf  ;;  %vm998_vm6 = vcmp.le.f32.partialorder %v966_v39, %v978_v60 }
 0x3aa   : > { %995 = vmin.xlane.f32.xlu0 %v994_v61  ;;  %989 = vmin.xlane.f32.xlu1 %v988_v62  ;;  %v1006_v0 = vsel %vm998_vm6, 1e+30, %v966_v39 }
 0x3ab   : > { %v1016_v50 = vsel %vm908_vm12, %v1006_v0, inf }
 0x3ac   : > { %1017 = vmin.xlane.f32.xlu2 %v1016_v50 }
 0x3ae   : > { %v975_v1 = vpop.xlane.xlu2 %974 }
 0x3af   : > { %vm997_vm7 = vcmp.le.f32.partialorder %v965_v34, %v975_v1 }
 0x3b0   : > { %v1005_v45 = vsel %vm997_vm7, 1e+30, %v965_v34  ;;  %v981_v2 = vpop.xlane.xlu0 %980 }
 0x3b1   : > { %v1013_v3 = vsel %vm908_vm12, %v1005_v45, inf  ;;  %vm999_vm8 = vcmp.le.f32.partialorder %v967_v43, %v981_v2  ;;  %v909_v2 = vsel %vm908_vm12, %v4918_v4, -inf }
 0x3b2   : > { %1014 = vmin.xlane.f32.xlu0 %v1013_v3  ;;  %v1007_v54 = vsel %vm999_vm8, 1e+30, %v967_v43 }
 0x3b3   : > { %v1019_v5 = vsel %vm908_vm12, %v1007_v54, inf }
 0x3b4   : > { %1020 = vmin.xlane.f32.xlu1 %v1019_v5 }
 0x3b8   : > { %v984_v7 = vpop.xlane.xlu2 %983 }
 0x3b9   : > { %vm1000_vm9 = vcmp.le.f32.partialorder %v968_v47, %v984_v7  ;;  %v918_v7 = vsel %vm908_vm12, %v4933_v40, -inf }
 0x3ba   : > { %v1008_v11 = vsel %vm1000_vm9, 1e+30, %v968_v47 }
 0x3bb   : > { %v1022_v12 = vsel %vm908_vm12, %v1008_v11, inf }
 0x3bc   : > { %1023 = vmin.xlane.f32.xlu0 %v1022_v12 }
 0x3c0   : > { %v987_v14 = vpop.xlane.xlu2 %986 }
 0x3c1   : > { %vm1001_vm10 = vcmp.le.f32.partialorder %v969_v51, %v987_v14 }
 0x3c2   : > { %v1009_v15 = vsel %vm1001_vm10, 1e+30, %v969_v51 }
 0x3c3   : > { %v1025_v16 = vsel %vm908_vm12, %v1009_v15, inf }
 0x3c4   : > { %1026 = vmin.xlane.f32.xlu0 %v1025_v16 }
 0x415   : > { %v993_v35 = vpop.xlane.xlu1 %992 }
 0x416   : > { %vm1003_vm13 = vcmp.le.f32.partialorder %v971_v55, %v993_v35 }
 0x417   : > { %v1011_v18 = vsel %vm1003_vm13, 1e+30, %v971_v55  ;;  %v912_v55 = vsel %vm908_vm12, %v4925_v10, -inf }
 0x418   : > { %v1031_v19 = vsel %vm908_vm12, %v1011_v18, inf }
 0x419   : > { %1032 = vmin.xlane.f32.xlu2 %v1031_v19 }
 0x41d   : > { %v990_v23 = vpop.xlane.xlu1 %989  ;;  %v996_v26 = vpop.xlane.xlu0 %995 }
 0x41e   : > { %vm1002_vm14 = vcmp.le.f32.partialorder %v970_v59, %v990_v23  ;;  %vm1004_vm15 = vcmp.le.f32.partialorder %v972_v58, %v996_v26  ;;  %v924_v23 = vsel %vm908_vm12, %v4945_v27, -inf }
 0x41f   : > { %v1010_v28 = vsel %vm1002_vm14, 1e+30, %v970_v59  ;;  %v1012_v30 = vsel %vm1004_vm15, 1e+30, %v972_v58  ;;  %v1018_v31 = vpop.xlane.xlu2 %1017 }
 0x420   : > { %v1028_v52 = vsel %vm908_vm12, %v1010_v28, inf  ;;  %v1034_v32 = vsel %vm908_vm12, %v1012_v30, inf  ;;  %vm1038_vm1 = vcmp.le.f32.partialorder %v1006_v0, %v1018_v31 }
 0x421   : > { %1029 = vmin.xlane.f32.xlu2 %v1028_v52  ;;  %1035 = vmin.xlane.f32.xlu1 %v1034_v32  ;;  %v1046_v39 = vsel %vm1038_vm1, 1e+30, %v1006_v0 }
 0x422   : > { %v1056_v33 = vsel %vm908_vm12, %v1046_v39, inf }
 0x423   : > { %1057 = vmin.xlane.f32.xlu0 %v1056_v33 }
 0x425   : > { %v1015_v34 = vpop.xlane.xlu0 %1014 }
 0x426   : > { %vm1037_vm2 = vcmp.le.f32.partialorder %v1005_v45, %v1015_v34 }
 0x427   : > { %v1045_v36 = vsel %vm1037_vm2, 1e+30, %v1005_v45  ;;  %v1021_v38 = vpop.xlane.xlu1 %1020 }
 0x428   : > { %v1053_v43 = vsel %vm908_vm12, %v1045_v36, inf  ;;  %vm1039_vm3 = vcmp.le.f32.partialorder %v1007_v54, %v1021_v38 }
 0x429   : > { %1054 = vmin.xlane.f32.xlu1 %v1053_v43  ;;  %v1047_v44 = vsel %vm1039_vm3, 1e+30, %v1007_v54 }
 0x42a   : > { %v1059_v46 = vsel %vm908_vm12, %v1047_v44, inf }
 0x42b   : > { %1060 = vmin.xlane.f32.xlu2 %v1059_v46 }
 0x42f   : > { %v1024_v47 = vpop.xlane.xlu0 %1023 }
 0x430   : > { %vm1040_vm4 = vcmp.le.f32.partialorder %v1008_v11, %v1024_v47 }
 0x431   : > { %v1048_v48 = vsel %vm1040_vm4, 1e+30, %v1008_v11  ;;  %v927_v11 = vsel %vm908_vm12, %v4941_v21, -inf }
 0x432   : > { %v1062_v49 = vsel %vm908_vm12, %v1048_v48, inf }
 0x433   : > { %1063 = vmin.xlane.f32.xlu1 %v1062_v49 }
 0x437   : > { %v1027_v51 = vpop.xlane.xlu0 %1026 }
 0x438   : > { %vm1041_vm5 = vcmp.le.f32.partialorder %v1009_v15, %v1027_v51 }
 0x439   : > { %v1049_v53 = vsel %vm1041_vm5, 1e+30, %v1009_v15  ;;  %v921_v15 = vsel %vm908_vm12, %v4937_v17, -inf }
 0x43a   : > { %v1065_v25 = vsel %vm908_vm12, %v1049_v53, inf }
 0x43b   : > { %1066 = vmin.xlane.f32.xlu1 %v1065_v25 }
 0x443   : > { %913 = vmax.xlane.f32.xlu1 %v912_v55 }
 0x44b   : > { %916 = vmax.xlane.f32.xlu1 %v915_v56 }
 0x453   : > { %931 = vmax.xlane.f32.xlu1 %v930_v57 }
 0x48c   : > { %v1033_v37 = vpop.xlane.xlu2 %1032 }
 0x48d   : > { %vm1043_vm8 = vcmp.le.f32.partialorder %v1011_v18, %v1033_v37 }
 0x48e   : > { %v1051_v50 = vsel %vm1043_vm8, 1e+30, %v1011_v18 }
 0x48f   : > { %v1071_v45 = vsel %vm908_vm12, %v1051_v50, inf }
 0x494   : > { %v1030_v58 = vpop.xlane.xlu2 %1029  ;;  %v1036_v59 = vpop.xlane.xlu1 %1035 }
 0x495   : > { %vm1042_vm6 = vcmp.le.f32.partialorder %v1010_v28, %v1030_v58  ;;  %vm1044_vm7 = vcmp.le.f32.partialorder %v1012_v30, %v1036_v59 }
 0x496   : > { %v4996_v60 = vsel %vm1042_vm6, 1e+30, %v1010_v28  ;;  %v1052_v61 = vsel %vm1044_vm7, 1e+30, %v1012_v30  ;;  %v1058_v5 = vpop.xlane.xlu0 %1057 }
 0x497   : > { %v1068_v62 = vsel %vm908_vm12, %v4996_v60, inf  ;;  %v1074_v0 = vsel %vm908_vm12, %v1052_v61, inf  ;;  %vm1078_vm10 = vcmp.le.f32.partialorder %v1046_v39, %v1058_v5 }
 0x498   : > { %1069 = vmin.xlane.f32.xlu0 %v1068_v62  ;;  %1075 = vmin.xlane.f32.xlu2 %v1074_v0  ;;  %v1086_v14 = vsel %vm1078_vm10, 1e+30, %v1046_v39 }
 0x499   : > { %v1096_v16 = vsel %vm908_vm12, %v1086_v14, inf }
 0x49c   : > { %v1055_v12 = vpop.xlane.xlu1 %1054 }
 0x49d   : > { %vm1077_vm13 = vcmp.le.f32.partialorder %v1045_v36, %v1055_v12 }
 0x49e   : > { %v1061_v1 = vpop.xlane.xlu2 %1060  ;;  %v1085_v18 = vsel %vm1077_vm13, 1e+30, %v1045_v36 }
 0x49f   : > { %vm1079_vm9 = vcmp.le.f32.partialorder %v1047_v44, %v1061_v1  ;;  %v1093_v19 = vsel %vm908_vm12, %v1085_v18, inf }
 0x4a0   : > { %1072 = vmin.xlane.f32.xlu0 %v1071_v45  ;;  %910 = vmax.xlane.f32.xlu2 %v909_v2  ;;  %v1087_v3 = vsel %vm1079_vm9, 1e+30, %v1047_v44 }
 0x4a1   : > { %v1099_v54 = vsel %vm908_vm12, %v1087_v3, inf }
 0x4a2   : > { %1100 = vmin.xlane.f32.xlu1 %v1099_v54 }
 0x4a6   : > { %v1064_v35 = vpop.xlane.xlu1 %1063 }
 0x4a7   : > { %vm1080_vm14 = vcmp.le.f32.partialorder %v1048_v48, %v1064_v35 }
 0x4a8   : > { %919 = vmax.xlane.f32.xlu0 %v918_v7  ;;  %928 = vmax.xlane.f32.xlu2 %v927_v11  ;;  %v1088_v26 = vsel %vm1080_vm14, 1e+30, %v1048_v48 }
 0x4a9   : > { %v1102_v30 = vsel %vm908_vm12, %v1088_v26, inf }
 0x4ae   : > { %v1067_v28 = vpop.xlane.xlu1 %1066 }
 0x4af   : > { %vm1081_vm15 = vcmp.le.f32.partialorder %v1049_v53, %v1067_v28 }
 0x4b0   : > { %922 = vmax.xlane.f32.xlu0 %v921_v15  ;;  %1097 = vmin.xlane.f32.xlu2 %v1096_v16  ;;  %v1089_v31 = vsel %vm1081_vm15, 1e+30, %v1049_v53 }
 0x4b1   : > { %v1105_v52 = vsel %vm908_vm12, %v1089_v31, inf }
 0x4b6   : > { %v914_v32 = vpop.xlane.xlu1 %913 }
 0x4b7   : > { %v1134_v51 = vsub.f32 %v4925_v10, %v914_v32 }
 0x4b8   : > { %1094 = vmin.xlane.f32.xlu0 %v1093_v19  ;;  %925 = vmax.xlane.f32.xlu2 %v924_v23 }
 0x4b9   : > { %v1143_v37 = vmul.f32 1.442695, %v1134_v51 }
 0x4be   : > { %v917_v39 = vpop.xlane.xlu1 %916 }
 0x4bf   : > { %v1135_v47 = vsub.f32 %v4929_v13, %v917_v39 }
 0x4c0   : > { %1103 = vmin.xlane.f32.xlu0 %v1102_v30 }
 0x4c1   : > { %v1145_v53 = vmul.f32 1.442695, %v1135_v47 }
 0x4c3   : > { %4447 = vpow2.f32 %v1145_v53 }
 0x4c4   : > { %4449 = vpow2.f32 %v1143_v37 }
 0x4c6   : > { %v5020_v43 = vpop.xlane.xlu1 %931 }
 0x4c7   : > { %v1140_v47 = vsub.f32 %v4947_v29, %v5020_v43 }
 0x4c8   : > { %1106 = vmin.xlane.f32.xlu0 %v1105_v52 }
 0x4c9   : > { %v1155_v51 = vmul.f32 1.442695, %v1140_v47 }
 0x4dc   : > { %1347 = vrot.lane.b32.xlu0 %v4885_v22, %s4633_s23 }
 0x50b   : > { %v1076_v33 = vpop.xlane.xlu2 %1075  ;;  %v1070_v34 = vpop.xlane.xlu0 %1069 }
 0x50c   : > { %vm1084_vm1 = vcmp.le.f32.partialorder %v1052_v61, %v1076_v33  ;;  %vm1082_vm3 = vcmp.le.f32.partialorder %v4996_v60, %v1070_v34 }
 0x50d   : > { %v1092_v36 = vsel %vm1084_vm1, 1e+30, %v1052_v61  ;;  %v1090_v57 = vsel %vm1082_vm3, 1e+30, %v4996_v60  ;;  %v4448_v61 = vpop.eup %4447 }
 0x50e   : > { %v1114_v38 = vsel %vm908_vm12, %v1092_v36, inf  ;;  %v1108_v59 = vsel %vm908_vm12, %v1090_v57, inf  ;;  %v4450_v45 = vpop.eup %4449 }
 0x50f   : > { %1115 = vmin.xlane.f32.xlu1 %v1114_v38 }
 0x513   : > { %v911_v44 = vpop.xlane.xlu2 %910  ;;  %v1073_v46 = vpop.xlane.xlu0 %1072 }
 0x514   : > { %vm1083_vm2 = vcmp.le.f32.partialorder %v1051_v50, %v1073_v46 }
 0x515   : > { %v1091_v48 = vsel %vm1083_vm2, 1e+30, %v1051_v50  ;;  %v1101_v25 = vpop.xlane.xlu1 %1100 }
 0x516   : > { %v1111_v49 = vsel %vm908_vm12, %v1091_v48, inf  ;;  %v1119_v58 = vmin.f32 %v1101_v25, %v917_v39 }
 0x517   : > { %1112 = vmin.xlane.f32.xlu2 %v1111_v49 }
 0x518   : > { %vm1127_vm4 = vcmp.ge.f32.partialorder %v4929_v13, %v1119_v58 }
 0x519   : > { %v5031_v50 = vsel %vm1127_vm4, %v4448_v61, 0.0 }
 0x51a   : > { %v1171_v2 = vsel %vm908_vm12, %v5031_v50, 0.0 }
 0x51b   : > { %v920_v55 = vpop.xlane.xlu0 %919  ;;  %v5026_v56 = vpop.xlane.xlu2 %928 }
 0x51c   : > { %v1136_v18 = vsub.f32 %v4933_v40, %v920_v55 }
 0x51e   : > { %v1147_v23 = vmul.f32 1.442695, %v1136_v18 }
 0x51f   : > { %1109 = vmin.xlane.f32.xlu2 %v1108_v59 }
 0x523   : > { %v923_v62 = vpop.xlane.xlu0 %922  ;;  %v1098_v0 = vpop.xlane.xlu2 %1097 }
 0x524   : > { %v1118_v1 = vmin.f32 %v1098_v0, %v914_v32  ;;  %v1137_v54 = vsub.f32 %v4937_v17, %v923_v62 }
 0x526   : > { %vm1126_vm5 = vcmp.ge.f32.partialorder %v4925_v10, %v1118_v1  ;;  %v1149_v7 = vmul.f32 1.442695, %v1137_v54  ;;  %v1133_v10 = vsub.f32 %v4918_v4, %v911_v44 }
 0x527   : > { %1172 = vadd.xlane.f32.xlu2 %v1171_v2  ;;  %v5036_v60 = vsel %vm1126_vm5, %v4450_v45, 0.0 }
 0x528   : > { %1322 = vrot.lane.b32.xlu1 %v4879_v6, %s4633_s23  ;;  %v1168_v13 = vsel %vm908_vm12, %v5036_v60, 0.0  ;;  %4451 = vpow2.f32 %v1149_v7  ;;  %v1141_v35 = vmul.f32 1.442695, %v1133_v10 }
 0x529   : > { %1169 = vadd.xlane.f32.xlu0 %v1168_v13 }
 0x52a   : > { %4453 = vpow2.f32 %v1141_v35 }
 0x52b   : > { %v1095_v3 = vpop.xlane.xlu0 %1094  ;;  %4455 = vpow2.f32 %v1147_v23  ;;  %v926_v33 = vpop.xlane.xlu2 %925 }
 0x52c   : > { %v1117_v19 = vmin.f32 %v1095_v3, %v911_v44 }
 0x52e   : > { %v4452_v14 = vpop.eup %4451  ;;  %vm1125_vm7 = vcmp.ge.f32.partialorder %v4918_v4, %v1117_v19  ;;  %v1139_v4 = vsub.f32 %v4941_v21, %v5026_v56 }
 0x530   : > { %v4454_v26 = vpop.eup %4453  ;;  %v1153_v34 = vmul.f32 1.442695, %v1139_v4 }
 0x531   : > { %v5051_v30 = vsel %vm1125_vm7, %v4454_v26, 0.0  ;;  %v4456_v52 = vpop.eup %4455 }
 0x532   : > { %v1165_v31 = vsel %vm908_vm12, %v5051_v30, 0.0  ;;  %4457 = vpow2.f32 %v1153_v34 }
 0x533   : > { %v1104_v5 = vpop.xlane.xlu0 %1103 }
 0x538   : > { %v4458_v46 = vpop.eup %4457 }
 0x53b   : > { %v1107_v11 = vpop.xlane.xlu0 %1106 }
 0x53c   : > { %v1121_v12 = vmin.f32 %v1107_v11, %v923_v62 }
 0x53e   : > { %vm1129_vm6 = vcmp.ge.f32.partialorder %v4937_v17, %v1121_v12  ;;  %v1120_v17 = vmin.f32 %v1104_v5, %v920_v55 }
 0x53f   : > { %v5045_v15 = vsel %vm1129_vm6, %v4452_v14, 0.0 }
 0x540   : > { %v1177_v16 = vsel %vm908_vm12, %v5045_v15, 0.0  ;;  %vm1128_vm8 = vcmp.ge.f32.partialorder %v4933_v40, %v1120_v17  ;;  %v1138_v40 = vsub.f32 %v4945_v27, %v926_v33 }
 0x541   : > { %1178 = vadd.xlane.f32.xlu0 %v1177_v16  ;;  %v5056_v32 = vsel %vm1128_vm8, %v4456_v52, 0.0 }
 0x542   : > { %v1174_v39 = vsel %vm908_vm12, %v5056_v32, 0.0  ;;  %v1151_v38 = vmul.f32 1.442695, %v1138_v40 }
 0x544   : > { %4459 = vpow2.f32 %v1151_v38 }
 0x545   : > { %4461 = vpow2.f32 %v1155_v51 }
 0x54e   : > { %v1348_v28 = vpop.permute.xlu0 %1347 }
 0x54f   : > { %1360 = vmatpush.bf16.msrb.mxu3 %v1348_v28 }
 0x552   : > { %1166 = vadd.xlane.f32.xlu1 %v1165_v31 }
 0x55a   : > { %1175 = vadd.xlane.f32.xlu1 %v1174_v39 }
 0x573   : > { %1372 = vrot.lane.b32.xlu1 %v4891_v41, %s4633_s23 }
 0x57b   : > { %1470 = vrot.lane.b32.xlu1 %v4891_v41, %s4634_s24 }
 0x582   : > { %v1116_v53 = vpop.xlane.xlu1 %1115 }
 0x583   : > { %1468 = vrot.lane.b32.xlu1 %v4893_v42, %s4635_s25  ;;  %v1124_v57 = vmin.f32 %v1116_v53, %v5020_v43 }
 0x585   : > { %vm1132_vm13 = vcmp.ge.f32.partialorder %v4947_v29, %v1124_v57 }
 0x58a   : > { %v1113_v36 = vpop.xlane.xlu2 %1112 }
 0x58b   : > { %v1123_v44 = vmin.f32 %v1113_v36, %v5026_v56  ;;  %1492 = vrot.lane.b32.xlu1 %v4901_v63, %s4635_s25  ;;  %v4460_v56 = vpop.eup %4459 }
 0x58c   : > { %v4462_v59 = vpop.eup %4461 }
 0x58d   : > { %vm1131_vm9 = vcmp.ge.f32.partialorder %v4941_v21, %v1123_v44  ;;  %v5086_v61 = vsel %vm1132_vm13, %v4462_v59, 0.0 }
 0x58e   : > { %v5075_v48 = vsel %vm1131_vm9, %v4458_v46, 0.0  ;;  %v1186_v62 = vsel %vm908_vm12, %v5086_v61, 0.0 }
 0x58f   : > { %v1183_v49 = vsel %vm908_vm12, %v5075_v48, 0.0 }
 0x590   : > { %1184 = vadd.xlane.f32.xlu0 %v1183_v49 }
 0x592   : > { %v1110_v25 = vpop.xlane.xlu2 %1109 }
 0x593   : > { %v1122_v55 = vmin.f32 %v1110_v25, %v926_v33 }
 0x595   : > { %vm1130_vm10 = vcmp.ge.f32.partialorder %v4945_v27, %v1122_v55 }
 0x596   : > { %v5081_v37 = vsel %vm1130_vm10, %v4460_v56, 0.0 }
 0x597   : > { %v1180_v21 = vsel %vm908_vm12, %v5081_v37, 0.0 }
 0x598   : > { %1181 = vadd.xlane.f32.xlu2 %v1180_v21 }
 0x59a   : > { %v1323_v58 = vpop.permute.xlu1 %1322  ;;  %v1173_v29 = vpop.xlane.xlu2 %1172 }
 0x59b   : > { %1335 = vmatpush.bf16.msra.mxu2 %v1323_v58  ;;  %v1230_v17 = vand.u32 2147483648, %v1173_v29  ;;  %vm1224_vm5 = vweird.f32 %v1173_v29  ;;  %v1228_v39 = vand.u32 2147483647, %v1173_v29 }
 0x59c   : > { %v1170_v27 = vpop.xlane.xlu0 %1169 }
 0x59d   : > { %4463 = vrcp.f32 %v1170_v27  ;;  %v1215_v7 = vand.u32 2147483648, %v1170_v27  ;;  %vm1209_vm15 = vweird.f32 %v1170_v27  ;;  %v1213_v11 = vand.u32 2147483647, %v1170_v27 }
 0x59e   : > { %4465 = vrcp.f32 %v1173_v29  ;;  %v1231_v38 = vor.u32 1.1754944e-38, %v1230_v17  ;;  %vm1229_vm10 = vcmp.eq.f32.partialorder %v1228_v39, 8.507059e+37 }
 0x59f   : > { %v1216_v18 = vor.u32 1.1754944e-38, %v1215_v7  ;;  %vm1214_vm2 = vcmp.eq.f32.partialorder %v1213_v11, 8.507059e+37 }
 0x5a0   : > { %1187 = vadd.xlane.f32.xlu2 %v1186_v62 }
 0x5a3   : > { %v4464_v43 = vpop.eup %4463 }
 0x5a4   : > { %1422 = vrot.lane.b32.xlu0 %v4879_v6, %s4634_s24  ;;  %v1205_v0 = vmul.f32 %v4464_v43, %v1170_v27  ;;  %v4466_v1 = vpop.eup %4465  ;;  %vm1210_vm14 = vweird.f32 %v4464_v43 }
 0x5a5   : > { %v1220_v2 = vmul.f32 %v4466_v1, %v1173_v29  ;;  %vm1211_vm1 = vmor %vm1209_vm15, %vm1210_vm14  ;;  %vm1225_vm3 = vweird.f32 %v4466_v1 }
 0x5a6   : > { %v1206_v45 = vsub.f32 1.0, %v1205_v0  ;;  %vm1226_vm6 = vmor %vm1224_vm5, %vm1225_vm3 }
 0x5a7   : > { %v1221_v54 = vsub.f32 1.0, %v1220_v2 }
 0x5a8   : > { %v1207_v13 = vmul.f32 %v4464_v43, %v1206_v45 }
 0x5a9   : > { %v1222_v14 = vmul.f32 %v4466_v1, %v1221_v54 }
 0x5aa   : > { %v1208_v5 = vadd.f32 %v4464_v43, %v1207_v13 }
 0x5ab   : > { %v1223_v23 = vadd.f32 %v4466_v1, %v1222_v14 }
 0x5ac   : > { %1446 = vrot.lane.b32.xlu0 %v4885_v22, %s4634_s24  ;;  %v1212_v35 = vsel %vm1211_vm1, %v4464_v43, %v1208_v5 }
 0x5ad   : > { %v1217_v28 = vsel %vm1214_vm2, %v1216_v18, %v1212_v35  ;;  %v1227_v40 = vsel %vm1226_vm6, %v4466_v1, %v1223_v23 }
 0x5ae   : > { %v1218_v33 = vmul.f32 %v1217_v28, %v5036_v60  ;;  %v1232_v49 = vsel %vm1229_vm10, %v1231_v38, %v1227_v40 }
 0x5af   : > { %v1233_v21 = vmul.f32 %v1232_v49, %v5031_v50 }
 0x5b0   : > { %v1310_v25 = vpack.c.bf16 %v1218_v33, %v1218_v33 }
 0x5b1   : > { %v1311_v1 = vpack.c.bf16 %v1233_v21, %v1233_v21 }
 0x5b2   : > { %v1320_v62 = vunpack.c.l.b16 %v1310_v25 }
 0x5b3   : > { %v1344_v2 = vunpack.c.l.b16 %v1311_v1 }
 0x5b4   : > { %1494 = vrot.lane.b32.xlu0 %v4899_v8, %s4634_s24  ;;  %v1179_v54 = vpop.xlane.xlu0 %1178 }
 0x5b5   : > { %v1260_v18 = vand.u32 2147483648, %v1179_v54  ;;  %vm1254_vm3 = vweird.f32 %v1179_v54  ;;  %v1258_v23 = vand.u32 2147483647, %v1179_v54 }
 0x5b7   : > { %v1261_v17 = vor.u32 1.1754944e-38, %v1260_v18  ;;  %vm1259_vm5 = vcmp.eq.f32.partialorder %v1258_v23, 8.507059e+37 }
 0x5b8   : > { %1397 = vrot.lane.b32.xlu2 %v4899_v8, %s4633_s23  ;;  %s4645_s23 = smov 24  }
 0x5c0   : > { %1420 = vrot.lane.b32.xlu2 %v4881_v9, %s4635_s25 }
 0x5c5   : > { %v1167_v3 = vpop.xlane.xlu1 %1166 }
 0x5c6   : > { %4467 = vrcp.f32 %v1167_v3  ;;  %v1200_v26 = vand.u32 2147483648, %v1167_v3  ;;  %v1198_v52 = vand.u32 2147483647, %v1167_v3  ;;  %vm1194_vm7 = vweird.f32 %v1167_v3 }
 0x5c8   : > { %1444 = vrot.lane.b32.xlu2 %v4887_v24, %s4635_s25  ;;  %v1201_v36 = vor.u32 1.1754944e-38, %v1200_v26  ;;  %vm1199_vm9 = vcmp.eq.f32.partialorder %v1198_v52, 8.507059e+37  ;;  %s4639_s25 = smov 48  }
 0x5cc   : > { %v4468_v12 = vpop.eup %4467 }
 0x5cd   : > { %v1190_v10 = vmul.f32 %v4468_v12, %v1167_v3  ;;  %v1176_v16 = vpop.xlane.xlu1 %1175  ;;  %vm1195_vm4 = vweird.f32 %v4468_v12 }
 0x5ce   : > { %4469 = vrcp.f32 %v1176_v16  ;;  %vm1196_vm8 = vmor %vm1194_vm7, %vm1195_vm4  ;;  %v1245_v55 = vand.u32 2147483648, %v1176_v16  ;;  %v1243_v57 = vand.u32 2147483647, %v1176_v16  ;;  %vm1239_vm14 = vweird.f32 %v1176_v16 }
 0x5cf   : > { %v1191_v19 = vsub.f32 1.0, %v1190_v10  ;;  %4471 = vrcp.f32 %v1179_v54 }
 0x5d0   : > { %v1246_v27 = vor.u32 1.1754944e-38, %v1245_v55  ;;  %vm1244_vm1 = vcmp.eq.f32.partialorder %v1243_v57, 8.507059e+37 }
 0x5d1   : > { %v1192_v31 = vmul.f32 %v4468_v12, %v1191_v19 }
 0x5d3   : > { %v1193_v4 = vadd.f32 %v4468_v12, %v1192_v31 }
 0x5d4   : > { %v4470_v34 = vpop.eup %4469 }
 0x5d5   : > { %v1235_v44 = vmul.f32 %v4470_v34, %v1176_v16  ;;  %v1197_v46 = vsel %vm1196_vm8, %v4468_v12, %v1193_v4  ;;  %vm1240_vm13 = vweird.f32 %v4470_v34  ;;  %v4472_v5 = vpop.eup %4471 }
 0x5d6   : > { %v1202_v47 = vsel %vm1199_vm9, %v1201_v36, %v1197_v46  ;;  %vm1241_vm15 = vmor %vm1239_vm14, %vm1240_vm13  ;;  %v1250_v7 = vmul.f32 %v4472_v5, %v1179_v54  ;;  %vm1255_vm2 = vweird.f32 %v4472_v5 }
 0x5d7   : > { %v1236_v51 = vsub.f32 1.0, %v1235_v44  ;;  %v1203_v53 = vmul.f32 %v1202_v47, %v5051_v30  ;;  %vm1256_vm4 = vmor %vm1254_vm3, %vm1255_vm2 }
 0x5d8   : > { %v1251_v12 = vsub.f32 1.0, %v1250_v7 }
 0x5d9   : > { %v1237_v56 = vmul.f32 %v4470_v34, %v1236_v51  ;;  %v1309_v60 = vpack.c.bf16 %v1203_v53, %v1203_v53 }
 0x5da   : > { %v1252_v10 = vmul.f32 %v4472_v5, %v1251_v12 }
 0x5db   : > { %v1238_v58 = vadd.f32 %v4470_v34, %v1237_v56  ;;  %v1319_v59 = vunpack.c.l.b16 %v1309_v60 }
 0x5dc   : > { %v1253_v35 = vadd.f32 %v4472_v5, %v1252_v10 }
 0x5dd   : > { %v1242_v29 = vsel %vm1241_vm15, %v4470_v34, %v1238_v58  ;;  %v1321_v43 = vpack.c.b16 %v1320_v62, %v1319_v59 }
 0x5de   : > { %v1247_v0 = vsel %vm1244_vm1, %v1246_v27, %v1242_v29  ;;  %v1257_v28 = vsel %vm1256_vm4, %v4472_v5, %v1253_v35 }
 0x5df   : > { %4231 = vmatmul.msk.bf16.vlgmr.msra.gmra.mxu2 %vm908_vm12, %v1321_v43  ;;  %v1248_v30 = vmul.f32 %v1247_v0, %v5056_v32  ;;  %v1262_v33 = vsel %vm1259_vm5, %v1261_v17, %v1257_v28 }
 0x5e0   : > { %v1263_v49 = vmul.f32 %v1262_v33, %v5045_v15 }
 0x5e1   : > { %v1312_v45 = vpack.c.bf16 %v1248_v30, %v1248_v30 }
 0x5e2   : > { %v1313_v29 = vpack.c.bf16 %v1263_v49, %v1263_v49 }
 0x5e3   : > { %v1345_v13 = vunpack.c.l.b16 %v1312_v45 }
 0x5e4   : > { %v1369_v54 = vunpack.c.l.b16 %v1313_v29 }
 0x5e5   : > { %v1373_v3 = vpop.permute.xlu1 %1372  ;;  %v1346_v50 = vpack.c.b16 %v1345_v13, %v1344_v2 }
 0x5e6   : > { %1385 = vmatpush.bf16.msrb.mxu1 %v1373_v3 }
 0x5e7   : > { %4232 = vmatmul.msk.bf16.vlgmr.msrb.gmra.mxu3 %vm908_vm12, %v1346_v50 }
 0x5ed   : > { %v1471_v51 = vpop.permute.xlu1 %1470 }
 0x5ee   : > { %v1476_v15 = vsel %vm791_vm11, %v1471_v51, 0 }
 0x603   : > { %v1185_v11 = vpop.xlane.xlu0 %1184 }
 0x604   : > { %4473 = vrcp.f32 %v1185_v11  ;;  %vm1284_vm8 = vweird.f32 %v1185_v11  ;;  %v1290_v47 = vand.u32 2147483648, %v1185_v11  ;;  %v1288_v25 = vand.u32 2147483647, %v1185_v11 }
 0x606   : > { %v1291_v62 = vor.u32 1.1754944e-38, %v1290_v47  ;;  %vm1289_vm15 = vcmp.eq.f32.partialorder %v1288_v25, 8.507059e+37  ;;  %v4236_v47 = vld [vmem:[%s6306_s5 + $0x18] sm:$0xff] }
 0x60a   : > { %v4474_v14 = vpop.eup %4473 }
 0x60b   : > { %v1280_v16 = vmul.f32 %v4474_v14, %v1185_v11  ;;  %v1182_v32 = vpop.xlane.xlu2 %1181  ;;  %vm1285_vm6 = vweird.f32 %v4474_v14 }
 0x60c   : > { %4475 = vrcp.f32 %v1182_v32  ;;  %v1273_v34 = vand.u32 2147483647, %v1182_v32  ;;  %v1275_v40 = vand.u32 2147483648, %v1182_v32  ;;  %vm5110_vm9 = vmor %vm1284_vm8, %vm1285_vm6  ;;  %vm1269_vm10 = vweird.f32 %v1182_v32 }
 0x60d   : > { %v1281_v19 = vsub.f32 1.0, %v1280_v16 }
 0x60e   : > { %v1276_v57 = vor.u32 1.1754944e-38, %v1275_v40  ;;  %vm1274_vm14 = vcmp.eq.f32.partialorder %v1273_v34, 8.507059e+37  ;;  %v4235_v34 = vld [vmem:[%s6306_s5 + $0x10] sm:$0xff] }
 0x60f   : > { %v1282_v31 = vmul.f32 %v4474_v14, %v1281_v19 }
 0x611   : > { %v1283_v38 = vadd.f32 %v4474_v14, %v1282_v31 }
 0x612   : > { %v4476_v26 = vpop.eup %4475 }
 0x613   : > { %v1265_v52 = vmul.f32 %v4476_v26, %v1182_v32  ;;  %v1188_v39 = vpop.xlane.xlu2 %1187  ;;  %vm1270_vm7 = vweird.f32 %v4476_v26  ;;  %v1287_v59 = vsel %vm5110_vm9, %v4474_v14, %v1283_v38 }
 0x614   : > { %4477 = vrcp.f32 %v1188_v39  ;;  %vm1271_vm13 = vmor %vm1269_vm10, %vm1270_vm7  ;;  %v1303_v30 = vand.u32 2147483647, %v1188_v39  ;;  %v1305_v1 = vand.u32 2147483648, %v1188_v39  ;;  %v1292_v2 = vsel %vm1289_vm15, %v1291_v62, %v1287_v59 }
 0x615   : > { %v1266_v4 = vsub.f32 1.0, %v1265_v52  ;;  %vm1299_vm2 = vweird.f32 %v1188_v39  ;;  %v1293_v11 = vmul.f32 %v1292_v2, %v5075_v48  ;;  %v1469_v48 = vpop.permute.xlu1 %1468 }
 0x616   : > { %v1423_v36 = vpop.permute.xlu0 %1422  ;;  %v1306_v12 = vor.u32 1.1754944e-38, %v1305_v1  ;;  %vm1304_vm4 = vcmp.eq.f32.partialorder %v1303_v30, 8.507059e+37 }
 0x617   : > { %v1267_v44 = vmul.f32 %v4476_v26, %v1266_v4  ;;  %v1428_v46 = vsel %vm791_vm11, %v1423_v36, 0  ;;  %v1315_v35 = vpack.c.bf16 %v1293_v11, %v1293_v11 }
 0x618   : > { %1437 = vmatpush.bf16.xpose.msra.mxu3 %v1428_v46 }
 0x619   : > { %v1268_v55 = vadd.f32 %v4476_v26, %v1267_v44 }
 0x61a   : > { %v4478_v56 = vpop.eup %4477 }
 0x61b   : > { %v1295_v60 = vmul.f32 %v4478_v56, %v1188_v39  ;;  %v1398_v21 = vpop.permute.xlu2 %1397  ;;  %v1272_v58 = vsel %vm1271_vm13, %v4476_v26, %v1268_v55  ;;  %vm1300_vm1 = vweird.f32 %v4478_v56  ;;  %v1394_v26 = vunpack.c.l.b16 %v1315_v35 }
 0x61c   : > { %1410 = vmatpush.bf16.msrb.mxu2 %v1398_v21  ;;  %v1277_v27 = vsel %vm1274_vm14, %v1276_v57, %v1272_v58  ;;  %vm1301_vm3 = vmor %vm1299_vm2, %vm1300_vm1 }
 0x61d   : > { %v1296_v43 = vsub.f32 1.0, %v1295_v60  ;;  %v1278_v0 = vmul.f32 %v1277_v27, %v5081_v37  ;;  %v1493_v31 = vpop.permute.xlu1 %1492 }
 0x61e   : > { %v1447_v45 = vpop.permute.xlu0 %1446 }
 0x61f   : > { %v1297_v13 = vmul.f32 %v4478_v56, %v1296_v43  ;;  %v1452_v3 = vsel %vm791_vm11, %v1447_v45, 0  ;;  %v1314_v50 = vpack.c.bf16 %v1278_v0, %v1278_v0 }
 0x620   : > { %1485 = vmatpush.bf16.xpose.msra.mxu2 %v1476_v15  ;;  %1461 = vmatpush.bf16.xpose.msra.mxu1 %v1452_v3 }
 0x621   : > { %v1298_v5 = vadd.f32 %v4478_v56, %v1297_v13  ;;  %v1370_v7 = vunpack.c.l.b16 %v1314_v50 }
 0x623   : > { %v1421_v37 = vpop.permute.xlu2 %1420  ;;  %v1371_v14 = vpack.c.b16 %v1370_v7, %v1369_v54  ;;  %v1302_v10 = vsel %vm1301_vm3, %v4478_v56, %v1298_v5 }
 0x624   : > { %4237 = vmatmul.msk.bf16.vlgmr.msra.gmra.mxu3 %vm791_vm11, %v1421_v37  ;;  %v1307_v16 = vsel %vm1304_vm4, %v1306_v12, %v1302_v10 }
 0x625   : > { %4233 = vmatmul.msk.bf16.vlgmr.msrb.gmra.mxu1 %vm908_vm12, %v1371_v14  ;;  %v1308_v32 = vmul.f32 %v1307_v16, %v5086_v61 }
 0x626   : > { %v1495_v18 = vpop.permute.xlu0 %1494 }
 0x627   : > { %v1500_v19 = vsel %vm791_vm11, %v1495_v18, 0  ;;  %v1316_v23 = vpack.c.bf16 %v1308_v32, %v1308_v32 }
 0x628   : > { %1509 = vmatpush.bf16.xpose.msrb.mxu3 %v1500_v19 }
 0x629   : > { %v1395_v28 = vunpack.c.l.b16 %v1316_v23 }
 0x62b   : > { %v1396_v17 = vpack.c.b16 %v1395_v28, %v1394_v26  ;;  %v1445_v52 = vpop.permute.xlu2 %1444 }
 0x62d   : > { %4234 = vmatmul.msk.bf16.vlgmr.msrb.gmra.mxu2 %vm908_vm12, %v1396_v17 }
 0x634   : > { %4240 = vmatmul.msk.bf16.vlgmr.msrb.gmra.mxu3 %vm791_vm11, %v1493_v31 }
 0x635   : > { %4238 = vmatmul.msk.bf16.vlgmr.msra.gmra.mxu1 %vm791_vm11, %v1445_v52 }
 0x63d   : > { %4239 = vmatmul.msk.bf16.vlgmr.msra.gmra.mxu2 %vm791_vm11, %v1469_v48 }
 0x662   : > { %v5130_v39 = vpop.f32.mrf.mxu2 }
 0x66a   : > { %v5128_v61 = vpop.f32.mrf.mxu3  ;;  %v5139_v36 = vpop.f32.mrf.mxu2 }
 0x672   : > { %v5132_v4 = vpop.f32.mrf.mxu3 }
 0x6a2   : > { %v5134_v33 = vpop.f32.mrf.mxu1 }
 0x6a7   : > { %v1439_v40 = vpop.f32.mrf.mxu3 }
 0x6a8   : > { %v5141_v38 = vadd.f32 %v4235_v34, %v1439_v40 }
 0x6aa   : > { %v5143_v44 = vpop.f32.mrf.mxu1  ;;  %v1540_v46 = vsel %vm908_vm12, %v5141_v38, inf  ;;  %v1516_v54 = vsel %vm908_vm12, %v5141_v38, -inf }
 0x6ab   : > { %1541 = vmin.xlane.f32.xlu2 %v1540_v46 }
 0x6af   : > { %v1441_v49 = vpop.f32.mrf.mxu3 }
 0x6b0   : > { %v5150_v51 = vadd.f32 %v4236_v47, %v1441_v49  ;;  %v5152_v53 = vpop.f32.mrf.mxu2 }
 0x6b2   : > { %v1543_v25 = vsel %vm908_vm12, %v5150_v51, inf  ;;  %v1463_v55 = vpop.f32.mrf.mxu1  ;;  %v1519_v23 = vsel %vm908_vm12, %v5150_v51, -inf }
 0x6b3   : > { %1544 = vmin.xlane.f32.xlu0 %v1543_v25  ;;  %v5156_v56 = vadd.f32 %v4235_v34, %v1463_v55 }
 0x6b5   : > { %v1546_v21 = vsel %vm908_vm12, %v5156_v56, inf  ;;  %v1522_v40 = vsel %vm908_vm12, %v5156_v56, -inf }
 0x6b7   : > { %v1511_v57 = vpop.f32.mrf.mxu3 }
 0x6b8   : > { %v5158_v60 = vpop.f32.mrf.mxu2  ;;  %v5180_v3 = vadd.f32 %v4235_v34, %v1511_v57 }
 0x6ba   : > { %v1465_v43 = vpop.f32.mrf.mxu1  ;;  %v1558_v50 = vsel %vm908_vm12, %v5180_v3, inf  ;;  %v1534_v57 = vsel %vm908_vm12, %v5180_v3, -inf }
 0x6bb   : > { %1547 = vmin.xlane.f32.xlu0 %v1546_v21  ;;  %v5170_v0 = vadd.f32 %v4236_v47, %v1465_v43 }
 0x6bd   : > { %v1549_v13 = vsel %vm908_vm12, %v5170_v0, inf }
 0x6bf   : > { %v1513_v58 = vpop.f32.mrf.mxu3 }
 0x6c0   : > { %v5162_v59 = vadd.f32 %v4236_v47, %v1513_v58  ;;  %v1487_v15 = vpop.f32.mrf.mxu2 }
 0x6c1   : > { %v5164_v62 = vadd.f32 %v4235_v34, %v1487_v15 }
 0x6c2   : > { %v1561_v27 = vsel %vm908_vm12, %v5162_v59, inf }
 0x6c3   : > { %1562 = vmin.xlane.f32.xlu0 %v1561_v27  ;;  %v1552_v29 = vsel %vm908_vm12, %v5164_v62, inf  ;;  %v1528_v45 = vsel %vm908_vm12, %v5164_v62, -inf }
 0x6c4   : > { %1553 = vmin.xlane.f32.xlu1 %v1552_v29 }
 0x6c8   : > { %v1489_v30 = vpop.f32.mrf.mxu2 }
 0x6c9   : > { %v5172_v1 = vadd.f32 %v4236_v47, %v1489_v30  ;;  %v1525_v47 = vsel %vm908_vm12, %v5170_v0, -inf }
 0x6cb   : > { %1529 = vmax.xlane.f32.xlu0 %v1528_v45  ;;  %v1555_v2 = vsel %vm908_vm12, %v5172_v1, inf  ;;  %v1531_v10 = vsel %vm908_vm12, %v5172_v1, -inf }
 0x6cc   : > { %1556 = vmin.xlane.f32.xlu2 %v1555_v2  ;;  %1550 = vmin.xlane.f32.xlu1 %v1549_v13 }
 0x6d4   : > { %1559 = vmin.xlane.f32.xlu2 %v1558_v50  ;;  %1517 = vmax.xlane.f32.xlu1 %v1516_v54 }
 0x71e   : > { %v1542_v5 = vpop.xlane.xlu2 %1541 }
 0x71f   : > { %vm1564_vm5 = vcmp.le.f32.partialorder %v5141_v38, %v1542_v5 }
 0x720   : > { %v1572_v7 = vsel %vm1564_vm5, 1e+30, %v5141_v38 }
 0x721   : > { %v1580_v11 = vsel %vm908_vm12, %v1572_v7, inf }
 0x722   : > { %1581 = vmin.xlane.f32.xlu1 %v1580_v11 }
 0x726   : > { %v1545_v12 = vpop.xlane.xlu0 %1544 }
 0x727   : > { %vm1565_vm6 = vcmp.le.f32.partialorder %v5150_v51, %v1545_v12 }
 0x728   : > { %v1573_v37 = vsel %vm1565_vm6, 1e+30, %v5150_v51 }
 0x729   : > { %v1583_v14 = vsel %vm908_vm12, %v1573_v37, inf }
 0x72a   : > { %1584 = vmin.xlane.f32.xlu2 %v1583_v14  ;;  %1532 = vmax.xlane.f32.xlu1 %v1531_v10 }
 0x72e   : > { %v1548_v16 = vpop.xlane.xlu0 %1547 }
 0x72f   : > { %vm1566_vm7 = vcmp.le.f32.partialorder %v5156_v56, %v1548_v16 }
 0x730   : > { %v1574_v32 = vsel %vm1566_vm7, 1e+30, %v5156_v56 }
 0x731   : > { %v1586_v35 = vsel %vm908_vm12, %v1574_v32, inf }
 0x732   : > { %1587 = vmin.xlane.f32.xlu2 %v1586_v35 }
 0x736   : > { %v1563_v19 = vpop.xlane.xlu0 %1562 }
 0x737   : > { %v1554_v18 = vpop.xlane.xlu1 %1553  ;;  %vm1571_vm8 = vcmp.le.f32.partialorder %v5162_v59, %v1563_v19 }
 0x738   : > { %v1579_v48 = vsel %vm1571_vm8, 1e+30, %v5162_v59  ;;  %vm1568_vm13 = vcmp.le.f32.partialorder %v5164_v62, %v1554_v18 }
 0x739   : > { %v1601_v17 = vsel %vm908_vm12, %v1579_v48, inf  ;;  %v1576_v25 = vsel %vm1568_vm13, 1e+30, %v5164_v62 }
 0x73a   : > { %1520 = vmax.xlane.f32.xlu2 %v1519_v23  ;;  %v1592_v55 = vsel %vm908_vm12, %v1576_v25, inf }
 0x73e   : > { %v5227_v11 = vpop.xlane.xlu0 %1529 }
 0x73f   : > { %v1551_v26 = vpop.xlane.xlu1 %1550  ;;  %v1557_v28 = vpop.xlane.xlu2 %1556 }
 0x740   : > { %vm1567_vm9 = vcmp.le.f32.partialorder %v5170_v0, %v1551_v26  ;;  %vm1569_vm14 = vcmp.le.f32.partialorder %v5172_v1, %v1557_v28 }
 0x741   : > { %v1575_v31 = vsel %vm1567_vm9, 1e+30, %v5170_v0  ;;  %v1577_v21 = vsel %vm1569_vm14, 1e+30, %v5172_v1 }
 0x742   : > { %1602 = vmin.xlane.f32.xlu2 %v1601_v17  ;;  %v1589_v52 = vsel %vm908_vm12, %v1575_v31, inf  ;;  %v1595_v58 = vsel %vm908_vm12, %v1577_v21, inf }
 0x743   : > { %1590 = vmin.xlane.f32.xlu0 %v1589_v52 }
 0x747   : > { %v1560_v34 = vpop.xlane.xlu2 %1559  ;;  %v5220_v15 = vpop.xlane.xlu1 %1517 }
 0x748   : > { %vm1570_vm10 = vcmp.le.f32.partialorder %v5180_v3, %v1560_v34  ;;  %v1537_v34 = vsel %vm908_vm12, %v5162_v59, -inf }
 0x749   : > { %v1578_v46 = vsel %vm1570_vm10, 1e+30, %v5180_v3 }
 0x74a   : > { %1523 = vmax.xlane.f32.xlu2 %v1522_v40  ;;  %v1598_v49 = vsel %vm908_vm12, %v1578_v46, inf }
 0x74b   : > { %1526 = vmax.xlane.f32.xlu0 %v1525_v47  ;;  %1599 = vmin.xlane.f32.xlu1 %v1598_v49 }
 0x753   : > { %1593 = vmin.xlane.f32.xlu0 %v1592_v55  ;;  %1535 = vmax.xlane.f32.xlu1 %v1534_v57 }
 0x75b   : > { %1596 = vmin.xlane.f32.xlu1 %v1595_v58 }
 0x795   : > { %v1582_v27 = vpop.xlane.xlu1 %1581 }
 0x796   : > { %vm1604_vm15 = vcmp.le.f32.partialorder %v1572_v7, %v1582_v27 }
 0x797   : > { %v1612_v29 = vsel %vm1604_vm15, 1e+30, %v1572_v7 }
 0x798   : > { %v1620_v43 = vsel %vm908_vm12, %v1612_v29, inf }
 0x799   : > { %1621 = vmin.xlane.f32.xlu0 %v1620_v43 }
 0x79d   : > { %v1585_v30 = vpop.xlane.xlu2 %1584  ;;  %v5229_v12 = vpop.xlane.xlu1 %1532 }
 0x79e   : > { %vm1605_vm1 = vcmp.le.f32.partialorder %v1573_v37, %v1585_v30 }
 0x79f   : > { %v1613_v45 = vsel %vm1605_vm1, 1e+30, %v1573_v37 }
 0x7a0   : > { %v1623_v2 = vsel %vm908_vm12, %v1613_v45, inf }
 0x7a1   : > { %1624 = vmin.xlane.f32.xlu1 %v1623_v2 }
 0x7a5   : > { %v1588_v13 = vpop.xlane.xlu2 %1587 }
 0x7a6   : > { %vm1606_vm2 = vcmp.le.f32.partialorder %v1574_v32, %v1588_v13 }
 0x7a7   : > { %v1614_v50 = vsel %vm1606_vm2, 1e+30, %v1574_v32 }
 0x7a8   : > { %v1626_v54 = vsel %vm908_vm12, %v1614_v50, inf }
 0x7a9   : > { %1627 = vmin.xlane.f32.xlu1 %v1626_v54 }
 0x7ad   : > { %v5225_v5 = vpop.xlane.xlu2 %1520 }
 0x7b5   : > { %v1603_v7 = vpop.xlane.xlu2 %1602 }
 0x7b6   : > { %vm1611_vm3 = vcmp.le.f32.partialorder %v1579_v48, %v1603_v7  ;;  %v1591_v14 = vpop.xlane.xlu0 %1590 }
 0x7b7   : > { %vm1607_vm4 = vcmp.le.f32.partialorder %v1575_v31, %v1591_v14  ;;  %v1619_v37 = vsel %vm1611_vm3, 1e+30, %v1579_v48 }
 0x7b8   : > { %v1641_v10 = vsel %vm908_vm12, %v1619_v37, inf  ;;  %v1615_v16 = vsel %vm1607_vm4, 1e+30, %v1575_v31 }
 0x7b9   : > { %1642 = vmin.xlane.f32.xlu1 %v1641_v10  ;;  %v1629_v32 = vsel %vm908_vm12, %v1615_v16, inf }
 0x7ba   : > { %1630 = vmin.xlane.f32.xlu2 %v1629_v32 }
 0x7bd   : > { %v5247_v43 = vpop.xlane.xlu2 %1523 }
 0x7be   : > { %v5233_v35 = vpop.xlane.xlu0 %1526  ;;  %v1600_v18 = vpop.xlane.xlu1 %1599 }
 0x7bf   : > { %vm1610_vm5 = vcmp.le.f32.partialorder %v1578_v46, %v1600_v18 }
 0x7c0   : > { %v1618_v19 = vsel %vm1610_vm5, 1e+30, %v1578_v46 }
 0x7c1   : > { %v1638_v23 = vsel %vm908_vm12, %v1618_v19, inf }
 0x7c2   : > { %1639 = vmin.xlane.f32.xlu0 %v1638_v23 }
 0x7c6   : > { %v1594_v26 = vpop.xlane.xlu0 %1593  ;;  %v5236_v28 = vpop.xlane.xlu1 %1535 }
 0x7c7   : > { %vm1608_vm6 = vcmp.le.f32.partialorder %v1576_v25, %v1594_v26 }
 0x7c8   : > { %v1616_v48 = vsel %vm1608_vm6, 1e+30, %v1576_v25 }
 0x7c9   : > { %v1632_v17 = vsel %vm908_vm12, %v1616_v48, inf }
 0x7ca   : > { %1633 = vmin.xlane.f32.xlu2 %v1632_v17 }
 0x7ce   : > { %v1597_v31 = vpop.xlane.xlu1 %1596 }
 0x7cf   : > { %vm1609_vm7 = vcmp.le.f32.partialorder %v1577_v21, %v1597_v31 }
 0x7d0   : > { %v1617_v52 = vsel %vm1609_vm7, 1e+30, %v1577_v21 }
 0x7d1   : > { %v1635_v40 = vsel %vm908_vm12, %v1617_v52, inf }
 0x7d2   : > { %1538 = vmax.xlane.f32.xlu2 %v1537_v34  ;;  %1636 = vmin.xlane.f32.xlu0 %v1635_v40 }
 0x7d3   : > { %2029 = vrot.lane.b32.xlu1 %v4879_v6, %s4636_s17 }
 0x80c   : > { %v1622_v46 = vpop.xlane.xlu0 %1621 }
 0x80d   : > { %vm1644_vm8 = vcmp.le.f32.partialorder %v1612_v29, %v1622_v46 }
 0x80e   : > { %v1652_v47 = vsel %vm1644_vm8, 1e+30, %v1612_v29 }
 0x80f   : > { %v1660_v49 = vsel %vm908_vm12, %v1652_v47, inf }
 0x810   : > { %1661 = vmin.xlane.f32.xlu2 %v1660_v49 }
 0x814   : > { %v1625_v25 = vpop.xlane.xlu1 %1624 }
 0x815   : > { %vm1645_vm9 = vcmp.le.f32.partialorder %v1613_v45, %v1625_v25 }
 0x816   : > { %v1653_v55 = vsel %vm1645_vm9, 1e+30, %v1613_v45 }
 0x817   : > { %v1663_v57 = vsel %vm908_vm12, %v1653_v55, inf }
 0x818   : > { %1664 = vmin.xlane.f32.xlu0 %v1663_v57 }
 0x81c   : > { %v1628_v21 = vpop.xlane.xlu1 %1627 }
 0x81d   : > { %vm1646_vm10 = vcmp.le.f32.partialorder %v1614_v50, %v1628_v21 }
 0x81e   : > { %v1654_v58 = vsel %vm1646_vm10, 1e+30, %v1614_v50 }
 0x81f   : > { %v1666_v27 = vsel %vm908_vm12, %v1654_v58, inf }
 0x820   : > { %1667 = vmin.xlane.f32.xlu0 %v1666_v27 }
 0x82c   : > { %v1643_v30 = vpop.xlane.xlu1 %1642 }
 0x82d   : > { %vm1651_vm13 = vcmp.le.f32.partialorder %v1619_v37, %v1643_v30  ;;  %v1631_v29 = vpop.xlane.xlu2 %1630 }
 0x82e   : > { %vm1647_vm14 = vcmp.le.f32.partialorder %v1615_v16, %v1631_v29  ;;  %v1659_v2 = vsel %vm1651_vm13, 1e+30, %v1619_v37 }
 0x82f   : > { %v1681_v13 = vsel %vm908_vm12, %v1659_v2, inf  ;;  %v1655_v54 = vsel %vm1647_vm14, 1e+30, %v1615_v16 }
 0x830   : > { %1682 = vmin.xlane.f32.xlu0 %v1681_v13  ;;  %v1669_v45 = vsel %vm908_vm12, %v1655_v54, inf }
 0x831   : > { %1670 = vmin.xlane.f32.xlu1 %v1669_v45 }
 0x835   : > { %v1640_v7 = vpop.xlane.xlu0 %1639 }
 0x836   : > { %vm1650_vm15 = vcmp.le.f32.partialorder %v1618_v19, %v1640_v7 }
 0x837   : > { %v1658_v50 = vsel %vm1650_vm15, 1e+30, %v1618_v19 }
 0x838   : > { %v1678_v14 = vsel %vm908_vm12, %v1658_v50, inf }
 0x839   : > { %1679 = vmin.xlane.f32.xlu2 %v1678_v14 }
 0x83d   : > { %v1634_v10 = vpop.xlane.xlu2 %1633 }
 0x83e   : > { %vm1648_vm1 = vcmp.le.f32.partialorder %v1616_v48, %v1634_v10 }
 0x83f   : > { %v1656_v32 = vsel %vm1648_vm1, 1e+30, %v1616_v48 }
 0x840   : > { %v1672_v18 = vsel %vm908_vm12, %v1656_v32, inf }
 0x841   : > { %1673 = vmin.xlane.f32.xlu1 %v1672_v18 }
 0x844   : > { %1979 = vrot.lane.b32.xlu0 %v4891_v41, %s4637_s18 }
 0x845   : > { %v2030_v37 = vpop.permute.xlu1 %2029  ;;  %v1637_v16 = vpop.xlane.xlu0 %1636 }
 0x846   : > { %vm1649_vm2 = vcmp.le.f32.partialorder %v1617_v52, %v1637_v16  ;;  %v2035_v23 = vsel %vm791_vm11, %v2030_v37, 0  ;;  %v5257_v17 = vpop.xlane.xlu2 %1538 }
 0x847   : > { %2044 = vmatpush.bf16.xpose.msrb.mxu0 %v2035_v23  ;;  %v1657_v19 = vsel %vm1649_vm2, 1e+30, %v1617_v52 }
 0x848   : > { %v1675_v26 = vsel %vm908_vm12, %v1657_v19, inf }
 0x849   : > { %1676 = vmin.xlane.f32.xlu2 %v1675_v26 }
 0x883   : > { %v1662_v48 = vpop.xlane.xlu2 %1661 }
 0x884   : > { %vm1684_vm3 = vcmp.le.f32.partialorder %v1652_v47, %v1662_v48 }
 0x885   : > { %v1692_v31 = vsel %vm1684_vm3, 1e+30, %v1652_v47 }
 0x886   : > { %v1700_v34 = vsel %vm908_vm12, %v1692_v31, inf }
 0x887   : > { %1701 = vmin.xlane.f32.xlu1 %v1700_v34  ;;  %v1742_v34 = vsub.f32 %v5156_v56, %v5247_v43 }
 0x88b   : > { %v1665_v40 = vpop.xlane.xlu0 %1664 }
 0x88c   : > { %vm1685_vm4 = vcmp.le.f32.partialorder %v1653_v55, %v1665_v40 }
 0x88d   : > { %v1693_v46 = vsel %vm1685_vm4, 1e+30, %v1653_v55 }
 0x88e   : > { %v1703_v49 = vsel %vm908_vm12, %v1693_v46, inf }
 0x88f   : > { %1704 = vmin.xlane.f32.xlu2 %v1703_v49  ;;  %v1752_v49 = vmul.f32 1.442695, %v1742_v34 }
 0x893   : > { %v1668_v25 = vpop.xlane.xlu0 %1667 }
 0x894   : > { %vm1686_vm5 = vcmp.le.f32.partialorder %v1654_v58, %v1668_v25 }
 0x895   : > { %v1694_v52 = vsel %vm1686_vm5, 1e+30, %v1654_v58 }
 0x896   : > { %v1706_v57 = vsel %vm908_vm12, %v1694_v52, inf }
 0x897   : > { %1707 = vmin.xlane.f32.xlu2 %v1706_v57 }
 0x8a3   : > { %v1683_v21 = vpop.xlane.xlu0 %1682 }
 0x8a4   : > { %vm1691_vm6 = vcmp.le.f32.partialorder %v1659_v2, %v1683_v21  ;;  %v1671_v29 = vpop.xlane.xlu1 %1670 }
 0x8a5   : > { %v1699_v27 = vsel %vm1691_vm6, 1e+30, %v1659_v2  ;;  %vm1687_vm8 = vcmp.le.f32.partialorder %v1655_v54, %v1671_v29 }
 0x8a6   : > { %v1721_v47 = vsel %vm908_vm12, %v1699_v27, inf  ;;  %v1695_v58 = vsel %vm1687_vm8, 1e+30, %v1655_v54  ;;  %v1740_v54 = vsub.f32 %v5141_v38, %v5220_v15 }
 0x8a7   : > { %1722 = vmin.xlane.f32.xlu1 %v1721_v47  ;;  %v1709_v2 = vsel %vm908_vm12, %v1695_v58, inf }
 0x8a8   : > { %v1748_v16 = vmul.f32 1.442695, %v1740_v54 }
 0x8aa   : > { %4479 = vpow2.f32 %v1748_v16 }
 0x8ac   : > { %v1680_v30 = vpop.xlane.xlu2 %1679 }
 0x8ad   : > { %vm1690_vm7 = vcmp.le.f32.partialorder %v1658_v50, %v1680_v30 }
 0x8ae   : > { %v1698_v13 = vsel %vm1690_vm7, 1e+30, %v1658_v50 }
 0x8af   : > { %1929 = vrot.lane.b32.xlu2 %v4879_v6, %s4637_s18  ;;  %v1718_v55 = vsel %vm908_vm12, %v1698_v13, inf  ;;  %v1746_v13 = vsub.f32 %v5180_v3, %v5236_v28 }
 0x8b0   : > { %1719 = vmin.xlane.f32.xlu0 %v1718_v55  ;;  %v4480_v48 = vpop.eup %4479 }
 0x8b4   : > { %v1674_v45 = vpop.xlane.xlu1 %1673 }
 0x8b5   : > { %vm1688_vm9 = vcmp.le.f32.partialorder %v1656_v32, %v1674_v45 }
 0x8b6   : > { %v1980_v7 = vpop.permute.xlu0 %1979  ;;  %v1696_v10 = vsel %vm1688_vm9, 1e+30, %v1656_v32  ;;  %v1741_v32 = vsub.f32 %v5150_v51, %v5225_v5 }
 0x8b7   : > { %1992 = vmatpush.bf16.msrb.mxu2 %v1980_v7  ;;  %v1712_v50 = vsel %vm908_vm12, %v1696_v10, inf }
 0x8b8   : > { %1710 = vmin.xlane.f32.xlu0 %v1709_v2  ;;  %v1743_v2 = vsub.f32 %v5170_v0, %v5233_v35 }
 0x8ba   : > { %v1754_v10 = vmul.f32 1.442695, %v1743_v2 }
 0x8bc   : > { %v1677_v14 = vpop.xlane.xlu2 %1676 }
 0x8bd   : > { %vm1689_vm10 = vcmp.le.f32.partialorder %v1657_v19, %v1677_v14 }
 0x8be   : > { %v1697_v18 = vsel %vm1689_vm10, 1e+30, %v1657_v19  ;;  %v1750_v19 = vmul.f32 1.442695, %v1741_v32 }
 0x8bf   : > { %v1715_v37 = vsel %vm908_vm12, %v1697_v18, inf }
 0x8c0   : > { %1713 = vmin.xlane.f32.xlu0 %v1712_v50  ;;  %1716 = vmin.xlane.f32.xlu1 %v1715_v37  ;;  %4481 = vpow2.f32 %v1750_v19  ;;  %v1745_v37 = vsub.f32 %v5172_v1, %v5229_v12 }
 0x8c1   : > { %4483 = vpow2.f32 %v1752_v49 }
 0x8c6   : > { %v4482_v52 = vpop.eup %4481 }
 0x8c7   : > { %v4484_v27 = vpop.eup %4483 }
 0x8d4   : > { %2027 = vrot.lane.b32.xlu0 %v4881_v9, %s4638_s20 }
 0x8d9   : > { %1954 = vrot.lane.b32.xlu1 %v4885_v22, %s4637_s18 }
 0x8fa   : > { %v1702_v23 = vpop.xlane.xlu1 %1701 }
 0x8fb   : > { %v1724_v26 = vmin.f32 %v1702_v23, %v5220_v15  ;;  %v1758_v23 = vmul.f32 1.442695, %v1745_v37 }
 0x8fd   : > { %vm1732_vm13 = vcmp.ge.f32.partialorder %v5141_v38, %v1724_v26 }
 0x8fe   : > { %v5279_v31 = vsel %vm1732_vm13, %v4480_v48, 0.0 }
 0x8ff   : > { %v1772_v40 = vsel %vm908_vm12, %v5279_v31, 0.0 }
 0x900   : > { %1773 = vadd.xlane.f32.xlu2 %v1772_v40 }
 0x902   : > { %v1705_v46 = vpop.xlane.xlu2 %1704 }
 0x903   : > { %v1725_v25 = vmin.f32 %v1705_v46, %v5225_v5  ;;  %v1747_v5 = vsub.f32 %v5162_v59, %v5257_v17 }
 0x905   : > { %vm1733_vm14 = vcmp.ge.f32.partialorder %v5150_v51, %v1725_v25  ;;  %v1762_v29 = vmul.f32 1.442695, %v1747_v5 }
 0x906   : > { %v5287_v15 = vsel %vm1733_vm14, %v4482_v52, 0.0 }
 0x907   : > { %v1775_v38 = vsel %vm908_vm12, %v5287_v15, 0.0  ;;  %4485 = vpow2.f32 %v1762_v29 }
 0x908   : > { %1776 = vadd.xlane.f32.xlu0 %v1775_v38 }
 0x90a   : > { %v1708_v57 = vpop.xlane.xlu2 %1707 }
 0x90b   : > { %v1726_v21 = vmin.f32 %v1708_v57, %v5247_v43 }
 0x90d   : > { %vm1734_vm15 = vcmp.ge.f32.partialorder %v5156_v56, %v1726_v21  ;;  %v1760_v56 = vmul.f32 1.442695, %v1746_v13  ;;  %v4486_v58 = vpop.eup %4485 }
 0x90e   : > { %v5293_v47 = vsel %vm1734_vm15, %v4484_v27, 0.0 }
 0x90f   : > { %v1778_v51 = vsel %vm908_vm12, %v5293_v47, 0.0  ;;  %4487 = vpow2.f32 %v1760_v56 }
 0x910   : > { %1779 = vadd.xlane.f32.xlu0 %v1778_v51  ;;  %4489 = vpow2.f32 %v1754_v10 }
 0x912   : > { %v1930_v30 = vpop.permute.xlu2 %1929 }
 0x913   : > { %1942 = vmatpush.bf16.msra.mxu3 %v1930_v30 }
 0x915   : > { %v4488_v50 = vpop.eup %4487 }
 0x916   : > { %v4490_v19 = vpop.eup %4489 }
 0x91a   : > { %v1723_v43 = vpop.xlane.xlu1 %1722 }
 0x91b   : > { %v1731_v55 = vmin.f32 %v1723_v43, %v5257_v17 }
 0x91d   : > { %vm1739_vm1 = vcmp.ge.f32.partialorder %v5162_v59, %v1731_v55  ;;  %v1744_v59 = vsub.f32 %v5164_v62, %v5227_v11 }
 0x91e   : > { %v5303_v45 = vsel %vm1739_vm1, %v4486_v58, 0.0 }
 0x91f   : > { %v1793_v7 = vsel %vm908_vm12, %v5303_v45, 0.0  ;;  %v1756_v16 = vmul.f32 1.442695, %v1744_v59 }
 0x920   : > { %1794 = vadd.xlane.f32.xlu0 %v1793_v7 }
 0x921   : > { %4491 = vpow2.f32 %v1756_v16 }
 0x922   : > { %4493 = vpow2.f32 %v1758_v23 }
 0x923   : > { %v1720_v14 = vpop.xlane.xlu0 %1719 }
 0x924   : > { %v1730_v18 = vmin.f32 %v1720_v14, %v5236_v28 }
 0x926   : > { %vm1738_vm2 = vcmp.ge.f32.partialorder %v5180_v3, %v1730_v18 }
 0x927   : > { %v5313_v17 = vsel %vm1738_vm2, %v4488_v50, 0.0 }
 0x928   : > { %v1790_v54 = vsel %vm908_vm12, %v5313_v17, 0.0 }
 0x929   : > { %1791 = vadd.xlane.f32.xlu2 %v1790_v54 }
 0x92b   : > { %v1711_v32 = vpop.xlane.xlu0 %1710 }
 0x92c   : > { %v1727_v28 = vmin.f32 %v1711_v32, %v5233_v35  ;;  %v4492_v35 = vpop.eup %4491 }
 0x92d   : > { %v4494_v49 = vpop.eup %4493 }
 0x92e   : > { %vm1735_vm3 = vcmp.ge.f32.partialorder %v5170_v0, %v1727_v28 }
 0x92f   : > { %v5321_v3 = vsel %vm1735_vm3, %v4490_v19, 0.0 }
 0x930   : > { %v1781_v26 = vsel %vm908_vm12, %v5321_v3, 0.0 }
 0x931   : > { %1782 = vadd.xlane.f32.xlu1 %v1781_v26 }
 0x933   : > { %v1714_v48 = vpop.xlane.xlu0 %1713  ;;  %v1717_v34 = vpop.xlane.xlu1 %1716 }
 0x934   : > { %v1728_v40 = vmin.f32 %v1714_v48, %v5227_v11  ;;  %v1729_v46 = vmin.f32 %v1717_v34, %v5229_v12  ;;  %2004 = vrot.lane.b32.xlu0 %v4899_v8, %s4637_s18 }
 0x936   : > { %vm1736_vm4 = vcmp.ge.f32.partialorder %v5164_v62, %v1728_v40  ;;  %vm1737_vm5 = vcmp.ge.f32.partialorder %v5172_v1, %v1729_v46 }
 0x937   : > { %v5331_v0 = vsel %vm1736_vm4, %v4492_v35, 0.0  ;;  %v5333_v25 = vsel %vm1737_vm5, %v4494_v49, 0.0 }
 0x938   : > { %v1784_v52 = vsel %vm908_vm12, %v5331_v0, 0.0  ;;  %v1787_v11 = vsel %vm908_vm12, %v5333_v25, 0.0 }
 0x939   : > { %1785 = vadd.xlane.f32.xlu1 %v1784_v52  ;;  %1788 = vadd.xlane.f32.xlu2 %v1787_v11 }
 0x93c   : > { %2101 = vrot.lane.b32.xlu0 %v4899_v8, %s4636_s17 }
 0x946   : > { %v2028_v12 = vpop.permute.xlu0 %2027 }
 0x947   : > { %4247 = vmatmul.msk.bf16.vlgmr.msrb.gmra.mxu0 %vm791_vm11, %v2028_v12 }
 0x94b   : > { %v1955_v62 = vpop.permute.xlu1 %1954 }
 0x94c   : > { %1967 = vmatpush.bf16.msrb.mxu1 %v1955_v62 }
 0x951   : > { %2077 = vrot.lane.b32.xlu2 %v4891_v41, %s4636_s17 }
 0x952   : > { %2053 = vrot.lane.b32.xlu1 %v4885_v22, %s4636_s17 }
 0x959   : > { %2075 = vrot.lane.b32.xlu2 %v4893_v42, %s4638_s20 }
 0x95a   : > { %2051 = vrot.lane.b32.xlu1 %v4887_v24, %s4638_s20 }
 0x961   : > { %2099 = vrot.lane.b32.xlu2 %v4901_v63, %s4638_s20  ;;  %s4642_s20 = smov 40  }
 0x973   : > { %v1774_v1 = vpop.xlane.xlu2 %1773 }
 0x974   : > { %4495 = vrcp.f32 %v1774_v1  ;;  %v1807_v51 = vand.u32 2147483648, %v1774_v1  ;;  %vm1801_vm7 = vweird.f32 %v1774_v1  ;;  %v1805_v29 = vand.u32 2147483647, %v1774_v1 }
 0x976   : > { %v1808_v56 = vor.u32 1.1754944e-38, %v1807_v51  ;;  %vm1806_vm9 = vcmp.eq.f32.partialorder %v1805_v29, 8.507059e+37 }
 0x97a   : > { %v4496_v38 = vpop.eup %4495 }
 0x97b   : > { %v1797_v57 = vmul.f32 %v4496_v38, %v1774_v1  ;;  %v1777_v21 = vpop.xlane.xlu0 %1776  ;;  %vm1802_vm6 = vweird.f32 %v4496_v38 }
 0x97c   : > { %4497 = vrcp.f32 %v1777_v21  ;;  %vm1803_vm8 = vmor %vm1801_vm7, %vm1802_vm6  ;;  %v1822_v2 = vand.u32 2147483648, %v1777_v21  ;;  %v1820_v10 = vand.u32 2147483647, %v1777_v21  ;;  %vm1816_vm13 = vweird.f32 %v1777_v21 }
 0x97d   : > { %v1798_v27 = vsub.f32 1.0, %v1797_v57 }
 0x97e   : > { %v1823_v59 = vor.u32 1.1754944e-38, %v1822_v2  ;;  %vm1821_vm15 = vcmp.eq.f32.partialorder %v1820_v10, 8.507059e+37 }
 0x97f   : > { %v1799_v5 = vmul.f32 %v4496_v38, %v1798_v27 }
 0x981   : > { %v1800_v30 = vadd.f32 %v4496_v38, %v1799_v5 }
 0x982   : > { %v4498_v13 = vpop.eup %4497 }
 0x983   : > { %v1804_v43 = vsel %vm1803_vm8, %v4496_v38, %v1800_v30  ;;  %v1812_v55 = vmul.f32 %v4498_v13, %v1777_v21  ;;  %vm1817_vm10 = vweird.f32 %v4498_v13  ;;  %v5353_v54 = vpop.xlane.xlu0 %1779 }
 0x984   : > { %v1809_v7 = vsel %vm1806_vm9, %v1808_v56, %v1804_v43  ;;  %vm1818_vm14 = vmor %vm1816_vm13, %vm1817_vm10  ;;  %4499 = vrcp.f32 %v5353_v54  ;;  %vm1831_vm7 = vweird.f32 %v5353_v54  ;;  %v1835_v10 = vand.u32 2147483647, %v5353_v54 }
 0x985   : > { %v1813_v58 = vsub.f32 1.0, %v1812_v55  ;;  %v1810_v50 = vmul.f32 %v1809_v7, %v5279_v31  ;;  %v1837_v7 = vand.u32 2147483648, %v5353_v54 }
 0x987   : > { %v1814_v14 = vmul.f32 %v4498_v13, %v1813_v58  ;;  %v1916_v23 = vpack.c.bf16 %v1810_v50, %v1810_v50 }
 0x989   : > { %v1815_v18 = vadd.f32 %v4498_v13, %v1814_v14  ;;  %v1926_v19 = vunpack.c.l.b16 %v1916_v23 }
 0x98a   : > { %v4500_v31 = vpop.eup %4499 }
 0x98b   : > { %v1819_v37 = vsel %vm1818_vm14, %v4498_v13, %v1815_v18  ;;  %v1827_v46 = vmul.f32 %v4500_v31, %v5353_v54  ;;  %vm1832_vm4 = vweird.f32 %v4500_v31  ;;  %vm1836_vm14 = vcmp.eq.f32.partialorder %v1835_v10, 8.507059e+37 }
 0x98c   : > { %v1824_v16 = vsel %vm1821_vm15, %v1823_v59, %v1819_v37  ;;  %vm5367_vm8 = vmor %vm1831_vm7, %vm1832_vm4 }
 0x98d   : > { %v1825_v32 = vmul.f32 %v1824_v16, %v5287_v15  ;;  %v1828_v15 = vsub.f32 1.0, %v1827_v46 }
 0x98f   : > { %v1917_v28 = vpack.c.bf16 %v1825_v32, %v1825_v32  ;;  %v1829_v1 = vmul.f32 %v4500_v31, %v1828_v15 }
 0x991   : > { %v1927_v26 = vunpack.c.l.b16 %v1917_v28  ;;  %v1830_v13 = vadd.f32 %v4500_v31, %v1829_v1 }
 0x993   : > { %v1795_v48 = vpop.xlane.xlu0 %1794  ;;  %v1928_v34 = vpack.c.b16 %v1927_v26, %v1926_v19  ;;  %v1834_v59 = vsel %vm5367_vm8, %v4500_v31, %v1830_v13  ;;  %v1838_v26 = vor.u32 1.1754944e-38, %v1837_v7 }
 0x994   : > { %4501 = vrcp.f32 %v1795_v48  ;;  %v1912_v38 = vand.u32 2147483648, %v1795_v48  ;;  %vm1906_vm2 = vweird.f32 %v1795_v48  ;;  %v1910_v57 = vand.u32 2147483647, %v1795_v48 }
 0x995   : > { %4241 = vmatmul.msk.bf16.vlgmr.msra.gmra.mxu3 %vm908_vm12, %v1928_v34 }
 0x996   : > { %v1913_v43 = vor.u32 1.1754944e-38, %v1912_v38  ;;  %vm1911_vm5 = vcmp.eq.f32.partialorder %v1910_v57, 8.507059e+37 }
 0x99a   : > { %v4502_v40 = vpop.eup %4501 }
 0x99b   : > { %v1902_v35 = vmul.f32 %v4502_v40, %v1795_v48  ;;  %vm1907_vm1 = vweird.f32 %v4502_v40 }
 0x99c   : > { %v1792_v49 = vpop.xlane.xlu2 %1791  ;;  %vm5359_vm3 = vmor %vm1906_vm2, %vm1907_vm1 }
 0x99d   : > { %v1903_v52 = vsub.f32 1.0, %v1902_v35  ;;  %4503 = vrcp.f32 %v1792_v49  ;;  %v1897_v55 = vand.u32 2147483648, %v1792_v49  ;;  %v1895_v58 = vand.u32 2147483647, %v1792_v49 }
 0x99e   : > { %vm1891_vm9 = vweird.f32 %v1792_v49 }
 0x99f   : > { %v1904_v11 = vmul.f32 %v4502_v40, %v1903_v52  ;;  %v1898_v37 = vor.u32 1.1754944e-38, %v1897_v55  ;;  %vm1896_vm13 = vcmp.eq.f32.partialorder %v1895_v58, 8.507059e+37 }
 0x9a1   : > { %v1905_v12 = vadd.f32 %v4502_v40, %v1904_v11 }
 0x9a3   : > { %v4504_v62 = vpop.eup %4503  ;;  %v1909_v51 = vsel %vm5359_vm3, %v4502_v40, %v1905_v12  ;;  %v1839_v40 = vsel %vm1836_vm14, %v1838_v26, %v1834_v59 }
 0x9a4   : > { %v1887_v21 = vmul.f32 %v4504_v62, %v1792_v49  ;;  %v1783_v27 = vpop.xlane.xlu1 %1782  ;;  %vm1892_vm6 = vweird.f32 %v4504_v62  ;;  %v1914_v2 = vsel %vm1911_vm5, %v1913_v43, %v1909_v51  ;;  %v1840_v12 = vmul.f32 %v1839_v40, %v5293_v47 }
 0x9a5   : > { %4505 = vrcp.f32 %v1783_v27  ;;  %vm1893_vm10 = vmor %vm1891_vm9, %vm1892_vm6  ;;  %v1915_v19 = vmul.f32 %v1914_v2, %v5303_v45  ;;  %v1850_v31 = vand.u32 2147483647, %v1783_v27  ;;  %v1852_v46 = vand.u32 2147483648, %v1783_v27 }
 0x9a6   : > { %v1888_v30 = vsub.f32 1.0, %v1887_v21  ;;  %v2005_v29 = vpop.permute.xlu0 %2004  ;;  %vm1846_vm1 = vweird.f32 %v1783_v27  ;;  %v1918_v55 = vpack.c.bf16 %v1840_v12, %v1840_v12 }
 0x9a7   : > { %2017 = vmatpush.bf16.msrb.mxu3 %v2005_v29  ;;  %v1923_v15 = vpack.c.bf16 %v1915_v19, %v1915_v19  ;;  %vm1851_vm3 = vcmp.eq.f32.partialorder %v1850_v31, 8.507059e+37  ;;  %v1853_v1 = vor.u32 1.1754944e-38, %v1852_v46 }
 0x9a8   : > { %v1889_v56 = vmul.f32 %v4504_v62, %v1888_v30 }
 0x9a9   : > { %v2002_v30 = vunpack.c.l.b16 %v1923_v15 }
 0x9aa   : > { %v1890_v18 = vadd.f32 %v4504_v62, %v1889_v56 }
 0x9ab   : > { %v4506_v50 = vpop.eup %4505 }
 0x9ac   : > { %v1894_v16 = vsel %vm1893_vm10, %v4504_v62, %v1890_v18  ;;  %v1842_v32 = vmul.f32 %v4506_v50, %v1783_v27  ;;  %v1786_v23 = vpop.xlane.xlu1 %1785  ;;  %v5374_v28 = vpop.xlane.xlu2 %1788  ;;  %vm1847_vm15 = vweird.f32 %v4506_v50 }
 0x9ad   : > { %v1899_v48 = vsel %vm1896_vm13, %v1898_v37, %v1894_v16  ;;  %4507 = vrcp.f32 %v1786_v23  ;;  %vm1848_vm2 = vmor %vm1846_vm1, %vm1847_vm15  ;;  %v1865_v56 = vand.u32 2147483647, %v1786_v23  ;;  %v1867_v58 = vand.u32 2147483648, %v1786_v23 }
 0x9ae   : > { %v1843_v54 = vsub.f32 1.0, %v1842_v32  ;;  %4509 = vrcp.f32 %v5374_v28  ;;  %v2102_v34 = vpop.permute.xlu0 %2101  ;;  %v1900_v52 = vmul.f32 %v1899_v48, %v5313_v17  ;;  %v1882_v14 = vand.u32 2147483648, %v5374_v28 }
 0x9af   : > { %v2107_v35 = vsel %vm791_vm11, %v2102_v34, 0  ;;  %vm1861_vm6 = vweird.f32 %v1786_v23  ;;  %v1951_v37 = vunpack.c.l.b16 %v1918_v55  ;;  %vm1876_vm8 = vweird.f32 %v5374_v28 }
 0x9b0   : > { %v1844_v49 = vmul.f32 %v4506_v50, %v1843_v54  ;;  %2116 = vmatpush.bf16.xpose.msra.mxu3 %v2107_v35  ;;  %v1922_v11 = vpack.c.bf16 %v1900_v52, %v1900_v52  ;;  %vm1866_vm9 = vcmp.eq.f32.partialorder %v1865_v56, 8.507059e+37  ;;  %v1883_v26 = vor.u32 1.1754944e-38, %v1882_v14 }
 0x9b2   : > { %v1845_v45 = vadd.f32 %v4506_v50, %v1844_v49  ;;  %v2001_v51 = vunpack.c.l.b16 %v1922_v11 }
 0x9b3   : > { %v4508_v62 = vpop.eup %4507 }
 0x9b4   : > { %v4510_v38 = vpop.eup %4509  ;;  %v1849_v57 = vsel %vm1848_vm2, %v4506_v50, %v1845_v45  ;;  %v1857_v21 = vmul.f32 %v4508_v62, %v1786_v23  ;;  %v2078_v5 = vpop.permute.xlu2 %2077  ;;  %v2003_v27 = vpack.c.b16 %v2002_v30, %v2001_v51  ;;  %vm1862_vm4 = vweird.f32 %v4508_v62 }
 0x9b5   : > { %v1854_v29 = vsel %vm1851_vm3, %v1853_v1, %v1849_v57  ;;  %v1872_v13 = vmul.f32 %v4510_v38, %v5374_v28  ;;  %v2083_v17 = vsel %vm791_vm11, %v2078_v5, 0  ;;  %vm1877_vm5 = vweird.f32 %v4510_v38  ;;  %vm1863_vm7 = vmor %vm1861_vm6, %vm1862_vm4 }
 0x9b6   : > { %v1858_v43 = vsub.f32 1.0, %v1857_v21  ;;  %2092 = vmatpush.bf16.xpose.msra.mxu2 %v2083_v17  ;;  %v1855_v47 = vmul.f32 %v1854_v29, %v5321_v3  ;;  %4244 = vmatmul.msk.bf16.vlgmr.msrb.gmra.mxu3 %vm908_vm12, %v2003_v27  ;;  %v1880_v50 = vand.u32 2147483647, %v5374_v28  ;;  %v1868_v3 = vor.u32 1.1754944e-38, %v1867_v58  ;;  %vm1878_vm10 = vmor %vm1876_vm8, %vm1877_vm5  ;;  %v4245_v28 = vld [vmem:[%s6306_s5 + $0x20] sm:$0xff] }
 0x9b7   : > { %v1873_v7 = vsub.f32 1.0, %v1872_v13 }
 0x9b8   : > { %v1859_v2 = vmul.f32 %v4508_v62, %v1858_v43  ;;  %v1919_v10 = vpack.c.bf16 %v1855_v47, %v1855_v47  ;;  %vm1881_vm13 = vcmp.eq.f32.partialorder %v1880_v50, 8.507059e+37 }
 0x9b9   : > { %v1874_v18 = vmul.f32 %v4510_v38, %v1873_v7 }
 0x9ba   : > { %v1860_v59 = vadd.f32 %v4508_v62, %v1859_v2  ;;  %v1952_v16 = vunpack.c.l.b16 %v1919_v10 }
 0x9bb   : > { %v1875_v32 = vadd.f32 %v4510_v38, %v1874_v18 }
 0x9bc   : > { %v1864_v19 = vsel %vm1863_vm7, %v4508_v62, %v1860_v59  ;;  %v2076_v48 = vpop.permute.xlu2 %2075  ;;  %v1953_v54 = vpack.c.b16 %v1952_v16, %v1951_v37 }
 0x9bd   : > { %v1869_v34 = vsel %vm1866_vm9, %v1868_v3, %v1864_v19  ;;  %v1879_v40 = vsel %vm1878_vm10, %v4510_v38, %v1875_v32 }
 0x9be   : > { %v1884_v31 = vsel %vm1881_vm13, %v1883_v26, %v1879_v40  ;;  %4242 = vmatmul.msk.bf16.vlgmr.msrb.gmra.mxu1 %vm908_vm12, %v1953_v54  ;;  %v1870_v23 = vmul.f32 %v1869_v34, %v5331_v0 }
 0x9bf   : > { %v1885_v46 = vmul.f32 %v1884_v31, %v5333_v25  ;;  %v4246_v25 = vld [vmem:[%s6306_s5 + $0x28] sm:$0xff] }
 0x9c0   : > { %v1920_v35 = vpack.c.bf16 %v1870_v23, %v1870_v23 }
 0x9c1   : > { %v1921_v49 = vpack.c.bf16 %v1885_v46, %v1885_v46 }
 0x9c2   : > { %v1976_v52 = vunpack.c.l.b16 %v1920_v35 }
 0x9c3   : > { %v1977_v15 = vunpack.c.l.b16 %v1921_v49 }
 0x9c4   : > { %v2046_v45 = vpop.f32.mrf.mxu0  ;;  %v2054_v11 = vpop.permute.xlu1 %2053 }
 0x9c5   : > { %v5394_v12 = vadd.f32 %v4245_v28, %v2046_v45  ;;  %v2059_v62 = vsel %vm791_vm11, %v2054_v11, 0  ;;  %v2100_v1 = vpop.permute.xlu2 %2099  ;;  %v1978_v38 = vpack.c.b16 %v1977_v15, %v1976_v52 }
 0x9c6   : > { %2068 = vmatpush.bf16.xpose.msra.mxu1 %v2059_v62  ;;  %4250 = vmatmul.msk.bf16.vlgmr.msra.gmra.mxu3 %vm791_vm11, %v2100_v1 }
 0x9c7   : > { %4243 = vmatmul.msk.bf16.vlgmr.msrb.gmra.mxu2 %vm908_vm12, %v1978_v38  ;;  %v2147_v0 = vsel %vm908_vm12, %v5394_v12, inf }
 0x9c8   : > { %2148 = vmin.xlane.f32.xlu1 %v2147_v0 }
 0x9cc   : > { %v2048_v57 = vpop.f32.mrf.mxu0  ;;  %v2052_v21 = vpop.permute.xlu1 %2051 }
 0x9cd   : > { %v5404_v5 = vadd.f32 %v4246_v25, %v2048_v57 }
 0x9ce   : > { %4248 = vmatmul.msk.bf16.vlgmr.msra.gmra.mxu1 %vm791_vm11, %v2052_v21 }
 0x9cf   : > { %v2150_v51 = vsel %vm908_vm12, %v5404_v5, inf }
 0x9d0   : > { %2151 = vmin.xlane.f32.xlu0 %v2150_v51 }
 0x9d7   : > { %4249 = vmatmul.msk.bf16.vlgmr.msra.gmra.mxu2 %vm791_vm11, %v2076_v48 }
 0xa18   : > { %v5410_v30 = vpop.f32.mrf.mxu3 }
 0xa20   : > { %v5412_v29 = vpop.f32.mrf.mxu3 }
 0xa21   : > { %v4361_v13 = vpack.i.bf16 %v5412_v29, %v5410_v30 }
 0xa39   : > { %v5416_v17 = vpop.f32.mrf.mxu3 }
 0xa3b   : > { %v5418_v43 = vpop.f32.mrf.mxu1  ;;  %v2149_v46 = vpop.xlane.xlu1 %2148 }
 0xa3c   : > { %vm2171_vm15 = vcmp.le.f32.partialorder %v5394_v12, %v2149_v46 }
 0xa3d   : > { %v2179_v15 = vsel %vm2171_vm15, 1e+30, %v5394_v12 }
 0xa3e   : > { %v2187_v45 = vsel %vm908_vm12, %v2179_v15, inf }
 0xa41   : > { %v5420_v27 = vpop.f32.mrf.mxu3 }
 0xa42   : > { %v4406_v47 = vpack.i.bf16 %v5420_v27, %v5416_v17 }
 0xa43   : > { %v5424_v55 = vpop.f32.mrf.mxu1  ;;  %v2152_v48 = vpop.xlane.xlu0 %2151 }
 0xa44   : > { %v4376_v56 = vpack.i.bf16 %v5424_v55, %v5418_v43  ;;  %vm2172_vm14 = vcmp.le.f32.partialorder %v5404_v5, %v2152_v48 }
 0xa45   : > { %v2180_v35 = vsel %vm2172_vm14, 1e+30, %v5404_v5 }
 0xa46   : > { %v2190_v52 = vsel %vm908_vm12, %v2180_v35, inf }
 0xa49   : > { %v2118_v50 = vpop.f32.mrf.mxu3 }
 0xa4a   : > { %v5428_v58 = vpop.f32.mrf.mxu2  ;;  %v5442_v32 = vadd.f32 %v4245_v28, %v2118_v50 }
 0xa4b   : > { %v2070_v7 = vpop.f32.mrf.mxu1 }
 0xa4c   : > { %v5430_v2 = vadd.f32 %v4245_v28, %v2070_v7  ;;  %v2165_v34 = vsel %vm908_vm12, %v5442_v32, inf }
 0xa4e   : > { %v2153_v14 = vsel %vm908_vm12, %v5430_v2, inf }
 0xa4f   : > { %2154 = vmin.xlane.f32.xlu2 %v2153_v14 }
 0xa51   : > { %v2120_v54 = vpop.f32.mrf.mxu3 }
 0xa52   : > { %v5434_v10 = vpop.f32.mrf.mxu2  ;;  %v5451_v40 = vadd.f32 %v4246_v25, %v2120_v54 }
 0xa53   : > { %v4391_v18 = vpack.i.bf16 %v5434_v10, %v5428_v58  ;;  %v2072_v59 = vpop.f32.mrf.mxu1 }
 0xa54   : > { %v5438_v37 = vadd.f32 %v4246_v25, %v2072_v59 }
 0xa56   : > { %v2156_v16 = vsel %vm908_vm12, %v5438_v37, inf }
 0xa57   : > { %2157 = vmin.xlane.f32.xlu1 %v2156_v16 }
 0xa5a   : > { %v2094_v3 = vpop.f32.mrf.mxu2 }
 0xa5b   : > { %v5444_v19 = vadd.f32 %v4245_v28, %v2094_v3  ;;  %v2168_v28 = vsel %vm908_vm12, %v5451_v40, inf }
 0xa5d   : > { %v2159_v26 = vsel %vm908_vm12, %v5444_v19, inf }
 0xa5e   : > { %2160 = vmin.xlane.f32.xlu0 %v2159_v26 }
 0xa5f   : > { %2166 = vmin.xlane.f32.xlu1 %v2165_v34 }
 0xa62   : > { %v2096_v31 = vpop.f32.mrf.mxu2 }
 0xa63   : > { %v5453_v23 = vadd.f32 %v4246_v25, %v2096_v31 }
 0xa65   : > { %v2162_v49 = vsel %vm908_vm12, %v5453_v23, inf }
 0xa66   : > { %2163 = vmin.xlane.f32.xlu2 %v2162_v49  ;;  %2169 = vmin.xlane.f32.xlu0 %v2168_v28 }
 0xa67   : > { %2191 = vmin.xlane.f32.xlu1 %v2190_v52 }
 0xa6e   : > { %2188 = vmin.xlane.f32.xlu2 %v2187_v45 }
 0xac2   : > { %v2155_v11 = vpop.xlane.xlu2 %2154 }
 0xac3   : > { %vm2173_vm1 = vcmp.le.f32.partialorder %v5430_v2, %v2155_v11 }
 0xac4   : > { %v2181_v62 = vsel %vm2173_vm1, 1e+30, %v5430_v2 }
 0xac5   : > { %v2193_v1 = vsel %vm908_vm12, %v2181_v62, inf }
 0xac6   : > { %2194 = vmin.xlane.f32.xlu0 %v2193_v1 }
 0xaca   : > { %v2158_v38 = vpop.xlane.xlu1 %2157 }
 0xacb   : > { %vm2174_vm2 = vcmp.le.f32.partialorder %v5438_v37, %v2158_v38 }
 0xacc   : > { %v2182_v0 = vsel %vm2174_vm2, 1e+30, %v5438_v37 }
 0xacd   : > { %v2196_v25 = vsel %vm908_vm12, %v2182_v0, inf }
 0xace   : > { %2197 = vmin.xlane.f32.xlu2 %v2196_v25 }
 0xad1   : > { %v2161_v57 = vpop.xlane.xlu0 %2160 }
 0xad2   : > { %v2167_v21 = vpop.xlane.xlu1 %2166  ;;  %vm2175_vm7 = vcmp.le.f32.partialorder %v5444_v19, %v2161_v57 }
 0xad3   : > { %vm2177_vm3 = vcmp.le.f32.partialorder %v5442_v32, %v2167_v21  ;;  %v2183_v31 = vsel %vm2175_vm7, 1e+30, %v5444_v19 }
 0xad4   : > { %v2185_v51 = vsel %vm2177_vm3, 1e+30, %v5442_v32  ;;  %v2199_v28 = vsel %vm908_vm12, %v2183_v31, inf }
 0xad5   : > { %v2205_v7 = vsel %vm908_vm12, %v2185_v51, inf }
 0xad6   : > { %2206 = vmin.xlane.f32.xlu2 %v2205_v7 }
 0xad9   : > { %v2170_v14 = vpop.xlane.xlu0 %2169  ;;  %v2164_v50 = vpop.xlane.xlu2 %2163 }
 0xada   : > { %vm2178_vm4 = vcmp.le.f32.partialorder %v5451_v40, %v2170_v14  ;;  %vm2176_vm5 = vcmp.le.f32.partialorder %v5453_v23, %v2164_v50  ;;  %v2192_v3 = vpop.xlane.xlu1 %2191 }
 0xadb   : > { %v2186_v59 = vsel %vm2178_vm4, 1e+30, %v5451_v40  ;;  %v2184_v16 = vsel %vm2176_vm5, 1e+30, %v5453_v23  ;;  %vm2212_vm6 = vcmp.le.f32.partialorder %v2180_v35, %v2192_v3 }
 0xadc   : > { %v2208_v26 = vsel %vm908_vm12, %v2186_v59, inf  ;;  %v2202_v48 = vsel %vm908_vm12, %v2184_v16, inf  ;;  %v2220_v54 = vsel %vm2212_vm6, 1e+30, %v2180_v35 }
 0xadd   : > { %2209 = vmin.xlane.f32.xlu1 %v2208_v26  ;;  %2203 = vmin.xlane.f32.xlu0 %v2202_v48  ;;  %v2230_v34 = vsel %vm908_vm12, %v2220_v54, inf }
 0xade   : > { %2231 = vmin.xlane.f32.xlu2 %v2230_v34 }
 0xae1   : > { %v2189_v46 = vpop.xlane.xlu2 %2188 }
 0xae2   : > { %vm2211_vm8 = vcmp.le.f32.partialorder %v2179_v15, %v2189_v46 }
 0xae3   : > { %v2219_v49 = vsel %vm2211_vm8, 1e+30, %v2179_v15 }
 0xae4   : > { %v2227_v52 = vsel %vm908_vm12, %v2219_v49, inf }
 0xae5   : > { %2200 = vmin.xlane.f32.xlu1 %v2199_v28  ;;  %2228 = vmin.xlane.f32.xlu0 %v2227_v52 }
 0xb39   : > { %v2195_v45 = vpop.xlane.xlu0 %2194 }
 0xb3a   : > { %vm2213_vm9 = vcmp.le.f32.partialorder %v2181_v62, %v2195_v45  ;;  %v2123_v45 = vsel %vm908_vm12, %v5394_v12, -inf }
 0xb3b   : > { %v2221_v35 = vsel %vm2213_vm9, 1e+30, %v2181_v62 }
 0xb3c   : > { %v2233_v11 = vsel %vm908_vm12, %v2221_v35, inf }
 0xb3d   : > { %2234 = vmin.xlane.f32.xlu1 %v2233_v11 }
 0xb41   : > { %v2198_v1 = vpop.xlane.xlu2 %2197 }
 0xb42   : > { %vm2214_vm10 = vcmp.le.f32.partialorder %v2182_v0, %v2198_v1 }
 0xb43   : > { %v2222_v38 = vsel %vm2214_vm10, 1e+30, %v2182_v0 }
 0xb44   : > { %v2236_v25 = vsel %vm908_vm12, %v2222_v38, inf }
 0xb45   : > { %2237 = vmin.xlane.f32.xlu0 %v2236_v25 }
 0xb49   : > { %v2207_v57 = vpop.xlane.xlu2 %2206 }
 0xb4a   : > { %vm2217_vm13 = vcmp.le.f32.partialorder %v2185_v51, %v2207_v57 }
 0xb4b   : > { %v2225_v15 = vsel %vm2217_vm13, 1e+30, %v2185_v51 }
 0xb4c   : > { %v2245_v21 = vsel %vm908_vm12, %v2225_v15, inf }
 0xb4d   : > { %2246 = vmin.xlane.f32.xlu0 %v2245_v21 }
 0xb50   : > { %v2210_v7 = vpop.xlane.xlu1 %2209  ;;  %v2204_v14 = vpop.xlane.xlu0 %2203 }
 0xb51   : > { %v2232_v50 = vpop.xlane.xlu2 %2231  ;;  %vm2218_vm2 = vcmp.le.f32.partialorder %v2186_v59, %v2210_v7  ;;  %vm2216_vm3 = vcmp.le.f32.partialorder %v2184_v16, %v2204_v14 }
 0xb52   : > { %vm2252_vm14 = vcmp.le.f32.partialorder %v2220_v54, %v2232_v50  ;;  %v2226_v28 = vsel %vm2218_vm2, 1e+30, %v2186_v59 }
 0xb53   : > { %v5487_v62 = vsel %vm2252_vm14, 1e+30, %v2220_v54  ;;  %v2126_v54 = vsel %vm908_vm12, %v5404_v5, -inf  ;;  %v2248_v52 = vsel %vm908_vm12, %v2226_v28, inf }
 0xb54   : > { %v2270_v3 = vsel %vm908_vm12, %v5487_v62, inf }
 0xb55   : > { %2271 = vmin.xlane.f32.xlu0 %v2270_v3 }
 0xb58   : > { %v2201_v0 = vpop.xlane.xlu1 %2200  ;;  %v2229_v26 = vpop.xlane.xlu0 %2228 }
 0xb59   : > { %vm2215_vm15 = vcmp.le.f32.partialorder %v2183_v31, %v2201_v0  ;;  %vm2251_vm1 = vcmp.le.f32.partialorder %v2219_v49, %v2229_v26 }
 0xb5a   : > { %v2223_v48 = vsel %vm2215_vm15, 1e+30, %v2183_v31  ;;  %v2259_v34 = vsel %vm2251_vm1, 1e+30, %v2219_v49  ;;  %v2224_v31 = vsel %vm2216_vm3, 1e+30, %v2184_v16 }
 0xb5b   : > { %v2239_v51 = vsel %vm908_vm12, %v2223_v48, inf  ;;  %v2267_v46 = vsel %vm908_vm12, %v2259_v34, inf  ;;  %v2242_v49 = vsel %vm908_vm12, %v2224_v31, inf }
 0xb5c   : > { %2240 = vmin.xlane.f32.xlu2 %v2239_v51  ;;  %2268 = vmin.xlane.f32.xlu1 %v2267_v46 }
 0xb5d   : > { %2127 = vmax.xlane.f32.xlu0 %v2126_v54 }
 0xb64   : > { %2249 = vmin.xlane.f32.xlu2 %v2248_v52  ;;  %2124 = vmax.xlane.f32.xlu1 %v2123_v45 }
 0xb6c   : > { %2243 = vmin.xlane.f32.xlu1 %v2242_v49 }
 0xbb0   : > { %v2235_v11 = vpop.xlane.xlu1 %2234 }
 0xbb1   : > { %vm2253_vm4 = vcmp.le.f32.partialorder %v2221_v35, %v2235_v11 }
 0xbb2   : > { %v5499_v1 = vsel %vm2253_vm4, 1e+30, %v2221_v35 }
 0xbb3   : > { %v2273_v25 = vsel %vm908_vm12, %v5499_v1, inf }
 0xbb4   : > { %2274 = vmin.xlane.f32.xlu2 %v2273_v25 }
 0xbb8   : > { %v2238_v59 = vpop.xlane.xlu0 %2237 }
 0xbb9   : > { %vm2254_vm5 = vcmp.le.f32.partialorder %v2222_v38, %v2238_v59  ;;  %v2135_v59 = vsel %vm908_vm12, %v5444_v19, -inf }
 0xbba   : > { %v2262_v57 = vsel %vm2254_vm5, 1e+30, %v2222_v38 }
 0xbbb   : > { %v2276_v21 = vsel %vm908_vm12, %v2262_v57, inf }
 0xbbc   : > { %2277 = vmin.xlane.f32.xlu1 %v2276_v21  ;;  %v2144_v21 = vsel %vm908_vm12, %v5451_v40, -inf }
 0xbc0   : > { %v2247_v7 = vpop.xlane.xlu0 %2246 }
 0xbc1   : > { %vm2257_vm6 = vcmp.le.f32.partialorder %v2225_v15, %v2247_v7  ;;  %v2141_v7 = vsel %vm908_vm12, %v5442_v32, -inf }
 0xbc2   : > { %v5504_v16 = vsel %vm2257_vm6, 1e+30, %v2225_v15 }
 0xbc3   : > { %v2285_v14 = vsel %vm908_vm12, %v5504_v16, inf }
 0xbc4   : > { %2286 = vmin.xlane.f32.xlu2 %v2285_v14 }
 0xbc8   : > { %v2272_v45 = vpop.xlane.xlu0 %2271 }
 0xbc9   : > { %vm2292_vm13 = vcmp.le.f32.partialorder %v5487_v62, %v2272_v45 }
 0xbca   : > { %v2300_v11 = vsel %vm2292_vm13, 1e+30, %v5487_v62 }
 0xbcb   : > { %v2310_v25 = vsel %vm908_vm12, %v2300_v11, inf }
 0xbcf   : > { %v2269_v35 = vpop.xlane.xlu1 %2268  ;;  %v2241_v50 = vpop.xlane.xlu2 %2240 }
 0xbd0   : > { %vm2291_vm7 = vcmp.le.f32.partialorder %v2259_v34, %v2269_v35  ;;  %vm2255_vm8 = vcmp.le.f32.partialorder %v2223_v48, %v2241_v50 }
 0xbd1   : > { %v2299_v3 = vsel %vm2291_vm7, 1e+30, %v2259_v34  ;;  %v2263_v38 = vsel %vm2255_vm8, 1e+30, %v2223_v48  ;;  %v2132_v48 = vsel %vm908_vm12, %v5438_v37, -inf }
 0xbd2   : > { %v2307_v0 = vsel %vm908_vm12, %v2299_v3, inf  ;;  %v2279_v15 = vsel %vm908_vm12, %v2263_v38, inf  ;;  %v2128_v3 = vpop.xlane.xlu0 %2127 }
 0xbd3   : > { %2308 = vmin.xlane.f32.xlu0 %v2307_v0 }
 0xbd7   : > { %v2125_v26 = vpop.xlane.xlu1 %2124  ;;  %v2250_v51 = vpop.xlane.xlu2 %2249 }
 0xbd8   : > { %vm2258_vm9 = vcmp.le.f32.partialorder %v2226_v28, %v2250_v51  ;;  %v2347_v50 = vsub.f32 %v5394_v12, %v2125_v26 }
 0xbd9   : > { %v2266_v46 = vsel %vm2258_vm9, 1e+30, %v2226_v28  ;;  %v2129_v28 = vsel %vm908_vm12, %v5430_v2, -inf }
 0xbda   : > { %v2288_v54 = vsel %vm908_vm12, %v2266_v46, inf  ;;  %v2355_v0 = vmul.f32 1.442695, %v2347_v50 }
 0xbdb   : > { %2280 = vmin.xlane.f32.xlu0 %v2279_v15  ;;  %2289 = vmin.xlane.f32.xlu1 %v2288_v54 }
 0xbdc   : > { %4511 = vpow2.f32 %v2355_v0 }
 0xbdf   : > { %v2244_v52 = vpop.xlane.xlu1 %2243 }
 0xbe0   : > { %vm2256_vm10 = vcmp.le.f32.partialorder %v2224_v31, %v2244_v52 }
 0xbe1   : > { %v5511_v49 = vsel %vm2256_vm10, 1e+30, %v2224_v31  ;;  %v2138_v31 = vsel %vm908_vm12, %v5453_v23, -inf }
 0xbe2   : > { %v2282_v34 = vsel %vm908_vm12, %v5511_v49, inf  ;;  %v4512_v52 = vpop.eup %4511 }
 0xbe3   : > { %2283 = vmin.xlane.f32.xlu2 %v2282_v34  ;;  %2133 = vmax.xlane.f32.xlu0 %v2132_v48 }
 0xbe4   : > { %2130 = vmax.xlane.f32.xlu1 %v2129_v28 }
 0xbeb   : > { %2311 = vmin.xlane.f32.xlu2 %v2310_v25 }
 0xbec   : > { %2139 = vmax.xlane.f32.xlu1 %v2138_v31 }
 0xbf3   : > { %2136 = vmax.xlane.f32.xlu2 %v2135_v59 }
 0xbf4   : > { %2145 = vmax.xlane.f32.xlu1 %v2144_v21 }
 0xbfb   : > { %2142 = vmax.xlane.f32.xlu2 %v2141_v7 }
 0xc27   : > { %v2275_v51 = vpop.xlane.xlu2 %2274 }
 0xc28   : > { %vm2293_vm4 = vcmp.le.f32.partialorder %v5499_v1, %v2275_v51 }
 0xc2f   : > { %v2278_v62 = vpop.xlane.xlu1 %2277 }
 0xc30   : > { %vm2294_vm14 = vcmp.le.f32.partialorder %v2262_v57, %v2278_v62 }
 0xc31   : > { %v2302_v14 = vsel %vm2294_vm14, 1e+30, %v2262_v57 }
 0xc32   : > { %v2316_v35 = vsel %vm908_vm12, %v2302_v14, inf }
 0xc33   : > { %2317 = vmin.xlane.f32.xlu2 %v2316_v35 }
 0xc37   : > { %v2287_v57 = vpop.xlane.xlu2 %2286 }
 0xc38   : > { %vm2297_vm5 = vcmp.le.f32.partialorder %v5504_v16, %v2287_v57 }
 0xc46   : > { %v2309_v15 = vpop.xlane.xlu0 %2308 }
 0xc47   : > { %v2331_v54 = vmin.f32 %v2309_v15, %v2125_v26  ;;  %v2348_v26 = vsub.f32 %v5404_v5, %v2128_v3 }
 0xc49   : > { %vm2339_vm15 = vcmp.ge.f32.partialorder %v5394_v12, %v2331_v54  ;;  %v2357_v21 = vmul.f32 1.442695, %v2348_v26 }
 0xc4a   : > { %v5533_v45 = vsel %vm2339_vm15, %v4512_v52, 0.0 }
 0xc4b   : > { %v2379_v34 = vsel %vm908_vm12, %v5533_v45, 0.0  ;;  %4513 = vpow2.f32 %v2357_v21 }
 0xc4c   : > { %2380 = vadd.xlane.f32.xlu1 %v2379_v34 }
 0xc4e   : > { %v2281_v48 = vpop.xlane.xlu0 %2280  ;;  %v2290_v28 = vpop.xlane.xlu1 %2289 }
 0xc4f   : > { %vm2295_vm1 = vcmp.le.f32.partialorder %v2263_v38, %v2281_v48  ;;  %vm2298_vm2 = vcmp.le.f32.partialorder %v2266_v46, %v2290_v28 }
 0xc50   : > { %v2303_v11 = vsel %vm2295_vm1, 1e+30, %v2263_v38  ;;  %v2306_v25 = vsel %vm2298_vm2, 1e+30, %v2266_v46  ;;  %v2301_v46 = vsel %vm2293_vm4, 1e+30, %v5499_v1 }
 0xc51   : > { %v2328_v31 = vsel %vm908_vm12, %v2306_v25, inf  ;;  %v2319_v12 = vsel %vm908_vm12, %v2303_v11, inf  ;;  %v4514_v14 = vpop.eup %4513  ;;  %v2313_v50 = vsel %vm908_vm12, %v2301_v46, inf }
 0xc52   : > { %2329 = vmin.xlane.f32.xlu2 %v2328_v31 }
 0xc54   : > { %2320 = vmin.xlane.f32.xlu1 %v2319_v12 }
 0xc56   : > { %v2284_v59 = vpop.xlane.xlu2 %2283  ;;  %v2134_v15 = vpop.xlane.xlu0 %2133 }
 0xc57   : > { %vm2296_vm6 = vcmp.le.f32.partialorder %v5511_v49, %v2284_v59  ;;  %v2350_v54 = vsub.f32 %v5438_v37, %v2134_v15  ;;  %v2131_v34 = vpop.xlane.xlu1 %2130 }
 0xc58   : > { %v2304_v0 = vsel %vm2296_vm6, 1e+30, %v5511_v49 }
 0xc59   : > { %v2322_v1 = vsel %vm908_vm12, %v2304_v0, inf }
 0xc5e   : > { %v2312_v7 = vpop.xlane.xlu2 %2311 }
 0xc5f   : > { %v2332_v62 = vmin.f32 %v2312_v7, %v2128_v3  ;;  %v5566_v25 = vpop.xlane.xlu1 %2139 }
 0xc61   : > { %vm2340_vm3 = vcmp.ge.f32.partialorder %v5404_v5, %v2332_v62  ;;  %v2305_v5 = vsel %vm2297_vm5, 1e+30, %v5504_v16  ;;  %v2361_v16 = vmul.f32 1.442695, %v2350_v54 }
 0xc62   : > { %v5541_v35 = vsel %vm2340_vm3, %v4514_v14, 0.0  ;;  %v2325_v3 = vsel %vm908_vm12, %v2305_v5, inf  ;;  %v2349_v5 = vsub.f32 %v5430_v2, %v2131_v34 }
 0xc63   : > { %v2382_v38 = vsel %vm908_vm12, %v5541_v35, 0.0  ;;  %4515 = vpow2.f32 %v2361_v16 }
 0xc64   : > { %2383 = vadd.xlane.f32.xlu0 %v2382_v38 }
 0xc66   : > { %v2137_v51 = vpop.xlane.xlu2 %2136 }
 0xc67   : > { %v5568_v31 = vpop.xlane.xlu1 %2145  ;;  %v2351_v26 = vsub.f32 %v5444_v19, %v2137_v51 }
 0xc69   : > { %v4516_v28 = vpop.eup %4515  ;;  %v2363_v59 = vmul.f32 1.442695, %v2351_v26 }
 0xc6b   : > { %4517 = vpow2.f32 %v2363_v59 }
 0xc6c   : > { %2314 = vmin.xlane.f32.xlu0 %v2313_v50 }
 0xc6d   : > { %2536 = vrot.lane.b32.xlu1 %v4879_v6, %s4639_s25 }
 0xc6e   : > { %v5559_v52 = vpop.xlane.xlu2 %2142 }
 0xc71   : > { %v4518_v7 = vpop.eup %4517 }
 0xc74   : > { %2326 = vmin.xlane.f32.xlu0 %v2325_v3 }
 0xc7c   : > { %2323 = vmin.xlane.f32.xlu0 %v2322_v1 }
 0xc90   : > { %2636 = vrot.lane.b32.xlu0 %v4879_v6, %s4640_s26 }
 0xca6   : > { %v2318_v57 = vpop.xlane.xlu2 %2317 }
 0xca7   : > { %v2334_v48 = vmin.f32 %v2318_v57, %v2134_v15 }
 0xca9   : > { %vm2342_vm7 = vcmp.ge.f32.partialorder %v5438_v37, %v2334_v48 }
 0xcaa   : > { %v5562_v49 = vsel %vm2342_vm7, %v4516_v28, 0.0 }
 0xcab   : > { %v2388_v11 = vsel %vm908_vm12, %v5562_v49, 0.0 }
 0xcac   : > { %2389 = vadd.xlane.f32.xlu1 %v2388_v11 }
 0xcbf   : > { %v2381_v12 = vpop.xlane.xlu1 %2380 }
 0xcc0   : > { %4519 = vrcp.f32 %v2381_v12  ;;  %v2414_v15 = vand.u32 2147483648, %v2381_v12  ;;  %vm2408_vm10 = vweird.f32 %v2381_v12  ;;  %v2412_v54 = vand.u32 2147483647, %v2381_v12 }
 0xcc2   : > { %vm2413_vm14 = vcmp.eq.f32.partialorder %v2412_v54, 8.507059e+37 }
 0xcc5   : > { %2586 = vrot.lane.b32.xlu1 %v4891_v41, %s4639_s25 }
 0xcc6   : > { %v4520_v14 = vpop.eup %4519 }
 0xcc7   : > { %v2321_v37 = vpop.xlane.xlu1 %2320  ;;  %v2404_v46 = vmul.f32 %v4520_v14, %v2381_v12  ;;  %vm2409_vm9 = vweird.f32 %v4520_v14 }
 0xcc8   : > { %v2335_v21 = vmin.f32 %v2321_v37, %v2137_v51  ;;  %v2353_v51 = vsub.f32 %v5442_v32, %v5559_v52  ;;  %vm5585_vm13 = vmor %vm2408_vm10, %vm2409_vm9  ;;  %v2415_v37 = vor.u32 1.1754944e-38, %v2414_v15 }
 0xcc9   : > { %v2405_v50 = vsub.f32 1.0, %v2404_v46 }
 0xcca   : > { %vm2343_vm8 = vcmp.ge.f32.partialorder %v5444_v19, %v2335_v21  ;;  %v2359_v19 = vmul.f32 1.442695, %v2349_v5  ;;  %v2367_v59 = vmul.f32 1.442695, %v2353_v51  ;;  %v2330_v51 = vpop.xlane.xlu2 %2329 }
 0xccb   : > { %v5574_v62 = vsel %vm2343_vm8, %v4518_v7, 0.0  ;;  %v2406_v3 = vmul.f32 %v4520_v14, %v2405_v50 }
 0xccc   : > { %v2391_v38 = vsel %vm908_vm12, %v5574_v62, 0.0 }
 0xccd   : > { %2392 = vadd.xlane.f32.xlu0 %v2391_v38  ;;  %2684 = vrot.lane.b32.xlu1 %v4891_v41, %s4640_s26  ;;  %v2407_v1 = vadd.f32 %v4520_v14, %v2406_v3  ;;  %v2354_v38 = vsub.f32 %v5451_v40, %v5568_v31 }
 0xccf   : > { %v2411_v48 = vsel %vm5585_vm13, %v4520_v14, %v2407_v1 }
 0xcd5   : > { %2611 = vrot.lane.b32.xlu1 %v4899_v8, %s4639_s25 }
 0xcd7   : > { %v2384_v0 = vpop.xlane.xlu0 %2383 }
 0xcd8   : > { %4521 = vrcp.f32 %v2384_v0  ;;  %v2429_v46 = vand.u32 2147483648, %v2384_v0  ;;  %v2427_v50 = vand.u32 2147483647, %v2384_v0  ;;  %vm2423_vm2 = vweird.f32 %v2384_v0 }
 0xcd9   : > { %4523 = vpow2.f32 %v2359_v19  ;;  %v2369_v19 = vmul.f32 1.442695, %v2354_v38 }
 0xcda   : > { %4525 = vpow2.f32 %v2367_v59  ;;  %v2430_v1 = vor.u32 1.1754944e-38, %v2429_v46  ;;  %vm2428_vm4 = vcmp.eq.f32.partialorder %v2427_v50, 8.507059e+37 }
 0xcdb   : > { %4527 = vpow2.f32 %v2369_v19 }
 0xcdd   : > { %2706 = vrot.lane.b32.xlu1 %v4901_v63, %s4641_s27  ;;  %v2416_v63 = vsel %vm2413_vm14, %v2415_v37, %v2411_v48 }
 0xcde   : > { %v4522_v16 = vpop.eup %4521  ;;  %v2417_v3 = vmul.f32 %v2416_v63, %v5533_v45 }
 0xcdf   : > { %v2419_v28 = vmul.f32 %v4522_v16, %v2384_v0  ;;  %v2537_v11 = vpop.permute.xlu1 %2536  ;;  %v2315_v26 = vpop.xlane.xlu0 %2314  ;;  %vm2424_vm1 = vweird.f32 %v4522_v16  ;;  %v2352_v0 = vsub.f32 %v5453_v23, %v5566_v25 }
 0xce0   : > { %v2333_v21 = vmin.f32 %v2315_v26, %v2131_v34  ;;  %2549 = vmatpush.bf16.msra.mxu0 %v2537_v11  ;;  %v4524_v7 = vpop.eup %4523  ;;  %vm2425_vm3 = vmor %vm2423_vm2, %vm2424_vm1  ;;  %v2523_v48 = vpack.c.bf16 %v2417_v3, %v2417_v3  ;;  %v2338_v11 = vmin.f32 %v2330_v51, %v5568_v31 }
 0xce1   : > { %v2420_v12 = vsub.f32 1.0, %v2419_v28  ;;  %2634 = vrot.lane.b32.xlu0 %v4881_v9, %s4641_s27  ;;  %v4526_v45 = vpop.eup %4525  ;;  %v2365_v37 = vmul.f32 1.442695, %v2352_v0 }
 0xce2   : > { %vm2341_vm15 = vcmp.ge.f32.partialorder %v5430_v2, %v2333_v21  ;;  %v2533_v59 = vunpack.c.l.b16 %v2523_v48  ;;  %vm2346_vm6 = vcmp.ge.f32.partialorder %v5451_v40, %v2338_v11 }
 0xce3   : > { %v2421_v14 = vmul.f32 %v4522_v16, %v2420_v12  ;;  %v5598_v5 = vsel %vm2341_vm15, %v4524_v7, 0.0  ;;  %v4528_v7 = vpop.eup %4527  ;;  %4529 = vpow2.f32 %v2365_v37 }
 0xce4   : > { %v2385_v34 = vsel %vm908_vm12, %v5598_v5, 0.0 }
 0xce5   : > { %v2422_v9 = vadd.f32 %v4522_v16, %v2421_v14  ;;  %2386 = vadd.xlane.f32.xlu2 %v2385_v34 }
 0xce7   : > { %v2426_v15 = vsel %vm2425_vm3, %v4522_v16, %v2422_v9  ;;  %v2327_v2 = vpop.xlane.xlu0 %2326 }
 0xce8   : > { %v2431_v54 = vsel %vm2428_vm4, %v2430_v1, %v2426_v15  ;;  %v2337_v57 = vmin.f32 %v2327_v2, %v5559_v52 }
 0xce9   : > { %v2432_v28 = vmul.f32 %v2431_v54, %v5541_v35  ;;  %2660 = vrot.lane.b32.xlu0 %v4885_v22, %s4640_s26  ;;  %v4530_v40 = vpop.eup %4529 }
 0xcea   : > { %vm2345_vm5 = vcmp.ge.f32.partialorder %v5442_v32, %v2337_v57  ;;  %v5619_v32 = vsel %vm2346_vm6, %v4528_v7, 0.0 }
 0xceb   : > { %v2524_v16 = vpack.c.bf16 %v2432_v28, %v2432_v28  ;;  %v5611_v26 = vsel %vm2345_vm5, %v4526_v45, 0.0  ;;  %v2400_v38 = vsel %vm908_vm12, %v5619_v32, 0.0 }
 0xcec   : > { %v2397_v52 = vsel %vm908_vm12, %v5611_v26, 0.0 }
 0xced   : > { %v2534_v35 = vunpack.c.l.b16 %v2524_v16  ;;  %2398 = vadd.xlane.f32.xlu2 %v2397_v52 }
 0xcef   : > { %v2324_v21 = vpop.xlane.xlu0 %2323  ;;  %v2535_v12 = vpack.c.b16 %v2534_v35, %v2533_v59 }
 0xcf0   : > { %v2336_v31 = vmin.f32 %v2324_v21, %v5566_v25 }
 0xcf1   : > { %4251 = vmatmul.msk.bf16.vlgmr.msra.gmra.mxu0 %vm908_vm12, %v2535_v12  ;;  %2658 = vrot.lane.b32.xlu0 %v4887_v24, %s4641_s27 }
 0xcf2   : > { %vm2344_vm7 = vcmp.ge.f32.partialorder %v5453_v23, %v2336_v31 }
 0xcf3   : > { %v5627_v63 = vsel %vm2344_vm7, %v4530_v40, 0.0 }
 0xcf4   : > { %v2394_v24 = vsel %vm908_vm12, %v5627_v63, 0.0 }
 0xcf5   : > { %2401 = vadd.xlane.f32.xlu2 %v2400_v38 }
 0xcf9   : > { %2708 = vrot.lane.b32.xlu0 %v4899_v8, %s4640_s26 }
 0xcfd   : > { %2395 = vadd.xlane.f32.xlu2 %v2394_v24 }
 0xd02   : > { %v2637_v46 = vpop.permute.xlu0 %2636 }
 0xd03   : > { %v2642_v14 = vsel %vm791_vm11, %v2637_v46, 0 }
 0xd04   : > { %2651 = vmatpush.bf16.xpose.msrb.mxu0 %v2642_v14 }
 0xd15   : > { %2561 = vrot.lane.b32.xlu2 %v4885_v22, %s4639_s25 }
 0xd1d   : > { %2682 = vrot.lane.b32.xlu2 %v4893_v42, %s4641_s27 }
 0xd1f   : > { %v2390_v23 = vpop.xlane.xlu1 %2389 }
 0xd20   : > { %4531 = vrcp.f32 %v2390_v23  ;;  %v2459_v52 = vand.u32 2147483648, %v2390_v23  ;;  %vm2453_vm10 = vweird.f32 %v2390_v23  ;;  %v2457_v35 = vand.u32 2147483647, %v2390_v23 }
 0xd22   : > { %v2460_v24 = vor.u32 1.1754944e-38, %v2459_v52  ;;  %vm2458_vm1 = vcmp.eq.f32.partialorder %v2457_v35, 8.507059e+37 }
 0xd26   : > { %v4532_v1 = vpop.eup %4531 }
 0xd27   : > { %v2449_v51 = vmul.f32 %v4532_v1, %v2390_v23  ;;  %vm2454_vm8 = vweird.f32 %v4532_v1 }
 0xd28   : > { %vm5649_vm13 = vmor %vm2453_vm10, %vm2454_vm8 }
 0xd29   : > { %v2450_v42 = vsub.f32 1.0, %v2449_v51 }
 0xd2b   : > { %v2451_v57 = vmul.f32 %v4532_v1, %v2450_v42 }
 0xd2d   : > { %v2452_v11 = vadd.f32 %v4532_v1, %v2451_v57 }
 0xd2f   : > { %v2456_v40 = vsel %vm5649_vm13, %v4532_v1, %v2452_v11 }
 0xd37   : > { %v2587_v25 = vpop.permute.xlu1 %2586 }
 0xd38   : > { %2599 = vmatpush.bf16.msrb.mxu2 %v2587_v25 }
 0xd3f   : > { %v2685_v50 = vpop.permute.xlu1 %2684 }
 0xd40   : > { %v2690_v34 = vsel %vm791_vm11, %v2685_v50, 0  ;;  %v5637_v9 = vpop.xlane.xlu0 %2392 }
 0xd41   : > { %2699 = vmatpush.bf16.xpose.msra.mxu2 %v2690_v34  ;;  %v2461_v34 = vsel %vm2458_vm1, %v2460_v24, %v2456_v40  ;;  %vm2468_vm8 = vweird.f32 %v5637_v9  ;;  %v2472_v24 = vand.u32 2147483647, %v5637_v9 }
 0xd42   : > { %v2462_v1 = vmul.f32 %v2461_v34, %v5562_v49 }
 0xd44   : > { %v2526_v49 = vpack.c.bf16 %v2462_v1, %v2462_v1 }
 0xd47   : > { %v2612_v3 = vpop.permute.xlu1 %2611 }
 0xd48   : > { %2624 = vmatpush.bf16.msrb.mxu3 %v2612_v3 }
 0xd53   : > { %v2635_v19 = vpop.permute.xlu0 %2634 }
 0xd54   : > { %4257 = vmatmul.msk.bf16.vlgmr.msrb.gmra.mxu0 %vm791_vm11, %v2635_v19 }
 0xd58   : > { %v2387_v15 = vpop.xlane.xlu2 %2386 }
 0xd59   : > { %4533 = vrcp.f32 %v2387_v15  ;;  %v2444_v21 = vand.u32 2147483648, %v2387_v15  ;;  %vm2438_vm14 = vweird.f32 %v2387_v15  ;;  %v2442_v31 = vand.u32 2147483647, %v2387_v15 }
 0xd5a   : > { %4535 = vrcp.f32 %v5637_v9 }
 0xd5b   : > { %v5640_v2 = vpop.permute.xlu0 %2660  ;;  %v2445_v50 = vor.u32 1.1754944e-38, %v2444_v21  ;;  %vm2443_vm2 = vcmp.eq.f32.partialorder %v2442_v31, 8.507059e+37 }
 0xd5f   : > { %v4534_v54 = vpop.eup %4533 }
 0xd60   : > { %v2434_v48 = vmul.f32 %v4534_v54, %v2387_v15  ;;  %v2399_v28 = vpop.xlane.xlu2 %2398  ;;  %v5643_v45 = vpop.eup %4535  ;;  %vm2439_vm9 = vweird.f32 %v4534_v54 }
 0xd61   : > { %4537 = vrcp.f32 %v2399_v28  ;;  %v2464_v37 = vmul.f32 %v5643_v45, %v5637_v9  ;;  %vm2440_vm15 = vmor %vm2438_vm14, %vm2439_vm9  ;;  %vm2498_vm4 = vweird.f32 %v2399_v28  ;;  %v2502_v11 = vand.u32 2147483647, %v2399_v28 }
 0xd62   : > { %v2435_v0 = vsub.f32 1.0, %v2434_v48  ;;  %vm2469_vm6 = vweird.f32 %v5643_v45 }
 0xd63   : > { %v5645_v16 = vpop.permute.xlu0 %2658  ;;  %v2465_v25 = vsub.f32 1.0, %v2464_v37  ;;  %vm2503_vm7 = vcmp.eq.f32.partialorder %v2502_v11, 8.507059e+37  ;;  %vm5663_vm9 = vmor %vm2468_vm8, %vm2469_vm6 }
 0xd64   : > { %v2436_v59 = vmul.f32 %v4534_v54, %v2435_v0 }
 0xd65   : > { %v2466_v57 = vmul.f32 %v5643_v45, %v2465_v25 }
 0xd66   : > { %v2437_v7 = vadd.f32 %v4534_v54, %v2436_v59 }
 0xd67   : > { %v4538_v38 = vpop.eup %4537  ;;  %v2467_v21 = vadd.f32 %v5643_v45, %v2466_v57 }
 0xd68   : > { %v2441_v46 = vsel %vm2440_vm15, %v4534_v54, %v2437_v7  ;;  %v2494_v14 = vmul.f32 %v4538_v38, %v2399_v28  ;;  %v2402_v23 = vpop.xlane.xlu2 %2401  ;;  %vm2499_vm3 = vweird.f32 %v4538_v38  ;;  %v2504_v54 = vand.u32 2147483648, %v2399_v28 }
 0xd69   : > { %4539 = vrcp.f32 %v2402_v23  ;;  %v2446_v19 = vsel %vm2443_vm2, %v2445_v50, %v2441_v46  ;;  %vm2500_vm5 = vmor %vm2498_vm4, %vm2499_vm3  ;;  %v2519_v40 = vand.u32 2147483648, %v2402_v23  ;;  %v2471_v25 = vsel %vm5663_vm9, %v5643_v45, %v2467_v21 }
 0xd6a   : > { %v2495_v3 = vsub.f32 1.0, %v2494_v14  ;;  %v2447_v48 = vmul.f32 %v2446_v19, %v5598_v5  ;;  %v2505_v12 = vor.u32 1.1754944e-38, %v2504_v54  ;;  %v2474_v5 = vand.u32 2147483648, %v5637_v9 }
 0xd6b   : > { %v2709_v51 = vpop.permute.xlu0 %2708  ;;  %v2517_v14 = vand.u32 2147483647, %v2402_v23  ;;  %vm2513_vm13 = vweird.f32 %v2402_v23  ;;  %vm2473_vm15 = vcmp.eq.f32.partialorder %v2472_v24, 8.507059e+37 }
 0xd6c   : > { %v2496_v42 = vmul.f32 %v4538_v38, %v2495_v3  ;;  %v2714_v15 = vsel %vm791_vm11, %v2709_v51, 0  ;;  %v2525_v7 = vpack.c.bf16 %v2447_v48, %v2447_v48  ;;  %v2559_v51 = vunpack.c.l.b16 %v2526_v49 }
 0xd6d   : > { %2723 = vmatpush.bf16.xpose.msra.mxu3 %v2714_v15  ;;  %v2520_v15 = vor.u32 1.1754944e-38, %v2519_v40  ;;  %vm2518_vm1 = vcmp.eq.f32.partialorder %v2517_v14, 8.507059e+37  ;;  %v2666_v48 = vsel %vm791_vm11, %v5640_v2, 0 }
 0xd6e   : > { %v2497_v0 = vadd.f32 %v4538_v38, %v2496_v42  ;;  %v2558_v50 = vunpack.c.l.b16 %v2525_v7  ;;  %v2475_v42 = vor.u32 1.1754944e-38, %v2474_v5 }
 0xd6f   : > { %v4540_v52 = vpop.eup %4539 }
 0xd70   : > { %v2501_v59 = vsel %vm2500_vm5, %v4538_v38, %v2497_v0  ;;  %v2509_v35 = vmul.f32 %v4540_v52, %v2402_v23  ;;  %v2396_v37 = vpop.xlane.xlu2 %2395  ;;  %vm2514_vm10 = vweird.f32 %v4540_v52  ;;  %v2476_v54 = vsel %vm2473_vm15, %v2475_v42, %v2471_v25 }
 0xd71   : > { %4541 = vrcp.f32 %v2396_v37  ;;  %v2506_v28 = vsel %vm2503_vm7, %v2505_v12, %v2501_v59  ;;  %vm2515_vm14 = vmor %vm2513_vm13, %vm2514_vm10  ;;  %v2560_v11 = vpack.c.b16 %v2559_v51, %v2558_v50  ;;  %v2489_v59 = vand.u32 2147483648, %v2396_v37  ;;  %v5684_v50 = vpop.f32.mrf.mxu0  ;;  %v4256_v51 = vld [vmem:[%s6306_s5 + $0x38] sm:$0xff] }
 0xd72   : > { %v2510_v31 = vsub.f32 1.0, %v2509_v35  ;;  %v2507_v34 = vmul.f32 %v2506_v28, %v5611_v26  ;;  %v2477_v12 = vmul.f32 %v2476_v54, %v5574_v62  ;;  %vm2483_vm3 = vweird.f32 %v2396_v37  ;;  %v2707_v62 = vpop.permute.xlu1 %2706 }
 0xd74   : > { %v2511_v46 = vmul.f32 %v4540_v52, %v2510_v31  ;;  %v2529_v0 = vpack.c.bf16 %v2507_v34, %v2507_v34  ;;  %v2490_v31 = vor.u32 1.1754944e-38, %v2489_v59  ;;  %v2527_v40 = vpack.c.bf16 %v2477_v12, %v2477_v12  ;;  %v4255_v34 = vld [vmem:[%s6306_s5 + $0x30] sm:$0xff] }
 0xd76   : > { %v2512_v3 = vadd.f32 %v4540_v52, %v2511_v46  ;;  %v2608_v49 = vunpack.c.l.b16 %v2529_v0  ;;  %v2583_v46 = vunpack.c.l.b16 %v2527_v40 }
 0xd77   : > { %v4542_v19 = vpop.eup %4541 }
 0xd78   : > { %v2516_v1 = vsel %vm2515_vm14, %v4540_v52, %v2512_v3  ;;  %v2479_v9 = vmul.f32 %v4542_v19, %v2396_v37  ;;  %v2562_v57 = vpop.permute.xlu2 %2561  ;;  %vm2484_vm2 = vweird.f32 %v4542_v19  ;;  %v2487_v52 = vand.u32 2147483647, %v2396_v37 }
 0xd79   : > { %v2521_v45 = vsel %vm2518_vm1, %v2520_v15, %v2516_v1  ;;  %2574 = vmatpush.bf16.msrb.mxu1 %v2562_v57  ;;  %vm2485_vm4 = vmor %vm2483_vm3, %vm2484_vm2 }
 0xd7a   : > { %v2522_v26 = vmul.f32 %v2521_v45, %v5619_v32  ;;  %v2480_v23 = vsub.f32 1.0, %v2479_v9  ;;  %vm2488_vm5 = vcmp.eq.f32.partialorder %v2487_v52, 8.507059e+37 }
 0xd7c   : > { %v2530_v35 = vpack.c.bf16 %v2522_v26, %v2522_v26  ;;  %v2481_v21 = vmul.f32 %v4542_v19, %v2480_v23  ;;  %4252 = vmatmul.msk.bf16.vlgmr.msrb.gmra.mxu1 %vm908_vm12, %v2560_v11 }
 0xd7d   : > { %2675 = vmatpush.bf16.xpose.msra.mxu1 %v2666_v48 }
 0xd7e   : > { %v2609_v7 = vunpack.c.l.b16 %v2530_v35  ;;  %v2482_v2 = vadd.f32 %v4542_v19, %v2481_v21 }
 0xd80   : > { %v2486_v5 = vsel %vm2485_vm4, %v4542_v19, %v2482_v2  ;;  %v2610_v32 = vpack.c.b16 %v2609_v7, %v2608_v49  ;;  %v2683_v37 = vpop.permute.xlu2 %2682 }
 0xd81   : > { %v2491_v28 = vsel %vm2488_vm5, %v2490_v31, %v2486_v5 }
 0xd82   : > { %v2492_v38 = vmul.f32 %v2491_v28, %v5627_v63  ;;  %4254 = vmatmul.msk.bf16.vlgmr.msrb.gmra.mxu3 %vm908_vm12, %v2610_v32  ;;  %v5686_v63 = vpop.f32.mrf.mxu0 }
 0xd84   : > { %v2528_v24 = vpack.c.bf16 %v2492_v38, %v2492_v38 }
 0xd86   : > { %v2584_v14 = vunpack.c.l.b16 %v2528_v24 }
 0xd88   : > { %v2585_v25 = vpack.c.b16 %v2584_v14, %v2583_v46 }
 0xd8a   : > { %4253 = vmatmul.msk.bf16.vlgmr.msrb.gmra.mxu2 %vm908_vm12, %v2585_v25 }
 0xd8c   : > { %4258 = vmatmul.msk.bf16.vlgmr.msra.gmra.mxu1 %vm791_vm11, %v5645_v16 }
 0xd92   : > { %4260 = vmatmul.msk.bf16.vlgmr.msra.gmra.mxu3 %vm791_vm11, %v2707_v62 }
 0xd9a   : > { %4259 = vmatmul.msk.bf16.vlgmr.msra.gmra.mxu2 %vm791_vm11, %v2683_v37 }
 0xdd1   : > { %v2653_v3 = vpop.f32.mrf.mxu0 }
 0xdd2   : > { %v5691_v19 = vadd.f32 %v4255_v34, %v2653_v3 }
 0xdd4   : > { %v2754_v16 = vsel %vm908_vm12, %v5691_v19, inf }
 0xdd5   : > { %2755 = vmin.xlane.f32.xlu2 %v2754_v16 }
 0xdd9   : > { %v2655_v42 = vpop.f32.mrf.mxu0 }
 0xdda   : > { %v5698_v15 = vadd.f32 %v4256_v51, %v2655_v42 }
 0xddc   : > { %v2757_v1 = vsel %vm908_vm12, %v5698_v15, inf }
 0xddd   : > { %2758 = vmin.xlane.f32.xlu0 %v2757_v1 }
 0xdf9   : > { %v5702_v9 = vpop.f32.mrf.mxu1 }
 0xe01   : > { %v5704_v57 = vpop.f32.mrf.mxu1 }
 0xe02   : > { %v4381_v54 = vpack.i.bf16 %v5704_v57, %v5702_v9  ;;  %v4326_v9 = vld [vmem:[%s6307_s6 + $0x8] sm:$0xff] }
 0xe05   : > { %v5708_v48 = vpop.f32.mrf.mxu3 }
 0xe09   : > { %v2677_v45 = vpop.f32.mrf.mxu1 }
 0xe0a   : > { %v5710_v0 = vadd.f32 %v4255_v34, %v2677_v45 }
 0xe0c   : > { %v2760_v26 = vsel %vm908_vm12, %v5710_v0, inf }
 0xe0d   : > { %v5714_v23 = vpop.f32.mrf.mxu2  ;;  %v5716_v11 = vpop.f32.mrf.mxu3  ;;  %2761 = vmin.xlane.f32.xlu1 %v2760_v26 }
 0xe0e   : > { %v4411_v59 = vpack.i.bf16 %v5716_v11, %v5708_v48 }
 0xe11   : > { %v2679_v35 = vpop.f32.mrf.mxu1 }
 0xe12   : > { %v5720_v21 = vadd.f32 %v4256_v51, %v2679_v35 }
 0xe14   : > { %v2763_v52 = vsel %vm908_vm12, %v5720_v21, inf }
 0xe15   : > { %v5724_v12 = vpop.f32.mrf.mxu2  ;;  %v2725_v49 = vpop.f32.mrf.mxu3  ;;  %2764 = vmin.xlane.f32.xlu2 %v2763_v52 }
 0xe16   : > { %v4396_v7 = vpack.i.bf16 %v5724_v12, %v5714_v23  ;;  %v5728_v2 = vadd.f32 %v4255_v34, %v2725_v49 }
 0xe18   : > { %v2772_v31 = vsel %vm908_vm12, %v5728_v2, inf }
 0xe1d   : > { %2773 = vmin.xlane.f32.xlu2 %v2772_v31  ;;  %v2701_v5 = vpop.f32.mrf.mxu2  ;;  %v2727_v40 = vpop.f32.mrf.mxu3 }
 0xe1e   : > { %v5732_v32 = vadd.f32 %v4255_v34, %v2701_v5  ;;  %v5736_v38 = vadd.f32 %v4256_v51, %v2727_v40 }
 0xe20   : > { %v2766_v28 = vsel %vm908_vm12, %v5732_v32, inf  ;;  %v2775_v25 = vsel %vm908_vm12, %v5736_v38, inf }
 0xe21   : > { %2767 = vmin.xlane.f32.xlu0 %v2766_v28 }
 0xe25   : > { %v2703_v24 = vpop.f32.mrf.mxu2 }
 0xe26   : > { %v5738_v46 = vadd.f32 %v4256_v51, %v2703_v24 }
 0xe28   : > { %v2769_v14 = vsel %vm908_vm12, %v5738_v46, inf }
 0xe29   : > { %2770 = vmin.xlane.f32.xlu1 %v2769_v14  ;;  %2776 = vmin.xlane.f32.xlu0 %v2775_v25 }
 0xe48   : > { %v2756_v62 = vpop.xlane.xlu2 %2755 }
 0xe49   : > { %vm2778_vm6 = vcmp.le.f32.partialorder %v5691_v19, %v2756_v62 }
 0xe4a   : > { %v2786_v37 = vsel %vm2778_vm6, 1e+30, %v5691_v19 }
 0xe4b   : > { %v2794_v34 = vsel %vm908_vm12, %v2786_v37, inf }
 0xe4c   : > { %2795 = vmin.xlane.f32.xlu1 %v2794_v34 }
 0xe50   : > { %v2759_v3 = vpop.xlane.xlu0 %2758 }
 0xe51   : > { %vm2779_vm7 = vcmp.le.f32.partialorder %v5698_v15, %v2759_v3 }
 0xe52   : > { %v2787_v16 = vsel %vm2779_vm7, 1e+30, %v5698_v15 }
 0xe53   : > { %v2797_v51 = vsel %vm908_vm12, %v2787_v16, inf }
 0xe54   : > { %2798 = vmin.xlane.f32.xlu2 %v2797_v51 }
 0xe80   : > { %v2762_v42 = vpop.xlane.xlu1 %2761 }
 0xe81   : > { %vm2780_vm8 = vcmp.le.f32.partialorder %v5710_v0, %v2762_v42 }
 0xe82   : > { %v2788_v1 = vsel %vm2780_vm8, 1e+30, %v5710_v0 }
 0xe83   : > { %v2800_v45 = vsel %vm908_vm12, %v2788_v1, inf }
 0xe84   : > { %2801 = vmin.xlane.f32.xlu0 %v2800_v45 }
 0xe88   : > { %v2765_v26 = vpop.xlane.xlu2 %2764 }
 0xe89   : > { %vm2781_vm9 = vcmp.le.f32.partialorder %v5720_v21, %v2765_v26 }
 0xe8a   : > { %v2789_v35 = vsel %vm2781_vm9, 1e+30, %v5720_v21 }
 0xe8b   : > { %v2803_v52 = vsel %vm908_vm12, %v2789_v35, inf }
 0xe8c   : > { %2804 = vmin.xlane.f32.xlu1 %v2803_v52 }
 0xe90   : > { %v2774_v49 = vpop.xlane.xlu2 %2773 }
 0xe91   : > { %vm2784_vm10 = vcmp.le.f32.partialorder %v5728_v2, %v2774_v49 }
 0xe92   : > { %v2792_v31 = vsel %vm2784_vm10, 1e+30, %v5728_v2 }
 0xe93   : > { %v2812_v5 = vsel %vm908_vm12, %v2792_v31, inf }
 0xe94   : > { %v2768_v28 = vpop.xlane.xlu0 %2767  ;;  %2813 = vmin.xlane.f32.xlu1 %v2812_v5 }
 0xe95   : > { %vm2782_vm13 = vcmp.le.f32.partialorder %v5732_v32, %v2768_v28 }
 0xe96   : > { %v2790_v40 = vsel %vm2782_vm13, 1e+30, %v5732_v32 }
 0xe97   : > { %v2806_v24 = vsel %vm908_vm12, %v2790_v40, inf }
 0xe98   : > { %2807 = vmin.xlane.f32.xlu2 %v2806_v24 }
 0xe9c   : > { %v2771_v14 = vpop.xlane.xlu1 %2770  ;;  %v2777_v25 = vpop.xlane.xlu0 %2776 }
 0xe9d   : > { %vm2783_vm14 = vcmp.le.f32.partialorder %v5738_v46, %v2771_v14  ;;  %vm2785_vm15 = vcmp.le.f32.partialorder %v5736_v38, %v2777_v25 }
 0xe9e   : > { %v2791_v62 = vsel %vm2783_vm14, 1e+30, %v5738_v46  ;;  %v2793_v34 = vsel %vm2785_vm15, 1e+30, %v5736_v38 }
 0xe9f   : > { %v2809_v3 = vsel %vm908_vm12, %v2791_v62, inf  ;;  %v2815_v51 = vsel %vm908_vm12, %v2793_v34, inf }
 0xea0   : > { %2810 = vmin.xlane.f32.xlu0 %v2809_v3  ;;  %2816 = vmin.xlane.f32.xlu2 %v2815_v51 }
 0xebf   : > { %v2796_v42 = vpop.xlane.xlu1 %2795 }
 0xec0   : > { %vm2818_vm1 = vcmp.le.f32.partialorder %v2786_v37, %v2796_v42 }
 0xec1   : > { %v2826_v45 = vsel %vm2818_vm1, 1e+30, %v2786_v37 }
 0xec2   : > { %v2834_v26 = vsel %vm908_vm12, %v2826_v45, inf }
 0xec3   : > { %2835 = vmin.xlane.f32.xlu0 %v2834_v26 }
 0xec7   : > { %v2799_v52 = vpop.xlane.xlu2 %2798 }
 0xec8   : > { %vm2819_vm2 = vcmp.le.f32.partialorder %v2787_v16, %v2799_v52 }
 0xec9   : > { %v2827_v49 = vsel %vm2819_vm2, 1e+30, %v2787_v16 }
 0xeca   : > { %v2837_v5 = vsel %vm908_vm12, %v2827_v49, inf }
 0xecb   : > { %2838 = vmin.xlane.f32.xlu1 %v2837_v5 }
 0xef7   : > { %v2802_v28 = vpop.xlane.xlu0 %2801 }
 0xef8   : > { %vm2820_vm3 = vcmp.le.f32.partialorder %v2788_v1, %v2802_v28 }
 0xef9   : > { %v2828_v24 = vsel %vm2820_vm3, 1e+30, %v2788_v1 }
 0xefa   : > { %v2840_v14 = vsel %vm908_vm12, %v2828_v24, inf }
 0xefb   : > { %2841 = vmin.xlane.f32.xlu2 %v2840_v14 }
 0xeff   : > { %v2805_v25 = vpop.xlane.xlu1 %2804 }
 0xf00   : > { %vm2821_vm4 = vcmp.le.f32.partialorder %v2789_v35, %v2805_v25 }
 0xf01   : > { %v2829_v3 = vsel %vm2821_vm4, 1e+30, %v2789_v35 }
 0xf02   : > { %v2843_v37 = vsel %vm908_vm12, %v2829_v3, inf }
 0xf03   : > { %2844 = vmin.xlane.f32.xlu0 %v2843_v37 }
 0xf07   : > { %v2814_v51 = vpop.xlane.xlu1 %2813 }
 0xf08   : > { %vm2824_vm5 = vcmp.le.f32.partialorder %v2792_v31, %v2814_v51 }
 0xf09   : > { %v2832_v42 = vsel %vm2824_vm5, 1e+30, %v2792_v31 }
 0xf0a   : > { %v2852_v16 = vsel %vm908_vm12, %v2832_v42, inf }
 0xf0b   : > { %2853 = vmin.xlane.f32.xlu0 %v2852_v16  ;;  %v2808_v26 = vpop.xlane.xlu2 %2807 }
 0xf0c   : > { %vm2822_vm6 = vcmp.le.f32.partialorder %v2790_v40, %v2808_v26 }
 0xf0d   : > { %v2830_v52 = vsel %vm2822_vm6, 1e+30, %v2790_v40 }
 0xf0e   : > { %v2846_v1 = vsel %vm908_vm12, %v2830_v52, inf }
 0xf0f   : > { %2847 = vmin.xlane.f32.xlu1 %v2846_v1 }
 0xf13   : > { %v2811_v5 = vpop.xlane.xlu0 %2810  ;;  %v2817_v28 = vpop.xlane.xlu2 %2816 }
 0xf14   : > { %vm2823_vm7 = vcmp.le.f32.partialorder %v2791_v62, %v2811_v5  ;;  %vm2825_vm8 = vcmp.le.f32.partialorder %v2793_v34, %v2817_v28 }
 0xf15   : > { %v5774_v35 = vsel %vm2823_vm7, 1e+30, %v2791_v62  ;;  %v2833_v14 = vsel %vm2825_vm8, 1e+30, %v2793_v34  ;;  %v2733_v34 = vsel %vm908_vm12, %v5698_v15, -inf }
 0xf16   : > { %v2849_v25 = vsel %vm908_vm12, %v5774_v35, inf  ;;  %v2855_v31 = vsel %vm908_vm12, %v2833_v14, inf }
 0xf17   : > { %2850 = vmin.xlane.f32.xlu2 %v2849_v25  ;;  %2856 = vmin.xlane.f32.xlu1 %v2855_v31 }
 0xf36   : > { %v2836_v37 = vpop.xlane.xlu0 %2835 }
 0xf37   : > { %vm2858_vm9 = vcmp.le.f32.partialorder %v2826_v45, %v2836_v37 }
 0xf38   : > { %v2866_v40 = vsel %vm2858_vm9, 1e+30, %v2826_v45 }
 0xf39   : > { %v2874_v51 = vsel %vm908_vm12, %v2866_v40, inf }
 0xf3a   : > { %2875 = vmin.xlane.f32.xlu2 %v2874_v51  ;;  %v2730_v51 = vsel %vm908_vm12, %v5691_v19, -inf }
 0xf3e   : > { %v2839_v16 = vpop.xlane.xlu1 %2838 }
 0xf3f   : > { %vm2859_vm10 = vcmp.le.f32.partialorder %v2827_v49, %v2839_v16 }
 0xf40   : > { %v2867_v26 = vsel %vm2859_vm10, 1e+30, %v2827_v49 }
 0xf41   : > { %v2877_v62 = vsel %vm908_vm12, %v2867_v26, inf }
 0xf42   : > { %2878 = vmin.xlane.f32.xlu0 %v2877_v62 }
 0xf4a   : > { %2734 = vmax.xlane.f32.xlu0 %v2733_v34 }
 0xf6e   : > { %v2842_v1 = vpop.xlane.xlu2 %2841 }
 0xf6f   : > { %vm2860_vm13 = vcmp.le.f32.partialorder %v2828_v24, %v2842_v1 }
 0xf70   : > { %v2868_v5 = vsel %vm2860_vm13, 1e+30, %v2828_v24 }
 0xf71   : > { %v2880_v28 = vsel %vm908_vm12, %v2868_v5, inf }
 0xf72   : > { %2881 = vmin.xlane.f32.xlu1 %v2880_v28 }
 0xf76   : > { %v2845_v45 = vpop.xlane.xlu0 %2844 }
 0xf77   : > { %vm2861_vm14 = vcmp.le.f32.partialorder %v2829_v3, %v2845_v45  ;;  %v2751_v45 = vsel %vm908_vm12, %v5736_v38, -inf }
 0xf78   : > { %v2869_v25 = vsel %vm2861_vm14, 1e+30, %v2829_v3 }
 0xf79   : > { %v2883_v31 = vsel %vm908_vm12, %v2869_v25, inf }
 0xf7a   : > { %2884 = vmin.xlane.f32.xlu2 %v2883_v31 }
 0xf7e   : > { %v2854_v49 = vpop.xlane.xlu0 %2853 }
 0xf7f   : > { %vm2864_vm15 = vcmp.le.f32.partialorder %v2832_v42, %v2854_v49 }
 0xf80   : > { %v2872_v37 = vsel %vm2864_vm15, 1e+30, %v2832_v42  ;;  %v2736_v42 = vsel %vm908_vm12, %v5710_v0, -inf }
 0xf81   : > { %v2892_v16 = vsel %vm908_vm12, %v2872_v37, inf }
 0xf82   : > { %2731 = vmax.xlane.f32.xlu2 %v2730_v51  ;;  %v2848_v62 = vpop.xlane.xlu1 %2847  ;;  %2893 = vmin.xlane.f32.xlu1 %v2892_v16 }
 0xf83   : > { %vm2862_vm1 = vcmp.le.f32.partialorder %v2830_v52, %v2848_v62 }
 0xf84   : > { %v2870_v24 = vsel %vm2862_vm1, 1e+30, %v2830_v52 }
 0xf85   : > { %v2886_v34 = vsel %vm908_vm12, %v2870_v24, inf }
 0xf86   : > { %2887 = vmin.xlane.f32.xlu0 %v2886_v34  ;;  %v2739_v34 = vsel %vm908_vm12, %v5720_v21, -inf }
 0xf8a   : > { %v2857_v3 = vpop.xlane.xlu1 %2856  ;;  %v2851_v31 = vpop.xlane.xlu2 %2850 }
 0xf8b   : > { %vm2865_vm2 = vcmp.le.f32.partialorder %v2833_v14, %v2857_v3  ;;  %v2745_v3 = vsel %vm908_vm12, %v5738_v46, -inf  ;;  %vm2863_vm5 = vcmp.le.f32.partialorder %v5774_v35, %v2851_v31 }
 0xf8c   : > { %v2873_v1 = vsel %vm2865_vm2, 1e+30, %v2833_v14 }
 0xf8d   : > { %v2895_v28 = vsel %vm908_vm12, %v2873_v1, inf }
 0xf8e   : > { %2896 = vmin.xlane.f32.xlu2 %v2895_v28  ;;  %v2742_v28 = vsel %vm908_vm12, %v5732_v32, -inf }
 0xf96   : > { %2737 = vmax.xlane.f32.xlu2 %v2736_v42 }
 0xf9e   : > { %2752 = vmax.xlane.f32.xlu2 %v2751_v45 }
 0xfad   : > { %v2876_v49 = vpop.xlane.xlu2 %2875 }
 0xfae   : > { %vm2898_vm3 = vcmp.le.f32.partialorder %v2866_v40, %v2876_v49 }
 0xfaf   : > { %v2906_v52 = vsel %vm2898_vm3, 1e+30, %v2866_v40  ;;  %v2748_v40 = vsel %vm908_vm12, %v5728_v2, -inf }
 0xfb0   : > { %v2914_v51 = vsel %vm908_vm12, %v2906_v52, inf }
 0xfb1   : > { %2915 = vmin.xlane.f32.xlu0 %v2914_v51 }
 0xfb5   : > { %v2879_v16 = vpop.xlane.xlu0 %2878 }
 0xfb6   : > { %vm2899_vm4 = vcmp.le.f32.partialorder %v2867_v26, %v2879_v16 }
 0xfb7   : > { %v2907_v14 = vsel %vm2899_vm4, 1e+30, %v2867_v26  ;;  %v2871_v26 = vsel %vm2863_vm5, 1e+30, %v5774_v35 }
 0xfb8   : > { %v2917_v62 = vsel %vm908_vm12, %v2907_v14, inf  ;;  %v2889_v42 = vsel %vm908_vm12, %v2871_v26, inf }
 0xfb9   : > { %2918 = vmin.xlane.f32.xlu1 %v2917_v62  ;;  %2740 = vmax.xlane.f32.xlu0 %v2739_v34 }
 0xfbd   : > { %v2735_v62 = vpop.xlane.xlu0 %2734 }
 0xfc1   : > { %2746 = vmax.xlane.f32.xlu1 %v2745_v3  ;;  %2743 = vmax.xlane.f32.xlu0 %v2742_v28 }
 0xfc9   : > { %2749 = vmax.xlane.f32.xlu1 %v2748_v40 }
 0xfd1   : > { %2890 = vmin.xlane.f32.xlu1 %v2889_v42 }
 0xfe5   : > { %v2882_v45 = vpop.xlane.xlu1 %2881 }
 0xfe6   : > { %vm2900_vm6 = vcmp.le.f32.partialorder %v2868_v5, %v2882_v45 }
 0xfe7   : > { %v2908_v49 = vsel %vm2900_vm6, 1e+30, %v2868_v5 }
 0xfe8   : > { %v2920_v52 = vsel %vm908_vm12, %v2908_v49, inf }
 0xfe9   : > { %2921 = vmin.xlane.f32.xlu1 %v2920_v52 }
 0xfed   : > { %v2885_v51 = vpop.xlane.xlu2 %2884 }
 0xfee   : > { %vm2901_vm7 = vcmp.le.f32.partialorder %v2869_v25, %v2885_v51 }
 0xfef   : > { %v2909_v16 = vsel %vm2901_vm7, 1e+30, %v2869_v25 }
 0xff0   : > { %v2923_v14 = vsel %vm908_vm12, %v2909_v16, inf }
 0xff1   : > { %2924 = vmin.xlane.f32.xlu2 %v2923_v14 }
 0xff5   : > { %v2894_v34 = vpop.xlane.xlu1 %2893  ;;  %v2732_v3 = vpop.xlane.xlu2 %2731 }
 0xff6   : > { %vm2904_vm8 = vcmp.le.f32.partialorder %v2872_v37, %v2894_v34  ;;  %v2954_v49 = vsub.f32 %v5691_v19, %v2732_v3 }
 0xff7   : > { %v2912_v31 = vsel %vm2904_vm8, 1e+30, %v2872_v37  ;;  %v2955_v37 = vsub.f32 %v5698_v15, %v2735_v62 }
 0xff8   : > { %v2932_v35 = vsel %vm908_vm12, %v2912_v31, inf  ;;  %v2962_v52 = vmul.f32 1.442695, %v2954_v49 }
 0xff9   : > { %v2888_v28 = vpop.xlane.xlu0 %2887  ;;  %2933 = vmin.xlane.f32.xlu0 %v2932_v35  ;;  %v2964_v51 = vmul.f32 1.442695, %v2955_v37 }
 0xffa   : > { %vm2902_vm9 = vcmp.le.f32.partialorder %v2870_v24, %v2888_v28  ;;  %4543 = vpow2.f32 %v2962_v52 }
 0xffb   : > { %v2910_v5 = vsel %vm2902_vm9, 1e+30, %v2870_v24  ;;  %4545 = vpow2.f32 %v2964_v51 }
 0xffc   : > { %v2926_v40 = vsel %vm908_vm12, %v2910_v5, inf }
 0xffd   : > { %2927 = vmin.xlane.f32.xlu2 %v2926_v40 }
0x1000   : > { %v4544_v14 = vpop.eup %4543 }
0x1001   : > { %v2897_v42 = vpop.xlane.xlu2 %2896  ;;  %v4546_v28 = vpop.eup %4545 }
0x1002   : > { %vm2905_vm10 = vcmp.le.f32.partialorder %v2873_v1, %v2897_v42 }
0x1003   : > { %v2913_v25 = vsel %vm2905_vm10, 1e+30, %v2873_v1 }
0x1004   : > { %v2935_v45 = vsel %vm908_vm12, %v2913_v25, inf }
0x1005   : > { %2936 = vmin.xlane.f32.xlu1 %v2935_v45 }
0x1009   : > { %v2738_v45 = vpop.xlane.xlu2 %2737 }
0x1011   : > { %v2753_v37 = vpop.xlane.xlu2 %2752 }
0x101e   : > { %3168 = vrot.lane.b32.xlu1 %v4885_v22, %s4642_s20 }
0x1024   : > { %v2916_v24 = vpop.xlane.xlu0 %2915 }
0x1025   : > { %v2938_v16 = vmin.f32 %v2916_v24, %v2732_v3 }
0x1027   : > { %vm2946_vm13 = vcmp.ge.f32.partialorder %v5691_v19, %v2938_v16 }
0x1028   : > { %v5817_v1 = vsel %vm2946_vm13, %v4544_v14, 0.0 }
0x1029   : > { %v2986_v34 = vsel %vm908_vm12, %v5817_v1, 0.0 }
0x102a   : > { %2987 = vadd.xlane.f32.xlu2 %v2986_v34 }
0x102c   : > { %v2919_v31 = vpop.xlane.xlu1 %2918 }
0x102d   : > { %v2939_v35 = vmin.f32 %v2919_v31, %v2735_v62  ;;  %v2956_v62 = vsub.f32 %v5710_v0, %v2738_v45 }
0x102f   : > { %vm2947_vm14 = vcmp.ge.f32.partialorder %v5698_v15, %v2939_v35  ;;  %v2966_v49 = vmul.f32 1.442695, %v2956_v62  ;;  %v2741_v15 = vpop.xlane.xlu0 %2740 }
0x1030   : > { %v5822_v22 = vsel %vm2947_vm14, %v4546_v28, 0.0  ;;  %v2957_v52 = vsub.f32 %v5720_v21, %v2741_v15 }
0x1031   : > { %v2989_v3 = vsel %vm908_vm12, %v5822_v22, 0.0  ;;  %4547 = vpow2.f32 %v2966_v49 }
0x1032   : > { %2990 = vadd.xlane.f32.xlu0 %v2989_v3  ;;  %v2968_v51 = vmul.f32 1.442695, %v2957_v52 }
0x1034   : > { %v5826_v5 = vpop.xlane.xlu1 %2746  ;;  %4549 = vpow2.f32 %v2968_v51 }
0x1037   : > { %v4548_v14 = vpop.eup %4547  ;;  %v2744_v35 = vpop.xlane.xlu0 %2743 }
0x1038   : > { %v2958_v3 = vsub.f32 %v5732_v32, %v2744_v35 }
0x103c   : > { %v2750_v19 = vpop.xlane.xlu1 %2749 }
0x103d   : > { %v2960_v34 = vsub.f32 %v5728_v2, %v2750_v19 }
0x1044   : > { %v2891_v40 = vpop.xlane.xlu1 %2890 }
0x1045   : > { %vm2903_vm15 = vcmp.le.f32.partialorder %v2871_v26, %v2891_v40  ;;  %v2974_v40 = vmul.f32 1.442695, %v2960_v34 }
0x1046   : > { %v2911_v42 = vsel %vm2903_vm15, 1e+30, %v2871_v26 }
0x1047   : > { %v2929_v25 = vsel %vm908_vm12, %v2911_v42, inf  ;;  %v4550_v42 = vpop.eup %4549  ;;  %4551 = vpow2.f32 %v2974_v40 }
0x1048   : > { %2930 = vmin.xlane.f32.xlu0 %v2929_v25 }
0x104d   : > { %v4552_v52 = vpop.eup %4551 }
0x105c   : > { %v2922_v24 = vpop.xlane.xlu1 %2921  ;;  %3143 = vrot.lane.b32.xlu0 %v4879_v6, %s4642_s20 }
0x105d   : > { %v2940_v16 = vmin.f32 %v2922_v24, %v2738_v45 }
0x105f   : > { %vm2948_vm1 = vcmp.ge.f32.partialorder %v5710_v0, %v2940_v16  ;;  %v2970_v0 = vmul.f32 1.442695, %v2958_v3 }
0x1060   : > { %v5834_v26 = vsel %vm2948_vm1, %v4548_v14, 0.0  ;;  %v2961_v14 = vsub.f32 %v5736_v38, %v2753_v37 }
0x1061   : > { %v2992_v31 = vsel %vm908_vm12, %v5834_v26, 0.0  ;;  %4553 = vpow2.f32 %v2970_v0 }
0x1062   : > { %2993 = vadd.xlane.f32.xlu1 %v2992_v31 }
0x1064   : > { %v2925_v28 = vpop.xlane.xlu2 %2924 }
0x1065   : > { %v2941_v6 = vmin.f32 %v2925_v28, %v2741_v15 }
0x1067   : > { %vm2949_vm2 = vcmp.ge.f32.partialorder %v5720_v21, %v2941_v6  ;;  %v4554_v16 = vpop.eup %4553  ;;  %v4366_v6 = vpack.i.bf16 %v5686_v63, %v5684_v50 }
0x1068   : > { %v5841_v25 = vsel %vm2949_vm2, %v4550_v42, 0.0  ;;  %v2959_v42 = vsub.f32 %v5738_v46, %v5826_v5 }
0x1069   : > { %v2995_v45 = vsel %vm908_vm12, %v5841_v25, 0.0 }
0x106a   : > { %2996 = vadd.xlane.f32.xlu2 %v2995_v45 }
0x106c   : > { %v2934_v62 = vpop.xlane.xlu0 %2933 }
0x106d   : > { %v2944_v49 = vmin.f32 %v2934_v62, %v2750_v19  ;;  %v2972_v62 = vmul.f32 1.442695, %v2959_v42 }
0x106f   : > { %vm2952_vm3 = vcmp.ge.f32.partialorder %v5728_v2, %v2944_v49  ;;  %v2976_v2 = vmul.f32 1.442695, %v2961_v14 }
0x1070   : > { %v2928_v24 = vpop.xlane.xlu2 %2927  ;;  %v5846_v51 = vsel %vm2952_vm3, %v4552_v52, 0.0 }
0x1071   : > { %v2942_v15 = vmin.f32 %v2928_v24, %v2744_v35  ;;  %v3004_v21 = vsel %vm908_vm12, %v5846_v51, 0.0  ;;  %4555 = vpow2.f32 %v2976_v2 }
0x1072   : > { %3005 = vadd.xlane.f32.xlu2 %v3004_v21 }
0x1073   : > { %vm2950_vm4 = vcmp.ge.f32.partialorder %v5732_v32, %v2942_v15 }
0x1074   : > { %v5852_v34 = vsel %vm2950_vm4, %v4554_v16, 0.0 }
0x1075   : > { %v2998_v19 = vsel %vm908_vm12, %v5852_v34, 0.0 }
0x1076   : > { %2999 = vadd.xlane.f32.xlu1 %v2998_v19 }
0x1077   : > { %v4556_v35 = vpop.eup %4555 }
0x1078   : > { %v2937_v31 = vpop.xlane.xlu1 %2936 }
0x1079   : > { %v2945_v28 = vmin.f32 %v2937_v31, %v2753_v37 }
0x107b   : > { %vm2953_vm5 = vcmp.ge.f32.partialorder %v5736_v38, %v2945_v28 }
0x107c   : > { %v5857_v3 = vsel %vm2953_vm5, %v4556_v35, 0.0 }
0x107d   : > { %v3007_v40 = vsel %vm908_vm12, %v5857_v3, 0.0 }
0x1086   : > { %3008 = vadd.xlane.f32.xlu0 %v3007_v40 }
0x108f   : > { %3218 = vrot.lane.b32.xlu1 %v4899_v8, %s4642_s20 }
0x1090   : > { %v3169_v32 = vpop.permute.xlu1 %3168 }
0x1091   : > { %3181 = vmatpush.bf16.msrb.mxu1 %v3169_v32 }
0x1097   : > { %4367 = vrot.lane.b32.xlu1 %v4366_v6, %s4643_s21 }
0x109a   : > { %4392 = vrot.lane.b32.xlu0 %v4391_v18, %s4644_s22 }
0x109d   : > { %v2988_v8 = vpop.xlane.xlu2 %2987 }
0x109e   : > { %v3021_v15 = vand.u32 2147483648, %v2988_v8  ;;  %vm3015_vm10 = vweird.f32 %v2988_v8  ;;  %v3019_v16 = vand.u32 2147483647, %v2988_v8 }
0x109f   : > { %4377 = vrot.lane.b32.xlu1 %v4376_v56, %s4644_s22 }
0x10a0   : > { %v3022_v35 = vor.u32 1.1754944e-38, %v3021_v15  ;;  %vm3020_vm1 = vcmp.eq.f32.partialorder %v3019_v16, 8.507059e+37 }
0x10a5   : > { %v2991_v38 = vpop.xlane.xlu0 %2990 }
0x10a6   : > { %4557 = vrcp.f32 %v2991_v38  ;;  %v3036_v43 = vand.u32 2147483648, %v2991_v38  ;;  %vm3030_vm8 = vweird.f32 %v2991_v38  ;;  %v3034_v52 = vand.u32 2147483647, %v2991_v38 }
0x10a7   : > { %4559 = vrcp.f32 %v2988_v8 }
0x10a8   : > { %4561 = vpow2.f32 %v2972_v62  ;;  %v3037_v19 = vor.u32 1.1754944e-38, %v3036_v43  ;;  %vm3035_vm15 = vcmp.eq.f32.partialorder %v3034_v52, 8.507059e+37 }
0x10ac   : > { %v4558_v37 = vpop.eup %4557 }
0x10ad   : > { %v4560_v50 = vpop.eup %4559  ;;  %v3026_v63 = vmul.f32 %v4558_v37, %v2991_v38  ;;  %vm3031_vm6 = vweird.f32 %v4558_v37 }
0x10ae   : > { %v3011_v0 = vmul.f32 %v4560_v50, %v2988_v8  ;;  %vm3016_vm7 = vweird.f32 %v4560_v50  ;;  %vm3032_vm9 = vmor %vm3030_vm8, %vm3031_vm6  ;;  %v4562_v21 = vpop.eup %4561 }
0x10af   : > { %v3027_v45 = vsub.f32 1.0, %v3026_v63  ;;  %vm3017_vm14 = vmor %vm3015_vm10, %vm3016_vm7 }
0x10b0   : > { %v3012_v58 = vsub.f32 1.0, %v3011_v0 }
0x10b1   : > { %v3028_v10 = vmul.f32 %v4558_v37, %v3027_v45 }
0x10b2   : > { %v3013_v18 = vmul.f32 %v4560_v50, %v3012_v58 }
0x10b3   : > { %v3029_v49 = vadd.f32 %v4558_v37, %v3028_v10 }
0x10b4   : > { %v3014_v56 = vadd.f32 %v4560_v50, %v3013_v18 }
0x10b5   : > { %v3033_v14 = vsel %vm3032_vm9, %v4558_v37, %v3029_v49 }
0x10b6   : > { %v3018_v31 = vsel %vm3017_vm14, %v4560_v50, %v3014_v56  ;;  %v3038_v40 = vsel %vm3035_vm15, %v3037_v19, %v3033_v14 }
0x10b7   : > { %v3039_v32 = vmul.f32 %v3038_v40, %v5822_v22 }
0x10b9   : > { %v3131_v8 = vpack.c.bf16 %v3039_v32, %v3039_v32 }
0x10bb   : > { %v2931_v55 = vpop.xlane.xlu0 %2930  ;;  %v3141_v38 = vunpack.c.l.b16 %v3131_v8 }
0x10bc   : > { %v2943_v24 = vmin.f32 %v2931_v55, %v5826_v5  ;;  %v3023_v5 = vsel %vm3020_vm1, %v3022_v35, %v3018_v31 }
0x10bd   : > { %v3024_v6 = vmul.f32 %v3023_v5, %v5817_v1 }
0x10be   : > { %vm2951_vm13 = vcmp.ge.f32.partialorder %v5738_v46, %v2943_v24 }
0x10bf   : > { %v5878_v2 = vsel %vm2951_vm13, %v4562_v21, 0.0  ;;  %v3130_v46 = vpack.c.bf16 %v3024_v6, %v3024_v6 }
0x10c0   : > { %v3001_v28 = vsel %vm908_vm12, %v5878_v2, 0.0 }
0x10c1   : > { %3002 = vadd.xlane.f32.xlu2 %v3001_v28  ;;  %v3140_v37 = vunpack.c.l.b16 %v3130_v46 }
0x10c3   : > { %v3142_v50 = vpack.c.b16 %v3141_v38, %v3140_v37 }
0x10ce   : > { %v3144_v63 = vpop.permute.xlu0 %3143 }
0x10cf   : > { %3156 = vmatpush.bf16.msra.mxu0 %v3144_v63 }
0x10d2   : > { %4261 = vmatmul.msk.bf16.vlgmr.msra.gmra.mxu0 %vm908_vm12, %v3142_v50 }
0x10d3   : > { %3401 = vmatpush.bf16.msrb.mxu0 %v4326_v9 }
0x10d5   : > { %v2994_v42 = vpop.xlane.xlu1 %2993 }
0x10d6   : > { %4563 = vrcp.f32 %v2994_v42  ;;  %v3051_v58 = vand.u32 2147483648, %v2994_v42  ;;  %vm3045_vm3 = vweird.f32 %v2994_v42  ;;  %v3049_v18 = vand.u32 2147483647, %v2994_v42 }
0x10d8   : > { %v3052_v56 = vor.u32 1.1754944e-38, %v3051_v58  ;;  %vm3050_vm5 = vcmp.eq.f32.partialorder %v3049_v18, 8.507059e+37 }
0x10d9   : > { %3193 = vrot.lane.b32.xlu2 %v4891_v41, %s4642_s20 }
0x10dc   : > { %v4564_v0 = vpop.eup %4563 }
0x10dd   : > { %v3041_v45 = vmul.f32 %v4564_v0, %v2994_v42  ;;  %v2997_v62 = vpop.xlane.xlu2 %2996  ;;  %vm3046_vm2 = vweird.f32 %v4564_v0 }
0x10de   : > { %4565 = vrcp.f32 %v2997_v62  ;;  %vm3047_vm4 = vmor %vm3045_vm3, %vm3046_vm2  ;;  %v3066_v15 = vand.u32 2147483648, %v2997_v62  ;;  %v3064_v16 = vand.u32 2147483647, %v2997_v62  ;;  %vm3060_vm7 = vweird.f32 %v2997_v62 }
0x10df   : > { %v3042_v22 = vsub.f32 1.0, %v3041_v45 }
0x10e0   : > { %vm3065_vm9 = vcmp.eq.f32.partialorder %v3064_v16, 8.507059e+37 }
0x10e1   : > { %v3043_v1 = vmul.f32 %v4564_v0, %v3042_v22  ;;  %4362 = vrot.lane.b32.xlu2 %v4361_v13, %s4644_s22  ;;  %v3067_v13 = vor.u32 1.1754944e-38, %v3066_v15 }
0x10e3   : > { %v3044_v10 = vadd.f32 %v4564_v0, %v3043_v1 }
0x10e4   : > { %v4566_v49 = vpop.eup %4565 }
0x10e5   : > { %v3048_v43 = vsel %vm3047_vm4, %v4564_v0, %v3044_v10  ;;  %v3056_v41 = vmul.f32 %v4566_v49, %v2997_v62  ;;  %v3006_v55 = vpop.xlane.xlu2 %3005  ;;  %vm3061_vm6 = vweird.f32 %v4566_v49 }
0x10e6   : > { %v3053_v24 = vsel %vm3050_vm5, %v3052_v56, %v3048_v43  ;;  %4567 = vrcp.f32 %v3006_v55  ;;  %vm3062_vm8 = vmor %vm3060_vm7, %vm3061_vm6  ;;  %v3111_v50 = vand.u32 2147483648, %v3006_v55  ;;  %vm3105_vm13 = vweird.f32 %v3006_v55 }
0x10e7   : > { %v3057_v52 = vsub.f32 1.0, %v3056_v41  ;;  %v3054_v30 = vmul.f32 %v3053_v24, %v5834_v26  ;;  %v3109_v42 = vand.u32 2147483647, %v3006_v55 }
0x10e8   : > { %v3112_v22 = vor.u32 1.1754944e-38, %v3111_v50 }
0x10e9   : > { %v3058_v21 = vmul.f32 %v4566_v49, %v3057_v52  ;;  %v3132_v28 = vpack.c.bf16 %v3054_v30, %v3054_v30  ;;  %v3000_v38 = vpop.xlane.xlu1 %2999  ;;  %vm3110_vm15 = vcmp.eq.f32.partialorder %v3109_v42, 8.507059e+37 }
0x10ea   : > { %vm3075_vm6 = vweird.f32 %v3000_v38 }
0x10eb   : > { %v3059_v29 = vadd.f32 %v4566_v49, %v3058_v21  ;;  %v3165_v32 = vunpack.c.l.b16 %v3132_v28 }
0x10ec   : > { %v4568_v19 = vpop.eup %4567 }
0x10ed   : > { %v3063_v14 = vsel %vm3062_vm8, %v4566_v49, %v3059_v29  ;;  %v3101_v5 = vmul.f32 %v4568_v19, %v3006_v55  ;;  %vm3106_vm10 = vweird.f32 %v4568_v19 }
0x10ee   : > { %v3068_v31 = vsel %vm3065_vm9, %v3067_v13, %v3063_v14  ;;  %vm3107_vm14 = vmor %vm3105_vm13, %vm3106_vm10 }
0x10ef   : > { %v3069_v35 = vmul.f32 %v3068_v31, %v5841_v25  ;;  %v3102_v8 = vsub.f32 1.0, %v3101_v5 }
0x10f1   : > { %v3133_v40 = vpack.c.bf16 %v3069_v35, %v3069_v35  ;;  %v3103_v26 = vmul.f32 %v4568_v19, %v3102_v8  ;;  %v3081_v35 = vand.u32 2147483648, %v3000_v38 }
0x10f3   : > { %v3166_v6 = vunpack.c.l.b16 %v3133_v40  ;;  %v3104_v63 = vadd.f32 %v4568_v19, %v3103_v26  ;;  %v3079_v40 = vand.u32 2147483647, %v3000_v38  ;;  %v3082_v8 = vor.u32 1.1754944e-38, %v3081_v35 }
0x10f5   : > { %v3167_v46 = vpack.c.b16 %v3166_v6, %v3165_v32  ;;  %v3108_v25 = vsel %vm3107_vm14, %v4568_v19, %v3104_v63  ;;  %vm3080_vm8 = vcmp.eq.f32.partialorder %v3079_v40, 8.507059e+37 }
0x10f6   : > { %v3113_v58 = vsel %vm3110_vm15, %v3112_v22, %v3108_v25  ;;  %vm3350_vm15 = vcmask 195584  }
0x10f7   : > { %4262 = vmatmul.msk.bf16.vlgmr.msrb.gmra.mxu1 %vm908_vm12, %v3167_v46  ;;  %v3114_v43 = vmul.f32 %v3113_v58, %v5846_v51 }
0x10f9   : > { %v3009_v37 = vpop.xlane.xlu0 %3008  ;;  %v3136_v24 = vpack.c.bf16 %v3114_v43, %v3114_v43 }
0x10fa   : > { %4569 = vrcp.f32 %v3009_v37  ;;  %v3126_v10 = vand.u32 2147483648, %v3009_v37  ;;  %v3124_v49 = vand.u32 2147483647, %v3009_v37  ;;  %vm3120_vm2 = vweird.f32 %v3009_v37 }
0x10fb   : > { %v3215_v16 = vunpack.c.l.b16 %v3136_v24  ;;  %4571 = vrcp.f32 %v3000_v38 }
0x10fc   : > { %v3127_v55 = vor.u32 1.1754944e-38, %v3126_v10  ;;  %vm3125_vm4 = vcmp.eq.f32.partialorder %v3124_v49, 8.507059e+37 }
0x1100   : > { %v4570_v0 = vpop.eup %4569 }
0x1101   : > { %v3116_v45 = vmul.f32 %v4570_v0, %v3009_v37  ;;  %v3219_v62 = vpop.permute.xlu1 %3218  ;;  %vm3121_vm1 = vweird.f32 %v4570_v0  ;;  %v4572_v13 = vpop.eup %4571 }
0x1102   : > { %3231 = vmatpush.bf16.msrb.mxu3 %v3219_v62  ;;  %vm3122_vm3 = vmor %vm3120_vm2, %vm3121_vm1  ;;  %v3071_v14 = vmul.f32 %v4572_v13, %v3000_v38  ;;  %vm3076_vm5 = vweird.f32 %v4572_v13 }
0x1103   : > { %v3117_v1 = vsub.f32 1.0, %v3116_v45  ;;  %vm3077_vm7 = vmor %vm3075_vm6, %vm3076_vm5 }
0x1104   : > { %v3072_v51 = vsub.f32 1.0, %v3071_v14 }
0x1105   : > { %v3118_v18 = vmul.f32 %v4570_v0, %v3117_v1 }
0x1106   : > { %v3073_v19 = vmul.f32 %v4572_v13, %v3072_v51 }
0x1107   : > { %v3119_v41 = vadd.f32 %v4570_v0, %v3118_v18 }
0x1108   : > { %v3074_v28 = vadd.f32 %v4572_v13, %v3073_v19 }
0x1109   : > { %v3123_v56 = vsel %vm3122_vm3, %v4570_v0, %v3119_v41 }
0x110a   : > { %v3128_v52 = vsel %vm3125_vm4, %v3127_v55, %v3123_v56 }
0x110b   : > { %v3129_v15 = vmul.f32 %v3128_v52, %v5857_v3  ;;  %v3078_v3 = vsel %vm3077_vm7, %v4572_v13, %v3074_v28 }
0x110c   : > { %v3083_v26 = vsel %vm3080_vm8, %v3082_v8, %v3078_v3 }
0x110d   : > { %v3137_v21 = vpack.c.bf16 %v3129_v15, %v3129_v15  ;;  %v3084_v42 = vmul.f32 %v3083_v26, %v5852_v34 }
0x110f   : > { %v3216_v30 = vunpack.c.l.b16 %v3137_v21  ;;  %v3134_v62 = vpack.c.bf16 %v3084_v42, %v3084_v42  ;;  %v3424_v42 = vld [vmem:[%s4738_s19] sm:$0xff] }
0x1111   : > { %v3217_v29 = vpack.c.b16 %v3216_v30, %v3215_v16  ;;  %v3190_v58 = vunpack.c.l.b16 %v3134_v62  ;;  %v3425_v62 = vld [vmem:[%s4738_s19 + $0x8] sm:$0xff] }
0x1113   : > { %4264 = vmatmul.msk.bf16.vlgmr.msrb.gmra.mxu3 %vm908_vm12, %v3217_v29 }
0x1134   : > { %v3003_v31 = vpop.xlane.xlu2 %3002 }
0x1135   : > { %4573 = vrcp.f32 %v3003_v31  ;;  %v3096_v37 = vand.u32 2147483648, %v3003_v31  ;;  %v3094_v50 = vand.u32 2147483647, %v3003_v31  ;;  %vm3090_vm10 = vweird.f32 %v3003_v31 }
0x1137   : > { %v3097_v38 = vor.u32 1.1754944e-38, %v3096_v37  ;;  %vm3095_vm14 = vcmp.eq.f32.partialorder %v3094_v50, 8.507059e+37 }
0x113b   : > { %v4574_v5 = vpop.eup %4573 }
0x113c   : > { %v3086_v32 = vmul.f32 %v4574_v5, %v3003_v31  ;;  %v3194_v6 = vpop.permute.xlu2 %3193  ;;  %vm3091_vm9 = vweird.f32 %v4574_v5 }
0x113d   : > { %3206 = vmatpush.bf16.msrb.mxu2 %v3194_v6  ;;  %vm3092_vm13 = vmor %vm3090_vm10, %vm3091_vm9 }
0x113e   : > { %v3087_v46 = vsub.f32 1.0, %v3086_v32 }
0x1140   : > { %v3088_v63 = vmul.f32 %v4574_v5, %v3087_v46 }
0x1142   : > { %v3089_v0 = vadd.f32 %v4574_v5, %v3088_v63 }
0x1144   : > { %v3093_v25 = vsel %vm3092_vm13, %v4574_v5, %v3089_v0  ;;  %v4363_v17 = vpop.permute.xlu2 %4362 }
0x1145   : > { %v3098_v45 = vsel %vm3095_vm14, %v3097_v38, %v3093_v25  ;;  %v4365_v27 = vunpack.i.h.bf16 %v4363_v17 }
0x1146   : > { %v3099_v22 = vmul.f32 %v3098_v45, %v5878_v2 }
0x1147   : > { %v3335_v56 = vsel %vm791_vm11, %v5139_v36, %v4365_v27 }
0x1148   : > { %v3135_v1 = vpack.c.bf16 %v3099_v22, %v3099_v22 }
0x114a   : > { %v3191_v10 = vunpack.c.l.b16 %v3135_v1 }
0x114c   : > { %v3192_v18 = vpack.c.b16 %v3191_v10, %v3190_v58  ;;  %v4393_v10 = vpop.permute.xlu0 %4392 }
0x114e   : > { %4263 = vmatmul.msk.bf16.vlgmr.msrb.gmra.mxu2 %vm908_vm12, %v3192_v18 }
0x114f   : > { %v3158_v49 = vpop.f32.mrf.mxu0 }
0x1157   : > { %v3160_v43 = vpop.f32.mrf.mxu0 }
0x1158   : > { %v4371_v41 = vpack.i.bf16 %v3160_v43, %v3158_v49  ;;  %v4395_v49 = vunpack.i.h.bf16 %v4393_v10  ;;  %v4394_v43 = vunpack.i.l.bf16 %v4393_v10 }
0x115a   : > { %4372 = vrot.lane.b32.xlu2 %v4371_v41, %s4645_s23  ;;  %v3338_v9 = vsel %vm791_vm11, %v5134_v33, %v4394_v43  ;;  %v3430_v43 = vld [vmem:[%s4738_s19 + $0x30] sm:$0xff] }
0x1162   : > { %4382 = vrot.lane.b32.xlu2 %v4381_v54, %s4643_s21  ;;  %v4325_v54 = vld [vmem:[%s6307_s6] sm:$0xff] }
0x1163   : > { %3402 = vmatpush.bf16.msrb.mxu0 %v4325_v54 }
0x116a   : > { %4397 = vrot.lane.b32.xlu2 %v4396_v7, %s4643_s21  ;;  %v4368_v7 = vpop.permute.xlu1 %4367 }
0x116b   : > { %v4370_v24 = vunpack.i.h.bf16 %v4368_v7  ;;  %v4369_v15 = vunpack.i.l.bf16 %v4368_v7 }
0x116d   : > { %v3343_v13 = vsel %vm908_vm12, %v3335_v56, %v4370_v24 }
0x1172   : > { %4407 = vrot.lane.b32.xlu2 %v4406_v47, %s4644_s22  ;;  %v4364_v47 = vunpack.i.l.bf16 %v4363_v17  ;;  %v4378_v28 = vpop.permute.xlu1 %4377 }
0x1173   : > { %v4380_v40 = vunpack.i.h.bf16 %v4378_v28  ;;  %v4379_v5 = vunpack.i.l.bf16 %v4378_v28 }
0x1174   : > { %v3183_v34 = vpop.f32.mrf.mxu1  ;;  %v3334_v52 = vsel %vm791_vm11, %v5130_v39, %v4364_v47 }
0x1175   : > { %v3342_v29 = vsel %vm908_vm12, %v3334_v52, %v4369_v15  ;;  %v3337_v8 = vsel %vm791_vm11, %v5132_v4, %v4380_v40  ;;  %v3336_v46 = vsel %vm791_vm11, %v5128_v61, %v4379_v5  ;;  %v5947_v4 = vld [vmem:[%s6308_s7] ss:$0 sm:$0xff]  ;;  %v3427_v40 = vld [vmem:[%s4738_s19 + $0x18] sm:$0xff] }
0x117c   : > { %v3185_v2 = vpop.f32.mrf.mxu1 }
0x117d   : > { %v4386_v55 = vpack.i.bf16 %v3185_v2, %v3183_v34 }
0x117f   : > { %4387 = vrot.lane.b32.xlu1 %v4386_v55, %s4645_s23  ;;  %v3339_v55 = vsel %vm791_vm11, %v5143_v44, %v4395_v49 }
0x1196   : > { %v3233_v57 = vpop.f32.mrf.mxu3 }
0x119e   : > { %v3235_v23 = vpop.f32.mrf.mxu3 }
0x119f   : > { %v4416_v12 = vpack.i.bf16 %v3235_v23, %v3233_v57 }
0x11a1   : > { %4417 = vrot.lane.b32.xlu0 %v4416_v12, %s4645_s23 }
0x11b4   : > { %v4373_v21 = vpop.permute.xlu2 %4372 }
0x11b5   : > { %v4375_v16 = vunpack.i.h.bf16 %v4373_v21  ;;  %v4374_v30 = vunpack.i.l.bf16 %v4373_v21 }
0x11b7   : > { %v3351_v14 = vsel %vm3350_vm15, %v3342_v29, %v4374_v30  ;;  %v3352_v51 = vsel %vm3350_vm15, %v3343_v13, %v4375_v16 }
0x11b8   : > { %v3359_v19 = vpack.c.bf16 %v3352_v51, %v3351_v14 }
0x11ba   : > { %4273 = vmatmul.msk.bf16.vlgmr.msrb.gmra.mxu0 %vm482_vm0, %v3359_v19 }
0x11bc   : > { %v4383_v35 = vpop.permute.xlu2 %4382 }
0x11bd   : > { %v4385_v3 = vunpack.i.h.bf16 %v4383_v35  ;;  %v4384_v32 = vunpack.i.l.bf16 %v4383_v35 }
0x11bf   : > { %v3345_v48 = vsel %vm908_vm12, %v3337_v8, %v4385_v3  ;;  %v3344_v11 = vsel %vm908_vm12, %v3336_v46, %v4384_v32 }
0x11c4   : > { %v4398_v18 = vpop.permute.xlu2 %4397 }
0x11c5   : > { %v4400_v41 = vunpack.i.h.bf16 %v4398_v18  ;;  %v4399_v34 = vunpack.i.l.bf16 %v4398_v18 }
0x11c7   : > { %v3347_v23 = vsel %vm908_vm12, %v3339_v55, %v4400_v41  ;;  %v3346_v12 = vsel %vm908_vm12, %v3338_v9, %v4399_v34  ;;  %v3431_v9 = vld [vmem:[%s4738_s19 + $0x38] sm:$0xff] }
0x11cc   : > { %v4408_v7 = vpop.permute.xlu2 %4407 }
0x11cd   : > { %v4410_v52 = vunpack.i.h.bf16 %v4408_v7  ;;  %v4409_v44 = vunpack.i.l.bf16 %v4408_v7 }
0x11cf   : > { %v3341_v21 = vsel %vm791_vm11, %v5158_v60, %v4410_v52  ;;  %v3340_v16 = vsel %vm791_vm11, %v5152_v53, %v4409_v44 }
0x11d1   : > { %v3208_v36 = vpop.f32.mrf.mxu2 }
0x11d9   : > { %v3210_v31 = vpop.f32.mrf.mxu2 }
0x11da   : > { %v4401_v39 = vpack.i.bf16 %v3210_v31, %v3208_v36 }
0x11dc   : > { %4402 = vrot.lane.b32.xlu1 %v4401_v39, %s4645_s23  ;;  %v3426_v39 = vld [vmem:[%s4738_s19 + $0x10] sm:$0xff] }
0x11e4   : > { %4412 = vrot.lane.b32.xlu1 %v4411_v59, %s4643_s21  ;;  %s6273_s21 = scalar_lea.vmem %s6315_s14, %s4212_s16 }
0x11f1   : > { %v4388_v6 = vpop.permute.xlu1 %4387 }
0x11f2   : > { %v4390_v26 = vunpack.i.h.bf16 %v4388_v6  ;;  %v4389_v37 = vunpack.i.l.bf16 %v4388_v6 }
0x11f4   : > { %v3353_v59 = vsel %vm3350_vm15, %v3344_v11, %v4389_v37  ;;  %v3354_v63 = vsel %vm3350_vm15, %v3345_v48, %v4390_v26 }
0x11f5   : > { %v3360_v50 = vpack.c.bf16 %v3354_v63, %v3353_v59  ;;  %v3428_v59 = vld [vmem:[%s4738_s19 + $0x20] sm:$0xff] }
0x11f7   : > { %4274 = vmatmul.msk.bf16.gmra.mxu0 %vm482_vm0, %v3360_v50 }
0x1213   : > { %v4418_v15 = vpop.permute.xlu0 %4417 }
0x1214   : > { %v4420_v13 = vunpack.i.h.bf16 %v4418_v15  ;;  %v4419_v14 = vunpack.i.l.bf16 %v4418_v15 }
0x1237   : > { %v3404_v61 = vpop.f32.mrf.mxu0 }
0x1238   : > { %v3405_v0 = vadd.f32 %v5947_v4, %v3404_v61 }
0x123a   : > { %v5951_v38 = vadd.f32 %v3424_v42, %v3405_v0 }
0x123c   : > { %v3442_v25 = vsel %vm482_vm0, %v5951_v38, 0.0 }
0x123d   : > { %3443 = vadd.xlane.f32.xlu2 %v3442_v25 }
0x123f   : > { %v3406_v45 = vpop.f32.mrf.mxu0 }
0x1240   : > { %v3407_v22 = vadd.f32 %v5947_v4, %v3406_v45  ;;  %v3429_v45 = vld [vmem:[%s4738_s19 + $0x28] sm:$0xff] }
0x1242   : > { %v5957_v1 = vadd.f32 %v3425_v62, %v3407_v22 }
0x1244   : > { %v3445_v58 = vsel %vm482_vm0, %v5957_v1, 0.0 }
0x1245   : > { %3446 = vadd.xlane.f32.xlu1 %v3445_v58 }
0x124e   : > { %v4403_v2 = vpop.permute.xlu1 %4402 }
0x124f   : > { %v4405_v57 = vunpack.i.h.bf16 %v4403_v2  ;;  %v4404_v54 = vunpack.i.l.bf16 %v4403_v2 }
0x1251   : > { %v3355_v17 = vsel %vm3350_vm15, %v3346_v12, %v4404_v54  ;;  %v3356_v27 = vsel %vm3350_vm15, %v3347_v23, %v4405_v57 }
0x1252   : > { %v3361_v47 = vpack.c.bf16 %v3356_v27, %v3355_v17 }
0x1254   : > { %4275 = vmatmul.msk.bf16.gmra.mxu0 %vm482_vm0, %v3361_v47 }
0x1256   : > { %v4413_v56 = vpop.permute.xlu1 %4412 }
0x1257   : > { %v4415_v24 = vunpack.i.h.bf16 %v4413_v56  ;;  %v4414_v33 = vunpack.i.l.bf16 %v4413_v56 }
0x1259   : > { %v3348_v30 = vsel %vm908_vm12, %v3340_v16, %v4414_v33  ;;  %v3349_v29 = vsel %vm908_vm12, %v3341_v21, %v4415_v24  ;;  %v4328_v16 = vld [vmem:[%s6311_s10 + $0x8] sm:$0xff] }
0x125a   : > { %v3357_v51 = vsel %vm3350_vm15, %v3348_v30, %v4419_v14  ;;  %v3358_v19 = vsel %vm3350_vm15, %v3349_v29, %v4420_v13  ;;  %3682 = vmatpush.bf16.msra.mxu1 %v4328_v16 }
0x125b   : > { %v3362_v36 = vpack.c.bf16 %v3358_v19, %v3357_v51  ;;  %v4327_v51 = vld [vmem:[%s6311_s10] sm:$0xff] }
0x125e   : > { %3683 = vmatpush.bf16.msra.mxu1 %v4327_v51 }
0x1264   : > { %4276 = vmatmul.msk.bf16.gmra.mxu0 %vm482_vm0, %v3362_v36 }
0x1274   : > { %v3409_v31 = vpop.f32.mrf.mxu0 }
0x1275   : > { %v3410_v60 = vadd.f32 %v5947_v4, %v3409_v31 }
0x1277   : > { %v5981_v28 = vadd.f32 %v3426_v39, %v3410_v60 }
0x1279   : > { %v3448_v53 = vsel %vm482_vm0, %v5981_v28, 0.0 }
0x127a   : > { %3449 = vadd.xlane.f32.xlu0 %v3448_v53 }
0x127c   : > { %v3411_v35 = vpop.f32.mrf.mxu0 }
0x127d   : > { %v3412_v5 = vadd.f32 %v5947_v4, %v3411_v35 }
0x127f   : > { %v5987_v3 = vadd.f32 %v3427_v40, %v3412_v5 }
0x1281   : > { %v3451_v32 = vsel %vm482_vm0, %v5987_v3, 0.0 }
0x1282   : > { %3452 = vadd.xlane.f32.xlu2 %v3451_v32 }
0x12b0   : > { %v3444_v6 = vpop.xlane.xlu2 %3443 }
0x12b1   : > { %v3466_v8 = vmul.f32 %v3444_v6, %v4754_v20 }
0x12b3   : > { %v5993_v46 = vsub.f32 %v5951_v38, %v3466_v8 }
0x12b5   : > { %v3482_v26 = vmul.f32 %v5993_v46, %v5993_v46 }
0x12b7   : > { %v3490_v37 = vsel %vm482_vm0, %v3482_v26, 0.0 }
0x12b8   : > { %3491 = vadd.xlane.f32.xlu2 %v3490_v37  ;;  %v3447_v48 = vpop.xlane.xlu1 %3446 }
0x12b9   : > { %v3467_v63 = vmul.f32 %v3447_v48, %v4754_v20 }
0x12bb   : > { %v6004_v42 = vsub.f32 %v5957_v1, %v3467_v63 }
0x12bd   : > { %v3483_v22 = vmul.f32 %v6004_v42, %v6004_v42 }
0x12bf   : > { %v3493_v18 = vsel %vm482_vm0, %v3483_v22, 0.0 }
0x12d1   : > { %v3414_v11 = vpop.f32.mrf.mxu0 }
0x12d2   : > { %v3415_v50 = vadd.f32 %v5947_v4, %v3414_v11 }
0x12d4   : > { %v6001_v61 = vadd.f32 %v3428_v59, %v3415_v50 }
0x12d6   : > { %v3454_v0 = vsel %vm482_vm0, %v6001_v61, 0.0 }
0x12d7   : > { %3455 = vadd.xlane.f32.xlu1 %v3454_v0 }
0x12d9   : > { %v3416_v25 = vpop.f32.mrf.mxu0 }
0x12da   : > { %v3417_v62 = vadd.f32 %v5947_v4, %v3416_v25 }
0x12dc   : > { %v6012_v58 = vadd.f32 %v3429_v45, %v3417_v62 }
0x12de   : > { %v3457_v10 = vsel %vm482_vm0, %v6012_v58, 0.0 }
0x12df   : > { %3458 = vadd.xlane.f32.xlu0 %v3457_v10  ;;  %3494 = vadd.xlane.f32.xlu1 %v3493_v18 }
0x12e1   : > { %v3419_v49 = vpop.f32.mrf.mxu0 }
0x12e2   : > { %v3420_v41 = vadd.f32 %v5947_v4, %v3419_v49 }
0x12e4   : > { %v6019_v34 = vadd.f32 %v3430_v43, %v3420_v41  ;;  %v6076_v41 = vld [vmem:[%s6309_s8] ss:$0 sm:$0xff] }
0x12e6   : > { %v3460_v2 = vsel %vm482_vm0, %v6019_v34, 0.0 }
0x12e7   : > { %3461 = vadd.xlane.f32.xlu0 %v3460_v2 }
0x12e9   : > { %v3421_v55 = vpop.f32.mrf.mxu0 }
0x12ea   : > { %v3422_v57 = vadd.f32 %v5947_v4, %v3421_v55 }
0x12ec   : > { %v6025_v54 = vadd.f32 %v3431_v9, %v3422_v57 }
0x12ed   : > { %v3450_v23 = vpop.xlane.xlu0 %3449 }
0x12ee   : > { %v3468_v12 = vmul.f32 %v3450_v23, %v4754_v20  ;;  %v3463_v17 = vsel %vm482_vm0, %v6025_v54, 0.0 }
0x12ef   : > { %3464 = vadd.xlane.f32.xlu2 %v3463_v17  ;;  %v6087_v17 = vld [vmem:[%s6310_s9] ss:$0 sm:$0xff] }
0x12f0   : > { %v6031_v27 = vsub.f32 %v5981_v28, %v3468_v12 }
0x12f2   : > { %v3484_v47 = vmul.f32 %v6031_v27, %v6031_v27 }
0x12f4   : > { %v3496_v7 = vsel %vm482_vm0, %v3484_v47, 0.0 }
0x12f5   : > { %3497 = vadd.xlane.f32.xlu1 %v3496_v7  ;;  %v3453_v56 = vpop.xlane.xlu2 %3452 }
0x12f6   : > { %v3469_v4 = vmul.f32 %v3453_v56, %v4754_v20 }
0x12f8   : > { %v6038_v52 = vsub.f32 %v5987_v3, %v3469_v4 }
0x12fa   : > { %v3485_v44 = vmul.f32 %v6038_v52, %v6038_v52 }
0x12fc   : > { %v3499_v24 = vsel %vm482_vm0, %v3485_v44, 0.0 }
0x12fd   : > { %3500 = vadd.xlane.f32.xlu0 %v3499_v24 }
0x132b   : > { %v3492_v33 = vpop.xlane.xlu2 %3491 }
0x132c   : > { %v3514_v15 = vmul.f32 %v3492_v33, %v4754_v20 }
0x132e   : > { %v3522_v21 = vadd.f32 1e-05, %v3514_v15 }
0x1330   : > { %4575 = vrsqrt.f32 %v3522_v21  ;;  %vm3536_vm12 = vweird.f32 %v3522_v21 }
0x1336   : > { %v4576_v29 = vpop.eup %4575 }
0x1337   : > { %v3531_v19 = vmul.f32 %v4576_v29, %v3522_v21  ;;  %vm3537_vm11 = vweird.f32 %v4576_v29 }
0x1338   : > { %vm3538_vm1 = vmor %vm3536_vm12, %vm3537_vm11 }
0x1339   : > { %v3532_v39 = vmul.f32 %v4576_v29, %v3531_v19 }
0x133b   : > { %v3533_v6 = vmul.f32 0.5, %v3532_v39 }
0x133d   : > { %v3534_v37 = vsub.f32 1.5, %v3533_v6 }
0x133f   : > { %v3535_v50 = vmul.f32 %v4576_v29, %v3534_v37 }
0x1341   : > { %v3539_v22 = vsel %vm3538_vm1, %v4576_v29, %v3535_v50 }
0x1342   : > { %v3610_v2 = vmul.f32 %v3539_v22, %v5993_v46 }
0x1344   : > { %v3621_v47 = vmul.f32 %v6076_v41, %v3610_v2 }
0x1346   : > { %v3632_v24 = vadd.f32 %v6087_v17, %v3621_v47 }
0x134a   : > { %v3456_v30 = vpop.xlane.xlu1 %3455 }
0x134b   : > { %v3470_v13 = vmul.f32 %v3456_v30, %v4754_v20 }
0x134d   : > { %v6049_v14 = vsub.f32 %v6001_v61, %v3470_v13 }
0x134f   : > { %v3486_v36 = vmul.f32 %v6049_v14, %v6049_v14 }
0x1351   : > { %v3502_v31 = vsel %vm482_vm0, %v3486_v36, 0.0 }
0x1352   : > { %v3459_v60 = vpop.xlane.xlu0 %3458  ;;  %v3495_v53 = vpop.xlane.xlu1 %3494  ;;  %3503 = vadd.xlane.f32.xlu2 %v3502_v31 }
0x1353   : > { %v3471_v35 = vmul.f32 %v3459_v60, %v4754_v20  ;;  %v3515_v40 = vmul.f32 %v3495_v53, %v4754_v20 }
0x1355   : > { %v6060_v5 = vsub.f32 %v6012_v58, %v3471_v35  ;;  %v3523_v32 = vadd.f32 1e-05, %v3515_v40 }
0x1357   : > { %4577 = vrsqrt.f32 %v3523_v32  ;;  %v3487_v8 = vmul.f32 %v6060_v5, %v6060_v5  ;;  %vm3546_vm3 = vweird.f32 %v3523_v32 }
0x1359   : > { %v3505_v26 = vsel %vm482_vm0, %v3487_v8, 0.0 }
0x135a   : > { %v3462_v48 = vpop.xlane.xlu0 %3461  ;;  %3506 = vadd.xlane.f32.xlu1 %v3505_v26 }
0x135b   : > { %v3472_v11 = vmul.f32 %v3462_v48, %v4754_v20 }
0x135d   : > { %v4578_v59 = vpop.eup %4577  ;;  %v6067_v63 = vsub.f32 %v6019_v34, %v3472_v11 }
0x135e   : > { %v3541_v0 = vmul.f32 %v4578_v59, %v3523_v32  ;;  %vm3547_vm2 = vweird.f32 %v4578_v59 }
0x135f   : > { %v3488_v25 = vmul.f32 %v6067_v63, %v6067_v63  ;;  %vm3548_vm4 = vmor %vm3546_vm3, %vm3547_vm2 }
0x1360   : > { %v3542_v45 = vmul.f32 %v4578_v59, %v3541_v0 }
0x1361   : > { %v3508_v62 = vsel %vm482_vm0, %v3488_v25, 0.0 }
0x1362   : > { %v3543_v10 = vmul.f32 0.5, %v3542_v45  ;;  %3509 = vadd.xlane.f32.xlu0 %v3508_v62  ;;  %v3465_v18 = vpop.xlane.xlu2 %3464 }
0x1363   : > { %v3473_v49 = vmul.f32 %v3465_v18, %v4754_v20 }
0x1364   : > { %v3544_v43 = vsub.f32 1.5, %v3543_v10 }
0x1365   : > { %v6080_v55 = vsub.f32 %v6025_v54, %v3473_v49 }
0x1366   : > { %v3545_v9 = vmul.f32 %v4578_v59, %v3544_v43 }
0x1367   : > { %v3489_v57 = vmul.f32 %v6080_v55, %v6080_v55 }
0x1368   : > { %v3549_v23 = vsel %vm3548_vm4, %v4578_v59, %v3545_v9  ;;  %v3498_v12 = vpop.xlane.xlu1 %3497 }
0x1369   : > { %v3611_v46 = vmul.f32 %v3549_v23, %v6004_v42  ;;  %v3516_v7 = vmul.f32 %v3498_v12, %v4754_v20  ;;  %v3511_v56 = vsel %vm482_vm0, %v3489_v57, 0.0 }
0x136a   : > { %3512 = vadd.xlane.f32.xlu2 %v3511_v56 }
0x136b   : > { %v3622_v4 = vmul.f32 %v6076_v41, %v3611_v46  ;;  %v3524_v44 = vadd.f32 1e-05, %v3516_v7 }
0x136d   : > { %v3633_v33 = vadd.f32 %v6087_v17, %v3622_v4  ;;  %4579 = vrsqrt.f32 %v3524_v44  ;;  %vm3556_vm6 = vweird.f32 %v3524_v44 }
0x136f   : > { %v3640_v15 = vpack.c.bf16 %v3633_v33, %v3632_v24 }
0x1370   : > { %v3501_v21 = vpop.xlane.xlu0 %3500 }
0x1371   : > { %v3517_v16 = vmul.f32 %v3501_v21, %v4754_v20  ;;  %4285 = vmatmul.msk.bf16.vlgmr.msra.gmra.mxu1 %vm482_vm0, %v3640_v15 }
0x1373   : > { %v4580_v42 = vpop.eup %4579  ;;  %v3525_v30 = vadd.f32 1e-05, %v3517_v16 }
0x1374   : > { %v3551_v29 = vmul.f32 %v4580_v42, %v3524_v44  ;;  %vm3557_vm5 = vweird.f32 %v4580_v42 }
0x1375   : > { %4581 = vrsqrt.f32 %v3525_v30  ;;  %vm3558_vm7 = vmor %vm3556_vm6, %vm3557_vm5  ;;  %vm3566_vm9 = vweird.f32 %v3525_v30 }
0x1376   : > { %v3552_v13 = vmul.f32 %v4580_v42, %v3551_v29 }
0x1378   : > { %v3553_v51 = vmul.f32 0.5, %v3552_v13 }
0x137a   : > { %v3554_v19 = vsub.f32 1.5, %v3553_v51 }
0x137b   : > { %v4582_v36 = vpop.eup %4581 }
0x137c   : > { %v3555_v31 = vmul.f32 %v4580_v42, %v3554_v19  ;;  %v3561_v39 = vmul.f32 %v4582_v36, %v3525_v30  ;;  %vm3567_vm8 = vweird.f32 %v4582_v36 }
0x137d   : > { %vm3568_vm10 = vmor %vm3566_vm9, %vm3567_vm8 }
0x137e   : > { %v3562_v60 = vmul.f32 %v4582_v36, %v3561_v39  ;;  %v3559_v53 = vsel %vm3558_vm7, %v4580_v42, %v3555_v31 }
0x137f   : > { %v3612_v32 = vmul.f32 %v3559_v53, %v6031_v27 }
0x1380   : > { %v3563_v35 = vmul.f32 0.5, %v3562_v60 }
0x1381   : > { %v3623_v37 = vmul.f32 %v6076_v41, %v3612_v32 }
0x1382   : > { %v3564_v40 = vsub.f32 1.5, %v3563_v35 }
0x1383   : > { %v3634_v11 = vadd.f32 %v6087_v17, %v3623_v37 }
0x1384   : > { %v3565_v6 = vmul.f32 %v4582_v36, %v3564_v40 }
0x1386   : > { %v3569_v8 = vsel %vm3568_vm10, %v4582_v36, %v3565_v6 }
0x1387   : > { %v3613_v26 = vmul.f32 %v3569_v8, %v6038_v52 }
0x1389   : > { %v3624_v48 = vmul.f32 %v6076_v41, %v3613_v26 }
0x138b   : > { %v3635_v59 = vadd.f32 %v6087_v17, %v3624_v48 }
0x138d   : > { %v3641_v50 = vpack.c.bf16 %v3635_v59, %v3634_v11 }
0x138f   : > { %4286 = vmatmul.msk.bf16.gmra.mxu1 %vm482_vm0, %v3641_v50  ;;  %v4336_v50 = vld [vmem:[%s6313_s12 + $0x38] sm:$0xff] }
0x1390   : > { %4093 = vmatpush.bf16.msra.mxu2 %v4336_v50 }
0x13c5   : > { %v3504_v0 = vpop.xlane.xlu2 %3503 }
0x13c6   : > { %v3518_v27 = vmul.f32 %v3504_v0, %v4754_v20 }
0x13c8   : > { %v3526_v25 = vadd.f32 1e-05, %v3518_v27 }
0x13ca   : > { %4583 = vrsqrt.f32 %v3526_v25  ;;  %vm3576_vm14 = vweird.f32 %v3526_v25 }
0x13cd   : > { %v3507_v45 = vpop.xlane.xlu1 %3506 }
0x13ce   : > { %v3519_v62 = vmul.f32 %v3507_v45, %v4754_v20 }
0x13d0   : > { %v4584_v52 = vpop.eup %4583  ;;  %v3527_v22 = vadd.f32 1e-05, %v3519_v62 }
0x13d1   : > { %v3571_v10 = vmul.f32 %v4584_v52, %v3526_v25  ;;  %vm3577_vm13 = vweird.f32 %v4584_v52 }
0x13d2   : > { %4585 = vrsqrt.f32 %v3527_v22  ;;  %vm3578_vm15 = vmor %vm3576_vm14, %vm3577_vm13  ;;  %vm3586_vm12 = vweird.f32 %v3527_v22 }
0x13d3   : > { %v3572_v18 = vmul.f32 %v4584_v52, %v3571_v10 }
0x13d5   : > { %v3573_v49 = vmul.f32 0.5, %v3572_v18  ;;  %v3510_v43 = vpop.xlane.xlu0 %3509 }
0x13d6   : > { %v3520_v2 = vmul.f32 %v3510_v43, %v4754_v20 }
0x13d7   : > { %v3574_v9 = vsub.f32 1.5, %v3573_v49 }
0x13d8   : > { %v4586_v57 = vpop.eup %4585  ;;  %v3528_v23 = vadd.f32 1e-05, %v3520_v2 }
0x13d9   : > { %v3575_v12 = vmul.f32 %v4584_v52, %v3574_v9  ;;  %v3581_v47 = vmul.f32 %v4586_v57, %v3527_v22  ;;  %vm3587_vm11 = vweird.f32 %v4586_v57 }
0x13da   : > { %4587 = vrsqrt.f32 %v3528_v23  ;;  %vm3588_vm1 = vmor %vm3586_vm12, %vm3587_vm11  ;;  %vm3596_vm3 = vweird.f32 %v3528_v23 }
0x13db   : > { %v3582_v46 = vmul.f32 %v4586_v57, %v3581_v47  ;;  %v3579_v7 = vsel %vm3578_vm15, %v4584_v52, %v3575_v12 }
0x13dc   : > { %v3614_v15 = vmul.f32 %v3579_v7, %v6049_v14 }
0x13dd   : > { %v3583_v56 = vmul.f32 0.5, %v3582_v46  ;;  %v3513_v4 = vpop.xlane.xlu2 %3512  ;;  %v4332_v46 = vld [vmem:[%s6313_s12 + $0x18] sm:$0xff] }
0x13de   : > { %v3521_v44 = vmul.f32 %v3513_v4, %v4754_v20  ;;  %v3625_v51 = vmul.f32 %v6076_v41, %v3614_v15 }
0x13df   : > { %v3584_v24 = vsub.f32 1.5, %v3583_v56 }
0x13e0   : > { %v4588_v33 = vpop.eup %4587  ;;  %v3529_v21 = vadd.f32 1e-05, %v3521_v44  ;;  %v3636_v39 = vadd.f32 %v6087_v17, %v3625_v51 }
0x13e1   : > { %v3585_v16 = vmul.f32 %v4586_v57, %v3584_v24  ;;  %v3591_v42 = vmul.f32 %v4588_v33, %v3528_v23  ;;  %vm3597_vm2 = vweird.f32 %v4588_v33  ;;  %v4331_v24 = vld [vmem:[%s6313_s12 + $0x10] sm:$0xff] }
0x13e2   : > { %4589 = vrsqrt.f32 %v3529_v21  ;;  %vm3598_vm4 = vmor %vm3596_vm3, %vm3597_vm2  ;;  %vm3606_vm6 = vweird.f32 %v3529_v21 }
0x13e3   : > { %v3589_v30 = vsel %vm3588_vm1, %v4586_v57, %v3585_v16  ;;  %v3592_v29 = vmul.f32 %v4588_v33, %v3591_v42  ;;  %v4333_v57 = vld [vmem:[%s6313_s12 + $0x20] sm:$0xff] }
0x13e4   : > { %v3615_v13 = vmul.f32 %v3589_v30, %v6060_v5  ;;  %v6118_v5 = vld [vmem:[%s6312_s11] ss:$0 sm:$0xff] }
0x13e5   : > { %v3593_v19 = vmul.f32 0.5, %v3592_v29  ;;  %v4330_v29 = vld [vmem:[%s6313_s12 + $0x8] sm:$0xff] }
0x13e6   : > { %v3626_v20 = vmul.f32 %v6076_v41, %v3615_v13 }
0x13e7   : > { %v3594_v36 = vsub.f32 1.5, %v3593_v19 }
0x13e8   : > { %v4590_v31 = vpop.eup %4589  ;;  %v3637_v14 = vadd.f32 %v6087_v17, %v3626_v20 }
0x13e9   : > { %v3595_v60 = vmul.f32 %v4588_v33, %v3594_v36  ;;  %v3601_v53 = vmul.f32 %v4590_v31, %v3529_v21  ;;  %vm3607_vm5 = vweird.f32 %v4590_v31 }
0x13ea   : > { %v3642_v35 = vpack.c.bf16 %v3637_v14, %v3636_v39  ;;  %vm3608_vm7 = vmor %vm3606_vm6, %vm3607_vm5 }
0x13eb   : > { %v3602_v40 = vmul.f32 %v4590_v31, %v3601_v53  ;;  %v3599_v32 = vsel %vm3598_vm4, %v4588_v33, %v3595_v60  ;;  %v4329_v53 = vld [vmem:[%s6313_s12] sm:$0xff] }
0x13ec   : > { %4287 = vmatmul.msk.bf16.gmra.mxu1 %vm482_vm0, %v3642_v35  ;;  %v3616_v48 = vmul.f32 %v3599_v32, %v6067_v63  ;;  %v4335_v63 = vld [vmem:[%s6313_s12 + $0x30] sm:$0xff] }
0x13ed   : > { %v3603_v6 = vmul.f32 0.5, %v3602_v40  ;;  %4094 = vmatpush.bf16.msra.mxu2 %v4335_v63 }
0x13ee   : > { %v3685_v8 = vpop.f32.mrf.mxu1  ;;  %v3627_v45 = vmul.f32 %v6076_v41, %v3616_v48 }
0x13ef   : > { %v3604_v26 = vsub.f32 1.5, %v3603_v6  ;;  %v6122_v37 = vadd.f32 %v6118_v5, %v3685_v8 }
0x13f0   : > { %v3638_v49 = vadd.f32 %v6087_v17, %v3627_v45 }
0x13f1   : > { %v3605_v11 = vmul.f32 %v4590_v31, %v3604_v26  ;;  %v6126_v59 = vmul.f32 0.70710677, %v6122_v37 }
0x13f3   : > { %v3609_v0 = vsel %vm3608_vm7, %v4590_v31, %v3605_v11  ;;  %v3737_v27 = vand.u32 2147483647, %v6126_v59  ;;  %vm3721_vm1 = vcmp.ge.f32.partialorder %v6126_v59, 0.0 }
0x13f4   : > { %v3617_v25 = vmul.f32 %v3609_v0, %v6080_v55  ;;  %v4334_v55 = vld [vmem:[%s6313_s12 + $0x28] sm:$0xff] }
0x13f5   : > { %v3745_v62 = vmul.f32 0.3275911, %v3737_v27  ;;  %4095 = vmatpush.bf16.msra.mxu2 %v4334_v55  ;;  %v3953_v51 = vsub.f32 0.0, %v3737_v27 }
0x13f6   : > { %v3687_v52 = vpop.f32.mrf.mxu1  ;;  %v3628_v22 = vmul.f32 %v6076_v41, %v3617_v25 }
0x13f7   : > { %v3753_v10 = vadd.f32 1.0, %v3745_v62  ;;  %v6139_v18 = vadd.f32 %v6118_v5, %v3687_v52  ;;  %v3961_v40 = vmul.f32 %v3953_v51, %v3737_v27 }
0x13f8   : > { %v3639_v43 = vadd.f32 %v6087_v17, %v3628_v22 }
0x13f9   : > { %4591 = vrcp.f32 %v3753_v10  ;;  %v6147_v2 = vmul.f32 0.70710677, %v6139_v18  ;;  %4096 = vmatpush.bf16.msra.mxu2 %v4333_v57  ;;  %v3772_v56 = vand.u32 2147483648, %v3753_v10  ;;  %v3770_v44 = vand.u32 2147483647, %v3753_v10 }
0x13fa   : > { %v3643_v9 = vpack.c.bf16 %v3639_v43, %v3638_v49  ;;  %vm3766_vm9 = vweird.f32 %v3753_v10  ;;  %v3969_v0 = vmul.f32 1.442695, %v3961_v40 }
0x13fb   : > { %v6150_v41 = vand.u32 2147483647, %v6147_v2  ;;  %v3773_v15 = vor.u32 1.1754944e-38, %v3772_v56  ;;  %vm3771_vm13 = vcmp.eq.f32.partialorder %v3770_v44, 8.507059e+37  ;;  %vm3722_vm4 = vcmp.ge.f32.partialorder %v6147_v2, 0.0 }
0x13fc   : > { %4288 = vmatmul.msk.bf16.gmra.mxu1 %vm482_vm0, %v3643_v9  ;;  %v3706_v2 = vmul.f32 0.5, %v6139_v18 }
0x13fd   : > { %v3746_v17 = vmul.f32 0.3275911, %v6150_v41  ;;  %4097 = vmatpush.bf16.msra.mxu2 %v4332_v46  ;;  %v3954_v45 = vsub.f32 0.0, %v6150_v41 }
0x13ff   : > { %v4592_v23 = vpop.eup %4591  ;;  %v3754_v47 = vadd.f32 1.0, %v3746_v17  ;;  %v3962_v55 = vmul.f32 %v3954_v45, %v6150_v41 }
0x1400   : > { %v3762_v12 = vmul.f32 %v4592_v23, %v3753_v10  ;;  %vm3767_vm8 = vweird.f32 %v4592_v23 }
0x1401   : > { %4593 = vrcp.f32 %v3754_v47  ;;  %vm3768_vm10 = vmor %vm3766_vm9, %vm3767_vm8  ;;  %4098 = vmatpush.bf16.msra.mxu2 %v4331_v24  ;;  %v3787_v36 = vand.u32 2147483648, %v3754_v47  ;;  %v3785_v14 = vand.u32 2147483647, %v3754_v47  ;;  %vm3781_vm15 = vweird.f32 %v3754_v47 }
0x1402   : > { %v3763_v7 = vsub.f32 1.0, %v3762_v12  ;;  %4595 = vpow2.f32 %v3969_v0 }
0x1403   : > { %v3788_v26 = vor.u32 1.1754944e-38, %v3787_v36  ;;  %vm3786_vm12 = vcmp.eq.f32.partialorder %v3785_v14, 8.507059e+37  ;;  %v4646_v36 = vmov -1.0  }
0x1404   : > { %v3764_v4 = vmul.f32 %v4592_v23, %v3763_v7 }
0x1405   : > { %4099 = vmatpush.bf16.msra.mxu2 %v4330_v29 }
0x1406   : > { %v3765_v33 = vadd.f32 %v4592_v23, %v3764_v4 }
0x1407   : > { %v4594_v21 = vpop.eup %4593 }
0x1408   : > { %v3769_v16 = vsel %vm3768_vm10, %v4592_v23, %v3765_v33  ;;  %v3777_v30 = vmul.f32 %v4594_v21, %v3754_v47  ;;  %vm3782_vm14 = vweird.f32 %v4594_v21  ;;  %v3971_v47 = vmul.f32 1.442695, %v3962_v55  ;;  %v4596_v56 = vpop.eup %4595 }
0x1409   : > { %v3774_v42 = vsel %vm3771_vm13, %v3773_v15, %v3769_v16  ;;  %4100 = vmatpush.bf16.msra.mxu2 %v4329_v53  ;;  %vm3783_vm11 = vmor %vm3781_vm15, %vm3782_vm14 }
0x140a   : > { %v3881_v13 = vmul.f32 1.0614054, %v3774_v42  ;;  %v3778_v19 = vsub.f32 1.0, %v3777_v30 }
0x140c   : > { %v3889_v20 = vadd.f32 -1.4531521, %v3881_v13  ;;  %v3690_v31 = vpop.f32.mrf.mxu1  ;;  %v3779_v39 = vmul.f32 %v4594_v21, %v3778_v19 }
0x140d   : > { %v6167_v60 = vadd.f32 %v6118_v5, %v3690_v31  ;;  %v3729_v31 = vsel %vm3721_vm1, 1.0, %v4646_v36 }
0x140e   : > { %v3897_v35 = vmul.f32 %v3889_v20, %v3774_v42  ;;  %v3780_v32 = vadd.f32 %v4594_v21, %v3779_v39 }
0x140f   : > { %v6173_v6 = vmul.f32 0.70710677, %v6167_v60 }
0x1410   : > { %v3905_v8 = vadd.f32 1.4214138, %v3897_v35  ;;  %v3784_v48 = vsel %vm3783_vm11, %v4594_v21, %v3780_v32 }
0x1411   : > { %v6176_v11 = vand.u32 2147483647, %v6173_v6  ;;  %v3789_v25 = vsel %vm3786_vm12, %v3788_v26, %v3784_v48  ;;  %v3730_v48 = vsel %vm3722_vm4, 1.0, %v4646_v36  ;;  %vm3723_vm13 = vcmp.ge.f32.partialorder %v6173_v6, 0.0 }
0x1412   : > { %v3913_v50 = vmul.f32 %v3905_v8, %v3774_v42  ;;  %v3882_v27 = vmul.f32 1.0614054, %v3789_v25 }
0x1413   : > { %v3747_v62 = vmul.f32 0.3275911, %v6176_v11 }
0x1414   : > { %v3921_v63 = vadd.f32 -0.28449672, %v3913_v50  ;;  %v3692_v52 = vpop.f32.mrf.mxu1  ;;  %v3890_v22 = vadd.f32 -1.4531521, %v3882_v27  ;;  %v3955_v50 = vsub.f32 0.0, %v6176_v11 }
0x1415   : > { %v3755_v10 = vadd.f32 1.0, %v3747_v62  ;;  %v6181_v49 = vadd.f32 %v6118_v5, %v3692_v52  ;;  %v3705_v62 = vmul.f32 0.5, %v6122_v37 }
0x1416   : > { %v3929_v43 = vmul.f32 %v3921_v63, %v3774_v42  ;;  %v3898_v9 = vmul.f32 %v3890_v22, %v3789_v25  ;;  %v3963_v55 = vmul.f32 %v3955_v50, %v6176_v11 }
0x1417   : > { %4597 = vrcp.f32 %v3755_v10  ;;  %v6185_v17 = vmul.f32 0.70710677, %v6181_v49  ;;  %v3802_v29 = vand.u32 2147483648, %v3755_v10  ;;  %v3800_v51 = vand.u32 2147483647, %v3755_v10 }
0x1418   : > { %v3937_v57 = vadd.f32 0.2548296, %v3929_v43  ;;  %v3906_v23 = vadd.f32 1.4214138, %v3898_v9  ;;  %4599 = vpow2.f32 %v3971_v47  ;;  %vm3796_vm3 = vweird.f32 %v3755_v10 }
0x1419   : > { %v6188_v46 = vand.u32 2147483647, %v6185_v17  ;;  %v3803_v35 = vor.u32 1.1754944e-38, %v3802_v29  ;;  %vm3801_vm6 = vcmp.eq.f32.partialorder %v3800_v51, 8.507059e+37  ;;  %v3973_v18 = vmul.f32 1.442695, %v3963_v55 }
0x141a   : > { %v3945_v12 = vmul.f32 %v3937_v57, %v3774_v42  ;;  %v3914_v7 = vmul.f32 %v3906_v23, %v3789_v25  ;;  %vm3724_vm14 = vcmp.ge.f32.partialorder %v6185_v17, 0.0 }
0x141b   : > { %v3748_v4 = vmul.f32 0.3275911, %v6188_v46 }
0x141c   : > { %v3985_v24 = vmul.f32 %v4596_v56, %v3945_v12  ;;  %v3922_v33 = vadd.f32 -0.28449672, %v3914_v7 }
0x141d   : > { %v4598_v44 = vpop.eup %4597  ;;  %v3756_v15 = vadd.f32 1.0, %v3748_v4  ;;  %v3956_v4 = vsub.f32 0.0, %v6188_v46 }
0x141e   : > { %v3792_v41 = vmul.f32 %v4598_v44, %v3755_v10  ;;  %v3930_v21 = vmul.f32 %v3922_v33, %v3789_v25  ;;  %v3993_v42 = vsub.f32 1.0, %v3985_v24  ;;  %vm3797_vm2 = vweird.f32 %v4598_v44  ;;  %v4600_v20 = vpop.eup %4599 }
0x141f   : > { %4601 = vrcp.f32 %v3756_v15  ;;  %vm3798_vm5 = vmor %vm3796_vm3, %vm3797_vm2  ;;  %v3817_v63 = vand.u32 2147483648, %v3756_v15  ;;  %v3815_v43 = vand.u32 2147483647, %v3756_v15  ;;  %vm3811_vm8 = vweird.f32 %v3756_v15 }
0x1420   : > { %v3793_v16 = vsub.f32 1.0, %v3792_v41  ;;  %v3938_v30 = vadd.f32 0.2548296, %v3930_v21  ;;  %v4001_v14 = vmul.f32 %v3993_v42, %v3729_v31  ;;  %4603 = vpow2.f32 %v3973_v18 }
0x1421   : > { %v3818_v47 = vor.u32 1.1754944e-38, %v3817_v63  ;;  %vm3816_vm10 = vcmp.eq.f32.partialorder %v3815_v43, 8.507059e+37  ;;  %v3964_v21 = vmul.f32 %v3956_v4, %v6188_v46  ;;  %v3731_v46 = vsel %vm3723_vm13, 1.0, %v4646_v36 }
0x1422   : > { %v3794_v13 = vmul.f32 %v4598_v44, %v3793_v16  ;;  %v3946_v19 = vmul.f32 %v3938_v30, %v3789_v25  ;;  %v4009_v25 = vadd.f32 1.0, %v4001_v14 }
0x1423   : > { %v3975_v29 = vmul.f32 1.442695, %v3964_v21 }
0x1424   : > { %v3795_v39 = vadd.f32 %v4598_v44, %v3794_v13  ;;  %v3986_v53 = vmul.f32 %v4600_v20, %v3946_v19  ;;  %v4017_v57 = vmul.f32 %v4009_v25, %v3705_v62  ;;  %v3708_v25 = vmul.f32 0.5, %v6181_v49 }
0x1425   : > { %v4602_v59 = vpop.eup %4601  ;;  %4605 = vpow2.f32 %v3975_v29 }
0x1426   : > { %v3799_v40 = vsel %vm3798_vm5, %v4598_v44, %v3795_v39  ;;  %v3994_v32 = vsub.f32 1.0, %v3986_v53  ;;  %v3807_v8 = vmul.f32 %v4602_v59, %v3756_v15  ;;  %vm3812_vm7 = vweird.f32 %v4602_v59  ;;  %v4604_v19 = vpop.eup %4603 }
0x1427   : > { %v3804_v26 = vsel %vm3801_vm6, %v3803_v35, %v3799_v40  ;;  %vm3813_vm9 = vmor %vm3811_vm8, %vm3812_vm7 }
0x1428   : > { %v3883_v0 = vmul.f32 1.0614054, %v3804_v26  ;;  %v4002_v45 = vmul.f32 %v3994_v32, %v3730_v48  ;;  %v3808_v27 = vsub.f32 1.0, %v3807_v8 }
0x142a   : > { %v3891_v52 = vadd.f32 -1.4531521, %v3883_v0  ;;  %v4010_v22 = vadd.f32 1.0, %v4002_v45  ;;  %v3809_v10 = vmul.f32 %v4602_v59, %v3808_v27  ;;  %v3707_v0 = vmul.f32 0.5, %v6167_v60 }
0x142c   : > { %v3899_v9 = vmul.f32 %v3891_v52, %v3804_v26  ;;  %v4018_v23 = vmul.f32 %v4010_v22, %v3706_v2  ;;  %v3810_v12 = vadd.f32 %v4602_v59, %v3809_v10 }
0x142e   : > { %v3907_v7 = vadd.f32 1.4214138, %v3899_v9  ;;  %v4025_v56 = vpack.c.bf16 %v4018_v23, %v4017_v57  ;;  %v3814_v37 = vsel %vm3813_vm9, %v4602_v59, %v3810_v12  ;;  %v4606_v59 = vpop.eup %4605 }
0x142f   : > { %v3819_v44 = vsel %vm3816_vm10, %v3818_v47, %v3814_v37 }
0x1430   : > { %v3915_v24 = vmul.f32 %v3907_v7, %v3804_v26  ;;  %4101 = vmatmul.bf16.vlgmr.msra.gmra.mxu2 %v4025_v56  ;;  %v3884_v33 = vmul.f32 1.0614054, %v3819_v44 }
0x1432   : > { %v3923_v41 = vadd.f32 -0.28449672, %v3915_v24  ;;  %v3892_v11 = vadd.f32 -1.4531521, %v3884_v33 }
0x1434   : > { %v3931_v15 = vmul.f32 %v3923_v41, %v3804_v26  ;;  %v3900_v16 = vmul.f32 %v3892_v11, %v3819_v44 }
0x1436   : > { %v3939_v42 = vadd.f32 0.2548296, %v3931_v15  ;;  %v3908_v30 = vadd.f32 1.4214138, %v3900_v16 }
0x1438   : > { %v3947_v13 = vmul.f32 %v3939_v42, %v3804_v26  ;;  %v3916_v51 = vmul.f32 %v3908_v30, %v3819_v44  ;;  %v3732_v26 = vsel %vm3724_vm14, 1.0, %v4646_v36 }
0x143a   : > { %v3924_v20 = vadd.f32 -0.28449672, %v3916_v51  ;;  %v3987_v31 = vmul.f32 %v4604_v19, %v3947_v13 }
0x143c   : > { %v3932_v39 = vmul.f32 %v3924_v20, %v3819_v44  ;;  %v3995_v53 = vsub.f32 1.0, %v3987_v31 }
0x143e   : > { %v3940_v14 = vadd.f32 0.2548296, %v3932_v39  ;;  %v4003_v32 = vmul.f32 %v3995_v53, %v3731_v46 }
0x1440   : > { %v3948_v35 = vmul.f32 %v3940_v14, %v3819_v44  ;;  %v4011_v50 = vadd.f32 1.0, %v4003_v32 }
0x1442   : > { %v3988_v40 = vmul.f32 %v4606_v59, %v3948_v35  ;;  %v4019_v45 = vmul.f32 %v4011_v50, %v3707_v0 }
0x1444   : > { %v3996_v8 = vsub.f32 1.0, %v3988_v40 }
0x1446   : > { %v4004_v48 = vmul.f32 %v3996_v8, %v3732_v26 }
0x1448   : > { %v4012_v6 = vadd.f32 1.0, %v4004_v48 }
0x144a   : > { %v4020_v27 = vmul.f32 %v4012_v6, %v3708_v25 }
0x144c   : > { %v4026_v62 = vpack.c.bf16 %v4020_v27, %v4019_v45 }
0x144e   : > { %4106 = vmatmul.bf16.gmra.mxu2 %v4026_v62 }
0x1469   : > { %v3695_v2 = vpop.f32.mrf.mxu1 }
0x146a   : > { %v6208_v63 = vadd.f32 %v6118_v5, %v3695_v2 }
0x146c   : > { %v6211_v17 = vmul.f32 0.70710677, %v6208_v63 }
0x146e   : > { %v3741_v52 = vand.u32 2147483647, %v6211_v17  ;;  %vm3725_vm14 = vcmp.ge.f32.partialorder %v6211_v17, 0.0 }
0x1470   : > { %v3749_v22 = vmul.f32 0.3275911, %v3741_v52  ;;  %v3957_v13 = vsub.f32 0.0, %v3741_v52 }
0x1471   : > { %v3697_v10 = vpop.f32.mrf.mxu1 }
0x1472   : > { %v3757_v43 = vadd.f32 1.0, %v3749_v22  ;;  %v6215_v60 = vadd.f32 %v6118_v5, %v3697_v10  ;;  %v3965_v35 = vmul.f32 %v3957_v13, %v3741_v52 }
0x1474   : > { %4607 = vrcp.f32 %v3757_v43  ;;  %v6218_v49 = vmul.f32 0.70710677, %v6215_v60  ;;  %v3832_v44 = vand.u32 2147483648, %v3757_v43  ;;  %v3830_v33 = vand.u32 2147483647, %v3757_v43 }
0x1475   : > { %vm3826_vm11 = vweird.f32 %v3757_v43  ;;  %v3977_v6 = vmul.f32 1.442695, %v3965_v35 }
0x1476   : > { %v6221_v55 = vand.u32 2147483647, %v6218_v49  ;;  %v3833_v30 = vor.u32 1.1754944e-38, %v3832_v44  ;;  %vm3831_vm1 = vcmp.eq.f32.partialorder %v3830_v33, 8.507059e+37 }
0x1478   : > { %v3750_v9 = vmul.f32 0.3275911, %v6221_v55  ;;  %v3958_v27 = vsub.f32 0.0, %v6221_v55 }
0x1479   : > { %v3700_v57 = vpop.f32.mrf.mxu1 }
0x147a   : > { %v4608_v23 = vpop.eup %4607  ;;  %v6225_v12 = vadd.f32 %v6118_v5, %v3700_v57  ;;  %v3758_v7 = vadd.f32 1.0, %v3750_v9 }
0x147b   : > { %v3822_v47 = vmul.f32 %v4608_v23, %v3757_v43  ;;  %vm3827_vm15 = vweird.f32 %v4608_v23 }
0x147c   : > { %v6228_v56 = vmul.f32 0.70710677, %v6225_v12  ;;  %4609 = vrcp.f32 %v3758_v7  ;;  %vm3828_vm12 = vmor %vm3826_vm11, %vm3827_vm15  ;;  %v3845_v46 = vand.u32 2147483647, %v3758_v7  ;;  %vm3841_vm3 = vweird.f32 %v3758_v7 }
0x147d   : > { %v3823_v37 = vsub.f32 1.0, %v3822_v47  ;;  %v3966_v47 = vmul.f32 %v3958_v27, %v6221_v55 }
0x147e   : > { %v6231_v18 = vand.u32 2147483647, %v6228_v56  ;;  %vm3846_vm5 = vcmp.eq.f32.partialorder %v3845_v46, 8.507059e+37 }
0x147f   : > { %v3824_v4 = vmul.f32 %v4608_v23, %v3823_v37 }
0x1480   : > { %v3751_v24 = vmul.f32 0.3275911, %v6231_v18  ;;  %v3959_v33 = vsub.f32 0.0, %v6231_v18 }
0x1481   : > { %v3702_v41 = vpop.f32.mrf.mxu1  ;;  %v3825_v11 = vadd.f32 %v4608_v23, %v3824_v4 }
0x1482   : > { %v3759_v21 = vadd.f32 1.0, %v3751_v24  ;;  %v6235_v15 = vadd.f32 %v6118_v5, %v3702_v41  ;;  %v4610_v16 = vpop.eup %4609  ;;  %v3847_v5 = vand.u32 2147483648, %v3758_v7 }
0x1483   : > { %v3829_v42 = vsel %vm3828_vm12, %v4608_v23, %v3825_v11  ;;  %v3837_v29 = vmul.f32 %v4610_v16, %v3758_v7  ;;  %vm3842_vm2 = vweird.f32 %v4610_v16  ;;  %vm3726_vm12 = vcmp.ge.f32.partialorder %v6218_v49, 0.0 }
0x1484   : > { %4611 = vrcp.f32 %v3759_v21  ;;  %v6238_v51 = vmul.f32 0.70710677, %v6235_v15  ;;  %v3834_v19 = vsel %vm3831_vm1, %v3833_v30, %v3829_v42  ;;  %vm3843_vm4 = vmor %vm3841_vm3, %vm3842_vm2  ;;  %v3848_v0 = vor.u32 1.1754944e-38, %v3847_v5 }
0x1485   : > { %v3838_v20 = vsub.f32 1.0, %v3837_v29  ;;  %v3885_v31 = vmul.f32 1.0614054, %v3834_v19  ;;  %v3862_v52 = vand.u32 2147483648, %v3759_v21  ;;  %v3860_v43 = vand.u32 2147483647, %v3759_v21 }
0x1486   : > { %v6241_v39 = vand.u32 2147483647, %v6238_v51  ;;  %vm3856_vm7 = vweird.f32 %v3759_v21  ;;  %v3967_v5 = vmul.f32 %v3959_v33, %v6231_v18  ;;  %v3709_v49 = vmul.f32 0.5, %v6208_v63 }
0x1487   : > { %v3839_v14 = vmul.f32 %v4610_v16, %v3838_v20  ;;  %v3893_v53 = vadd.f32 -1.4531521, %v3885_v31  ;;  %v3863_v37 = vor.u32 1.1754944e-38, %v3862_v52  ;;  %vm3861_vm9 = vcmp.eq.f32.partialorder %v3860_v43, 8.507059e+37 }
0x1488   : > { %v3752_v59 = vmul.f32 0.3275911, %v6241_v39  ;;  %vm3727_vm1 = vcmp.ge.f32.partialorder %v6228_v56, 0.0  ;;  %vm3728_vm2 = vcmp.ge.f32.partialorder %v6238_v51, 0.0 }
0x1489   : > { %v3840_v32 = vadd.f32 %v4610_v16, %v3839_v14  ;;  %v3901_v8 = vmul.f32 %v3893_v53, %v3834_v19  ;;  %v3735_v63 = vsel %vm3727_vm1, 1.0, %v4646_v36 }
0x148a   : > { %v4612_v40 = vpop.eup %4611  ;;  %v3760_v48 = vadd.f32 1.0, %v3752_v59 }
0x148b   : > { %v3852_v26 = vmul.f32 %v4612_v40, %v3759_v21  ;;  %v3844_v50 = vsel %vm3843_vm4, %v4610_v16, %v3840_v32  ;;  %v3909_v25 = vadd.f32 1.4214138, %v3901_v8  ;;  %vm3857_vm6 = vweird.f32 %v4612_v40 }
0x148c   : > { %4613 = vrcp.f32 %v3760_v48  ;;  %v3849_v62 = vsel %vm3846_vm5, %v3848_v0, %v3844_v50  ;;  %vm3858_vm8 = vmor %vm3856_vm7, %vm3857_vm6  ;;  %v3979_v21 = vmul.f32 1.442695, %v3966_v47  ;;  %v3877_v31 = vand.u32 2147483648, %v3760_v48 }
0x148d   : > { %v3853_v45 = vsub.f32 1.0, %v3852_v26  ;;  %v3917_v2 = vmul.f32 %v3909_v25, %v3834_v19  ;;  %v3886_v10 = vmul.f32 1.0614054, %v3849_v62  ;;  %4615 = vpow2.f32 %v3977_v6 }
0x148e   : > { %v3875_v35 = vand.u32 2147483647, %v3760_v48  ;;  %4617 = vpow2.f32 %v3979_v21  ;;  %vm3871_vm13 = vweird.f32 %v3760_v48  ;;  %v3981_v50 = vmul.f32 1.442695, %v3967_v5 }
0x148f   : > { %v3854_v22 = vmul.f32 %v4612_v40, %v3853_v45  ;;  %v3925_v9 = vadd.f32 -0.28449672, %v3917_v2  ;;  %v3894_v57 = vadd.f32 -1.4531521, %v3886_v10  ;;  %v3960_v0 = vsub.f32 0.0, %v6241_v39 }
0x1490   : > { %vm3876_vm11 = vcmp.eq.f32.partialorder %v3875_v35, 8.507059e+37  ;;  %v3733_v10 = vsel %vm3725_vm14, 1.0, %v4646_v36  ;;  %4619 = vpow2.f32 %v3981_v50  ;;  %v3712_v50 = vmul.f32 0.5, %v6235_v15 }
0x1491   : > { %v3855_v23 = vadd.f32 %v4612_v40, %v3854_v22  ;;  %v3933_v7 = vmul.f32 %v3925_v9, %v3834_v19  ;;  %v3902_v44 = vmul.f32 %v3894_v57, %v3849_v62  ;;  %v3968_v9 = vmul.f32 %v3960_v0, %v6241_v39 }
0x1492   : > { %v4614_v4 = vpop.eup %4613 }
0x1493   : > { %v3859_v24 = vsel %vm3858_vm8, %v4612_v40, %v3855_v23  ;;  %v3867_v41 = vmul.f32 %v4614_v4, %v3760_v48  ;;  %v3941_v11 = vadd.f32 0.2548296, %v3933_v7  ;;  %v3910_v42 = vadd.f32 1.4214138, %v3902_v44  ;;  %v4616_v14 = vpop.eup %4615 }
0x1494   : > { %v3864_v16 = vsel %vm3861_vm9, %v3863_v37, %v3859_v24  ;;  %vm3872_vm10 = vweird.f32 %v4614_v4  ;;  %v4618_v48 = vpop.eup %4617  ;;  %v3983_v24 = vmul.f32 1.442695, %v3968_v9 }
0x1495   : > { %v3887_v30 = vmul.f32 1.0614054, %v3864_v16  ;;  %v3868_v29 = vsub.f32 1.0, %v3867_v41  ;;  %v3949_v13 = vmul.f32 %v3941_v11, %v3834_v19  ;;  %v3918_v20 = vmul.f32 %v3910_v42, %v3849_v62  ;;  %vm3873_vm15 = vmor %vm3871_vm13, %vm3872_vm10 }
0x1496   : > { %v3878_v19 = vor.u32 1.1754944e-38, %v3877_v31  ;;  %v4620_v11 = vpop.eup %4619  ;;  %4621 = vpow2.f32 %v3983_v24 }
0x1497   : > { %v3895_v55 = vadd.f32 -1.4531521, %v3887_v30  ;;  %v3869_v53 = vmul.f32 %v4614_v4, %v3868_v29  ;;  %v3926_v59 = vadd.f32 -0.28449672, %v3918_v20  ;;  %v3989_v46 = vmul.f32 %v4616_v14, %v3949_v13 }
0x1498   : > { %v3710_v30 = vmul.f32 0.5, %v6215_v60 }
0x1499   : > { %v3903_v40 = vmul.f32 %v3895_v55, %v3864_v16  ;;  %v3870_v32 = vadd.f32 %v4614_v4, %v3869_v53  ;;  %v3934_v8 = vmul.f32 %v3926_v59, %v3849_v62  ;;  %v3997_v6 = vsub.f32 1.0, %v3989_v46 }
0x149a   : > { %v3736_v46 = vsel %vm3728_vm2, 1.0, %v4646_v36 }
0x149b   : > { %v3911_v26 = vadd.f32 1.4214138, %v3903_v40  ;;  %v3874_v25 = vsel %vm3873_vm15, %v4614_v4, %v3870_v32  ;;  %v3942_v18 = vadd.f32 0.2548296, %v3934_v8  ;;  %v4005_v23 = vmul.f32 %v3997_v6, %v3733_v10  ;;  %v4428_v40 = vld [vmem:[%s6314_s13] ss:$0 sm:$0xff] }
0x149c   : > { %v3879_v45 = vsel %vm3876_vm11, %v3878_v19, %v3874_v25  ;;  %v4622_v53 = vpop.eup %4621 }
0x149d   : > { %v3919_v27 = vmul.f32 %v3911_v26, %v3864_v16  ;;  %v3888_v2 = vmul.f32 1.0614054, %v3879_v45  ;;  %v3950_v52 = vmul.f32 %v3942_v18, %v3849_v62  ;;  %v3734_v62 = vsel %vm3726_vm12, 1.0, %v4646_v36 }
0x149e   : > { %v4013_v41 = vadd.f32 1.0, %v4005_v23  ;;  %v3711_v26 = vmul.f32 0.5, %v6225_v12 }
0x149f   : > { %v3927_v22 = vadd.f32 -0.28449672, %v3919_v27  ;;  %v3896_v43 = vadd.f32 -1.4531521, %v3888_v2  ;;  %v3990_v57 = vmul.f32 %v4618_v48, %v3950_v52 }
0x14a0   : > { %v4021_v13 = vmul.f32 %v4013_v41, %v3709_v49 }
0x14a1   : > { %v3935_v47 = vmul.f32 %v3927_v22, %v3864_v16  ;;  %v3904_v7 = vmul.f32 %v3896_v43, %v3879_v45  ;;  %v3998_v37 = vsub.f32 1.0, %v3990_v57 }
0x14a3   : > { %v3943_v4 = vadd.f32 0.2548296, %v3935_v47  ;;  %v3912_v44 = vadd.f32 1.4214138, %v3904_v7  ;;  %v4006_v33 = vmul.f32 %v3998_v37, %v3734_v62 }
0x14a5   : > { %v3951_v17 = vmul.f32 %v3943_v4, %v3864_v16  ;;  %v3920_v42 = vmul.f32 %v3912_v44, %v3879_v45  ;;  %v4014_v39 = vadd.f32 1.0, %v4006_v33 }
0x14a7   : > { %v3928_v21 = vadd.f32 -0.28449672, %v3920_v42  ;;  %v3991_v29 = vmul.f32 %v4620_v11, %v3951_v17  ;;  %v4022_v20 = vmul.f32 %v4014_v39, %v3710_v30 }
0x14a9   : > { %v3936_v31 = vmul.f32 %v3928_v21, %v3879_v45  ;;  %v4027_v55 = vpack.c.bf16 %v4022_v20, %v4021_v13  ;;  %v3999_v5 = vsub.f32 1.0, %v3991_v29 }
0x14ab   : > { %v3944_v14 = vadd.f32 0.2548296, %v3936_v31  ;;  %4111 = vmatmul.bf16.gmra.mxu2 %v4027_v55  ;;  %v4007_v35 = vmul.f32 %v3999_v5, %v3735_v63 }
0x14ad   : > { %v3952_v16 = vmul.f32 %v3944_v14, %v3879_v45  ;;  %v4015_v8 = vadd.f32 1.0, %v4007_v35 }
0x14af   : > { %v3992_v60 = vmul.f32 %v4622_v53, %v3952_v16  ;;  %v4023_v0 = vmul.f32 %v4015_v8, %v3711_v26 }
0x14b1   : > { %v4000_v59 = vsub.f32 1.0, %v3992_v60 }
0x14b3   : > { %v4102_v56 = vpop.f32.mrf.mxu2  ;;  %v4008_v32 = vmul.f32 %v4000_v59, %v3736_v46 }
0x14b4   : > { %v4122_v19 = vadd.f32 %v4102_v56, %v5951_v38 }
0x14b5   : > { %v4016_v36 = vadd.f32 1.0, %v4008_v32 }
0x14b6   : > { %v4134_v51 = vadd.f32 %v4428_v40, %v4122_v19 }
0x14b7   : > { %v4024_v25 = vmul.f32 %v4016_v36, %v3712_v50 }
0x14b8   : > { %4142 = vst.msk [vmem:[%s6273_s21] sm:$0xff] %vm482_vm0, %v4134_v51 }
0x14b9   : > { %v4028_v38 = vpack.c.bf16 %v4024_v25, %v4023_v0 }
0x14bb   : > { %v4104_v12 = vpop.f32.mrf.mxu2  ;;  %4116 = vmatmul.bf16.gmra.mxu2 %v4028_v38 }
0x14bc   : > { %v4123_v15 = vadd.f32 %v4104_v12, %v5957_v1 }
0x14be   : > { %v4135_v18 = vadd.f32 %v4428_v40, %v4123_v15 }
0x14c0   : > { %4143 = vst.msk [vmem:[%s6273_s21 + $0x8] sm:$0xff] %vm482_vm0, %v4135_v18 }
0x14d1   : > { %v4107_v6 = vpop.f32.mrf.mxu2 }
0x14d2   : > { %v4124_v45 = vadd.f32 %v4107_v6, %v5981_v28 }
0x14d4   : > { %v4136_v27 = vadd.f32 %v4428_v40, %v4124_v45 }
0x14d6   : > { %4144 = vst.msk [vmem:[%s6273_s21 + $0x10] sm:$0xff] %vm482_vm0, %v4136_v27 }
0x14d9   : > { %v4109_v2 = vpop.f32.mrf.mxu2 }
0x14da   : > { %v4125_v52 = vadd.f32 %v4109_v2, %v5987_v3 }
0x14dc   : > { %v4137_v22 = vadd.f32 %v4428_v40, %v4125_v52 }
0x14de   : > { %4145 = vst.msk [vmem:[%s6273_s21 + $0x18] sm:$0xff] %vm482_vm0, %v4137_v22 }
0x152e   : > { %v4112_v1 = vpop.f32.mrf.mxu2 }
0x152f   : > { %v4126_v48 = vadd.f32 %v4112_v1, %v6001_v61 }
0x1531   : > { %v4138_v10 = vadd.f32 %v4428_v40, %v4126_v48 }
0x1533   : > { %4146 = vst.msk [vmem:[%s6273_s21 + $0x20] sm:$0xff] %vm482_vm0, %v4138_v10 }
0x1536   : > { %v4114_v43 = vpop.f32.mrf.mxu2 }
0x1537   : > { %v4127_v28 = vadd.f32 %v4114_v43, %v6012_v58 }
0x1539   : > { %v4139_v9 = vadd.f32 %v4428_v40, %v4127_v28 }
0x153b   : > { %4147 = vst.msk [vmem:[%s6273_s21 + $0x28] sm:$0xff] %vm482_vm0, %v4139_v9 }
0x153e   : > { %v4117_v57 = vpop.f32.mrf.mxu2 }
0x153f   : > { %v4128_v23 = vadd.f32 %v4117_v57, %v6019_v34 }
0x1541   : > { %v4140_v3 = vadd.f32 %v4428_v40, %v4128_v23 }
0x1543   : > { %4148 = vst.msk [vmem:[%s6273_s21 + $0x30] sm:$0xff] %vm482_vm0, %v4140_v3 }
0x1546   : > { %v4119_v47 = vpop.f32.mrf.mxu2 }
0x1547   : > { %v4129_v7 = vadd.f32 %v4119_v47, %v6025_v54 }
0x1549   : > { %v4141_v37 = vadd.f32 %v4428_v40, %v4129_v7 }
0x154b   : > { %4149 = vst.msk [vmem:[%s6273_s21 + $0x38] sm:$0xff] %vm482_vm0, %v4141_v37 }
0x154c PF: > { %s24_s29 = sadd.s32 1, %s4629_s29  }
0x154d   : > { %p21_p4 = scmp.ge.s32.totalorder %s24_s29, 4  }
0x154f   :  { %23 = sbr.rel (!%p21_p4) target bundleno = 1 (0x1), region = 109 }

// kernel: sub.10
= control target key start
LH: loop header
LB: loop body
LE: loop exit
PB: predicated region body
PF: predicated region fallthrough
CT: control target
= control target key end

     0   :  { %s29_s10 = smov 3  ;;  %s45_s11 = smov 12   ;;  %vm12_vm0 = vcmask 31744   ;;  %vm19_vm1 = vcmask 130144   ;;  %vm26_vm2 = vcmask 97344   ;;  %vm33_vm3 = vcmask 64544   ;;  %s67_s0 = inlined_call_operand.vmem [shape: s32[2,4,4], index: 0, kind: input, shape index: {}]   ;;  %s68_s1 = inlined_call_operand.vmem [shape: s32[2,16], index: 1, kind: output, shape index: {}]  }
   0x1   :  { %v41_v0 = vld [vmem:[%s67_s0 + $0x4] sm:$0xf]  ;;  %v8_v1 = vld [vmem:[%s67_s0] sm:$0xf]  ;;  %s15_s0 = smov 3  ;;  %s46_s12 = smov 4  }
   0x2   :  { %7 = vst [vmem:[#allocation1 + $0x8] sm:$0xf] %v41_v0  ;;  %s22_s13 = smov 3  ;;  %s47_s14 = smov 8  }
   0x3   :  { %9 = vst [vmem:[#allocation1] sm:$0xf] %v8_v1  ;;  %s10_s15 = smov 3 }
   0xa   :  { %v16_v2 = vld [vmem:[#allocation1 + $0x3] ss:$8 sm:%s15_s0]   ;;  %v30_v3 = vld [vmem:[#allocation1 + $0x1] ss:$8 sm:%s29_s10]   ;;  %v23_v4 = vld [vmem:[#allocation1 + $0x2] ss:$8 sm:%s22_s13]  }
   0xb   :  { %17 = vrot.lane.b32.xlu0 %v16_v2, %s45_s11  ;;  %31 = vrot.lane.b32.xlu1 %v30_v3, %s46_s12  ;;  %v11_v5 = vld [vmem:[#allocation1] ss:$8 sm:%s10_s15]  }
   0xc   :  { %13 = vst.msk [vmem:[#allocation0] sm:$0x3] %vm12_vm0, %v11_v5  }
  0x13   :  { %24 = vrot.lane.b32.xlu0 %v23_v4, %s47_s14 }
  0x7d   :  { %v18_v6 = vpop.permute.xlu0 %17   ;;  %v32_v7 = vpop.permute.xlu1 %31  }
  0x7e   :  { %20 = vst.msk [vmem:[#allocation0] sm:$0x3] %vm19_vm1, %v18_v6  }
  0x85   :  { %v25_v8 = vpop.permute.xlu0 %24  }
  0x86   :  { %27 = vst.msk [vmem:[#allocation0] sm:$0x3] %vm26_vm2, %v25_v8  }
  0x87   :  { %34 = vst.msk [vmem:[#allocation0] sm:$0x3] %vm33_vm3, %v32_v7  }
  0x8e   :  { %v37_v9 = vld [vmem:[#allocation0] sm:$0x3] }
  0x8f   :  { %40 = vst [vmem:[%s68_s1] sm:$0x3] %v37_v9 }

// kernel: basic_layer_forward.1
= control target key start
LH: loop header
LB: loop body
LE: loop exit
PB: predicated region body
PF: predicated region fallthrough
CT: control target
= control target key end

     0   :  { %s4722_s29 = smov 0   ;;  %s6301_s0 = inlined_call_operand.vmem [shape: f32[128,32], index: 0, kind: input, shape index: {}]   ;;  %s6302_s1 = inlined_call_operand.vmem [shape: f32[1,32], index: 1, kind: input, shape index: {}]   ;;  %s6303_s2 = inlined_call_operand.vmem [shape: f32[1,32], index: 2, kind: input, shape index: {}]   ;;  %s6304_s3 = inlined_call_operand.vmem [shape: bf16[32,96], index: 3, kind: input, shape index: {}]   ;;  %s6305_s4 = inlined_call_operand.vmem [shape: f32[1,96], index: 4, kind: input, shape index: {}]   ;;  %s6306_s5 = inlined_call_operand.vmem [shape: f32[4,16,16], index: 5, kind: input, shape index: {}]   ;;  %s6307_s6 = inlined_call_operand.vmem [shape: bf16[32,32], index: 6, kind: input, shape index: {}]   ;;  %s6308_s7 = inlined_call_operand.vmem [shape: f32[1,32], index: 7, kind: input, shape index: {}]   ;;  %s6309_s8 = inlined_call_operand.vmem [shape: f32[1,32], index: 8, kind: input, shape index: {}]   ;;  %s6310_s9 = inlined_call_operand.vmem [shape: f32[1,32], index: 9, kind: input, shape index: {}]   ;;  %s6311_s10 = inlined_call_operand.vmem [shape: bf16[32,128], index: 10, kind: input, shape index: {}]   ;;  %s6312_s11 = inlined_call_operand.vmem [shape: f32[1,128], index: 11, kind: input, shape index: {}]   ;;  %s6313_s12 = inlined_call_operand.vmem [shape: bf16[128,32], index: 12, kind: input, shape index: {}]   ;;  %s6314_s13 = inlined_call_operand.vmem [shape: f32[1,32], index: 13, kind: input, shape index: {}]   ;;  %s6315_s14 = inlined_call_operand.vmem [shape: f32[128,32], index: 14, kind: output, shape index: {}]  }
   0x1 LB: > { %s4206_s30 = sadd.s32 4294967295, %s4629_s29   ;;  %p4210_p0 = scmp.ge.s32.totalorder %s4629_s29, 1  ;;  %s4629_s29 = sphi %s4722_s29, %s24_s29  }
   0x2   : > { %p413_p1 = scmp.lt.s32.totalorder %s4629_s29, 3 }
   0x4   : > { %p414_p2 = pnand %p4210_p0, %p413_p1 }
   0x5   : > { %s4211_s15 = sshll.u32 (!%p414_p2), %s4206_s30, 3  ;;  %s4632_s17 = smov (!%p414_p2), 96  }
   0x6   : > { %417 = sbr.rel (%p414_p2) target bundleno = 5452 (0x154c), region = 76  ;;  %p460_p3 = scmp.lt.s32.totalorder (!%p414_p2), %s4211_s15, 15 }
   0x7   : > { %s4633_s23 = smov (!%p414_p2), 64   ;;  %s4634_s24 = smov (!%p414_p2), 88  }
   0x8   : > { %s4635_s25 = smov (!%p414_p2), 120   ;;  %s4637_s18 = smov (!%p414_p2), 56  }
   0x9   : > { %s4638_s20 = smov (!%p414_p2), 112   ;;  %s4640_s26 = smov (!%p414_p2), 72  }
   0xa   : > { %s4641_s27 = smov (!%p414_p2), 104   ;;  %s4643_s21 = smov (!%p414_p2), 16  }
   0xb   : > { %s6331_s15 = smov (!%p460_p3, %s4211_s15), 15  ;;  %vm482_vm0 = vcmask 261120   ;;  %v4631_v14 = vmov 32.0   ;;  %v4324_v58 = vld [vmem:[%s6304_s3 + $0x8] sm:$0xff]  ;;  %v4323_v62 = vld [vmem:[%s6304_s3] sm:$0xff]  ;;  %s4644_s22 = smov 8  }
   0xc   : > { %s4212_s16 = sshll.u32 %s6331_s15, 3  ;;  %4429 = vrcp.f32 %v4631_v14  ;;  %730 = vmatpush.bf16.msra.mxu0 %v4324_v58 }
   0xd   : > { %s4738_s19 = scalar_lea.vmem %s6301_s0, %s4212_s16 }
   0xe   : > { %v476_v0 = vld [vmem:[%s4738_s19 + $0x20] sm:$0xff]  ;;  %v474_v1 = vld [vmem:[%s4738_s19 + $0x10] sm:$0xff]  ;;  %v477_v6 = vld [vmem:[%s4738_s19 + $0x28] sm:$0xff] }
   0xf   : > { %v472_v2 = vld [vmem:[%s4738_s19] sm:$0xff]  ;;  %v495_v3 = vsel %vm482_vm0, %v476_v0, 0.0  ;;  %v489_v4 = vsel %vm482_vm0, %v474_v1, 0.0  ;;  %v475_v7 = vld [vmem:[%s4738_s19 + $0x18] sm:$0xff]  ;;  %v473_v8 = vld [vmem:[%s4738_s19 + $0x8] sm:$0xff]  ;;  %v498_v9 = vsel %vm482_vm0, %v477_v6, 0.0 }
  0x10   : > { %v483_v5 = vsel %vm482_vm0, %v472_v2, 0.0  ;;  %496 = vadd.xlane.f32.xlu2 %v495_v3  ;;  %490 = vadd.xlane.f32.xlu1 %v489_v4  ;;  %v492_v10 = vsel %vm482_vm0, %v475_v7, 0.0  ;;  %v486_v11 = vsel %vm482_vm0, %v473_v8, 0.0  ;;  %v478_v12 = vld [vmem:[%s4738_s19 + $0x30] sm:$0xff]  ;;  %v479_v36 = vld [vmem:[%s4738_s19 + $0x38] sm:$0xff] }
  0x11   : > { %484 = vadd.xlane.f32.xlu0 %v483_v5  ;;  %v501_v13 = vsel %vm482_vm0, %v478_v12, 0.0  ;;  %v504_v41 = vsel %vm482_vm0, %v479_v36, 0.0  ;;  %731 = vmatpush.bf16.msra.mxu0 %v4323_v62 }
  0x12   : > { %v4430_v15 = vpop.eup %4429 }
  0x13   : > { %v508_v16 = vmul.f32 32.0, %v4430_v15  ;;  %vm512_vm1 = vweird.f32 %v4430_v15 }
  0x15   : > { %v509_v17 = vsub.f32 1.0, %v508_v16 }
  0x17   : > { %v510_v18 = vmul.f32 %v4430_v15, %v509_v17 }
  0x18   : > { %499 = vadd.xlane.f32.xlu2 %v498_v9  ;;  %493 = vadd.xlane.f32.xlu1 %v492_v10 }
  0x19   : > { %487 = vadd.xlane.f32.xlu0 %v486_v11  ;;  %v511_v19 = vadd.f32 %v4430_v15, %v510_v18 }
  0x1b   : > { %v4754_v20 = vsel %vm512_vm1, %v4430_v15, %v511_v19 }
  0x20   : > { %502 = vadd.xlane.f32.xlu2 %v501_v13 }
  0x83   : > { %v497_v21 = vpop.xlane.xlu2 %496  ;;  %v491_v22 = vpop.xlane.xlu1 %490 }
  0x84   : > { %v485_v23 = vpop.xlane.xlu0 %484  ;;  %v518_v32 = vmul.f32 %v4754_v20, %v497_v21  ;;  %v516_v33 = vmul.f32 %v4754_v20, %v491_v22 }
  0x85   : > { %v514_v24 = vmul.f32 %v4754_v20, %v485_v23 }
  0x86   : > { %v4773_v39 = vsub.f32 %v476_v0, %v518_v32  ;;  %v4775_v40 = vsub.f32 %v474_v1, %v516_v33 }
  0x87   : > { %v4757_v25 = vsub.f32 %v472_v2, %v514_v24 }
  0x88   : > { %v534_v48 = vmul.f32 %v4773_v39, %v4773_v39  ;;  %v532_v49 = vmul.f32 %v4775_v40, %v4775_v40 }
  0x89   : > { %v530_v26 = vmul.f32 %v4757_v25, %v4757_v25 }
  0x8a   : > { %v550_v53 = vsel %vm482_vm0, %v534_v48, 0.0  ;;  %v544_v54 = vsel %vm482_vm0, %v532_v49, 0.0 }
  0x8b   : > { %v500_v27 = vpop.xlane.xlu2 %499  ;;  %v494_v28 = vpop.xlane.xlu1 %493  ;;  %v538_v29 = vsel %vm482_vm0, %v530_v26, 0.0 }
  0x8c   : > { %v517_v30 = vmul.f32 %v4754_v20, %v494_v28  ;;  %539 = vadd.xlane.f32.xlu0 %v538_v29  ;;  %v488_v31 = vpop.xlane.xlu0 %487  ;;  %v519_v47 = vmul.f32 %v4754_v20, %v500_v27 }
  0x8d   : > { %v515_v34 = vmul.f32 %v4754_v20, %v488_v31 }
  0x8e   : > { %v4766_v35 = vsub.f32 %v475_v7, %v517_v30  ;;  %v4792_v52 = vsub.f32 %v477_v6, %v519_v47 }
  0x8f   : > { %v4769_v37 = vsub.f32 %v473_v8, %v515_v34 }
  0x90   : > { %v533_v38 = vmul.f32 %v4766_v35, %v4766_v35  ;;  %v535_v56 = vmul.f32 %v4792_v52, %v4792_v52 }
  0x91   : > { %v531_v42 = vmul.f32 %v4769_v37, %v4769_v37 }
  0x92   : > { %v547_v43 = vsel %vm482_vm0, %v533_v38, 0.0  ;;  %v553_v57 = vsel %vm482_vm0, %v535_v56, 0.0 }
  0x93   : > { %v503_v44 = vpop.xlane.xlu2 %502  ;;  %548 = vadd.xlane.f32.xlu2 %v547_v43  ;;  %v541_v45 = vsel %vm482_vm0, %v531_v42, 0.0 }
  0x94   : > { %v520_v46 = vmul.f32 %v4754_v20, %v503_v44  ;;  %505 = vadd.xlane.f32.xlu0 %v504_v41  ;;  %542 = vadd.xlane.f32.xlu1 %v541_v45  ;;  %v4836_v45 = vld [vmem:[%s6302_s1] ss:$0 sm:$0xff] }
  0x96   : > { %v4788_v50 = vsub.f32 %v478_v12, %v520_v46 }
  0x98   : > { %v536_v51 = vmul.f32 %v4788_v50, %v4788_v50 }
  0x9a   : > { %v556_v55 = vsel %vm482_vm0, %v536_v51, 0.0 }
  0x9b   : > { %557 = vadd.xlane.f32.xlu2 %v556_v55 }
  0x9c   : > { %551 = vadd.xlane.f32.xlu0 %v550_v53  ;;  %545 = vadd.xlane.f32.xlu1 %v544_v54  ;;  %v4843_v54 = vld [vmem:[%s6303_s2] ss:$0 sm:$0xff] }
  0xa4   : > { %554 = vadd.xlane.f32.xlu1 %v553_v57 }
  0xff   : > { %v540_v59 = vpop.xlane.xlu0 %539 }
 0x100   : > { %v562_v60 = vmul.f32 %v540_v59, %v4754_v20 }
 0x102   : > { %v570_v61 = vadd.f32 1e-05, %v562_v60 }
 0x104   : > { %4431 = vrsqrt.f32 %v570_v61  ;;  %vm584_vm3 = vweird.f32 %v570_v61 }
 0x106   : > { %v549_v63 = vpop.xlane.xlu2 %548 }
 0x107   : > { %v565_v0 = vmul.f32 %v549_v63, %v4754_v20  ;;  %v543_v1 = vpop.xlane.xlu1 %542  ;;  %v506_v2 = vpop.xlane.xlu0 %505 }
 0x108   : > { %v563_v3 = vmul.f32 %v543_v1, %v4754_v20  ;;  %v521_v4 = vmul.f32 %v4754_v20, %v506_v2 }
 0x109   : > { %v4810_v5 = vadd.f32 1e-05, %v565_v0 }
 0x10a   : > { %v4432_v6 = vpop.eup %4431  ;;  %v571_v7 = vadd.f32 1e-05, %v563_v3  ;;  %v4812_v8 = vsub.f32 %v479_v36, %v521_v4 }
 0x10b   : > { %v579_v9 = vmul.f32 %v4432_v6, %v570_v61  ;;  %4433 = vrsqrt.f32 %v4810_v5  ;;  %vm585_vm2 = vweird.f32 %v4432_v6  ;;  %vm614_vm10 = vweird.f32 %v4810_v5 }
 0x10c   : > { %4435 = vrsqrt.f32 %v571_v7  ;;  %v537_v10 = vmul.f32 %v4812_v8, %v4812_v8  ;;  %vm4824_vm4 = vmor %vm584_vm3, %vm585_vm2  ;;  %vm594_vm5 = vweird.f32 %v571_v7 }
 0x10d   : > { %v580_v11 = vmul.f32 %v4432_v6, %v579_v9 }
 0x10e   : > { %v559_v12 = vsel %vm482_vm0, %v537_v10, 0.0  ;;  %v558_v28 = vpop.xlane.xlu2 %557 }
 0x10f   : > { %v581_v13 = vmul.f32 0.5, %v580_v11  ;;  %v546_v14 = vpop.xlane.xlu1 %545  ;;  %560 = vadd.xlane.f32.xlu0 %v559_v12  ;;  %v552_v16 = vpop.xlane.xlu0 %551 }
 0x110   : > { %v564_v15 = vmul.f32 %v546_v14, %v4754_v20  ;;  %v566_v23 = vmul.f32 %v552_v16, %v4754_v20 }
 0x111   : > { %v4819_v17 = vpop.eup %4433  ;;  %v582_v18 = vsub.f32 1.5, %v581_v13 }
 0x112   : > { %v4436_v19 = vpop.eup %4435  ;;  %v572_v21 = vadd.f32 1e-05, %v564_v15  ;;  %v609_v26 = vmul.f32 %v4819_v17, %v4810_v5  ;;  %v574_v30 = vadd.f32 1e-05, %v566_v23  ;;  %vm615_vm11 = vweird.f32 %v4819_v17 }
 0x113   : > { %v589_v22 = vmul.f32 %v4436_v19, %v571_v7  ;;  %v583_v24 = vmul.f32 %v4432_v6, %v582_v18  ;;  %vm595_vm6 = vweird.f32 %v4436_v19  ;;  %vm616_vm13 = vmor %vm614_vm10, %vm615_vm11  ;;  %vm791_vm11 = vcmask 64512  }
 0x114   : > { %4437 = vrsqrt.f32 %v572_v21  ;;  %v610_v33 = vmul.f32 %v4819_v17, %v609_v26  ;;  %vm596_vm7 = vmor %vm594_vm5, %vm595_vm6  ;;  %vm604_vm8 = vweird.f32 %v572_v21  ;;  %vm624_vm1 = vweird.f32 %v574_v30 }
 0x115   : > { %v590_v27 = vmul.f32 %v4436_v19, %v589_v22  ;;  %v587_v32 = vsel %vm4824_vm4, %v4432_v6, %v583_v24  ;;  %4439 = vrsqrt.f32 %v574_v30 }
 0x116   : > { %v658_v44 = vmul.f32 %v587_v32, %v4757_v25  ;;  %v611_v46 = vmul.f32 0.5, %v610_v33 }
 0x117   : > { %v591_v29 = vmul.f32 0.5, %v590_v27  ;;  %v555_v31 = vpop.xlane.xlu1 %554 }
 0x118   : > { %v567_v34 = vmul.f32 %v555_v31, %v4754_v20  ;;  %v669_v53 = vmul.f32 %v4836_v45, %v658_v44  ;;  %v612_v25 = vsub.f32 1.5, %v611_v46 }
 0x119   : > { %v592_v36 = vsub.f32 1.5, %v591_v29  ;;  %v568_v29 = vmul.f32 %v558_v28, %v4754_v20 }
 0x11a   : > { %v4438_v38 = vpop.eup %4437  ;;  %v575_v41 = vadd.f32 1e-05, %v567_v34  ;;  %v680_v60 = vadd.f32 %v4843_v54, %v669_v53  ;;  %v613_v61 = vmul.f32 %v4819_v17, %v612_v25 }
 0x11b   : > { %v593_v42 = vmul.f32 %v4436_v19, %v592_v36  ;;  %v599_v43 = vmul.f32 %v4438_v38, %v572_v21  ;;  %vm605_vm9 = vweird.f32 %v4438_v38  ;;  %v4440_v56 = vpop.eup %4439 }
 0x11c   : > { %4441 = vrsqrt.f32 %v575_v41  ;;  %vm606_vm12 = vmor %vm604_vm8, %vm605_vm9  ;;  %v619_v62 = vmul.f32 %v4440_v56, %v574_v30  ;;  %v617_v3 = vsel %vm616_vm13, %v4819_v17, %v613_v61  ;;  %vm634_vm14 = vweird.f32 %v575_v41 }
 0x11d   : > { %v597_v47 = vsel %vm596_vm7, %v4436_v19, %v593_v42  ;;  %v600_v48 = vmul.f32 %v4438_v38, %v599_v43  ;;  %v661_v7 = vmul.f32 %v617_v3, %v4766_v35  ;;  %vm625_vm2 = vweird.f32 %v4440_v56 }
 0x11e   : > { %v659_v49 = vmul.f32 %v597_v47, %v4769_v37  ;;  %v620_v4 = vmul.f32 %v4440_v56, %v619_v62  ;;  %vm626_vm4 = vmor %vm624_vm1, %vm625_vm2  ;;  %v576_v30 = vadd.f32 1e-05, %v568_v29 }
 0x11f   : > { %v601_v51 = vmul.f32 0.5, %v600_v48  ;;  %v672_v12 = vmul.f32 %v4836_v45, %v661_v7 }
 0x120   : > { %v670_v55 = vmul.f32 %v4836_v45, %v659_v49  ;;  %v621_v9 = vmul.f32 0.5, %v620_v4  ;;  %4443 = vrsqrt.f32 %v576_v30  ;;  %vm644_vm5 = vweird.f32 %v576_v30 }
 0x121   : > { %v602_v57 = vsub.f32 1.5, %v601_v51 }
 0x122   : > { %v681_v37 = vadd.f32 %v4843_v54, %v670_v55  ;;  %v4442_v58 = vpop.eup %4441  ;;  %v622_v13 = vsub.f32 1.5, %v621_v9 }
 0x123   : > { %v603_v59 = vmul.f32 %v4438_v38, %v602_v57  ;;  %v629_v63 = vmul.f32 %v4442_v58, %v575_v41  ;;  %vm635_vm15 = vweird.f32 %v4442_v58 }
 0x124   : > { %v688_v0 = vpack.c.bf16 %v681_v37, %v680_v60  ;;  %vm636_vm3 = vmor %vm634_vm14, %vm635_vm15  ;;  %v623_v16 = vmul.f32 %v4440_v56, %v622_v13 }
 0x125   : > { %v607_v1 = vsel %vm606_vm12, %v4438_v38, %v603_v59  ;;  %v630_v2 = vmul.f32 %v4442_v58, %v629_v63  ;;  %vm908_vm12 = vcmask 130048  }
 0x126   : > { %4223 = vmatmul.msk.bf16.vlgmr.msra.gmra.mxu0 %vm482_vm0, %v688_v0  ;;  %v660_v5 = vmul.f32 %v607_v1, %v4775_v40  ;;  %v683_v40 = vadd.f32 %v4843_v54, %v672_v12  ;;  %v627_v18 = vsel %vm626_vm4, %v4440_v56, %v623_v16  ;;  %v4444_v31 = vpop.eup %4443 }
 0x127   : > { %v631_v6 = vmul.f32 0.5, %v630_v2  ;;  %v662_v21 = vmul.f32 %v627_v18, %v4773_v39  ;;  %vm645_vm6 = vweird.f32 %v4444_v31 }
 0x128   : > { %v671_v10 = vmul.f32 %v4836_v45, %v660_v5  ;;  %vm646_vm7 = vmor %vm644_vm5, %vm645_vm6 }
 0x129   : > { %v632_v11 = vsub.f32 1.5, %v631_v6  ;;  %v673_v23 = vmul.f32 %v4836_v45, %v662_v21 }
 0x12a   : > { %v682_v14 = vadd.f32 %v4843_v54, %v671_v10 }
 0x12b   : > { %v633_v15 = vmul.f32 %v4442_v58, %v632_v11  ;;  %v684_v26 = vadd.f32 %v4843_v54, %v673_v23 }
 0x12c   : > { %v689_v35 = vpack.c.bf16 %v683_v40, %v682_v14 }
 0x12d   : > { %v637_v17 = vsel %vm636_vm3, %v4442_v58, %v633_v15 }
 0x12e   : > { %v663_v19 = vmul.f32 %v637_v17, %v4792_v52  ;;  %v639_v52 = vmul.f32 %v4444_v31, %v576_v30 }
 0x130   : > { %v674_v22 = vmul.f32 %v4836_v45, %v663_v19  ;;  %v640_v32 = vmul.f32 %v4444_v31, %v639_v52 }
 0x132   : > { %v685_v24 = vadd.f32 %v4843_v54, %v674_v22  ;;  %v641_v36 = vmul.f32 0.5, %v640_v32 }
 0x134   : > { %v690_v27 = vpack.c.bf16 %v685_v24, %v684_v26  ;;  %v642_v38 = vsub.f32 1.5, %v641_v36 }
 0x136   : > { %4224 = vmatmul.msk.bf16.gmra.mxu0 %vm482_vm0, %v689_v35  ;;  %v643_v42 = vmul.f32 %v4444_v31, %v642_v38 }
 0x138   : > { %v647_v46 = vsel %vm646_vm7, %v4444_v31, %v643_v42 }
 0x139   : > { %v664_v49 = vmul.f32 %v647_v46, %v4788_v50  ;;  %v4423_v50 = vld [vmem:[%s6305_s4] ss:$0 sm:$0xff] }
 0x13b   : > { %v675_v55 = vmul.f32 %v4836_v45, %v664_v49 }
 0x13d   : > { %v686_v57 = vadd.f32 %v4843_v54, %v675_v55 }
 0x146   : > { %4225 = vmatmul.msk.bf16.gmra.mxu0 %vm482_vm0, %v690_v27 }
 0x182   : > { %v561_v39 = vpop.xlane.xlu0 %560 }
 0x183   : > { %v569_v33 = vmul.f32 %v561_v39, %v4754_v20 }
 0x185   : > { %v577_v34 = vadd.f32 1e-05, %v569_v33 }
 0x187   : > { %4445 = vrsqrt.f32 %v577_v34  ;;  %vm654_vm9 = vweird.f32 %v577_v34 }
 0x18d   : > { %v4446_v41 = vpop.eup %4445 }
 0x18e   : > { %v649_v43 = vmul.f32 %v4446_v41, %v577_v34  ;;  %vm655_vm8 = vweird.f32 %v4446_v41 }
 0x18f   : > { %vm656_vm10 = vmor %vm654_vm9, %vm655_vm8 }
 0x190   : > { %v650_v44 = vmul.f32 %v4446_v41, %v649_v43 }
 0x192   : > { %v651_v47 = vmul.f32 0.5, %v650_v44 }
 0x194   : > { %v652_v48 = vsub.f32 1.5, %v651_v47 }
 0x196   : > { %v653_v51 = vmul.f32 %v4446_v41, %v652_v48 }
 0x198   : > { %v657_v53 = vsel %vm656_vm10, %v4446_v41, %v653_v51 }
 0x199   : > { %v665_v25 = vmul.f32 %v657_v53, %v4812_v8 }
 0x19b   : > { %v676_v56 = vmul.f32 %v4836_v45, %v665_v25 }
 0x19d   : > { %v687_v37 = vadd.f32 %v4843_v54, %v676_v56 }
 0x19f   : > { %v691_v58 = vpack.c.bf16 %v687_v37, %v686_v57 }
 0x1a1   : > { %4226 = vmatmul.msk.bf16.gmra.mxu0 %vm482_vm0, %v691_v58 }
 0x1a3   : > { %v733_v59 = vpop.f32.mrf.mxu0 }
 0x1a4   : > { %v734_v60 = vadd.f32 %v4423_v50, %v733_v59 }
 0x1a6   : > { %v753_v61 = vmul.f32 0.35355338, %v734_v60  ;;  %v769_v8 = vpack.c.bf16 %v734_v60, %v734_v60 }
 0x1a8   : > { %v761_v0 = vpack.c.bf16 %v753_v61, %v753_v61  ;;  %v786_v2 = vunpack.c.l.b16 %v769_v8 }
 0x1aa   : > { %v781_v54 = vunpack.c.l.b16 %v761_v0 }
 0x1ab   : > { %v735_v62 = vpop.f32.mrf.mxu0 }
 0x1ac   : > { %v736_v63 = vadd.f32 %v4423_v50, %v735_v62 }
 0x1ae   : > { %v754_v1 = vmul.f32 0.35355338, %v736_v63  ;;  %v770_v45 = vpack.c.bf16 %v736_v63, %v736_v63 }
 0x1b0   : > { %v762_v3 = vpack.c.bf16 %v754_v1, %v754_v1  ;;  %v787_v4 = vunpack.c.l.b16 %v770_v45 }
 0x1b2   : > { %v782_v5 = vunpack.c.l.b16 %v762_v3  ;;  %v4879_v6 = vpack.c.b16 %v787_v4, %v786_v2  ;;  %v777_v2 = vld [vmem:[%s6306_s5] sm:$0xff] }
 0x1b3   : > { %v738_v7 = vpop.f32.mrf.mxu0 }
 0x1b4   : > { %v4881_v9 = vpack.c.b16 %v782_v5, %v781_v54  ;;  %789 = vrot.lane.b32.xlu1 %v4879_v6, %s4632_s17  ;;  %v739_v10 = vadd.f32 %v4423_v50, %v738_v7  ;;  %v778_v5 = vld [vmem:[%s6306_s5 + $0x8] sm:$0xff] }
 0x1b6   : > { %v755_v11 = vmul.f32 0.35355338, %v739_v10  ;;  %v771_v13 = vpack.c.bf16 %v739_v10, %v739_v10 }
 0x1b8   : > { %v763_v15 = vpack.c.bf16 %v755_v11, %v755_v11  ;;  %v819_v35 = vunpack.c.l.b16 %v771_v13 }
 0x1ba   : > { %v814_v19 = vunpack.c.l.b16 %v763_v15 }
 0x1bb   : > { %v740_v12 = vpop.f32.mrf.mxu0 }
 0x1bc   : > { %v741_v14 = vadd.f32 %v4423_v50, %v740_v12 }
 0x1be   : > { %v756_v40 = vmul.f32 0.35355338, %v741_v14  ;;  %v772_v16 = vpack.c.bf16 %v741_v14, %v741_v14 }
 0x1c0   : > { %v764_v17 = vpack.c.bf16 %v756_v40, %v756_v40  ;;  %v820_v18 = vunpack.c.l.b16 %v772_v16 }
 0x1c2   : > { %v815_v21 = vunpack.c.l.b16 %v764_v17  ;;  %v4885_v22 = vpack.c.b16 %v820_v18, %v819_v35 }
 0x1c3   : > { %v743_v23 = vpop.f32.mrf.mxu0 }
 0x1c4   : > { %v4887_v24 = vpack.c.b16 %v815_v21, %v814_v19  ;;  %822 = vrot.lane.b32.xlu2 %v4885_v22, %s4632_s17  ;;  %v744_v26 = vadd.f32 %v4423_v50, %v743_v23 }
 0x1c6   : > { %v757_v27 = vmul.f32 0.35355338, %v744_v26  ;;  %v773_v29 = vpack.c.bf16 %v744_v26, %v744_v26 }
 0x1c8   : > { %v765_v31 = vpack.c.bf16 %v757_v27, %v757_v27  ;;  %v851_v39 = vunpack.c.l.b16 %v773_v29 }
 0x1ca   : > { %v846_v36 = vunpack.c.l.b16 %v765_v31 }
 0x1cb   : > { %v745_v28 = vpop.f32.mrf.mxu0 }
 0x1cc   : > { %v746_v30 = vadd.f32 %v4423_v50, %v745_v28 }
 0x1ce   : > { %v758_v52 = vmul.f32 0.35355338, %v746_v30  ;;  %v774_v32 = vpack.c.bf16 %v746_v30, %v746_v30 }
 0x1d0   : > { %v766_v33 = vpack.c.bf16 %v758_v52, %v758_v52  ;;  %v852_v34 = vunpack.c.l.b16 %v774_v32 }
 0x1d2   : > { %v847_v38 = vunpack.c.l.b16 %v766_v33  ;;  %v4891_v41 = vpack.c.b16 %v852_v34, %v851_v39 }
 0x1d4   : > { %v4893_v42 = vpack.c.b16 %v847_v38, %v846_v36  ;;  %854 = vrot.lane.b32.xlu2 %v4891_v41, %s4632_s17 }
 0x21e   : > { %v748_v43 = vpop.f32.mrf.mxu0  ;;  %v823_v47 = vpop.permute.xlu2 %822 }
 0x21f   : > { %v749_v44 = vadd.f32 %v4423_v50, %v748_v43  ;;  %v828_v37 = vsel %vm791_vm11, %v823_v47, 0 }
 0x221   : > { %v759_v46 = vmul.f32 0.35355338, %v749_v44  ;;  %v775_v49 = vpack.c.bf16 %v749_v44, %v749_v44 }
 0x223   : > { %v767_v55 = vpack.c.bf16 %v759_v46, %v759_v46  ;;  %v883_v58 = vunpack.c.l.b16 %v775_v49 }
 0x225   : > { %v878_v61 = vunpack.c.l.b16 %v767_v55 }
 0x226   : > { %v750_v48 = vpop.f32.mrf.mxu0  ;;  %v790_v51 = vpop.permute.xlu1 %789 }
 0x227   : > { %v751_v53 = vadd.f32 %v4423_v50, %v750_v48  ;;  %v796_v25 = vsel %vm791_vm11, %v790_v51, 0 }
 0x228   : > { %805 = vmatpush.bf16.xpose.msra.mxu3 %v796_v25 }
 0x229   : > { %v760_v56 = vmul.f32 0.35355338, %v751_v53  ;;  %v776_v57 = vpack.c.bf16 %v751_v53, %v751_v53 }
 0x22b   : > { %v768_v59 = vpack.c.bf16 %v760_v56, %v760_v56  ;;  %v884_v60 = vunpack.c.l.b16 %v776_v57 }
 0x22d   : > { %v879_v62 = vunpack.c.l.b16 %v768_v59  ;;  %v4899_v8 = vpack.c.b16 %v884_v60, %v883_v58 }
 0x22e   : > { %v855_v0 = vpop.permute.xlu2 %854 }
 0x22f   : > { %v4901_v63 = vpack.c.b16 %v879_v62, %v878_v61  ;;  %886 = vrot.lane.b32.xlu0 %v4899_v8, %s4632_s17  ;;  %v860_v50 = vsel %vm791_vm11, %v855_v0, 0  ;;  %4227 = vmatmul.msk.bf16.vlgmr.msra.gmra.mxu3 %vm791_vm11, %v4881_v9  ;;  %s4636_s17 = smov 80  }
 0x230   : > { %837 = vmatpush.bf16.xpose.msrb.mxu3 %v828_v37 }
 0x238   : > { %869 = vmatpush.bf16.xpose.msra.mxu3 %v860_v50 }
 0x23f   : > { %4228 = vmatmul.msk.bf16.vlgmr.msrb.gmra.mxu3 %vm791_vm11, %v4887_v24 }
 0x24f   : > { %4229 = vmatmul.msk.bf16.vlgmr.msra.gmra.mxu3 %vm791_vm11, %v4893_v42 }
 0x2a1   : > { %v887_v1 = vpop.permute.xlu0 %886 }
 0x2a2   : > { %v892_v45 = vsel %vm791_vm11, %v887_v1, 0 }
 0x2a3   : > { %901 = vmatpush.bf16.xpose.msra.mxu1 %v892_v45 }
 0x2aa   : > { %4230 = vmatmul.msk.bf16.vlgmr.msra.gmra.mxu1 %vm791_vm11, %v4901_v63 }
 0x2b2   : > { %v807_v3 = vpop.f32.mrf.mxu3 }
 0x2b3   : > { %v4918_v4 = vadd.f32 %v807_v3, %v777_v2 }
 0x2b5   : > { %v933_v54 = vsel %vm908_vm12, %v4918_v4, inf }
 0x2b6   : > { %934 = vmin.xlane.f32.xlu1 %v933_v54 }
 0x2ba   : > { %v809_v7 = vpop.f32.mrf.mxu3 }
 0x2bb   : > { %v4925_v10 = vadd.f32 %v809_v7, %v778_v5 }
 0x2bd   : > { %v936_v11 = vsel %vm908_vm12, %v4925_v10, inf }
 0x2be   : > { %937 = vmin.xlane.f32.xlu0 %v936_v11 }
 0x2c2   : > { %v839_v12 = vpop.f32.mrf.mxu3 }
 0x2c3   : > { %v4929_v13 = vadd.f32 %v839_v12, %v777_v2 }
 0x2c5   : > { %v939_v14 = vsel %vm908_vm12, %v4929_v13, inf }
 0x2c6   : > { %940 = vmin.xlane.f32.xlu2 %v939_v14 }
 0x2ca   : > { %v841_v15 = vpop.f32.mrf.mxu3 }
 0x2cb   : > { %v4933_v40 = vadd.f32 %v841_v15, %v778_v5 }
 0x2cd   : > { %v942_v16 = vsel %vm908_vm12, %v4933_v40, inf }
 0x2ce   : > { %943 = vmin.xlane.f32.xlu1 %v942_v16 }
 0x2d2   : > { %v871_v35 = vpop.f32.mrf.mxu3 }
 0x2d3   : > { %v4937_v17 = vadd.f32 %v871_v35, %v777_v2 }
 0x2d5   : > { %v945_v18 = vsel %vm908_vm12, %v4937_v17, inf }
 0x2d6   : > { %946 = vmin.xlane.f32.xlu1 %v945_v18 }
 0x2da   : > { %v873_v26 = vpop.f32.mrf.mxu3 }
 0x2db   : > { %v4945_v27 = vadd.f32 %v873_v26, %v778_v5 }
 0x2dd   : > { %v948_v32 = vsel %vm908_vm12, %v4945_v27, inf }
 0x327   : > { %v903_v19 = vpop.f32.mrf.mxu1 }
 0x328   : > { %v4941_v21 = vadd.f32 %v903_v19, %v777_v2 }
 0x329   : > { %v935_v30 = vpop.xlane.xlu1 %934 }
 0x32a   : > { %v951_v23 = vsel %vm908_vm12, %v4941_v21, inf  ;;  %vm957_vm14 = vcmp.le.f32.partialorder %v4918_v4, %v935_v30 }
 0x32b   : > { %952 = vmin.xlane.f32.xlu0 %v951_v23  ;;  %v965_v34 = vsel %vm957_vm14, 1e+30, %v4918_v4 }
 0x32c   : > { %v973_v38 = vsel %vm908_vm12, %v965_v34, inf }
 0x32f   : > { %v905_v28 = vpop.f32.mrf.mxu1 }
 0x330   : > { %v4947_v29 = vadd.f32 %v905_v28, %v778_v5 }
 0x331   : > { %v938_v31 = vpop.xlane.xlu0 %937 }
 0x332   : > { %v954_v52 = vsel %vm908_vm12, %v4947_v29, inf  ;;  %vm958_vm13 = vcmp.le.f32.partialorder %v4925_v10, %v938_v31 }
 0x333   : > { %955 = vmin.xlane.f32.xlu2 %v954_v52  ;;  %949 = vmin.xlane.f32.xlu0 %v948_v32  ;;  %v966_v39 = vsel %vm958_vm13, 1e+30, %v4925_v10 }
 0x334   : > { %v976_v33 = vsel %vm908_vm12, %v966_v39, inf }
 0x335   : > { %977 = vmin.xlane.f32.xlu1 %v976_v33 }
 0x339   : > { %v941_v36 = vpop.xlane.xlu2 %940 }
 0x33a   : > { %vm959_vm15 = vcmp.le.f32.partialorder %v4929_v13, %v941_v36 }
 0x33b   : > { %974 = vmin.xlane.f32.xlu2 %v973_v38  ;;  %v967_v43 = vsel %vm959_vm15, 1e+30, %v4929_v13 }
 0x33c   : > { %v979_v44 = vsel %vm908_vm12, %v967_v43, inf }
 0x33d   : > { %980 = vmin.xlane.f32.xlu0 %v979_v44 }
 0x341   : > { %v944_v46 = vpop.xlane.xlu1 %943 }
 0x342   : > { %vm960_vm1 = vcmp.le.f32.partialorder %v4933_v40, %v944_v46 }
 0x343   : > { %v968_v47 = vsel %vm960_vm1, 1e+30, %v4933_v40 }
 0x344   : > { %v982_v48 = vsel %vm908_vm12, %v968_v47, inf }
 0x345   : > { %983 = vmin.xlane.f32.xlu2 %v982_v48 }
 0x349   : > { %v947_v49 = vpop.xlane.xlu1 %946 }
 0x34a   : > { %vm961_vm2 = vcmp.le.f32.partialorder %v4937_v17, %v947_v49 }
 0x34b   : > { %v969_v51 = vsel %vm961_vm2, 1e+30, %v4937_v17 }
 0x34c   : > { %v985_v53 = vsel %vm908_vm12, %v969_v51, inf }
 0x34d   : > { %986 = vmin.xlane.f32.xlu2 %v985_v53 }
 0x39e   : > { %v953_v25 = vpop.xlane.xlu0 %952 }
 0x39f   : > { %vm963_vm3 = vcmp.le.f32.partialorder %v4941_v21, %v953_v25 }
 0x3a0   : > { %v971_v55 = vsel %vm963_vm3, 1e+30, %v4941_v21 }
 0x3a1   : > { %v991_v56 = vsel %vm908_vm12, %v971_v55, inf }
 0x3a2   : > { %992 = vmin.xlane.f32.xlu1 %v991_v56  ;;  %v915_v56 = vsel %vm908_vm12, %v4929_v13, -inf }
 0x3a6   : > { %v956_v57 = vpop.xlane.xlu2 %955  ;;  %v950_v37 = vpop.xlane.xlu0 %949 }
 0x3a7   : > { %vm964_vm4 = vcmp.le.f32.partialorder %v4947_v29, %v956_v57  ;;  %vm962_vm5 = vcmp.le.f32.partialorder %v4945_v27, %v950_v37  ;;  %v930_v57 = vsel %vm908_vm12, %v4947_v29, -inf }
 0x3a8   : > { %v972_v58 = vsel %vm964_vm4, 1e+30, %v4947_v29  ;;  %v970_v59 = vsel %vm962_vm5, 1e+30, %v4945_v27  ;;  %v978_v60 = vpop.xlane.xlu1 %977 }
 0x3a9   : > { %v994_v61 = vsel %vm908_vm12, %v972_v58, inf  ;;  %v988_v62 = vsel %vm908_vm12, %v970_v59, inf  ;;  %vm998_vm6 = vcmp.le.f32.partialorder %v966_v39, %v978_v60 }
 0x3aa   : > { %995 = vmin.xlane.f32.xlu0 %v994_v61  ;;  %989 = vmin.xlane.f32.xlu1 %v988_v62  ;;  %v1006_v0 = vsel %vm998_vm6, 1e+30, %v966_v39 }
 0x3ab   : > { %v1016_v50 = vsel %vm908_vm12, %v1006_v0, inf }
 0x3ac   : > { %1017 = vmin.xlane.f32.xlu2 %v1016_v50 }
 0x3ae   : > { %v975_v1 = vpop.xlane.xlu2 %974 }
 0x3af   : > { %vm997_vm7 = vcmp.le.f32.partialorder %v965_v34, %v975_v1 }
 0x3b0   : > { %v1005_v45 = vsel %vm997_vm7, 1e+30, %v965_v34  ;;  %v981_v2 = vpop.xlane.xlu0 %980 }
 0x3b1   : > { %v1013_v3 = vsel %vm908_vm12, %v1005_v45, inf  ;;  %vm999_vm8 = vcmp.le.f32.partialorder %v967_v43, %v981_v2  ;;  %v909_v2 = vsel %vm908_vm12, %v4918_v4, -inf }
 0x3b2   : > { %1014 = vmin.xlane.f32.xlu0 %v1013_v3  ;;  %v1007_v54 = vsel %vm999_vm8, 1e+30, %v967_v43 }
 0x3b3   : > { %v1019_v5 = vsel %vm908_vm12, %v1007_v54, inf }
 0x3b4   : > { %1020 = vmin.xlane.f32.xlu1 %v1019_v5 }
 0x3b8   : > { %v984_v7 = vpop.xlane.xlu2 %983 }
 0x3b9   : > { %vm1000_vm9 = vcmp.le.f32.partialorder %v968_v47, %v984_v7  ;;  %v918_v7 = vsel %vm908_vm12, %v4933_v40, -inf }
 0x3ba   : > { %v1008_v11 = vsel %vm1000_vm9, 1e+30, %v968_v47 }
 0x3bb   : > { %v1022_v12 = vsel %vm908_vm12, %v1008_v11, inf }
 0x3bc   : > { %1023 = vmin.xlane.f32.xlu0 %v1022_v12 }
 0x3c0   : > { %v987_v14 = vpop.xlane.xlu2 %986 }
 0x3c1   : > { %vm1001_vm10 = vcmp.le.f32.partialorder %v969_v51, %v987_v14 }
 0x3c2   : > { %v1009_v15 = vsel %vm1001_vm10, 1e+30, %v969_v51 }
 0x3c3   : > { %v1025_v16 = vsel %vm908_vm12, %v1009_v15, inf }
 0x3c4   : > { %1026 = vmin.xlane.f32.xlu0 %v1025_v16 }
 0x415   : > { %v993_v35 = vpop.xlane.xlu1 %992 }
 0x416   : > { %vm1003_vm13 = vcmp.le.f32.partialorder %v971_v55, %v993_v35 }
 0x417   : > { %v1011_v18 = vsel %vm1003_vm13, 1e+30, %v971_v55  ;;  %v912_v55 = vsel %vm908_vm12, %v4925_v10, -inf }
 0x418   : > { %v1031_v19 = vsel %vm908_vm12, %v1011_v18, inf }
 0x419   : > { %1032 = vmin.xlane.f32.xlu2 %v1031_v19 }
 0x41d   : > { %v990_v23 = vpop.xlane.xlu1 %989  ;;  %v996_v26 = vpop.xlane.xlu0 %995 }
 0x41e   : > { %vm1002_vm14 = vcmp.le.f32.partialorder %v970_v59, %v990_v23  ;;  %vm1004_vm15 = vcmp.le.f32.partialorder %v972_v58, %v996_v26  ;;  %v924_v23 = vsel %vm908_vm12, %v4945_v27, -inf }
 0x41f   : > { %v1010_v28 = vsel %vm1002_vm14, 1e+30, %v970_v59  ;;  %v1012_v30 = vsel %vm1004_vm15, 1e+30, %v972_v58  ;;  %v1018_v31 = vpop.xlane.xlu2 %1017 }
 0x420   : > { %v1028_v52 = vsel %vm908_vm12, %v1010_v28, inf  ;;  %v1034_v32 = vsel %vm908_vm12, %v1012_v30, inf  ;;  %vm1038_vm1 = vcmp.le.f32.partialorder %v1006_v0, %v1018_v31 }
 0x421   : > { %1029 = vmin.xlane.f32.xlu2 %v1028_v52  ;;  %1035 = vmin.xlane.f32.xlu1 %v1034_v32  ;;  %v1046_v39 = vsel %vm1038_vm1, 1e+30, %v1006_v0 }
 0x422   : > { %v1056_v33 = vsel %vm908_vm12, %v1046_v39, inf }
 0x423   : > { %1057 = vmin.xlane.f32.xlu0 %v1056_v33 }
 0x425   : > { %v1015_v34 = vpop.xlane.xlu0 %1014 }
 0x426   : > { %vm1037_vm2 = vcmp.le.f32.partialorder %v1005_v45, %v1015_v34 }
 0x427   : > { %v1045_v36 = vsel %vm1037_vm2, 1e+30, %v1005_v45  ;;  %v1021_v38 = vpop.xlane.xlu1 %1020 }
 0x428   : > { %v1053_v43 = vsel %vm908_vm12, %v1045_v36, inf  ;;  %vm1039_vm3 = vcmp.le.f32.partialorder %v1007_v54, %v1021_v38 }
 0x429   : > { %1054 = vmin.xlane.f32.xlu1 %v1053_v43  ;;  %v1047_v44 = vsel %vm1039_vm3, 1e+30, %v1007_v54 }
 0x42a   : > { %v1059_v46 = vsel %vm908_vm12, %v1047_v44, inf }
 0x42b   : > { %1060 = vmin.xlane.f32.xlu2 %v1059_v46 }
 0x42f   : > { %v1024_v47 = vpop.xlane.xlu0 %1023 }
 0x430   : > { %vm1040_vm4 = vcmp.le.f32.partialorder %v1008_v11, %v1024_v47 }
 0x431   : > { %v1048_v48 = vsel %vm1040_vm4, 1e+30, %v1008_v11  ;;  %v927_v11 = vsel %vm908_vm12, %v4941_v21, -inf }
 0x432   : > { %v1062_v49 = vsel %vm908_vm12, %v1048_v48, inf }
 0x433   : > { %1063 = vmin.xlane.f32.xlu1 %v1062_v49 }
 0x437   : > { %v1027_v51 = vpop.xlane.xlu0 %1026 }
 0x438   : > { %vm1041_vm5 = vcmp.le.f32.partialorder %v1009_v15, %v1027_v51 }
 0x439   : > { %v1049_v53 = vsel %vm1041_vm5, 1e+30, %v1009_v15  ;;  %v921_v15 = vsel %vm908_vm12, %v4937_v17, -inf }
 0x43a   : > { %v1065_v25 = vsel %vm908_vm12, %v1049_v53, inf }
 0x43b   : > { %1066 = vmin.xlane.f32.xlu1 %v1065_v25 }
 0x443   : > { %913 = vmax.xlane.f32.xlu1 %v912_v55 }
 0x44b   : > { %916 = vmax.xlane.f32.xlu1 %v915_v56 }
 0x453   : > { %931 = vmax.xlane.f32.xlu1 %v930_v57 }
 0x48c   : > { %v1033_v37 = vpop.xlane.xlu2 %1032 }
 0x48d   : > { %vm1043_vm8 = vcmp.le.f32.partialorder %v1011_v18, %v1033_v37 }
 0x48e   : > { %v1051_v50 = vsel %vm1043_vm8, 1e+30, %v1011_v18 }
 0x48f   : > { %v1071_v45 = vsel %vm908_vm12, %v1051_v50, inf }
 0x494   : > { %v1030_v58 = vpop.xlane.xlu2 %1029  ;;  %v1036_v59 = vpop.xlane.xlu1 %1035 }
 0x495   : > { %vm1042_vm6 = vcmp.le.f32.partialorder %v1010_v28, %v1030_v58  ;;  %vm1044_vm7 = vcmp.le.f32.partialorder %v1012_v30, %v1036_v59 }
 0x496   : > { %v4996_v60 = vsel %vm1042_vm6, 1e+30, %v1010_v28  ;;  %v1052_v61 = vsel %vm1044_vm7, 1e+30, %v1012_v30  ;;  %v1058_v5 = vpop.xlane.xlu0 %1057 }
 0x497   : > { %v1068_v62 = vsel %vm908_vm12, %v4996_v60, inf  ;;  %v1074_v0 = vsel %vm908_vm12, %v1052_v61, inf  ;;  %vm1078_vm10 = vcmp.le.f32.partialorder %v1046_v39, %v1058_v5 }
 0x498   : > { %1069 = vmin.xlane.f32.xlu0 %v1068_v62  ;;  %1075 = vmin.xlane.f32.xlu2 %v1074_v0  ;;  %v1086_v14 = vsel %vm1078_vm10, 1e+30, %v1046_v39 }
 0x499   : > { %v1096_v16 = vsel %vm908_vm12, %v1086_v14, inf }
 0x49c   : > { %v1055_v12 = vpop.xlane.xlu1 %1054 }
 0x49d   : > { %vm1077_vm13 = vcmp.le.f32.partialorder %v1045_v36, %v1055_v12 }
 0x49e   : > { %v1061_v1 = vpop.xlane.xlu2 %1060  ;;  %v1085_v18 = vsel %vm1077_vm13, 1e+30, %v1045_v36 }
 0x49f   : > { %vm1079_vm9 = vcmp.le.f32.partialorder %v1047_v44, %v1061_v1  ;;  %v1093_v19 = vsel %vm908_vm12, %v1085_v18, inf }
 0x4a0   : > { %1072 = vmin.xlane.f32.xlu0 %v1071_v45  ;;  %910 = vmax.xlane.f32.xlu2 %v909_v2  ;;  %v1087_v3 = vsel %vm1079_vm9, 1e+30, %v1047_v44 }
 0x4a1   : > { %v1099_v54 = vsel %vm908_vm12, %v1087_v3, inf }
 0x4a2   : > { %1100 = vmin.xlane.f32.xlu1 %v1099_v54 }
 0x4a6   : > { %v1064_v35 = vpop.xlane.xlu1 %1063 }
 0x4a7   : > { %vm1080_vm14 = vcmp.le.f32.partialorder %v1048_v48, %v1064_v35 }
 0x4a8   : > { %919 = vmax.xlane.f32.xlu0 %v918_v7  ;;  %928 = vmax.xlane.f32.xlu2 %v927_v11  ;;  %v1088_v26 = vsel %vm1080_vm14, 1e+30, %v1048_v48 }
 0x4a9   : > { %v1102_v30 = vsel %vm908_vm12, %v1088_v26, inf }
 0x4ae   : > { %v1067_v28 = vpop.xlane.xlu1 %1066 }
 0x4af   : > { %vm1081_vm15 = vcmp.le.f32.partialorder %v1049_v53, %v1067_v28 }
 0x4b0   : > { %922 = vmax.xlane.f32.xlu0 %v921_v15  ;;  %1097 = vmin.xlane.f32.xlu2 %v1096_v16  ;;  %v1089_v31 = vsel %vm1081_vm15, 1e+30, %v1049_v53 }
 0x4b1   : > { %v1105_v52 = vsel %vm908_vm12, %v1089_v31, inf }
 0x4b6   : > { %v914_v32 = vpop.xlane.xlu1 %913 }
 0x4b7   : > { %v1134_v51 = vsub.f32 %v4925_v10, %v914_v32 }
 0x4b8   : > { %1094 = vmin.xlane.f32.xlu0 %v1093_v19  ;;  %925 = vmax.xlane.f32.xlu2 %v924_v23 }
 0x4b9   : > { %v1143_v37 = vmul.f32 1.442695, %v1134_v51 }
 0x4be   : > { %v917_v39 = vpop.xlane.xlu1 %916 }
 0x4bf   : > { %v1135_v47 = vsub.f32 %v4929_v13, %v917_v39 }
 0x4c0   : > { %1103 = vmin.xlane.f32.xlu0 %v1102_v30 }
 0x4c1   : > { %v1145_v53 = vmul.f32 1.442695, %v1135_v47 }
 0x4c3   : > { %4447 = vpow2.f32 %v1145_v53 }
 0x4c4   : > { %4449 = vpow2.f32 %v1143_v37 }
 0x4c6   : > { %v5020_v43 = vpop.xlane.xlu1 %931 }
 0x4c7   : > { %v1140_v47 = vsub.f32 %v4947_v29, %v5020_v43 }
 0x4c8   : > { %1106 = vmin.xlane.f32.xlu0 %v1105_v52 }
 0x4c9   : > { %v1155_v51 = vmul.f32 1.442695, %v1140_v47 }
 0x4dc   : > { %1347 = vrot.lane.b32.xlu0 %v4885_v22, %s4633_s23 }
 0x50b   : > { %v1076_v33 = vpop.xlane.xlu2 %1075  ;;  %v1070_v34 = vpop.xlane.xlu0 %1069 }
 0x50c   : > { %vm1084_vm1 = vcmp.le.f32.partialorder %v1052_v61, %v1076_v33  ;;  %vm1082_vm3 = vcmp.le.f32.partialorder %v4996_v60, %v1070_v34 }
 0x50d   : > { %v1092_v36 = vsel %vm1084_vm1, 1e+30, %v1052_v61  ;;  %v1090_v57 = vsel %vm1082_vm3, 1e+30, %v4996_v60  ;;  %v4448_v61 = vpop.eup %4447 }
 0x50e   : > { %v1114_v38 = vsel %vm908_vm12, %v1092_v36, inf  ;;  %v1108_v59 = vsel %vm908_vm12, %v1090_v57, inf  ;;  %v4450_v45 = vpop.eup %4449 }
 0x50f   : > { %1115 = vmin.xlane.f32.xlu1 %v1114_v38 }
 0x513   : > { %v911_v44 = vpop.xlane.xlu2 %910  ;;  %v1073_v46 = vpop.xlane.xlu0 %1072 }
 0x514   : > { %vm1083_vm2 = vcmp.le.f32.partialorder %v1051_v50, %v1073_v46 }
 0x515   : > { %v1091_v48 = vsel %vm1083_vm2, 1e+30, %v1051_v50  ;;  %v1101_v25 = vpop.xlane.xlu1 %1100 }
 0x516   : > { %v1111_v49 = vsel %vm908_vm12, %v1091_v48, inf  ;;  %v1119_v58 = vmin.f32 %v1101_v25, %v917_v39 }
 0x517   : > { %1112 = vmin.xlane.f32.xlu2 %v1111_v49 }
 0x518   : > { %vm1127_vm4 = vcmp.ge.f32.partialorder %v4929_v13, %v1119_v58 }
 0x519   : > { %v5031_v50 = vsel %vm1127_vm4, %v4448_v61, 0.0 }
 0x51a   : > { %v1171_v2 = vsel %vm908_vm12, %v5031_v50, 0.0 }
 0x51b   : > { %v920_v55 = vpop.xlane.xlu0 %919  ;;  %v5026_v56 = vpop.xlane.xlu2 %928 }
 0x51c   : > { %v1136_v18 = vsub.f32 %v4933_v40, %v920_v55 }
 0x51e   : > { %v1147_v23 = vmul.f32 1.442695, %v1136_v18 }
 0x51f   : > { %1109 = vmin.xlane.f32.xlu2 %v1108_v59 }
 0x523   : > { %v923_v62 = vpop.xlane.xlu0 %922  ;;  %v1098_v0 = vpop.xlane.xlu2 %1097 }
 0x524   : > { %v1118_v1 = vmin.f32 %v1098_v0, %v914_v32  ;;  %v1137_v54 = vsub.f32 %v4937_v17, %v923_v62 }
 0x526   : > { %vm1126_vm5 = vcmp.ge.f32.partialorder %v4925_v10, %v1118_v1  ;;  %v1149_v7 = vmul.f32 1.442695, %v1137_v54  ;;  %v1133_v10 = vsub.f32 %v4918_v4, %v911_v44 }
 0x527   : > { %1172 = vadd.xlane.f32.xlu2 %v1171_v2  ;;  %v5036_v60 = vsel %vm1126_vm5, %v4450_v45, 0.0 }
 0x528   : > { %1322 = vrot.lane.b32.xlu1 %v4879_v6, %s4633_s23  ;;  %v1168_v13 = vsel %vm908_vm12, %v5036_v60, 0.0  ;;  %4451 = vpow2.f32 %v1149_v7  ;;  %v1141_v35 = vmul.f32 1.442695, %v1133_v10 }
 0x529   : > { %1169 = vadd.xlane.f32.xlu0 %v1168_v13 }
 0x52a   : > { %4453 = vpow2.f32 %v1141_v35 }
 0x52b   : > { %v1095_v3 = vpop.xlane.xlu0 %1094  ;;  %4455 = vpow2.f32 %v1147_v23  ;;  %v926_v33 = vpop.xlane.xlu2 %925 }
 0x52c   : > { %v1117_v19 = vmin.f32 %v1095_v3, %v911_v44 }
 0x52e   : > { %v4452_v14 = vpop.eup %4451  ;;  %vm1125_vm7 = vcmp.ge.f32.partialorder %v4918_v4, %v1117_v19  ;;  %v1139_v4 = vsub.f32 %v4941_v21, %v5026_v56 }
 0x530   : > { %v4454_v26 = vpop.eup %4453  ;;  %v1153_v34 = vmul.f32 1.442695, %v1139_v4 }
 0x531   : > { %v5051_v30 = vsel %vm1125_vm7, %v4454_v26, 0.0  ;;  %v4456_v52 = vpop.eup %4455 }
 0x532   : > { %v1165_v31 = vsel %vm908_vm12, %v5051_v30, 0.0  ;;  %4457 = vpow2.f32 %v1153_v34 }
 0x533   : > { %v1104_v5 = vpop.xlane.xlu0 %1103 }
 0x538   : > { %v4458_v46 = vpop.eup %4457 }
 0x53b   : > { %v1107_v11 = vpop.xlane.xlu0 %1106 }
 0x53c   : > { %v1121_v12 = vmin.f32 %v1107_v11, %v923_v62 }
 0x53e   : > { %vm1129_vm6 = vcmp.ge.f32.partialorder %v4937_v17, %v1121_v12  ;;  %v1120_v17 = vmin.f32 %v1104_v5, %v920_v55 }
 0x53f   : > { %v5045_v15 = vsel %vm1129_vm6, %v4452_v14, 0.0 }
 0x540   : > { %v1177_v16 = vsel %vm908_vm12, %v5045_v15, 0.0  ;;  %vm1128_vm8 = vcmp.ge.f32.partialorder %v4933_v40, %v1120_v17  ;;  %v1138_v40 = vsub.f32 %v4945_v27, %v926_v33 }
 0x541   : > { %1178 = vadd.xlane.f32.xlu0 %v1177_v16  ;;  %v5056_v32 = vsel %vm1128_vm8, %v4456_v52, 0.0 }
 0x542   : > { %v1174_v39 = vsel %vm908_vm12, %v5056_v32, 0.0  ;;  %v1151_v38 = vmul.f32 1.442695, %v1138_v40 }
 0x544   : > { %4459 = vpow2.f32 %v1151_v38 }
 0x545   : > { %4461 = vpow2.f32 %v1155_v51 }
 0x54e   : > { %v1348_v28 = vpop.permute.xlu0 %1347 }
 0x54f   : > { %1360 = vmatpush.bf16.msrb.mxu3 %v1348_v28 }
 0x552   : > { %1166 = vadd.xlane.f32.xlu1 %v1165_v31 }
 0x55a   : > { %1175 = vadd.xlane.f32.xlu1 %v1174_v39 }
 0x573   : > { %1372 = vrot.lane.b32.xlu1 %v4891_v41, %s4633_s23 }
 0x57b   : > { %1470 = vrot.lane.b32.xlu1 %v4891_v41, %s4634_s24 }
 0x582   : > { %v1116_v53 = vpop.xlane.xlu1 %1115 }
 0x583   : > { %1468 = vrot.lane.b32.xlu1 %v4893_v42, %s4635_s25  ;;  %v1124_v57 = vmin.f32 %v1116_v53, %v5020_v43 }
 0x585   : > { %vm1132_vm13 = vcmp.ge.f32.partialorder %v4947_v29, %v1124_v57 }
 0x58a   : > { %v1113_v36 = vpop.xlane.xlu2 %1112 }
 0x58b   : > { %v1123_v44 = vmin.f32 %v1113_v36, %v5026_v56  ;;  %1492 = vrot.lane.b32.xlu1 %v4901_v63, %s4635_s25  ;;  %v4460_v56 = vpop.eup %4459 }
 0x58c   : > { %v4462_v59 = vpop.eup %4461 }
 0x58d   : > { %vm1131_vm9 = vcmp.ge.f32.partialorder %v4941_v21, %v1123_v44  ;;  %v5086_v61 = vsel %vm1132_vm13, %v4462_v59, 0.0 }
 0x58e   : > { %v5075_v48 = vsel %vm1131_vm9, %v4458_v46, 0.0  ;;  %v1186_v62 = vsel %vm908_vm12, %v5086_v61, 0.0 }
 0x58f   : > { %v1183_v49 = vsel %vm908_vm12, %v5075_v48, 0.0 }
 0x590   : > { %1184 = vadd.xlane.f32.xlu0 %v1183_v49 }
 0x592   : > { %v1110_v25 = vpop.xlane.xlu2 %1109 }
 0x593   : > { %v1122_v55 = vmin.f32 %v1110_v25, %v926_v33 }
 0x595   : > { %vm1130_vm10 = vcmp.ge.f32.partialorder %v4945_v27, %v1122_v55 }
 0x596   : > { %v5081_v37 = vsel %vm1130_vm10, %v4460_v56, 0.0 }
 0x597   : > { %v1180_v21 = vsel %vm908_vm12, %v5081_v37, 0.0 }
 0x598   : > { %1181 = vadd.xlane.f32.xlu2 %v1180_v21 }
 0x59a   : > { %v1323_v58 = vpop.permute.xlu1 %1322  ;;  %v1173_v29 = vpop.xlane.xlu2 %1172 }
 0x59b   : > { %1335 = vmatpush.bf16.msra.mxu2 %v1323_v58  ;;  %v1230_v17 = vand.u32 2147483648, %v1173_v29  ;;  %vm1224_vm5 = vweird.f32 %v1173_v29  ;;  %v1228_v39 = vand.u32 2147483647, %v1173_v29 }
 0x59c   : > { %v1170_v27 = vpop.xlane.xlu0 %1169 }
 0x59d   : > { %4463 = vrcp.f32 %v1170_v27  ;;  %v1215_v7 = vand.u32 2147483648, %v1170_v27  ;;  %vm1209_vm15 = vweird.f32 %v1170_v27  ;;  %v1213_v11 = vand.u32 2147483647, %v1170_v27 }
 0x59e   : > { %4465 = vrcp.f32 %v1173_v29  ;;  %v1231_v38 = vor.u32 1.1754944e-38, %v1230_v17  ;;  %vm1229_vm10 = vcmp.eq.f32.partialorder %v1228_v39, 8.507059e+37 }
 0x59f   : > { %v1216_v18 = vor.u32 1.1754944e-38, %v1215_v7  ;;  %vm1214_vm2 = vcmp.eq.f32.partialorder %v1213_v11, 8.507059e+37 }
 0x5a0   : > { %1187 = vadd.xlane.f32.xlu2 %v1186_v62 }
 0x5a3   : > { %v4464_v43 = vpop.eup %4463 }
 0x5a4   : > { %1422 = vrot.lane.b32.xlu0 %v4879_v6, %s4634_s24  ;;  %v1205_v0 = vmul.f32 %v4464_v43, %v1170_v27  ;;  %v4466_v1 = vpop.eup %4465  ;;  %vm1210_vm14 = vweird.f32 %v4464_v43 }
 0x5a5   : > { %v1220_v2 = vmul.f32 %v4466_v1, %v1173_v29  ;;  %vm1211_vm1 = vmor %vm1209_vm15, %vm1210_vm14  ;;  %vm1225_vm3 = vweird.f32 %v4466_v1 }
 0x5a6   : > { %v1206_v45 = vsub.f32 1.0, %v1205_v0  ;;  %vm1226_vm6 = vmor %vm1224_vm5, %vm1225_vm3 }
 0x5a7   : > { %v1221_v54 = vsub.f32 1.0, %v1220_v2 }
 0x5a8   : > { %v1207_v13 = vmul.f32 %v4464_v43, %v1206_v45 }
 0x5a9   : > { %v1222_v14 = vmul.f32 %v4466_v1, %v1221_v54 }
 0x5aa   : > { %v1208_v5 = vadd.f32 %v4464_v43, %v1207_v13 }
 0x5ab   : > { %v1223_v23 = vadd.f32 %v4466_v1, %v1222_v14 }
 0x5ac   : > { %1446 = vrot.lane.b32.xlu0 %v4885_v22, %s4634_s24  ;;  %v1212_v35 = vsel %vm1211_vm1, %v4464_v43, %v1208_v5 }
 0x5ad   : > { %v1217_v28 = vsel %vm1214_vm2, %v1216_v18, %v1212_v35  ;;  %v1227_v40 = vsel %vm1226_vm6, %v4466_v1, %v1223_v23 }
 0x5ae   : > { %v1218_v33 = vmul.f32 %v1217_v28, %v5036_v60  ;;  %v1232_v49 = vsel %vm1229_vm10, %v1231_v38, %v1227_v40 }
 0x5af   : > { %v1233_v21 = vmul.f32 %v1232_v49, %v5031_v50 }
 0x5b0   : > { %v1310_v25 = vpack.c.bf16 %v1218_v33, %v1218_v33 }
 0x5b1   : > { %v1311_v1 = vpack.c.bf16 %v1233_v21, %v1233_v21 }
 0x5b2   : > { %v1320_v62 = vunpack.c.l.b16 %v1310_v25 }
 0x5b3   : > { %v1344_v2 = vunpack.c.l.b16 %v1311_v1 }
 0x5b4   : > { %1494 = vrot.lane.b32.xlu0 %v4899_v8, %s4634_s24  ;;  %v1179_v54 = vpop.xlane.xlu0 %1178 }
 0x5b5   : > { %v1260_v18 = vand.u32 2147483648, %v1179_v54  ;;  %vm1254_vm3 = vweird.f32 %v1179_v54  ;;  %v1258_v23 = vand.u32 2147483647, %v1179_v54 }
 0x5b7   : > { %v1261_v17 = vor.u32 1.1754944e-38, %v1260_v18  ;;  %vm1259_vm5 = vcmp.eq.f32.partialorder %v1258_v23, 8.507059e+37 }
 0x5b8   : > { %1397 = vrot.lane.b32.xlu2 %v4899_v8, %s4633_s23  ;;  %s4645_s23 = smov 24  }
 0x5c0   : > { %1420 = vrot.lane.b32.xlu2 %v4881_v9, %s4635_s25 }
 0x5c5   : > { %v1167_v3 = vpop.xlane.xlu1 %1166 }
 0x5c6   : > { %4467 = vrcp.f32 %v1167_v3  ;;  %v1200_v26 = vand.u32 2147483648, %v1167_v3  ;;  %v1198_v52 = vand.u32 2147483647, %v1167_v3  ;;  %vm1194_vm7 = vweird.f32 %v1167_v3 }
 0x5c8   : > { %1444 = vrot.lane.b32.xlu2 %v4887_v24, %s4635_s25  ;;  %v1201_v36 = vor.u32 1.1754944e-38, %v1200_v26  ;;  %vm1199_vm9 = vcmp.eq.f32.partialorder %v1198_v52, 8.507059e+37  ;;  %s4639_s25 = smov 48  }
 0x5cc   : > { %v4468_v12 = vpop.eup %4467 }
 0x5cd   : > { %v1190_v10 = vmul.f32 %v4468_v12, %v1167_v3  ;;  %v1176_v16 = vpop.xlane.xlu1 %1175  ;;  %vm1195_vm4 = vweird.f32 %v4468_v12 }
 0x5ce   : > { %4469 = vrcp.f32 %v1176_v16  ;;  %vm1196_vm8 = vmor %vm1194_vm7, %vm1195_vm4  ;;  %v1245_v55 = vand.u32 2147483648, %v1176_v16  ;;  %v1243_v57 = vand.u32 2147483647, %v1176_v16  ;;  %vm1239_vm14 = vweird.f32 %v1176_v16 }
 0x5cf   : > { %v1191_v19 = vsub.f32 1.0, %v1190_v10  ;;  %4471 = vrcp.f32 %v1179_v54 }
 0x5d0   : > { %v1246_v27 = vor.u32 1.1754944e-38, %v1245_v55  ;;  %vm1244_vm1 = vcmp.eq.f32.partialorder %v1243_v57, 8.507059e+37 }
 0x5d1   : > { %v1192_v31 = vmul.f32 %v4468_v12, %v1191_v19 }
 0x5d3   : > { %v1193_v4 = vadd.f32 %v4468_v12, %v1192_v31 }
 0x5d4   : > { %v4470_v34 = vpop.eup %4469 }
 0x5d5   : > { %v1235_v44 = vmul.f32 %v4470_v34, %v1176_v16  ;;  %v1197_v46 = vsel %vm1196_vm8, %v4468_v12, %v1193_v4  ;;  %vm1240_vm13 = vweird.f32 %v4470_v34  ;;  %v4472_v5 = vpop.eup %4471 }
 0x5d6   : > { %v1202_v47 = vsel %vm1199_vm9, %v1201_v36, %v1197_v46  ;;  %vm1241_vm15 = vmor %vm1239_vm14, %vm1240_vm13  ;;  %v1250_v7 = vmul.f32 %v4472_v5, %v1179_v54  ;;  %vm1255_vm2 = vweird.f32 %v4472_v5 }
 0x5d7   : > { %v1236_v51 = vsub.f32 1.0, %v1235_v44  ;;  %v1203_v53 = vmul.f32 %v1202_v47, %v5051_v30  ;;  %vm1256_vm4 = vmor %vm1254_vm3, %vm1255_vm2 }
 0x5d8   : > { %v1251_v12 = vsub.f32 1.0, %v1250_v7 }
 0x5d9   : > { %v1237_v56 = vmul.f32 %v4470_v34, %v1236_v51  ;;  %v1309_v60 = vpack.c.bf16 %v1203_v53, %v1203_v53 }
 0x5da   : > { %v1252_v10 = vmul.f32 %v4472_v5, %v1251_v12 }
 0x5db   : > { %v1238_v58 = vadd.f32 %v4470_v34, %v1237_v56  ;;  %v1319_v59 = vunpack.c.l.b16 %v1309_v60 }
 0x5dc   : > { %v1253_v35 = vadd.f32 %v4472_v5, %v1252_v10 }
 0x5dd   : > { %v1242_v29 = vsel %vm1241_vm15, %v4470_v34, %v1238_v58  ;;  %v1321_v43 = vpack.c.b16 %v1320_v62, %v1319_v59 }
 0x5de   : > { %v1247_v0 = vsel %vm1244_vm1, %v1246_v27, %v1242_v29  ;;  %v1257_v28 = vsel %vm1256_vm4, %v4472_v5, %v1253_v35 }
 0x5df   : > { %4231 = vmatmul.msk.bf16.vlgmr.msra.gmra.mxu2 %vm908_vm12, %v1321_v43  ;;  %v1248_v30 = vmul.f32 %v1247_v0, %v5056_v32  ;;  %v1262_v33 = vsel %vm1259_vm5, %v1261_v17, %v1257_v28 }
 0x5e0   : > { %v1263_v49 = vmul.f32 %v1262_v33, %v5045_v15 }
 0x5e1   : > { %v1312_v45 = vpack.c.bf16 %v1248_v30, %v1248_v30 }
 0x5e2   : > { %v1313_v29 = vpack.c.bf16 %v1263_v49, %v1263_v49 }
 0x5e3   : > { %v1345_v13 = vunpack.c.l.b16 %v1312_v45 }
 0x5e4   : > { %v1369_v54 = vunpack.c.l.b16 %v1313_v29 }
 0x5e5   : > { %v1373_v3 = vpop.permute.xlu1 %1372  ;;  %v1346_v50 = vpack.c.b16 %v1345_v13, %v1344_v2 }
 0x5e6   : > { %1385 = vmatpush.bf16.msrb.mxu1 %v1373_v3 }
 0x5e7   : > { %4232 = vmatmul.msk.bf16.vlgmr.msrb.gmra.mxu3 %vm908_vm12, %v1346_v50 }
 0x5ed   : > { %v1471_v51 = vpop.permute.xlu1 %1470 }
 0x5ee   : > { %v1476_v15 = vsel %vm791_vm11, %v1471_v51, 0 }
 0x603   : > { %v1185_v11 = vpop.xlane.xlu0 %1184 }
 0x604   : > { %4473 = vrcp.f32 %v1185_v11  ;;  %vm1284_vm8 = vweird.f32 %v1185_v11  ;;  %v1290_v47 = vand.u32 2147483648, %v1185_v11  ;;  %v1288_v25 = vand.u32 2147483647, %v1185_v11 }
 0x606   : > { %v1291_v62 = vor.u32 1.1754944e-38, %v1290_v47  ;;  %vm1289_vm15 = vcmp.eq.f32.partialorder %v1288_v25, 8.507059e+37  ;;  %v4236_v47 = vld [vmem:[%s6306_s5 + $0x18] sm:$0xff] }
 0x60a   : > { %v4474_v14 = vpop.eup %4473 }
 0x60b   : > { %v1280_v16 = vmul.f32 %v4474_v14, %v1185_v11  ;;  %v1182_v32 = vpop.xlane.xlu2 %1181  ;;  %vm1285_vm6 = vweird.f32 %v4474_v14 }
 0x60c   : > { %4475 = vrcp.f32 %v1182_v32  ;;  %v1273_v34 = vand.u32 2147483647, %v1182_v32  ;;  %v1275_v40 = vand.u32 2147483648, %v1182_v32  ;;  %vm5110_vm9 = vmor %vm1284_vm8, %vm1285_vm6  ;;  %vm1269_vm10 = vweird.f32 %v1182_v32 }
 0x60d   : > { %v1281_v19 = vsub.f32 1.0, %v1280_v16 }
 0x60e   : > { %v1276_v57 = vor.u32 1.1754944e-38, %v1275_v40  ;;  %vm1274_vm14 = vcmp.eq.f32.partialorder %v1273_v34, 8.507059e+37  ;;  %v4235_v34 = vld [vmem:[%s6306_s5 + $0x10] sm:$0xff] }
 0x60f   : > { %v1282_v31 = vmul.f32 %v4474_v14, %v1281_v19 }
 0x611   : > { %v1283_v38 = vadd.f32 %v4474_v14, %v1282_v31 }
 0x612   : > { %v4476_v26 = vpop.eup %4475 }
 0x613   : > { %v1265_v52 = vmul.f32 %v4476_v26, %v1182_v32  ;;  %v1188_v39 = vpop.xlane.xlu2 %1187  ;;  %vm1270_vm7 = vweird.f32 %v4476_v26  ;;  %v1287_v59 = vsel %vm5110_vm9, %v4474_v14, %v1283_v38 }
 0x614   : > { %4477 = vrcp.f32 %v1188_v39  ;;  %vm1271_vm13 = vmor %vm1269_vm10, %vm1270_vm7  ;;  %v1303_v30 = vand.u32 2147483647, %v1188_v39  ;;  %v1305_v1 = vand.u32 2147483648, %v1188_v39  ;;  %v1292_v2 = vsel %vm1289_vm15, %v1291_v62, %v1287_v59 }
 0x615   : > { %v1266_v4 = vsub.f32 1.0, %v1265_v52  ;;  %vm1299_vm2 = vweird.f32 %v1188_v39  ;;  %v1293_v11 = vmul.f32 %v1292_v2, %v5075_v48  ;;  %v1469_v48 = vpop.permute.xlu1 %1468 }
 0x616   : > { %v1423_v36 = vpop.permute.xlu0 %1422  ;;  %v1306_v12 = vor.u32 1.1754944e-38, %v1305_v1  ;;  %vm1304_vm4 = vcmp.eq.f32.partialorder %v1303_v30, 8.507059e+37 }
 0x617   : > { %v1267_v44 = vmul.f32 %v4476_v26, %v1266_v4  ;;  %v1428_v46 = vsel %vm791_vm11, %v1423_v36, 0  ;;  %v1315_v35 = vpack.c.bf16 %v1293_v11, %v1293_v11 }
 0x618   : > { %1437 = vmatpush.bf16.xpose.msra.mxu3 %v1428_v46 }
 0x619   : > { %v1268_v55 = vadd.f32 %v4476_v26, %v1267_v44 }
 0x61a   : > { %v4478_v56 = vpop.eup %4477 }
 0x61b   : > { %v1295_v60 = vmul.f32 %v4478_v56, %v1188_v39  ;;  %v1398_v21 = vpop.permute.xlu2 %1397  ;;  %v1272_v58 = vsel %vm1271_vm13, %v4476_v26, %v1268_v55  ;;  %vm1300_vm1 = vweird.f32 %v4478_v56  ;;  %v1394_v26 = vunpack.c.l.b16 %v1315_v35 }
 0x61c   : > { %1410 = vmatpush.bf16.msrb.mxu2 %v1398_v21  ;;  %v1277_v27 = vsel %vm1274_vm14, %v1276_v57, %v1272_v58  ;;  %vm1301_vm3 = vmor %vm1299_vm2, %vm1300_vm1 }
 0x61d   : > { %v1296_v43 = vsub.f32 1.0, %v1295_v60  ;;  %v1278_v0 = vmul.f32 %v1277_v27, %v5081_v37  ;;  %v1493_v31 = vpop.permute.xlu1 %1492 }
 0x61e   : > { %v1447_v45 = vpop.permute.xlu0 %1446 }
 0x61f   : > { %v1297_v13 = vmul.f32 %v4478_v56, %v1296_v43  ;;  %v1452_v3 = vsel %vm791_vm11, %v1447_v45, 0  ;;  %v1314_v50 = vpack.c.bf16 %v1278_v0, %v1278_v0 }
 0x620   : > { %1485 = vmatpush.bf16.xpose.msra.mxu2 %v1476_v15  ;;  %1461 = vmatpush.bf16.xpose.msra.mxu1 %v1452_v3 }
 0x621   : > { %v1298_v5 = vadd.f32 %v4478_v56, %v1297_v13  ;;  %v1370_v7 = vunpack.c.l.b16 %v1314_v50 }
 0x623   : > { %v1421_v37 = vpop.permute.xlu2 %1420  ;;  %v1371_v14 = vpack.c.b16 %v1370_v7, %v1369_v54  ;;  %v1302_v10 = vsel %vm1301_vm3, %v4478_v56, %v1298_v5 }
 0x624   : > { %4237 = vmatmul.msk.bf16.vlgmr.msra.gmra.mxu3 %vm791_vm11, %v1421_v37  ;;  %v1307_v16 = vsel %vm1304_vm4, %v1306_v12, %v1302_v10 }
 0x625   : > { %4233 = vmatmul.msk.bf16.vlgmr.msrb.gmra.mxu1 %vm908_vm12, %v1371_v14  ;;  %v1308_v32 = vmul.f32 %v1307_v16, %v5086_v61 }
 0x626   : > { %v1495_v18 = vpop.permute.xlu0 %1494 }
 0x627   : > { %v1500_v19 = vsel %vm791_vm11, %v1495_v18, 0  ;;  %v1316_v23 = vpack.c.bf16 %v1308_v32, %v1308_v32 }
 0x628   : > { %1509 = vmatpush.bf16.xpose.msrb.mxu3 %v1500_v19 }
 0x629   : > { %v1395_v28 = vunpack.c.l.b16 %v1316_v23 }
 0x62b   : > { %v1396_v17 = vpack.c.b16 %v1395_v28, %v1394_v26  ;;  %v1445_v52 = vpop.permute.xlu2 %1444 }
 0x62d   : > { %4234 = vmatmul.msk.bf16.vlgmr.msrb.gmra.mxu2 %vm908_vm12, %v1396_v17 }
 0x634   : > { %4240 = vmatmul.msk.bf16.vlgmr.msrb.gmra.mxu3 %vm791_vm11, %v1493_v31 }
 0x635   : > { %4238 = vmatmul.msk.bf16.vlgmr.msra.gmra.mxu1 %vm791_vm11, %v1445_v52 }
 0x63d   : > { %4239 = vmatmul.msk.bf16.vlgmr.msra.gmra.mxu2 %vm791_vm11, %v1469_v48 }
 0x662   : > { %v5130_v39 = vpop.f32.mrf.mxu2 }
 0x66a   : > { %v5128_v61 = vpop.f32.mrf.mxu3  ;;  %v5139_v36 = vpop.f32.mrf.mxu2 }
 0x672   : > { %v5132_v4 = vpop.f32.mrf.mxu3 }
 0x6a2   : > { %v5134_v33 = vpop.f32.mrf.mxu1 }
 0x6a7   : > { %v1439_v40 = vpop.f32.mrf.mxu3 }
 0x6a8   : > { %v5141_v38 = vadd.f32 %v4235_v34, %v1439_v40 }
 0x6aa   : > { %v5143_v44 = vpop.f32.mrf.mxu1  ;;  %v1540_v46 = vsel %vm908_vm12, %v5141_v38, inf  ;;  %v1516_v54 = vsel %vm908_vm12, %v5141_v38, -inf }
 0x6ab   : > { %1541 = vmin.xlane.f32.xlu2 %v1540_v46 }
 0x6af   : > { %v1441_v49 = vpop.f32.mrf.mxu3 }
 0x6b0   : > { %v5150_v51 = vadd.f32 %v4236_v47, %v1441_v49  ;;  %v5152_v53 = vpop.f32.mrf.mxu2 }
 0x6b2   : > { %v1543_v25 = vsel %vm908_vm12, %v5150_v51, inf  ;;  %v1463_v55 = vpop.f32.mrf.mxu1  ;;  %v1519_v23 = vsel %vm908_vm12, %v5150_v51, -inf }
 0x6b3   : > { %1544 = vmin.xlane.f32.xlu0 %v1543_v25  ;;  %v5156_v56 = vadd.f32 %v4235_v34, %v1463_v55 }
 0x6b5   : > { %v1546_v21 = vsel %vm908_vm12, %v5156_v56, inf  ;;  %v1522_v40 = vsel %vm908_vm12, %v5156_v56, -inf }
 0x6b7   : > { %v1511_v57 = vpop.f32.mrf.mxu3 }
 0x6b8   : > { %v5158_v60 = vpop.f32.mrf.mxu2  ;;  %v5180_v3 = vadd.f32 %v4235_v34, %v1511_v57 }
 0x6ba   : > { %v1465_v43 = vpop.f32.mrf.mxu1  ;;  %v1558_v50 = vsel %vm908_vm12, %v5180_v3, inf  ;;  %v1534_v57 = vsel %vm908_vm12, %v5180_v3, -inf }
 0x6bb   : > { %1547 = vmin.xlane.f32.xlu0 %v1546_v21  ;;  %v5170_v0 = vadd.f32 %v4236_v47, %v1465_v43 }
 0x6bd   : > { %v1549_v13 = vsel %vm908_vm12, %v5170_v0, inf }
 0x6bf   : > { %v1513_v58 = vpop.f32.mrf.mxu3 }
 0x6c0   : > { %v5162_v59 = vadd.f32 %v4236_v47, %v1513_v58  ;;  %v1487_v15 = vpop.f32.mrf.mxu2 }
 0x6c1   : > { %v5164_v62 = vadd.f32 %v4235_v34, %v1487_v15 }
 0x6c2   : > { %v1561_v27 = vsel %vm908_vm12, %v5162_v59, inf }
 0x6c3   : > { %1562 = vmin.xlane.f32.xlu0 %v1561_v27  ;;  %v1552_v29 = vsel %vm908_vm12, %v5164_v62, inf  ;;  %v1528_v45 = vsel %vm908_vm12, %v5164_v62, -inf }
 0x6c4   : > { %1553 = vmin.xlane.f32.xlu1 %v1552_v29 }
 0x6c8   : > { %v1489_v30 = vpop.f32.mrf.mxu2 }
 0x6c9   : > { %v5172_v1 = vadd.f32 %v4236_v47, %v1489_v30  ;;  %v1525_v47 = vsel %vm908_vm12, %v5170_v0, -inf }
 0x6cb   : > { %1529 = vmax.xlane.f32.xlu0 %v1528_v45  ;;  %v1555_v2 = vsel %vm908_vm12, %v5172_v1, inf  ;;  %v1531_v10 = vsel %vm908_vm12, %v5172_v1, -inf }
 0x6cc   : > { %1556 = vmin.xlane.f32.xlu2 %v1555_v2  ;;  %1550 = vmin.xlane.f32.xlu1 %v1549_v13 }
 0x6d4   : > { %1559 = vmin.xlane.f32.xlu2 %v1558_v50  ;;  %1517 = vmax.xlane.f32.xlu1 %v1516_v54 }
 0x71e   : > { %v1542_v5 = vpop.xlane.xlu2 %1541 }
 0x71f   : > { %vm1564_vm5 = vcmp.le.f32.partialorder %v5141_v38, %v1542_v5 }
 0x720   : > { %v1572_v7 = vsel %vm1564_vm5, 1e+30, %v5141_v38 }
 0x721   : > { %v1580_v11 = vsel %vm908_vm12, %v1572_v7, inf }
 0x722   : > { %1581 = vmin.xlane.f32.xlu1 %v1580_v11 }
 0x726   : > { %v1545_v12 = vpop.xlane.xlu0 %1544 }
 0x727   : > { %vm1565_vm6 = vcmp.le.f32.partialorder %v5150_v51, %v1545_v12 }
 0x728   : > { %v1573_v37 = vsel %vm1565_vm6, 1e+30, %v5150_v51 }
 0x729   : > { %v1583_v14 = vsel %vm908_vm12, %v1573_v37, inf }
 0x72a   : > { %1584 = vmin.xlane.f32.xlu2 %v1583_v14  ;;  %1532 = vmax.xlane.f32.xlu1 %v1531_v10 }
 0x72e   : > { %v1548_v16 = vpop.xlane.xlu0 %1547 }
 0x72f   : > { %vm1566_vm7 = vcmp.le.f32.partialorder %v5156_v56, %v1548_v16 }
 0x730   : > { %v1574_v32 = vsel %vm1566_vm7, 1e+30, %v5156_v56 }
 0x731   : > { %v1586_v35 = vsel %vm908_vm12, %v1574_v32, inf }
 0x732   : > { %1587 = vmin.xlane.f32.xlu2 %v1586_v35 }
 0x736   : > { %v1563_v19 = vpop.xlane.xlu0 %1562 }
 0x737   : > { %v1554_v18 = vpop.xlane.xlu1 %1553  ;;  %vm1571_vm8 = vcmp.le.f32.partialorder %v5162_v59, %v1563_v19 }
 0x738   : > { %v1579_v48 = vsel %vm1571_vm8, 1e+30, %v5162_v59  ;;  %vm1568_vm13 = vcmp.le.f32.partialorder %v5164_v62, %v1554_v18 }
 0x739   : > { %v1601_v17 = vsel %vm908_vm12, %v1579_v48, inf  ;;  %v1576_v25 = vsel %vm1568_vm13, 1e+30, %v5164_v62 }
 0x73a   : > { %1520 = vmax.xlane.f32.xlu2 %v1519_v23  ;;  %v1592_v55 = vsel %vm908_vm12, %v1576_v25, inf }
 0x73e   : > { %v5227_v11 = vpop.xlane.xlu0 %1529 }
 0x73f   : > { %v1551_v26 = vpop.xlane.xlu1 %1550  ;;  %v1557_v28 = vpop.xlane.xlu2 %1556 }
 0x740   : > { %vm1567_vm9 = vcmp.le.f32.partialorder %v5170_v0, %v1551_v26  ;;  %vm1569_vm14 = vcmp.le.f32.partialorder %v5172_v1, %v1557_v28 }
 0x741   : > { %v1575_v31 = vsel %vm1567_vm9, 1e+30, %v5170_v0  ;;  %v1577_v21 = vsel %vm1569_vm14, 1e+30, %v5172_v1 }
 0x742   : > { %1602 = vmin.xlane.f32.xlu2 %v1601_v17  ;;  %v1589_v52 = vsel %vm908_vm12, %v1575_v31, inf  ;;  %v1595_v58 = vsel %vm908_vm12, %v1577_v21, inf }
 0x743   : > { %1590 = vmin.xlane.f32.xlu0 %v1589_v52 }
 0x747   : > { %v1560_v34 = vpop.xlane.xlu2 %1559  ;;  %v5220_v15 = vpop.xlane.xlu1 %1517 }
 0x748   : > { %vm1570_vm10 = vcmp.le.f32.partialorder %v5180_v3, %v1560_v34  ;;  %v1537_v34 = vsel %vm908_vm12, %v5162_v59, -inf }
 0x749   : > { %v1578_v46 = vsel %vm1570_vm10, 1e+30, %v5180_v3 }
 0x74a   : > { %1523 = vmax.xlane.f32.xlu2 %v1522_v40  ;;  %v1598_v49 = vsel %vm908_vm12, %v1578_v46, inf }
 0x74b   : > { %1526 = vmax.xlane.f32.xlu0 %v1525_v47  ;;  %1599 = vmin.xlane.f32.xlu1 %v1598_v49 }
 0x753   : > { %1593 = vmin.xlane.f32.xlu0 %v1592_v55  ;;  %1535 = vmax.xlane.f32.xlu1 %v1534_v57 }
 0x75b   : > { %1596 = vmin.xlane.f32.xlu1 %v1595_v58 }
 0x795   : > { %v1582_v27 = vpop.xlane.xlu1 %1581 }
 0x796   : > { %vm1604_vm15 = vcmp.le.f32.partialorder %v1572_v7, %v1582_v27 }
 0x797   : > { %v1612_v29 = vsel %vm1604_vm15, 1e+30, %v1572_v7 }
 0x798   : > { %v1620_v43 = vsel %vm908_vm12, %v1612_v29, inf }
 0x799   : > { %1621 = vmin.xlane.f32.xlu0 %v1620_v43 }
 0x79d   : > { %v1585_v30 = vpop.xlane.xlu2 %1584  ;;  %v5229_v12 = vpop.xlane.xlu1 %1532 }
 0x79e   : > { %vm1605_vm1 = vcmp.le.f32.partialorder %v1573_v37, %v1585_v30 }
 0x79f   : > { %v1613_v45 = vsel %vm1605_vm1, 1e+30, %v1573_v37 }
 0x7a0   : > { %v1623_v2 = vsel %vm908_vm12, %v1613_v45, inf }
 0x7a1   : > { %1624 = vmin.xlane.f32.xlu1 %v1623_v2 }
 0x7a5   : > { %v1588_v13 = vpop.xlane.xlu2 %1587 }
 0x7a6   : > { %vm1606_vm2 = vcmp.le.f32.partialorder %v1574_v32, %v1588_v13 }
 0x7a7   : > { %v1614_v50 = vsel %vm1606_vm2, 1e+30, %v1574_v32 }
 0x7a8   : > { %v1626_v54 = vsel %vm908_vm12, %v1614_v50, inf }
 0x7a9   : > { %1627 = vmin.xlane.f32.xlu1 %v1626_v54 }
 0x7ad   : > { %v5225_v5 = vpop.xlane.xlu2 %1520 }
 0x7b5   : > { %v1603_v7 = vpop.xlane.xlu2 %1602 }
 0x7b6   : > { %vm1611_vm3 = vcmp.le.f32.partialorder %v1579_v48, %v1603_v7  ;;  %v1591_v14 = vpop.xlane.xlu0 %1590 }
 0x7b7   : > { %vm1607_vm4 = vcmp.le.f32.partialorder %v1575_v31, %v1591_v14  ;;  %v1619_v37 = vsel %vm1611_vm3, 1e+30, %v1579_v48 }
 0x7b8   : > { %v1641_v10 = vsel %vm908_vm12, %v1619_v37, inf  ;;  %v1615_v16 = vsel %vm1607_vm4, 1e+30, %v1575_v31 }
 0x7b9   : > { %1642 = vmin.xlane.f32.xlu1 %v1641_v10  ;;  %v1629_v32 = vsel %vm908_vm12, %v1615_v16, inf }
 0x7ba   : > { %1630 = vmin.xlane.f32.xlu2 %v1629_v32 }
 0x7bd   : > { %v5247_v43 = vpop.xlane.xlu2 %1523 }
 0x7be   : > { %v5233_v35 = vpop.xlane.xlu0 %1526  ;;  %v1600_v18 = vpop.xlane.xlu1 %1599 }
 0x7bf   : > { %vm1610_vm5 = vcmp.le.f32.partialorder %v1578_v46, %v1600_v18 }
 0x7c0   : > { %v1618_v19 = vsel %vm1610_vm5, 1e+30, %v1578_v46 }
 0x7c1   : > { %v1638_v23 = vsel %vm908_vm12, %v1618_v19, inf }
 0x7c2   : > { %1639 = vmin.xlane.f32.xlu0 %v1638_v23 }
 0x7c6   : > { %v1594_v26 = vpop.xlane.xlu0 %1593  ;;  %v5236_v28 = vpop.xlane.xlu1 %1535 }
 0x7c7   : > { %vm1608_vm6 = vcmp.le.f32.partialorder %v1576_v25, %v1594_v26 }
 0x7c8   : > { %v1616_v48 = vsel %vm1608_vm6, 1e+30, %v1576_v25 }
 0x7c9   : > { %v1632_v17 = vsel %vm908_vm12, %v1616_v48, inf }
 0x7ca   : > { %1633 = vmin.xlane.f32.xlu2 %v1632_v17 }
 0x7ce   : > { %v1597_v31 = vpop.xlane.xlu1 %1596 }
 0x7cf   : > { %vm1609_vm7 = vcmp.le.f32.partialorder %v1577_v21, %v1597_v31 }
 0x7d0   : > { %v1617_v52 = vsel %vm1609_vm7, 1e+30, %v1577_v21 }
 0x7d1   : > { %v1635_v40 = vsel %vm908_vm12, %v1617_v52, inf }
 0x7d2   : > { %1538 = vmax.xlane.f32.xlu2 %v1537_v34  ;;  %1636 = vmin.xlane.f32.xlu0 %v1635_v40 }
 0x7d3   : > { %2029 = vrot.lane.b32.xlu1 %v4879_v6, %s4636_s17 }
 0x80c   : > { %v1622_v46 = vpop.xlane.xlu0 %1621 }
 0x80d   : > { %vm1644_vm8 = vcmp.le.f32.partialorder %v1612_v29, %v1622_v46 }
 0x80e   : > { %v1652_v47 = vsel %vm1644_vm8, 1e+30, %v1612_v29 }
 0x80f   : > { %v1660_v49 = vsel %vm908_vm12, %v1652_v47, inf }
 0x810   : > { %1661 = vmin.xlane.f32.xlu2 %v1660_v49 }
 0x814   : > { %v1625_v25 = vpop.xlane.xlu1 %1624 }
 0x815   : > { %vm1645_vm9 = vcmp.le.f32.partialorder %v1613_v45, %v1625_v25 }
 0x816   : > { %v1653_v55 = vsel %vm1645_vm9, 1e+30, %v1613_v45 }
 0x817   : > { %v1663_v57 = vsel %vm908_vm12, %v1653_v55, inf }
 0x818   : > { %1664 = vmin.xlane.f32.xlu0 %v1663_v57 }
 0x81c   : > { %v1628_v21 = vpop.xlane.xlu1 %1627 }
 0x81d   : > { %vm1646_vm10 = vcmp.le.f32.partialorder %v1614_v50, %v1628_v21 }
 0x81e   : > { %v1654_v58 = vsel %vm1646_vm10, 1e+30, %v1614_v50 }
 0x81f   : > { %v1666_v27 = vsel %vm908_vm12, %v1654_v58, inf }
 0x820   : > { %1667 = vmin.xlane.f32.xlu0 %v1666_v27 }
 0x82c   : > { %v1643_v30 = vpop.xlane.xlu1 %1642 }
 0x82d   : > { %vm1651_vm13 = vcmp.le.f32.partialorder %v1619_v37, %v1643_v30  ;;  %v1631_v29 = vpop.xlane.xlu2 %1630 }
 0x82e   : > { %vm1647_vm14 = vcmp.le.f32.partialorder %v1615_v16, %v1631_v29  ;;  %v1659_v2 = vsel %vm1651_vm13, 1e+30, %v1619_v37 }
 0x82f   : > { %v1681_v13 = vsel %vm908_vm12, %v1659_v2, inf  ;;  %v1655_v54 = vsel %vm1647_vm14, 1e+30, %v1615_v16 }
 0x830   : > { %1682 = vmin.xlane.f32.xlu0 %v1681_v13  ;;  %v1669_v45 = vsel %vm908_vm12, %v1655_v54, inf }
 0x831   : > { %1670 = vmin.xlane.f32.xlu1 %v1669_v45 }
 0x835   : > { %v1640_v7 = vpop.xlane.xlu0 %1639 }
 0x836   : > { %vm1650_vm15 = vcmp.le.f32.partialorder %v1618_v19, %v1640_v7 }
 0x837   : > { %v1658_v50 = vsel %vm1650_vm15, 1e+30, %v1618_v19 }
 0x838   : > { %v1678_v14 = vsel %vm908_vm12, %v1658_v50, inf }
 0x839   : > { %1679 = vmin.xlane.f32.xlu2 %v1678_v14 }
 0x83d   : > { %v1634_v10 = vpop.xlane.xlu2 %1633 }
 0x83e   : > { %vm1648_vm1 = vcmp.le.f32.partialorder %v1616_v48, %v1634_v10 }
 0x83f   : > { %v1656_v32 = vsel %vm1648_vm1, 1e+30, %v1616_v48 }
 0x840   : > { %v1672_v18 = vsel %vm908_vm12, %v1656_v32, inf }
 0x841   : > { %1673 = vmin.xlane.f32.xlu1 %v1672_v18 }
 0x844   : > { %1979 = vrot.lane.b32.xlu0 %v4891_v41, %s4637_s18 }
 0x845   : > { %v2030_v37 = vpop.permute.xlu1 %2029  ;;  %v1637_v16 = vpop.xlane.xlu0 %1636 }
 0x846   : > { %vm1649_vm2 = vcmp.le.f32.partialorder %v1617_v52, %v1637_v16  ;;  %v2035_v23 = vsel %vm791_vm11, %v2030_v37, 0  ;;  %v5257_v17 = vpop.xlane.xlu2 %1538 }
 0x847   : > { %2044 = vmatpush.bf16.xpose.msrb.mxu0 %v2035_v23  ;;  %v1657_v19 = vsel %vm1649_vm2, 1e+30, %v1617_v52 }
 0x848   : > { %v1675_v26 = vsel %vm908_vm12, %v1657_v19, inf }
 0x849   : > { %1676 = vmin.xlane.f32.xlu2 %v1675_v26 }
 0x883   : > { %v1662_v48 = vpop.xlane.xlu2 %1661 }
 0x884   : > { %vm1684_vm3 = vcmp.le.f32.partialorder %v1652_v47, %v1662_v48 }
 0x885   : > { %v1692_v31 = vsel %vm1684_vm3, 1e+30, %v1652_v47 }
 0x886   : > { %v1700_v34 = vsel %vm908_vm12, %v1692_v31, inf }
 0x887   : > { %1701 = vmin.xlane.f32.xlu1 %v1700_v34  ;;  %v1742_v34 = vsub.f32 %v5156_v56, %v5247_v43 }
 0x88b   : > { %v1665_v40 = vpop.xlane.xlu0 %1664 }
 0x88c   : > { %vm1685_vm4 = vcmp.le.f32.partialorder %v1653_v55, %v1665_v40 }
 0x88d   : > { %v1693_v46 = vsel %vm1685_vm4, 1e+30, %v1653_v55 }
 0x88e   : > { %v1703_v49 = vsel %vm908_vm12, %v1693_v46, inf }
 0x88f   : > { %1704 = vmin.xlane.f32.xlu2 %v1703_v49  ;;  %v1752_v49 = vmul.f32 1.442695, %v1742_v34 }
 0x893   : > { %v1668_v25 = vpop.xlane.xlu0 %1667 }
 0x894   : > { %vm1686_vm5 = vcmp.le.f32.partialorder %v1654_v58, %v1668_v25 }
 0x895   : > { %v1694_v52 = vsel %vm1686_vm5, 1e+30, %v1654_v58 }
 0x896   : > { %v1706_v57 = vsel %vm908_vm12, %v1694_v52, inf }
 0x897   : > { %1707 = vmin.xlane.f32.xlu2 %v1706_v57 }
 0x8a3   : > { %v1683_v21 = vpop.xlane.xlu0 %1682 }
 0x8a4   : > { %vm1691_vm6 = vcmp.le.f32.partialorder %v1659_v2, %v1683_v21  ;;  %v1671_v29 = vpop.xlane.xlu1 %1670 }
 0x8a5   : > { %v1699_v27 = vsel %vm1691_vm6, 1e+30, %v1659_v2  ;;  %vm1687_vm8 = vcmp.le.f32.partialorder %v1655_v54, %v1671_v29 }
 0x8a6   : > { %v1721_v47 = vsel %vm908_vm12, %v1699_v27, inf  ;;  %v1695_v58 = vsel %vm1687_vm8, 1e+30, %v1655_v54  ;;  %v1740_v54 = vsub.f32 %v5141_v38, %v5220_v15 }
 0x8a7   : > { %1722 = vmin.xlane.f32.xlu1 %v1721_v47  ;;  %v1709_v2 = vsel %vm908_vm12, %v1695_v58, inf }
 0x8a8   : > { %v1748_v16 = vmul.f32 1.442695, %v1740_v54 }
 0x8aa   : > { %4479 = vpow2.f32 %v1748_v16 }
 0x8ac   : > { %v1680_v30 = vpop.xlane.xlu2 %1679 }
 0x8ad   : > { %vm1690_vm7 = vcmp.le.f32.partialorder %v1658_v50, %v1680_v30 }
 0x8ae   : > { %v1698_v13 = vsel %vm1690_vm7, 1e+30, %v1658_v50 }
 0x8af   : > { %1929 = vrot.lane.b32.xlu2 %v4879_v6, %s4637_s18  ;;  %v1718_v55 = vsel %vm908_vm12, %v1698_v13, inf  ;;  %v1746_v13 = vsub.f32 %v5180_v3, %v5236_v28 }
 0x8b0   : > { %1719 = vmin.xlane.f32.xlu0 %v1718_v55  ;;  %v4480_v48 = vpop.eup %4479 }
 0x8b4   : > { %v1674_v45 = vpop.xlane.xlu1 %1673 }
 0x8b5   : > { %vm1688_vm9 = vcmp.le.f32.partialorder %v1656_v32, %v1674_v45 }
 0x8b6   : > { %v1980_v7 = vpop.permute.xlu0 %1979  ;;  %v1696_v10 = vsel %vm1688_vm9, 1e+30, %v1656_v32  ;;  %v1741_v32 = vsub.f32 %v5150_v51, %v5225_v5 }
 0x8b7   : > { %1992 = vmatpush.bf16.msrb.mxu2 %v1980_v7  ;;  %v1712_v50 = vsel %vm908_vm12, %v1696_v10, inf }
 0x8b8   : > { %1710 = vmin.xlane.f32.xlu0 %v1709_v2  ;;  %v1743_v2 = vsub.f32 %v5170_v0, %v5233_v35 }
 0x8ba   : > { %v1754_v10 = vmul.f32 1.442695, %v1743_v2 }
 0x8bc   : > { %v1677_v14 = vpop.xlane.xlu2 %1676 }
 0x8bd   : > { %vm1689_vm10 = vcmp.le.f32.partialorder %v1657_v19, %v1677_v14 }
 0x8be   : > { %v1697_v18 = vsel %vm1689_vm10, 1e+30, %v1657_v19  ;;  %v1750_v19 = vmul.f32 1.442695, %v1741_v32 }
 0x8bf   : > { %v1715_v37 = vsel %vm908_vm12, %v1697_v18, inf }
 0x8c0   : > { %1713 = vmin.xlane.f32.xlu0 %v1712_v50  ;;  %1716 = vmin.xlane.f32.xlu1 %v1715_v37  ;;  %4481 = vpow2.f32 %v1750_v19  ;;  %v1745_v37 = vsub.f32 %v5172_v1, %v5229_v12 }
 0x8c1   : > { %4483 = vpow2.f32 %v1752_v49 }
 0x8c6   : > { %v4482_v52 = vpop.eup %4481 }
 0x8c7   : > { %v4484_v27 = vpop.eup %4483 }
 0x8d4   : > { %2027 = vrot.lane.b32.xlu0 %v4881_v9, %s4638_s20 }
 0x8d9   : > { %1954 = vrot.lane.b32.xlu1 %v4885_v22, %s4637_s18 }
 0x8fa   : > { %v1702_v23 = vpop.xlane.xlu1 %1701 }
 0x8fb   : > { %v1724_v26 = vmin.f32 %v1702_v23, %v5220_v15  ;;  %v1758_v23 = vmul.f32 1.442695, %v1745_v37 }
 0x8fd   : > { %vm1732_vm13 = vcmp.ge.f32.partialorder %v5141_v38, %v1724_v26 }
 0x8fe   : > { %v5279_v31 = vsel %vm1732_vm13, %v4480_v48, 0.0 }
 0x8ff   : > { %v1772_v40 = vsel %vm908_vm12, %v5279_v31, 0.0 }
 0x900   : > { %1773 = vadd.xlane.f32.xlu2 %v1772_v40 }
 0x902   : > { %v1705_v46 = vpop.xlane.xlu2 %1704 }
 0x903   : > { %v1725_v25 = vmin.f32 %v1705_v46, %v5225_v5  ;;  %v1747_v5 = vsub.f32 %v5162_v59, %v5257_v17 }
 0x905   : > { %vm1733_vm14 = vcmp.ge.f32.partialorder %v5150_v51, %v1725_v25  ;;  %v1762_v29 = vmul.f32 1.442695, %v1747_v5 }
 0x906   : > { %v5287_v15 = vsel %vm1733_vm14, %v4482_v52, 0.0 }
 0x907   : > { %v1775_v38 = vsel %vm908_vm12, %v5287_v15, 0.0  ;;  %4485 = vpow2.f32 %v1762_v29 }
 0x908   : > { %1776 = vadd.xlane.f32.xlu0 %v1775_v38 }
 0x90a   : > { %v1708_v57 = vpop.xlane.xlu2 %1707 }
 0x90b   : > { %v1726_v21 = vmin.f32 %v1708_v57, %v5247_v43 }
 0x90d   : > { %vm1734_vm15 = vcmp.ge.f32.partialorder %v5156_v56, %v1726_v21  ;;  %v1760_v56 = vmul.f32 1.442695, %v1746_v13  ;;  %v4486_v58 = vpop.eup %4485 }
 0x90e   : > { %v5293_v47 = vsel %vm1734_vm15, %v4484_v27, 0.0 }
 0x90f   : > { %v1778_v51 = vsel %vm908_vm12, %v5293_v47, 0.0  ;;  %4487 = vpow2.f32 %v1760_v56 }
 0x910   : > { %1779 = vadd.xlane.f32.xlu0 %v1778_v51  ;;  %4489 = vpow2.f32 %v1754_v10 }
 0x912   : > { %v1930_v30 = vpop.permute.xlu2 %1929 }
 0x913   : > { %1942 = vmatpush.bf16.msra.mxu3 %v1930_v30 }
 0x915   : > { %v4488_v50 = vpop.eup %4487 }
 0x916   : > { %v4490_v19 = vpop.eup %4489 }
 0x91a   : > { %v1723_v43 = vpop.xlane.xlu1 %1722 }
 0x91b   : > { %v1731_v55 = vmin.f32 %v1723_v43, %v5257_v17 }
 0x91d   : > { %vm1739_vm1 = vcmp.ge.f32.partialorder %v5162_v59, %v1731_v55  ;;  %v1744_v59 = vsub.f32 %v5164_v62, %v5227_v11 }
 0x91e   : > { %v5303_v45 = vsel %vm1739_vm1, %v4486_v58, 0.0 }
 0x91f   : > { %v1793_v7 = vsel %vm908_vm12, %v5303_v45, 0.0  ;;  %v1756_v16 = vmul.f32 1.442695, %v1744_v59 }
 0x920   : > { %1794 = vadd.xlane.f32.xlu0 %v1793_v7 }
 0x921   : > { %4491 = vpow2.f32 %v1756_v16 }
 0x922   : > { %4493 = vpow2.f32 %v1758_v23 }
 0x923   : > { %v1720_v14 = vpop.xlane.xlu0 %1719 }
 0x924   : > { %v1730_v18 = vmin.f32 %v1720_v14, %v5236_v28 }
 0x926   : > { %vm1738_vm2 = vcmp.ge.f32.partialorder %v5180_v3, %v1730_v18 }
 0x927   : > { %v5313_v17 = vsel %vm1738_vm2, %v4488_v50, 0.0 }
 0x928   : > { %v1790_v54 = vsel %vm908_vm12, %v5313_v17, 0.0 }
 0x929   : > { %1791 = vadd.xlane.f32.xlu2 %v1790_v54 }
 0x92b   : > { %v1711_v32 = vpop.xlane.xlu0 %1710 }
 0x92c   : > { %v1727_v28 = vmin.f32 %v1711_v32, %v5233_v35  ;;  %v4492_v35 = vpop.eup %4491 }
 0x92d   : > { %v4494_v49 = vpop.eup %4493 }
 0x92e   : > { %vm1735_vm3 = vcmp.ge.f32.partialorder %v5170_v0, %v1727_v28 }
 0x92f   : > { %v5321_v3 = vsel %vm1735_vm3, %v4490_v19, 0.0 }
 0x930   : > { %v1781_v26 = vsel %vm908_vm12, %v5321_v3, 0.0 }
 0x931   : > { %1782 = vadd.xlane.f32.xlu1 %v1781_v26 }
 0x933   : > { %v1714_v48 = vpop.xlane.xlu0 %1713  ;;  %v1717_v34 = vpop.xlane.xlu1 %1716 }
 0x934   : > { %v1728_v40 = vmin.f32 %v1714_v48, %v5227_v11  ;;  %v1729_v46 = vmin.f32 %v1717_v34, %v5229_v12  ;;  %2004 = vrot.lane.b32.xlu0 %v4899_v8, %s4637_s18 }
 0x936   : > { %vm1736_vm4 = vcmp.ge.f32.partialorder %v5164_v62, %v1728_v40  ;;  %vm1737_vm5 = vcmp.ge.f32.partialorder %v5172_v1, %v1729_v46 }
 0x937   : > { %v5331_v0 = vsel %vm1736_vm4, %v4492_v35, 0.0  ;;  %v5333_v25 = vsel %vm1737_vm5, %v4494_v49, 0.0 }
 0x938   : > { %v1784_v52 = vsel %vm908_vm12, %v5331_v0, 0.0  ;;  %v1787_v11 = vsel %vm908_vm12, %v5333_v25, 0.0 }
 0x939   : > { %1785 = vadd.xlane.f32.xlu1 %v1784_v52  ;;  %1788 = vadd.xlane.f32.xlu2 %v1787_v11 }
 0x93c   : > { %2101 = vrot.lane.b32.xlu0 %v4899_v8, %s4636_s17 }
 0x946   : > { %v2028_v12 = vpop.permute.xlu0 %2027 }
 0x947   : > { %4247 = vmatmul.msk.bf16.vlgmr.msrb.gmra.mxu0 %vm791_vm11, %v2028_v12 }
 0x94b   : > { %v1955_v62 = vpop.permute.xlu1 %1954 }
 0x94c   : > { %1967 = vmatpush.bf16.msrb.mxu1 %v1955_v62 }
 0x951   : > { %2077 = vrot.lane.b32.xlu2 %v4891_v41, %s4636_s17 }
 0x952   : > { %2053 = vrot.lane.b32.xlu1 %v4885_v22, %s4636_s17 }
 0x959   : > { %2075 = vrot.lane.b32.xlu2 %v4893_v42, %s4638_s20 }
 0x95a   : > { %2051 = vrot.lane.b32.xlu1 %v4887_v24, %s4638_s20 }
 0x961   : > { %2099 = vrot.lane.b32.xlu2 %v4901_v63, %s4638_s20  ;;  %s4642_s20 = smov 40  }
 0x973   : > { %v1774_v1 = vpop.xlane.xlu2 %1773 }
 0x974   : > { %4495 = vrcp.f32 %v1774_v1  ;;  %v1807_v51 = vand.u32 2147483648, %v1774_v1  ;;  %vm1801_vm7 = vweird.f32 %v1774_v1  ;;  %v1805_v29 = vand.u32 2147483647, %v1774_v1 }
 0x976   : > { %v1808_v56 = vor.u32 1.1754944e-38, %v1807_v51  ;;  %vm1806_vm9 = vcmp.eq.f32.partialorder %v1805_v29, 8.507059e+37 }
 0x97a   : > { %v4496_v38 = vpop.eup %4495 }
 0x97b   : > { %v1797_v57 = vmul.f32 %v4496_v38, %v1774_v1  ;;  %v1777_v21 = vpop.xlane.xlu0 %1776  ;;  %vm1802_vm6 = vweird.f32 %v4496_v38 }
 0x97c   : > { %4497 = vrcp.f32 %v1777_v21  ;;  %vm1803_vm8 = vmor %vm1801_vm7, %vm1802_vm6  ;;  %v1822_v2 = vand.u32 2147483648, %v1777_v21  ;;  %v1820_v10 = vand.u32 2147483647, %v1777_v21  ;;  %vm1816_vm13 = vweird.f32 %v1777_v21 }
 0x97d   : > { %v1798_v27 = vsub.f32 1.0, %v1797_v57 }
 0x97e   : > { %v1823_v59 = vor.u32 1.1754944e-38, %v1822_v2  ;;  %vm1821_vm15 = vcmp.eq.f32.partialorder %v1820_v10, 8.507059e+37 }
 0x97f   : > { %v1799_v5 = vmul.f32 %v4496_v38, %v1798_v27 }
 0x981   : > { %v1800_v30 = vadd.f32 %v4496_v38, %v1799_v5 }
 0x982   : > { %v4498_v13 = vpop.eup %4497 }
 0x983   : > { %v1804_v43 = vsel %vm1803_vm8, %v4496_v38, %v1800_v30  ;;  %v1812_v55 = vmul.f32 %v4498_v13, %v1777_v21  ;;  %vm1817_vm10 = vweird.f32 %v4498_v13  ;;  %v5353_v54 = vpop.xlane.xlu0 %1779 }
 0x984   : > { %v1809_v7 = vsel %vm1806_vm9, %v1808_v56, %v1804_v43  ;;  %vm1818_vm14 = vmor %vm1816_vm13, %vm1817_vm10  ;;  %4499 = vrcp.f32 %v5353_v54  ;;  %vm1831_vm7 = vweird.f32 %v5353_v54  ;;  %v1835_v10 = vand.u32 2147483647, %v5353_v54 }
 0x985   : > { %v1813_v58 = vsub.f32 1.0, %v1812_v55  ;;  %v1810_v50 = vmul.f32 %v1809_v7, %v5279_v31  ;;  %v1837_v7 = vand.u32 2147483648, %v5353_v54 }
 0x987   : > { %v1814_v14 = vmul.f32 %v4498_v13, %v1813_v58  ;;  %v1916_v23 = vpack.c.bf16 %v1810_v50, %v1810_v50 }
 0x989   : > { %v1815_v18 = vadd.f32 %v4498_v13, %v1814_v14  ;;  %v1926_v19 = vunpack.c.l.b16 %v1916_v23 }
 0x98a   : > { %v4500_v31 = vpop.eup %4499 }
 0x98b   : > { %v1819_v37 = vsel %vm1818_vm14, %v4498_v13, %v1815_v18  ;;  %v1827_v46 = vmul.f32 %v4500_v31, %v5353_v54  ;;  %vm1832_vm4 = vweird.f32 %v4500_v31  ;;  %vm1836_vm14 = vcmp.eq.f32.partialorder %v1835_v10, 8.507059e+37 }
 0x98c   : > { %v1824_v16 = vsel %vm1821_vm15, %v1823_v59, %v1819_v37  ;;  %vm5367_vm8 = vmor %vm1831_vm7, %vm1832_vm4 }
 0x98d   : > { %v1825_v32 = vmul.f32 %v1824_v16, %v5287_v15  ;;  %v1828_v15 = vsub.f32 1.0, %v1827_v46 }
 0x98f   : > { %v1917_v28 = vpack.c.bf16 %v1825_v32, %v1825_v32  ;;  %v1829_v1 = vmul.f32 %v4500_v31, %v1828_v15 }
 0x991   : > { %v1927_v26 = vunpack.c.l.b16 %v1917_v28  ;;  %v1830_v13 = vadd.f32 %v4500_v31, %v1829_v1 }
 0x993   : > { %v1795_v48 = vpop.xlane.xlu0 %1794  ;;  %v1928_v34 = vpack.c.b16 %v1927_v26, %v1926_v19  ;;  %v1834_v59 = vsel %vm5367_vm8, %v4500_v31, %v1830_v13  ;;  %v1838_v26 = vor.u32 1.1754944e-38, %v1837_v7 }
 0x994   : > { %4501 = vrcp.f32 %v1795_v48  ;;  %v1912_v38 = vand.u32 2147483648, %v1795_v48  ;;  %vm1906_vm2 = vweird.f32 %v1795_v48  ;;  %v1910_v57 = vand.u32 2147483647, %v1795_v48 }
 0x995   : > { %4241 = vmatmul.msk.bf16.vlgmr.msra.gmra.mxu3 %vm908_vm12, %v1928_v34 }
 0x996   : > { %v1913_v43 = vor.u32 1.1754944e-38, %v1912_v38  ;;  %vm1911_vm5 = vcmp.eq.f32.partialorder %v1910_v57, 8.507059e+37 }
 0x99a   : > { %v4502_v40 = vpop.eup %4501 }
 0x99b   : > { %v1902_v35 = vmul.f32 %v4502_v40, %v1795_v48  ;;  %vm1907_vm1 = vweird.f32 %v4502_v40 }
 0x99c   : > { %v1792_v49 = vpop.xlane.xlu2 %1791  ;;  %vm5359_vm3 = vmor %vm1906_vm2, %vm1907_vm1 }
 0x99d   : > { %v1903_v52 = vsub.f32 1.0, %v1902_v35  ;;  %4503 = vrcp.f32 %v1792_v49  ;;  %v1897_v55 = vand.u32 2147483648, %v1792_v49  ;;  %v1895_v58 = vand.u32 2147483647, %v1792_v49 }
 0x99e   : > { %vm1891_vm9 = vweird.f32 %v1792_v49 }
 0x99f   : > { %v1904_v11 = vmul.f32 %v4502_v40, %v1903_v52  ;;  %v1898_v37 = vor.u32 1.1754944e-38, %v1897_v55  ;;  %vm1896_vm13 = vcmp.eq.f32.partialorder %v1895_v58, 8.507059e+37 }
 0x9a1   : > { %v1905_v12 = vadd.f32 %v4502_v40, %v1904_v11 }
 0x9a3   : > { %v4504_v62 = vpop.eup %4503  ;;  %v1909_v51 = vsel %vm5359_vm3, %v4502_v40, %v1905_v12  ;;  %v1839_v40 = vsel %vm1836_vm14, %v1838_v26, %v1834_v59 }
 0x9a4   : > { %v1887_v21 = vmul.f32 %v4504_v62, %v1792_v49  ;;  %v1783_v27 = vpop.xlane.xlu1 %1782  ;;  %vm1892_vm6 = vweird.f32 %v4504_v62  ;;  %v1914_v2 = vsel %vm1911_vm5, %v1913_v43, %v1909_v51  ;;  %v1840_v12 = vmul.f32 %v1839_v40, %v5293_v47 }
 0x9a5   : > { %4505 = vrcp.f32 %v1783_v27  ;;  %vm1893_vm10 = vmor %vm1891_vm9, %vm1892_vm6  ;;  %v1915_v19 = vmul.f32 %v1914_v2, %v5303_v45  ;;  %v1850_v31 = vand.u32 2147483647, %v1783_v27  ;;  %v1852_v46 = vand.u32 2147483648, %v1783_v27 }
 0x9a6   : > { %v1888_v30 = vsub.f32 1.0, %v1887_v21  ;;  %v2005_v29 = vpop.permute.xlu0 %2004  ;;  %vm1846_vm1 = vweird.f32 %v1783_v27  ;;  %v1918_v55 = vpack.c.bf16 %v1840_v12, %v1840_v12 }
 0x9a7   : > { %2017 = vmatpush.bf16.msrb.mxu3 %v2005_v29  ;;  %v1923_v15 = vpack.c.bf16 %v1915_v19, %v1915_v19  ;;  %vm1851_vm3 = vcmp.eq.f32.partialorder %v1850_v31, 8.507059e+37  ;;  %v1853_v1 = vor.u32 1.1754944e-38, %v1852_v46 }
 0x9a8   : > { %v1889_v56 = vmul.f32 %v4504_v62, %v1888_v30 }
 0x9a9   : > { %v2002_v30 = vunpack.c.l.b16 %v1923_v15 }
 0x9aa   : > { %v1890_v18 = vadd.f32 %v4504_v62, %v1889_v56 }
 0x9ab   : > { %v4506_v50 = vpop.eup %4505 }
 0x9ac   : > { %v1894_v16 = vsel %vm1893_vm10, %v4504_v62, %v1890_v18  ;;  %v1842_v32 = vmul.f32 %v4506_v50, %v1783_v27  ;;  %v1786_v23 = vpop.xlane.xlu1 %1785  ;;  %v5374_v28 = vpop.xlane.xlu2 %1788  ;;  %vm1847_vm15 = vweird.f32 %v4506_v50 }
 0x9ad   : > { %v1899_v48 = vsel %vm1896_vm13, %v1898_v37, %v1894_v16  ;;  %4507 = vrcp.f32 %v1786_v23  ;;  %vm1848_vm2 = vmor %vm1846_vm1, %vm1847_vm15  ;;  %v1865_v56 = vand.u32 2147483647, %v1786_v23  ;;  %v1867_v58 = vand.u32 2147483648, %v1786_v23 }
 0x9ae   : > { %v1843_v54 = vsub.f32 1.0, %v1842_v32  ;;  %4509 = vrcp.f32 %v5374_v28  ;;  %v2102_v34 = vpop.permute.xlu0 %2101  ;;  %v1900_v52 = vmul.f32 %v1899_v48, %v5313_v17  ;;  %v1882_v14 = vand.u32 2147483648, %v5374_v28 }
 0x9af   : > { %v2107_v35 = vsel %vm791_vm11, %v2102_v34, 0  ;;  %vm1861_vm6 = vweird.f32 %v1786_v23  ;;  %v1951_v37 = vunpack.c.l.b16 %v1918_v55  ;;  %vm1876_vm8 = vweird.f32 %v5374_v28 }
 0x9b0   : > { %v1844_v49 = vmul.f32 %v4506_v50, %v1843_v54  ;;  %2116 = vmatpush.bf16.xpose.msra.mxu3 %v2107_v35  ;;  %v1922_v11 = vpack.c.bf16 %v1900_v52, %v1900_v52  ;;  %vm1866_vm9 = vcmp.eq.f32.partialorder %v1865_v56, 8.507059e+37  ;;  %v1883_v26 = vor.u32 1.1754944e-38, %v1882_v14 }
 0x9b2   : > { %v1845_v45 = vadd.f32 %v4506_v50, %v1844_v49  ;;  %v2001_v51 = vunpack.c.l.b16 %v1922_v11 }
 0x9b3   : > { %v4508_v62 = vpop.eup %4507 }
 0x9b4   : > { %v4510_v38 = vpop.eup %4509  ;;  %v1849_v57 = vsel %vm1848_vm2, %v4506_v50, %v1845_v45  ;;  %v1857_v21 = vmul.f32 %v4508_v62, %v1786_v23  ;;  %v2078_v5 = vpop.permute.xlu2 %2077  ;;  %v2003_v27 = vpack.c.b16 %v2002_v30, %v2001_v51  ;;  %vm1862_vm4 = vweird.f32 %v4508_v62 }
 0x9b5   : > { %v1854_v29 = vsel %vm1851_vm3, %v1853_v1, %v1849_v57  ;;  %v1872_v13 = vmul.f32 %v4510_v38, %v5374_v28  ;;  %v2083_v17 = vsel %vm791_vm11, %v2078_v5, 0  ;;  %vm1877_vm5 = vweird.f32 %v4510_v38  ;;  %vm1863_vm7 = vmor %vm1861_vm6, %vm1862_vm4 }
 0x9b6   : > { %v1858_v43 = vsub.f32 1.0, %v1857_v21  ;;  %2092 = vmatpush.bf16.xpose.msra.mxu2 %v2083_v17  ;;  %v1855_v47 = vmul.f32 %v1854_v29, %v5321_v3  ;;  %4244 = vmatmul.msk.bf16.vlgmr.msrb.gmra.mxu3 %vm908_vm12, %v2003_v27  ;;  %v1880_v50 = vand.u32 2147483647, %v5374_v28  ;;  %v1868_v3 = vor.u32 1.1754944e-38, %v1867_v58  ;;  %vm1878_vm10 = vmor %vm1876_vm8, %vm1877_vm5  ;;  %v4245_v28 = vld [vmem:[%s6306_s5 + $0x20] sm:$0xff] }
 0x9b7   : > { %v1873_v7 = vsub.f32 1.0, %v1872_v13 }
 0x9b8   : > { %v1859_v2 = vmul.f32 %v4508_v62, %v1858_v43  ;;  %v1919_v10 = vpack.c.bf16 %v1855_v47, %v1855_v47  ;;  %vm1881_vm13 = vcmp.eq.f32.partialorder %v1880_v50, 8.507059e+37 }
 0x9b9   : > { %v1874_v18 = vmul.f32 %v4510_v38, %v1873_v7 }
 0x9ba   : > { %v1860_v59 = vadd.f32 %v4508_v62, %v1859_v2  ;;  %v1952_v16 = vunpack.c.l.b16 %v1919_v10 }
 0x9bb   : > { %v1875_v32 = vadd.f32 %v4510_v38, %v1874_v18 }
 0x9bc   : > { %v1864_v19 = vsel %vm1863_vm7, %v4508_v62, %v1860_v59  ;;  %v2076_v48 = vpop.permute.xlu2 %2075  ;;  %v1953_v54 = vpack.c.b16 %v1952_v16, %v1951_v37 }
 0x9bd   : > { %v1869_v34 = vsel %vm1866_vm9, %v1868_v3, %v1864_v19  ;;  %v1879_v40 = vsel %vm1878_vm10, %v4510_v38, %v1875_v32 }
 0x9be   : > { %v1884_v31 = vsel %vm1881_vm13, %v1883_v26, %v1879_v40  ;;  %4242 = vmatmul.msk.bf16.vlgmr.msrb.gmra.mxu1 %vm908_vm12, %v1953_v54  ;;  %v1870_v23 = vmul.f32 %v1869_v34, %v5331_v0 }
 0x9bf   : > { %v1885_v46 = vmul.f32 %v1884_v31, %v5333_v25  ;;  %v4246_v25 = vld [vmem:[%s6306_s5 + $0x28] sm:$0xff] }
 0x9c0   : > { %v1920_v35 = vpack.c.bf16 %v1870_v23, %v1870_v23 }
 0x9c1   : > { %v1921_v49 = vpack.c.bf16 %v1885_v46, %v1885_v46 }
 0x9c2   : > { %v1976_v52 = vunpack.c.l.b16 %v1920_v35 }
 0x9c3   : > { %v1977_v15 = vunpack.c.l.b16 %v1921_v49 }
 0x9c4   : > { %v2046_v45 = vpop.f32.mrf.mxu0  ;;  %v2054_v11 = vpop.permute.xlu1 %2053 }
 0x9c5   : > { %v5394_v12 = vadd.f32 %v4245_v28, %v2046_v45  ;;  %v2059_v62 = vsel %vm791_vm11, %v2054_v11, 0  ;;  %v2100_v1 = vpop.permute.xlu2 %2099  ;;  %v1978_v38 = vpack.c.b16 %v1977_v15, %v1976_v52 }
 0x9c6   : > { %2068 = vmatpush.bf16.xpose.msra.mxu1 %v2059_v62  ;;  %4250 = vmatmul.msk.bf16.vlgmr.msra.gmra.mxu3 %vm791_vm11, %v2100_v1 }
 0x9c7   : > { %4243 = vmatmul.msk.bf16.vlgmr.msrb.gmra.mxu2 %vm908_vm12, %v1978_v38  ;;  %v2147_v0 = vsel %vm908_vm12, %v5394_v12, inf }
 0x9c8   : > { %2148 = vmin.xlane.f32.xlu1 %v2147_v0 }
 0x9cc   : > { %v2048_v57 = vpop.f32.mrf.mxu0  ;;  %v2052_v21 = vpop.permute.xlu1 %2051 }
 0x9cd   : > { %v5404_v5 = vadd.f32 %v4246_v25, %v2048_v57 }
 0x9ce   : > { %4248 = vmatmul.msk.bf16.vlgmr.msra.gmra.mxu1 %vm791_vm11, %v2052_v21 }
 0x9cf   : > { %v2150_v51 = vsel %vm908_vm12, %v5404_v5, inf }
 0x9d0   : > { %2151 = vmin.xlane.f32.xlu0 %v2150_v51 }
 0x9d7   : > { %4249 = vmatmul.msk.bf16.vlgmr.msra.gmra.mxu2 %vm791_vm11, %v2076_v48 }
 0xa18   : > { %v5410_v30 = vpop.f32.mrf.mxu3 }
 0xa20   : > { %v5412_v29 = vpop.f32.mrf.mxu3 }
 0xa21   : > { %v4361_v13 = vpack.i.bf16 %v5412_v29, %v5410_v30 }
 0xa39   : > { %v5416_v17 = vpop.f32.mrf.mxu3 }
 0xa3b   : > { %v5418_v43 = vpop.f32.mrf.mxu1  ;;  %v2149_v46 = vpop.xlane.xlu1 %2148 }
 0xa3c   : > { %vm2171_vm15 = vcmp.le.f32.partialorder %v5394_v12, %v2149_v46 }
 0xa3d   : > { %v2179_v15 = vsel %vm2171_vm15, 1e+30, %v5394_v12 }
 0xa3e   : > { %v2187_v45 = vsel %vm908_vm12, %v2179_v15, inf }
 0xa41   : > { %v5420_v27 = vpop.f32.mrf.mxu3 }
 0xa42   : > { %v4406_v47 = vpack.i.bf16 %v5420_v27, %v5416_v17 }
 0xa43   : > { %v5424_v55 = vpop.f32.mrf.mxu1  ;;  %v2152_v48 = vpop.xlane.xlu0 %2151 }
 0xa44   : > { %v4376_v56 = vpack.i.bf16 %v5424_v55, %v5418_v43  ;;  %vm2172_vm14 = vcmp.le.f32.partialorder %v5404_v5, %v2152_v48 }
 0xa45   : > { %v2180_v35 = vsel %vm2172_vm14, 1e+30, %v5404_v5 }
 0xa46   : > { %v2190_v52 = vsel %vm908_vm12, %v2180_v35, inf }
 0xa49   : > { %v2118_v50 = vpop.f32.mrf.mxu3 }
 0xa4a   : > { %v5428_v58 = vpop.f32.mrf.mxu2  ;;  %v5442_v32 = vadd.f32 %v4245_v28, %v2118_v50 }
 0xa4b   : > { %v2070_v7 = vpop.f32.mrf.mxu1 }
 0xa4c   : > { %v5430_v2 = vadd.f32 %v4245_v28, %v2070_v7  ;;  %v2165_v34 = vsel %vm908_vm12, %v5442_v32, inf }
 0xa4e   : > { %v2153_v14 = vsel %vm908_vm12, %v5430_v2, inf }
 0xa4f   : > { %2154 = vmin.xlane.f32.xlu2 %v2153_v14 }
 0xa51   : > { %v2120_v54 = vpop.f32.mrf.mxu3 }
 0xa52   : > { %v5434_v10 = vpop.f32.mrf.mxu2  ;;  %v5451_v40 = vadd.f32 %v4246_v25, %v2120_v54 }
 0xa53   : > { %v4391_v18 = vpack.i.bf16 %v5434_v10, %v5428_v58  ;;  %v2072_v59 = vpop.f32.mrf.mxu1 }
 0xa54   : > { %v5438_v37 = vadd.f32 %v4246_v25, %v2072_v59 }
 0xa56   : > { %v2156_v16 = vsel %vm908_vm12, %v5438_v37, inf }
 0xa57   : > { %2157 = vmin.xlane.f32.xlu1 %v2156_v16 }
 0xa5a   : > { %v2094_v3 = vpop.f32.mrf.mxu2 }
 0xa5b   : > { %v5444_v19 = vadd.f32 %v4245_v28, %v2094_v3  ;;  %v2168_v28 = vsel %vm908_vm12, %v5451_v40, inf }
 0xa5d   : > { %v2159_v26 = vsel %vm908_vm12, %v5444_v19, inf }
 0xa5e   : > { %2160 = vmin.xlane.f32.xlu0 %v2159_v26 }
 0xa5f   : > { %2166 = vmin.xlane.f32.xlu1 %v2165_v34 }
 0xa62   : > { %v2096_v31 = vpop.f32.mrf.mxu2 }
 0xa63   : > { %v5453_v23 = vadd.f32 %v4246_v25, %v2096_v31 }
 0xa65   : > { %v2162_v49 = vsel %vm908_vm12, %v5453_v23, inf }
 0xa66   : > { %2163 = vmin.xlane.f32.xlu2 %v2162_v49  ;;  %2169 = vmin.xlane.f32.xlu0 %v2168_v28 }
 0xa67   : > { %2191 = vmin.xlane.f32.xlu1 %v2190_v52 }
 0xa6e   : > { %2188 = vmin.xlane.f32.xlu2 %v2187_v45 }
 0xac2   : > { %v2155_v11 = vpop.xlane.xlu2 %2154 }
 0xac3   : > { %vm2173_vm1 = vcmp.le.f32.partialorder %v5430_v2, %v2155_v11 }
 0xac4   : > { %v2181_v62 = vsel %vm2173_vm1, 1e+30, %v5430_v2 }
 0xac5   : > { %v2193_v1 = vsel %vm908_vm12, %v2181_v62, inf }
 0xac6   : > { %2194 = vmin.xlane.f32.xlu0 %v2193_v1 }
 0xaca   : > { %v2158_v38 = vpop.xlane.xlu1 %2157 }
 0xacb   : > { %vm2174_vm2 = vcmp.le.f32.partialorder %v5438_v37, %v2158_v38 }
 0xacc   : > { %v2182_v0 = vsel %vm2174_vm2, 1e+30, %v5438_v37 }
 0xacd   : > { %v2196_v25 = vsel %vm908_vm12, %v2182_v0, inf }
 0xace   : > { %2197 = vmin.xlane.f32.xlu2 %v2196_v25 }
 0xad1   : > { %v2161_v57 = vpop.xlane.xlu0 %2160 }
 0xad2   : > { %v2167_v21 = vpop.xlane.xlu1 %2166  ;;  %vm2175_vm7 = vcmp.le.f32.partialorder %v5444_v19, %v2161_v57 }
 0xad3   : > { %vm2177_vm3 = vcmp.le.f32.partialorder %v5442_v32, %v2167_v21  ;;  %v2183_v31 = vsel %vm2175_vm7, 1e+30, %v5444_v19 }
 0xad4   : > { %v2185_v51 = vsel %vm2177_vm3, 1e+30, %v5442_v32  ;;  %v2199_v28 = vsel %vm908_vm12, %v2183_v31, inf }
 0xad5   : > { %v2205_v7 = vsel %vm908_vm12, %v2185_v51, inf }
 0xad6   : > { %2206 = vmin.xlane.f32.xlu2 %v2205_v7 }
 0xad9   : > { %v2170_v14 = vpop.xlane.xlu0 %2169  ;;  %v2164_v50 = vpop.xlane.xlu2 %2163 }
 0xada   : > { %vm2178_vm4 = vcmp.le.f32.partialorder %v5451_v40, %v2170_v14  ;;  %vm2176_vm5 = vcmp.le.f32.partialorder %v5453_v23, %v2164_v50  ;;  %v2192_v3 = vpop.xlane.xlu1 %2191 }
 0xadb   : > { %v2186_v59 = vsel %vm2178_vm4, 1e+30, %v5451_v40  ;;  %v2184_v16 = vsel %vm2176_vm5, 1e+30, %v5453_v23  ;;  %vm2212_vm6 = vcmp.le.f32.partialorder %v2180_v35, %v2192_v3 }
 0xadc   : > { %v2208_v26 = vsel %vm908_vm12, %v2186_v59, inf  ;;  %v2202_v48 = vsel %vm908_vm12, %v2184_v16, inf  ;;  %v2220_v54 = vsel %vm2212_vm6, 1e+30, %v2180_v35 }
 0xadd   : > { %2209 = vmin.xlane.f32.xlu1 %v2208_v26  ;;  %2203 = vmin.xlane.f32.xlu0 %v2202_v48  ;;  %v2230_v34 = vsel %vm908_vm12, %v2220_v54, inf }
 0xade   : > { %2231 = vmin.xlane.f32.xlu2 %v2230_v34 }
 0xae1   : > { %v2189_v46 = vpop.xlane.xlu2 %2188 }
 0xae2   : > { %vm2211_vm8 = vcmp.le.f32.partialorder %v2179_v15, %v2189_v46 }
 0xae3   : > { %v2219_v49 = vsel %vm2211_vm8, 1e+30, %v2179_v15 }
 0xae4   : > { %v2227_v52 = vsel %vm908_vm12, %v2219_v49, inf }
 0xae5   : > { %2200 = vmin.xlane.f32.xlu1 %v2199_v28  ;;  %2228 = vmin.xlane.f32.xlu0 %v2227_v52 }
 0xb39   : > { %v2195_v45 = vpop.xlane.xlu0 %2194 }
 0xb3a   : > { %vm2213_vm9 = vcmp.le.f32.partialorder %v2181_v62, %v2195_v45  ;;  %v2123_v45 = vsel %vm908_vm12, %v5394_v12, -inf }
 0xb3b   : > { %v2221_v35 = vsel %vm2213_vm9, 1e+30, %v2181_v62 }
 0xb3c   : > { %v2233_v11 = vsel %vm908_vm12, %v2221_v35, inf }
 0xb3d   : > { %2234 = vmin.xlane.f32.xlu1 %v2233_v11 }
 0xb41   : > { %v2198_v1 = vpop.xlane.xlu2 %2197 }
 0xb42   : > { %vm2214_vm10 = vcmp.le.f32.partialorder %v2182_v0, %v2198_v1 }
 0xb43   : > { %v2222_v38 = vsel %vm2214_vm10, 1e+30, %v2182_v0 }
 0xb44   : > { %v2236_v25 = vsel %vm908_vm12, %v2222_v38, inf }
 0xb45   : > { %2237 = vmin.xlane.f32.xlu0 %v2236_v25 }
 0xb49   : > { %v2207_v57 = vpop.xlane.xlu2 %2206 }
 0xb4a   : > { %vm2217_vm13 = vcmp.le.f32.partialorder %v2185_v51, %v2207_v57 }
 0xb4b   : > { %v2225_v15 = vsel %vm2217_vm13, 1e+30, %v2185_v51 }
 0xb4c   : > { %v2245_v21 = vsel %vm908_vm12, %v2225_v15, inf }
 0xb4d   : > { %2246 = vmin.xlane.f32.xlu0 %v2245_v21 }
 0xb50   : > { %v2210_v7 = vpop.xlane.xlu1 %2209  ;;  %v2204_v14 = vpop.xlane.xlu0 %2203 }
 0xb51   : > { %v2232_v50 = vpop.xlane.xlu2 %2231  ;;  %vm2218_vm2 = vcmp.le.f32.partialorder %v2186_v59, %v2210_v7  ;;  %vm2216_vm3 = vcmp.le.f32.partialorder %v2184_v16, %v2204_v14 }
 0xb52   : > { %vm2252_vm14 = vcmp.le.f32.partialorder %v2220_v54, %v2232_v50  ;;  %v2226_v28 = vsel %vm2218_vm2, 1e+30, %v2186_v59 }
 0xb53   : > { %v5487_v62 = vsel %vm2252_vm14, 1e+30, %v2220_v54  ;;  %v2126_v54 = vsel %vm908_vm12, %v5404_v5, -inf  ;;  %v2248_v52 = vsel %vm908_vm12, %v2226_v28, inf }
 0xb54   : > { %v2270_v3 = vsel %vm908_vm12, %v5487_v62, inf }
 0xb55   : > { %2271 = vmin.xlane.f32.xlu0 %v2270_v3 }
 0xb58   : > { %v2201_v0 = vpop.xlane.xlu1 %2200  ;;  %v2229_v26 = vpop.xlane.xlu0 %2228 }
 0xb59   : > { %vm2215_vm15 = vcmp.le.f32.partialorder %v2183_v31, %v2201_v0  ;;  %vm2251_vm1 = vcmp.le.f32.partialorder %v2219_v49, %v2229_v26 }
 0xb5a   : > { %v2223_v48 = vsel %vm2215_vm15, 1e+30, %v2183_v31  ;;  %v2259_v34 = vsel %vm2251_vm1, 1e+30, %v2219_v49  ;;  %v2224_v31 = vsel %vm2216_vm3, 1e+30, %v2184_v16 }
 0xb5b   : > { %v2239_v51 = vsel %vm908_vm12, %v2223_v48, inf  ;;  %v2267_v46 = vsel %vm908_vm12, %v2259_v34, inf  ;;  %v2242_v49 = vsel %vm908_vm12, %v2224_v31, inf }
 0xb5c   : > { %2240 = vmin.xlane.f32.xlu2 %v2239_v51  ;;  %2268 = vmin.xlane.f32.xlu1 %v2267_v46 }
 0xb5d   : > { %2127 = vmax.xlane.f32.xlu0 %v2126_v54 }
 0xb64   : > { %2249 = vmin.xlane.f32.xlu2 %v2248_v52  ;;  %2124 = vmax.xlane.f32.xlu1 %v2123_v45 }
 0xb6c   : > { %2243 = vmin.xlane.f32.xlu1 %v2242_v49 }
 0xbb0   : > { %v2235_v11 = vpop.xlane.xlu1 %2234 }
 0xbb1   : > { %vm2253_vm4 = vcmp.le.f32.partialorder %v2221_v35, %v2235_v11 }
 0xbb2   : > { %v5499_v1 = vsel %vm2253_vm4, 1e+30, %v2221_v35 }
 0xbb3   : > { %v2273_v25 = vsel %vm908_vm12, %v5499_v1, inf }
 0xbb4   : > { %2274 = vmin.xlane.f32.xlu2 %v2273_v25 }
 0xbb8   : > { %v2238_v59 = vpop.xlane.xlu0 %2237 }
 0xbb9   : > { %vm2254_vm5 = vcmp.le.f32.partialorder %v2222_v38, %v2238_v59  ;;  %v2135_v59 = vsel %vm908_vm12, %v5444_v19, -inf }
 0xbba   : > { %v2262_v57 = vsel %vm2254_vm5, 1e+30, %v2222_v38 }
 0xbbb   : > { %v2276_v21 = vsel %vm908_vm12, %v2262_v57, inf }
 0xbbc   : > { %2277 = vmin.xlane.f32.xlu1 %v2276_v21  ;;  %v2144_v21 = vsel %vm908_vm12, %v5451_v40, -inf }
 0xbc0   : > { %v2247_v7 = vpop.xlane.xlu0 %2246 }
 0xbc1   : > { %vm2257_vm6 = vcmp.le.f32.partialorder %v2225_v15, %v2247_v7  ;;  %v2141_v7 = vsel %vm908_vm12, %v5442_v32, -inf }
 0xbc2   : > { %v5504_v16 = vsel %vm2257_vm6, 1e+30, %v2225_v15 }
 0xbc3   : > { %v2285_v14 = vsel %vm908_vm12, %v5504_v16, inf }
 0xbc4   : > { %2286 = vmin.xlane.f32.xlu2 %v2285_v14 }
 0xbc8   : > { %v2272_v45 = vpop.xlane.xlu0 %2271 }
 0xbc9   : > { %vm2292_vm13 = vcmp.le.f32.partialorder %v5487_v62, %v2272_v45 }
 0xbca   : > { %v2300_v11 = vsel %vm2292_vm13, 1e+30, %v5487_v62 }
 0xbcb   : > { %v2310_v25 = vsel %vm908_vm12, %v2300_v11, inf }
 0xbcf   : > { %v2269_v35 = vpop.xlane.xlu1 %2268  ;;  %v2241_v50 = vpop.xlane.xlu2 %2240 }
 0xbd0   : > { %vm2291_vm7 = vcmp.le.f32.partialorder %v2259_v34, %v2269_v35  ;;  %vm2255_vm8 = vcmp.le.f32.partialorder %v2223_v48, %v2241_v50 }
 0xbd1   : > { %v2299_v3 = vsel %vm2291_vm7, 1e+30, %v2259_v34  ;;  %v2263_v38 = vsel %vm2255_vm8, 1e+30, %v2223_v48  ;;  %v2132_v48 = vsel %vm908_vm12, %v5438_v37, -inf }
 0xbd2   : > { %v2307_v0 = vsel %vm908_vm12, %v2299_v3, inf  ;;  %v2279_v15 = vsel %vm908_vm12, %v2263_v38, inf  ;;  %v2128_v3 = vpop.xlane.xlu0 %2127 }
 0xbd3   : > { %2308 = vmin.xlane.f32.xlu0 %v2307_v0 }
 0xbd7   : > { %v2125_v26 = vpop.xlane.xlu1 %2124  ;;  %v2250_v51 = vpop.xlane.xlu2 %2249 }
 0xbd8   : > { %vm2258_vm9 = vcmp.le.f32.partialorder %v2226_v28, %v2250_v51  ;;  %v2347_v50 = vsub.f32 %v5394_v12, %v2125_v26 }
 0xbd9   : > { %v2266_v46 = vsel %vm2258_vm9, 1e+30, %v2226_v28  ;;  %v2129_v28 = vsel %vm908_vm12, %v5430_v2, -inf }
 0xbda   : > { %v2288_v54 = vsel %vm908_vm12, %v2266_v46, inf  ;;  %v2355_v0 = vmul.f32 1.442695, %v2347_v50 }
 0xbdb   : > { %2280 = vmin.xlane.f32.xlu0 %v2279_v15  ;;  %2289 = vmin.xlane.f32.xlu1 %v2288_v54 }
 0xbdc   : > { %4511 = vpow2.f32 %v2355_v0 }
 0xbdf   : > { %v2244_v52 = vpop.xlane.xlu1 %2243 }
 0xbe0   : > { %vm2256_vm10 = vcmp.le.f32.partialorder %v2224_v31, %v2244_v52 }
 0xbe1   : > { %v5511_v49 = vsel %vm2256_vm10, 1e+30, %v2224_v31  ;;  %v2138_v31 = vsel %vm908_vm12, %v5453_v23, -inf }
 0xbe2   : > { %v2282_v34 = vsel %vm908_vm12, %v5511_v49, inf  ;;  %v4512_v52 = vpop.eup %4511 }
 0xbe3   : > { %2283 = vmin.xlane.f32.xlu2 %v2282_v34  ;;  %2133 = vmax.xlane.f32.xlu0 %v2132_v48 }
 0xbe4   : > { %2130 = vmax.xlane.f32.xlu1 %v2129_v28 }
 0xbeb   : > { %2311 = vmin.xlane.f32.xlu2 %v2310_v25 }
 0xbec   : > { %2139 = vmax.xlane.f32.xlu1 %v2138_v31 }
 0xbf3   : > { %2136 = vmax.xlane.f32.xlu2 %v2135_v59 }
 0xbf4   : > { %2145 = vmax.xlane.f32.xlu1 %v2144_v21 }
 0xbfb   : > { %2142 = vmax.xlane.f32.xlu2 %v2141_v7 }
 0xc27   : > { %v2275_v51 = vpop.xlane.xlu2 %2274 }
 0xc28   : > { %vm2293_vm4 = vcmp.le.f32.partialorder %v5499_v1, %v2275_v51 }
 0xc2f   : > { %v2278_v62 = vpop.xlane.xlu1 %2277 }
 0xc30   : > { %vm2294_vm14 = vcmp.le.f32.partialorder %v2262_v57, %v2278_v62 }
 0xc31   : > { %v2302_v14 = vsel %vm2294_vm14, 1e+30, %v2262_v57 }
 0xc32   : > { %v2316_v35 = vsel %vm908_vm12, %v2302_v14, inf }
 0xc33   : > { %2317 = vmin.xlane.f32.xlu2 %v2316_v35 }
 0xc37   : > { %v2287_v57 = vpop.xlane.xlu2 %2286 }
 0xc38   : > { %vm2297_vm5 = vcmp.le.f32.partialorder %v5504_v16, %v2287_v57 }
 0xc46   : > { %v2309_v15 = vpop.xlane.xlu0 %2308 }
 0xc47   : > { %v2331_v54 = vmin.f32 %v2309_v15, %v2125_v26  ;;  %v2348_v26 = vsub.f32 %v5404_v5, %v2128_v3 }
 0xc49   : > { %vm2339_vm15 = vcmp.ge.f32.partialorder %v5394_v12, %v2331_v54  ;;  %v2357_v21 = vmul.f32 1.442695, %v2348_v26 }
 0xc4a   : > { %v5533_v45 = vsel %vm2339_vm15, %v4512_v52, 0.0 }
 0xc4b   : > { %v2379_v34 = vsel %vm908_vm12, %v5533_v45, 0.0  ;;  %4513 = vpow2.f32 %v2357_v21 }
 0xc4c   : > { %2380 = vadd.xlane.f32.xlu1 %v2379_v34 }
 0xc4e   : > { %v2281_v48 = vpop.xlane.xlu0 %2280  ;;  %v2290_v28 = vpop.xlane.xlu1 %2289 }
 0xc4f   : > { %vm2295_vm1 = vcmp.le.f32.partialorder %v2263_v38, %v2281_v48  ;;  %vm2298_vm2 = vcmp.le.f32.partialorder %v2266_v46, %v2290_v28 }
 0xc50   : > { %v2303_v11 = vsel %vm2295_vm1, 1e+30, %v2263_v38  ;;  %v2306_v25 = vsel %vm2298_vm2, 1e+30, %v2266_v46  ;;  %v2301_v46 = vsel %vm2293_vm4, 1e+30, %v5499_v1 }
 0xc51   : > { %v2328_v31 = vsel %vm908_vm12, %v2306_v25, inf  ;;  %v2319_v12 = vsel %vm908_vm12, %v2303_v11, inf  ;;  %v4514_v14 = vpop.eup %4513  ;;  %v2313_v50 = vsel %vm908_vm12, %v2301_v46, inf }
 0xc52   : > { %2329 = vmin.xlane.f32.xlu2 %v2328_v31 }
 0xc54   : > { %2320 = vmin.xlane.f32.xlu1 %v2319_v12 }
 0xc56   : > { %v2284_v59 = vpop.xlane.xlu2 %2283  ;;  %v2134_v15 = vpop.xlane.xlu0 %2133 }
 0xc57   : > { %vm2296_vm6 = vcmp.le.f32.partialorder %v5511_v49, %v2284_v59  ;;  %v2350_v54 = vsub.f32 %v5438_v37, %v2134_v15  ;;  %v2131_v34 = vpop.xlane.xlu1 %2130 }
 0xc58   : > { %v2304_v0 = vsel %vm2296_vm6, 1e+30, %v5511_v49 }
 0xc59   : > { %v2322_v1 = vsel %vm908_vm12, %v2304_v0, inf }
 0xc5e   : > { %v2312_v7 = vpop.xlane.xlu2 %2311 }
 0xc5f   : > { %v2332_v62 = vmin.f32 %v2312_v7, %v2128_v3  ;;  %v5566_v25 = vpop.xlane.xlu1 %2139 }
 0xc61   : > { %vm2340_vm3 = vcmp.ge.f32.partialorder %v5404_v5, %v2332_v62  ;;  %v2305_v5 = vsel %vm2297_vm5, 1e+30, %v5504_v16  ;;  %v2361_v16 = vmul.f32 1.442695, %v2350_v54 }
 0xc62   : > { %v5541_v35 = vsel %vm2340_vm3, %v4514_v14, 0.0  ;;  %v2325_v3 = vsel %vm908_vm12, %v2305_v5, inf  ;;  %v2349_v5 = vsub.f32 %v5430_v2, %v2131_v34 }
 0xc63   : > { %v2382_v38 = vsel %vm908_vm12, %v5541_v35, 0.0  ;;  %4515 = vpow2.f32 %v2361_v16 }
 0xc64   : > { %2383 = vadd.xlane.f32.xlu0 %v2382_v38 }
 0xc66   : > { %v2137_v51 = vpop.xlane.xlu2 %2136 }
 0xc67   : > { %v5568_v31 = vpop.xlane.xlu1 %2145  ;;  %v2351_v26 = vsub.f32 %v5444_v19, %v2137_v51 }
 0xc69   : > { %v4516_v28 = vpop.eup %4515  ;;  %v2363_v59 = vmul.f32 1.442695, %v2351_v26 }
 0xc6b   : > { %4517 = vpow2.f32 %v2363_v59 }
 0xc6c   : > { %2314 = vmin.xlane.f32.xlu0 %v2313_v50 }
 0xc6d   : > { %2536 = vrot.lane.b32.xlu1 %v4879_v6, %s4639_s25 }
 0xc6e   : > { %v5559_v52 = vpop.xlane.xlu2 %2142 }
 0xc71   : > { %v4518_v7 = vpop.eup %4517 }
 0xc74   : > { %2326 = vmin.xlane.f32.xlu0 %v2325_v3 }
 0xc7c   : > { %2323 = vmin.xlane.f32.xlu0 %v2322_v1 }
 0xc90   : > { %2636 = vrot.lane.b32.xlu0 %v4879_v6, %s4640_s26 }
 0xca6   : > { %v2318_v57 = vpop.xlane.xlu2 %2317 }
 0xca7   : > { %v2334_v48 = vmin.f32 %v2318_v57, %v2134_v15 }
 0xca9   : > { %vm2342_vm7 = vcmp.ge.f32.partialorder %v5438_v37, %v2334_v48 }
 0xcaa   : > { %v5562_v49 = vsel %vm2342_vm7, %v4516_v28, 0.0 }
 0xcab   : > { %v2388_v11 = vsel %vm908_vm12, %v5562_v49, 0.0 }
 0xcac   : > { %2389 = vadd.xlane.f32.xlu1 %v2388_v11 }
 0xcbf   : > { %v2381_v12 = vpop.xlane.xlu1 %2380 }
 0xcc0   : > { %4519 = vrcp.f32 %v2381_v12  ;;  %v2414_v15 = vand.u32 2147483648, %v2381_v12  ;;  %vm2408_vm10 = vweird.f32 %v2381_v12  ;;  %v2412_v54 = vand.u32 2147483647, %v2381_v12 }
 0xcc2   : > { %vm2413_vm14 = vcmp.eq.f32.partialorder %v2412_v54, 8.507059e+37 }
 0xcc5   : > { %2586 = vrot.lane.b32.xlu1 %v4891_v41, %s4639_s25 }
 0xcc6   : > { %v4520_v14 = vpop.eup %4519 }
 0xcc7   : > { %v2321_v37 = vpop.xlane.xlu1 %2320  ;;  %v2404_v46 = vmul.f32 %v4520_v14, %v2381_v12  ;;  %vm2409_vm9 = vweird.f32 %v4520_v14 }
 0xcc8   : > { %v2335_v21 = vmin.f32 %v2321_v37, %v2137_v51  ;;  %v2353_v51 = vsub.f32 %v5442_v32, %v5559_v52  ;;  %vm5585_vm13 = vmor %vm2408_vm10, %vm2409_vm9  ;;  %v2415_v37 = vor.u32 1.1754944e-38, %v2414_v15 }
 0xcc9   : > { %v2405_v50 = vsub.f32 1.0, %v2404_v46 }
 0xcca   : > { %vm2343_vm8 = vcmp.ge.f32.partialorder %v5444_v19, %v2335_v21  ;;  %v2359_v19 = vmul.f32 1.442695, %v2349_v5  ;;  %v2367_v59 = vmul.f32 1.442695, %v2353_v51  ;;  %v2330_v51 = vpop.xlane.xlu2 %2329 }
 0xccb   : > { %v5574_v62 = vsel %vm2343_vm8, %v4518_v7, 0.0  ;;  %v2406_v3 = vmul.f32 %v4520_v14, %v2405_v50 }
 0xccc   : > { %v2391_v38 = vsel %vm908_vm12, %v5574_v62, 0.0 }
 0xccd   : > { %2392 = vadd.xlane.f32.xlu0 %v2391_v38  ;;  %2684 = vrot.lane.b32.xlu1 %v4891_v41, %s4640_s26  ;;  %v2407_v1 = vadd.f32 %v4520_v14, %v2406_v3  ;;  %v2354_v38 = vsub.f32 %v5451_v40, %v5568_v31 }
 0xccf   : > { %v2411_v48 = vsel %vm5585_vm13, %v4520_v14, %v2407_v1 }
 0xcd5   : > { %2611 = vrot.lane.b32.xlu1 %v4899_v8, %s4639_s25 }
 0xcd7   : > { %v2384_v0 = vpop.xlane.xlu0 %2383 }
 0xcd8   : > { %4521 = vrcp.f32 %v2384_v0  ;;  %v2429_v46 = vand.u32 2147483648, %v2384_v0  ;;  %v2427_v50 = vand.u32 2147483647, %v2384_v0  ;;  %vm2423_vm2 = vweird.f32 %v2384_v0 }
 0xcd9   : > { %4523 = vpow2.f32 %v2359_v19  ;;  %v2369_v19 = vmul.f32 1.442695, %v2354_v38 }
 0xcda   : > { %4525 = vpow2.f32 %v2367_v59  ;;  %v2430_v1 = vor.u32 1.1754944e-38, %v2429_v46  ;;  %vm2428_vm4 = vcmp.eq.f32.partialorder %v2427_v50, 8.507059e+37 }
 0xcdb   : > { %4527 = vpow2.f32 %v2369_v19 }
 0xcdd   : > { %2706 = vrot.lane.b32.xlu1 %v4901_v63, %s4641_s27  ;;  %v2416_v63 = vsel %vm2413_vm14, %v2415_v37, %v2411_v48 }
 0xcde   : > { %v4522_v16 = vpop.eup %4521  ;;  %v2417_v3 = vmul.f32 %v2416_v63, %v5533_v45 }
 0xcdf   : > { %v2419_v28 = vmul.f32 %v4522_v16, %v2384_v0  ;;  %v2537_v11 = vpop.permute.xlu1 %2536  ;;  %v2315_v26 = vpop.xlane.xlu0 %2314  ;;  %vm2424_vm1 = vweird.f32 %v4522_v16  ;;  %v2352_v0 = vsub.f32 %v5453_v23, %v5566_v25 }
 0xce0   : > { %v2333_v21 = vmin.f32 %v2315_v26, %v2131_v34  ;;  %2549 = vmatpush.bf16.msra.mxu0 %v2537_v11  ;;  %v4524_v7 = vpop.eup %4523  ;;  %vm2425_vm3 = vmor %vm2423_vm2, %vm2424_vm1  ;;  %v2523_v48 = vpack.c.bf16 %v2417_v3, %v2417_v3  ;;  %v2338_v11 = vmin.f32 %v2330_v51, %v5568_v31 }
 0xce1   : > { %v2420_v12 = vsub.f32 1.0, %v2419_v28  ;;  %2634 = vrot.lane.b32.xlu0 %v4881_v9, %s4641_s27  ;;  %v4526_v45 = vpop.eup %4525  ;;  %v2365_v37 = vmul.f32 1.442695, %v2352_v0 }
 0xce2   : > { %vm2341_vm15 = vcmp.ge.f32.partialorder %v5430_v2, %v2333_v21  ;;  %v2533_v59 = vunpack.c.l.b16 %v2523_v48  ;;  %vm2346_vm6 = vcmp.ge.f32.partialorder %v5451_v40, %v2338_v11 }
 0xce3   : > { %v2421_v14 = vmul.f32 %v4522_v16, %v2420_v12  ;;  %v5598_v5 = vsel %vm2341_vm15, %v4524_v7, 0.0  ;;  %v4528_v7 = vpop.eup %4527  ;;  %4529 = vpow2.f32 %v2365_v37 }
 0xce4   : > { %v2385_v34 = vsel %vm908_vm12, %v5598_v5, 0.0 }
 0xce5   : > { %v2422_v9 = vadd.f32 %v4522_v16, %v2421_v14  ;;  %2386 = vadd.xlane.f32.xlu2 %v2385_v34 }
 0xce7   : > { %v2426_v15 = vsel %vm2425_vm3, %v4522_v16, %v2422_v9  ;;  %v2327_v2 = vpop.xlane.xlu0 %2326 }
 0xce8   : > { %v2431_v54 = vsel %vm2428_vm4, %v2430_v1, %v2426_v15  ;;  %v2337_v57 = vmin.f32 %v2327_v2, %v5559_v52 }
 0xce9   : > { %v2432_v28 = vmul.f32 %v2431_v54, %v5541_v35  ;;  %2660 = vrot.lane.b32.xlu0 %v4885_v22, %s4640_s26  ;;  %v4530_v40 = vpop.eup %4529 }
 0xcea   : > { %vm2345_vm5 = vcmp.ge.f32.partialorder %v5442_v32, %v2337_v57  ;;  %v5619_v32 = vsel %vm2346_vm6, %v4528_v7, 0.0 }
 0xceb   : > { %v2524_v16 = vpack.c.bf16 %v2432_v28, %v2432_v28  ;;  %v5611_v26 = vsel %vm2345_vm5, %v4526_v45, 0.0  ;;  %v2400_v38 = vsel %vm908_vm12, %v5619_v32, 0.0 }
 0xcec   : > { %v2397_v52 = vsel %vm908_vm12, %v5611_v26, 0.0 }
 0xced   : > { %v2534_v35 = vunpack.c.l.b16 %v2524_v16  ;;  %2398 = vadd.xlane.f32.xlu2 %v2397_v52 }
 0xcef   : > { %v2324_v21 = vpop.xlane.xlu0 %2323  ;;  %v2535_v12 = vpack.c.b16 %v2534_v35, %v2533_v59 }
 0xcf0   : > { %v2336_v31 = vmin.f32 %v2324_v21, %v5566_v25 }
 0xcf1   : > { %4251 = vmatmul.msk.bf16.vlgmr.msra.gmra.mxu0 %vm908_vm12, %v2535_v12  ;;  %2658 = vrot.lane.b32.xlu0 %v4887_v24, %s4641_s27 }
 0xcf2   : > { %vm2344_vm7 = vcmp.ge.f32.partialorder %v5453_v23, %v2336_v31 }
 0xcf3   : > { %v5627_v63 = vsel %vm2344_vm7, %v4530_v40, 0.0 }
 0xcf4   : > { %v2394_v24 = vsel %vm908_vm12, %v5627_v63, 0.0 }
 0xcf5   : > { %2401 = vadd.xlane.f32.xlu2 %v2400_v38 }
 0xcf9   : > { %2708 = vrot.lane.b32.xlu0 %v4899_v8, %s4640_s26 }
 0xcfd   : > { %2395 = vadd.xlane.f32.xlu2 %v2394_v24 }
 0xd02   : > { %v2637_v46 = vpop.permute.xlu0 %2636 }
 0xd03   : > { %v2642_v14 = vsel %vm791_vm11, %v2637_v46, 0 }
 0xd04   : > { %2651 = vmatpush.bf16.xpose.msrb.mxu0 %v2642_v14 }
 0xd15   : > { %2561 = vrot.lane.b32.xlu2 %v4885_v22, %s4639_s25 }
 0xd1d   : > { %2682 = vrot.lane.b32.xlu2 %v4893_v42, %s4641_s27 }
 0xd1f   : > { %v2390_v23 = vpop.xlane.xlu1 %2389 }
 0xd20   : > { %4531 = vrcp.f32 %v2390_v23  ;;  %v2459_v52 = vand.u32 2147483648, %v2390_v23  ;;  %vm2453_vm10 = vweird.f32 %v2390_v23  ;;  %v2457_v35 = vand.u32 2147483647, %v2390_v23 }
 0xd22   : > { %v2460_v24 = vor.u32 1.1754944e-38, %v2459_v52  ;;  %vm2458_vm1 = vcmp.eq.f32.partialorder %v2457_v35, 8.507059e+37 }
 0xd26   : > { %v4532_v1 = vpop.eup %4531 }
 0xd27   : > { %v2449_v51 = vmul.f32 %v4532_v1, %v2390_v23  ;;  %vm2454_vm8 = vweird.f32 %v4532_v1 }
 0xd28   : > { %vm5649_vm13 = vmor %vm2453_vm10, %vm2454_vm8 }
 0xd29   : > { %v2450_v42 = vsub.f32 1.0, %v2449_v51 }
 0xd2b   : > { %v2451_v57 = vmul.f32 %v4532_v1, %v2450_v42 }
 0xd2d   : > { %v2452_v11 = vadd.f32 %v4532_v1, %v2451_v57 }
 0xd2f   : > { %v2456_v40 = vsel %vm5649_vm13, %v4532_v1, %v2452_v11 }
 0xd37   : > { %v2587_v25 = vpop.permute.xlu1 %2586 }
 0xd38   : > { %2599 = vmatpush.bf16.msrb.mxu2 %v2587_v25 }
 0xd3f   : > { %v2685_v50 = vpop.permute.xlu1 %2684 }
 0xd40   : > { %v2690_v34 = vsel %vm791_vm11, %v2685_v50, 0  ;;  %v5637_v9 = vpop.xlane.xlu0 %2392 }
 0xd41   : > { %2699 = vmatpush.bf16.xpose.msra.mxu2 %v2690_v34  ;;  %v2461_v34 = vsel %vm2458_vm1, %v2460_v24, %v2456_v40  ;;  %vm2468_vm8 = vweird.f32 %v5637_v9  ;;  %v2472_v24 = vand.u32 2147483647, %v5637_v9 }
 0xd42   : > { %v2462_v1 = vmul.f32 %v2461_v34, %v5562_v49 }
 0xd44   : > { %v2526_v49 = vpack.c.bf16 %v2462_v1, %v2462_v1 }
 0xd47   : > { %v2612_v3 = vpop.permute.xlu1 %2611 }
 0xd48   : > { %2624 = vmatpush.bf16.msrb.mxu3 %v2612_v3 }
 0xd53   : > { %v2635_v19 = vpop.permute.xlu0 %2634 }
 0xd54   : > { %4257 = vmatmul.msk.bf16.vlgmr.msrb.gmra.mxu0 %vm791_vm11, %v2635_v19 }
 0xd58   : > { %v2387_v15 = vpop.xlane.xlu2 %2386 }
 0xd59   : > { %4533 = vrcp.f32 %v2387_v15  ;;  %v2444_v21 = vand.u32 2147483648, %v2387_v15  ;;  %vm2438_vm14 = vweird.f32 %v2387_v15  ;;  %v2442_v31 = vand.u32 2147483647, %v2387_v15 }
 0xd5a   : > { %4535 = vrcp.f32 %v5637_v9 }
 0xd5b   : > { %v5640_v2 = vpop.permute.xlu0 %2660  ;;  %v2445_v50 = vor.u32 1.1754944e-38, %v2444_v21  ;;  %vm2443_vm2 = vcmp.eq.f32.partialorder %v2442_v31, 8.507059e+37 }
 0xd5f   : > { %v4534_v54 = vpop.eup %4533 }
 0xd60   : > { %v2434_v48 = vmul.f32 %v4534_v54, %v2387_v15  ;;  %v2399_v28 = vpop.xlane.xlu2 %2398  ;;  %v5643_v45 = vpop.eup %4535  ;;  %vm2439_vm9 = vweird.f32 %v4534_v54 }
 0xd61   : > { %4537 = vrcp.f32 %v2399_v28  ;;  %v2464_v37 = vmul.f32 %v5643_v45, %v5637_v9  ;;  %vm2440_vm15 = vmor %vm2438_vm14, %vm2439_vm9  ;;  %vm2498_vm4 = vweird.f32 %v2399_v28  ;;  %v2502_v11 = vand.u32 2147483647, %v2399_v28 }
 0xd62   : > { %v2435_v0 = vsub.f32 1.0, %v2434_v48  ;;  %vm2469_vm6 = vweird.f32 %v5643_v45 }
 0xd63   : > { %v5645_v16 = vpop.permute.xlu0 %2658  ;;  %v2465_v25 = vsub.f32 1.0, %v2464_v37  ;;  %vm2503_vm7 = vcmp.eq.f32.partialorder %v2502_v11, 8.507059e+37  ;;  %vm5663_vm9 = vmor %vm2468_vm8, %vm2469_vm6 }
 0xd64   : > { %v2436_v59 = vmul.f32 %v4534_v54, %v2435_v0 }
 0xd65   : > { %v2466_v57 = vmul.f32 %v5643_v45, %v2465_v25 }
 0xd66   : > { %v2437_v7 = vadd.f32 %v4534_v54, %v2436_v59 }
 0xd67   : > { %v4538_v38 = vpop.eup %4537  ;;  %v2467_v21 = vadd.f32 %v5643_v45, %v2466_v57 }
 0xd68   : > { %v2441_v46 = vsel %vm2440_vm15, %v4534_v54, %v2437_v7  ;;  %v2494_v14 = vmul.f32 %v4538_v38, %v2399_v28  ;;  %v2402_v23 = vpop.xlane.xlu2 %2401  ;;  %vm2499_vm3 = vweird.f32 %v4538_v38  ;;  %v2504_v54 = vand.u32 2147483648, %v2399_v28 }
 0xd69   : > { %4539 = vrcp.f32 %v2402_v23  ;;  %v2446_v19 = vsel %vm2443_vm2, %v2445_v50, %v2441_v46  ;;  %vm2500_vm5 = vmor %vm2498_vm4, %vm2499_vm3  ;;  %v2519_v40 = vand.u32 2147483648, %v2402_v23  ;;  %v2471_v25 = vsel %vm5663_vm9, %v5643_v45, %v2467_v21 }
 0xd6a   : > { %v2495_v3 = vsub.f32 1.0, %v2494_v14  ;;  %v2447_v48 = vmul.f32 %v2446_v19, %v5598_v5  ;;  %v2505_v12 = vor.u32 1.1754944e-38, %v2504_v54  ;;  %v2474_v5 = vand.u32 2147483648, %v5637_v9 }
 0xd6b   : > { %v2709_v51 = vpop.permute.xlu0 %2708  ;;  %v2517_v14 = vand.u32 2147483647, %v2402_v23  ;;  %vm2513_vm13 = vweird.f32 %v2402_v23  ;;  %vm2473_vm15 = vcmp.eq.f32.partialorder %v2472_v24, 8.507059e+37 }
 0xd6c   : > { %v2496_v42 = vmul.f32 %v4538_v38, %v2495_v3  ;;  %v2714_v15 = vsel %vm791_vm11, %v2709_v51, 0  ;;  %v2525_v7 = vpack.c.bf16 %v2447_v48, %v2447_v48  ;;  %v2559_v51 = vunpack.c.l.b16 %v2526_v49 }
 0xd6d   : > { %2723 = vmatpush.bf16.xpose.msra.mxu3 %v2714_v15  ;;  %v2520_v15 = vor.u32 1.1754944e-38, %v2519_v40  ;;  %vm2518_vm1 = vcmp.eq.f32.partialorder %v2517_v14, 8.507059e+37  ;;  %v2666_v48 = vsel %vm791_vm11, %v5640_v2, 0 }
 0xd6e   : > { %v2497_v0 = vadd.f32 %v4538_v38, %v2496_v42  ;;  %v2558_v50 = vunpack.c.l.b16 %v2525_v7  ;;  %v2475_v42 = vor.u32 1.1754944e-38, %v2474_v5 }
 0xd6f   : > { %v4540_v52 = vpop.eup %4539 }
 0xd70   : > { %v2501_v59 = vsel %vm2500_vm5, %v4538_v38, %v2497_v0  ;;  %v2509_v35 = vmul.f32 %v4540_v52, %v2402_v23  ;;  %v2396_v37 = vpop.xlane.xlu2 %2395  ;;  %vm2514_vm10 = vweird.f32 %v4540_v52  ;;  %v2476_v54 = vsel %vm2473_vm15, %v2475_v42, %v2471_v25 }
 0xd71   : > { %4541 = vrcp.f32 %v2396_v37  ;;  %v2506_v28 = vsel %vm2503_vm7, %v2505_v12, %v2501_v59  ;;  %vm2515_vm14 = vmor %vm2513_vm13, %vm2514_vm10  ;;  %v2560_v11 = vpack.c.b16 %v2559_v51, %v2558_v50  ;;  %v2489_v59 = vand.u32 2147483648, %v2396_v37  ;;  %v5684_v50 = vpop.f32.mrf.mxu0  ;;  %v4256_v51 = vld [vmem:[%s6306_s5 + $0x38] sm:$0xff] }
 0xd72   : > { %v2510_v31 = vsub.f32 1.0, %v2509_v35  ;;  %v2507_v34 = vmul.f32 %v2506_v28, %v5611_v26  ;;  %v2477_v12 = vmul.f32 %v2476_v54, %v5574_v62  ;;  %vm2483_vm3 = vweird.f32 %v2396_v37  ;;  %v2707_v62 = vpop.permute.xlu1 %2706 }
 0xd74   : > { %v2511_v46 = vmul.f32 %v4540_v52, %v2510_v31  ;;  %v2529_v0 = vpack.c.bf16 %v2507_v34, %v2507_v34  ;;  %v2490_v31 = vor.u32 1.1754944e-38, %v2489_v59  ;;  %v2527_v40 = vpack.c.bf16 %v2477_v12, %v2477_v12  ;;  %v4255_v34 = vld [vmem:[%s6306_s5 + $0x30] sm:$0xff] }
 0xd76   : > { %v2512_v3 = vadd.f32 %v4540_v52, %v2511_v46  ;;  %v2608_v49 = vunpack.c.l.b16 %v2529_v0  ;;  %v2583_v46 = vunpack.c.l.b16 %v2527_v40 }
 0xd77   : > { %v4542_v19 = vpop.eup %4541 }
 0xd78   : > { %v2516_v1 = vsel %vm2515_vm14, %v4540_v52, %v2512_v3  ;;  %v2479_v9 = vmul.f32 %v4542_v19, %v2396_v37  ;;  %v2562_v57 = vpop.permute.xlu2 %2561  ;;  %vm2484_vm2 = vweird.f32 %v4542_v19  ;;  %v2487_v52 = vand.u32 2147483647, %v2396_v37 }
 0xd79   : > { %v2521_v45 = vsel %vm2518_vm1, %v2520_v15, %v2516_v1  ;;  %2574 = vmatpush.bf16.msrb.mxu1 %v2562_v57  ;;  %vm2485_vm4 = vmor %vm2483_vm3, %vm2484_vm2 }
 0xd7a   : > { %v2522_v26 = vmul.f32 %v2521_v45, %v5619_v32  ;;  %v2480_v23 = vsub.f32 1.0, %v2479_v9  ;;  %vm2488_vm5 = vcmp.eq.f32.partialorder %v2487_v52, 8.507059e+37 }
 0xd7c   : > { %v2530_v35 = vpack.c.bf16 %v2522_v26, %v2522_v26  ;;  %v2481_v21 = vmul.f32 %v4542_v19, %v2480_v23  ;;  %4252 = vmatmul.msk.bf16.vlgmr.msrb.gmra.mxu1 %vm908_vm12, %v2560_v11 }
 0xd7d   : > { %2675 = vmatpush.bf16.xpose.msra.mxu1 %v2666_v48 }
 0xd7e   : > { %v2609_v7 = vunpack.c.l.b16 %v2530_v35  ;;  %v2482_v2 = vadd.f32 %v4542_v19, %v2481_v21 }
 0xd80   : > { %v2486_v5 = vsel %vm2485_vm4, %v4542_v19, %v2482_v2  ;;  %v2610_v32 = vpack.c.b16 %v2609_v7, %v2608_v49  ;;  %v2683_v37 = vpop.permute.xlu2 %2682 }
 0xd81   : > { %v2491_v28 = vsel %vm2488_vm5, %v2490_v31, %v2486_v5 }
 0xd82   : > { %v2492_v38 = vmul.f32 %v2491_v28, %v5627_v63  ;;  %4254 = vmatmul.msk.bf16.vlgmr.msrb.gmra.mxu3 %vm908_vm12, %v2610_v32  ;;  %v5686_v63 = vpop.f32.mrf.mxu0 }
 0xd84   : > { %v2528_v24 = vpack.c.bf16 %v2492_v38, %v2492_v38 }
 0xd86   : > { %v2584_v14 = vunpack.c.l.b16 %v2528_v24 }
 0xd88   : > { %v2585_v25 = vpack.c.b16 %v2584_v14, %v2583_v46 }
 0xd8a   : > { %4253 = vmatmul.msk.bf16.vlgmr.msrb.gmra.mxu2 %vm908_vm12, %v2585_v25 }
 0xd8c   : > { %4258 = vmatmul.msk.bf16.vlgmr.msra.gmra.mxu1 %vm791_vm11, %v5645_v16 }
 0xd92   : > { %4260 = vmatmul.msk.bf16.vlgmr.msra.gmra.mxu3 %vm791_vm11, %v2707_v62 }
 0xd9a   : > { %4259 = vmatmul.msk.bf16.vlgmr.msra.gmra.mxu2 %vm791_vm11, %v2683_v37 }
 0xdd1   : > { %v2653_v3 = vpop.f32.mrf.mxu0 }
 0xdd2   : > { %v5691_v19 = vadd.f32 %v4255_v34, %v2653_v3 }
 0xdd4   : > { %v2754_v16 = vsel %vm908_vm12, %v5691_v19, inf }
 0xdd5   : > { %2755 = vmin.xlane.f32.xlu2 %v2754_v16 }
 0xdd9   : > { %v2655_v42 = vpop.f32.mrf.mxu0 }
 0xdda   : > { %v5698_v15 = vadd.f32 %v4256_v51, %v2655_v42 }
 0xddc   : > { %v2757_v1 = vsel %vm908_vm12, %v5698_v15, inf }
 0xddd   : > { %2758 = vmin.xlane.f32.xlu0 %v2757_v1 }
 0xdf9   : > { %v5702_v9 = vpop.f32.mrf.mxu1 }
 0xe01   : > { %v5704_v57 = vpop.f32.mrf.mxu1 }
 0xe02   : > { %v4381_v54 = vpack.i.bf16 %v5704_v57, %v5702_v9  ;;  %v4326_v9 = vld [vmem:[%s6307_s6 + $0x8] sm:$0xff] }
 0xe05   : > { %v5708_v48 = vpop.f32.mrf.mxu3 }
 0xe09   : > { %v2677_v45 = vpop.f32.mrf.mxu1 }
 0xe0a   : > { %v5710_v0 = vadd.f32 %v4255_v34, %v2677_v45 }
 0xe0c   : > { %v2760_v26 = vsel %vm908_vm12, %v5710_v0, inf }
 0xe0d   : > { %v5714_v23 = vpop.f32.mrf.mxu2  ;;  %v5716_v11 = vpop.f32.mrf.mxu3  ;;  %2761 = vmin.xlane.f32.xlu1 %v2760_v26 }
 0xe0e   : > { %v4411_v59 = vpack.i.bf16 %v5716_v11, %v5708_v48 }
 0xe11   : > { %v2679_v35 = vpop.f32.mrf.mxu1 }
 0xe12   : > { %v5720_v21 = vadd.f32 %v4256_v51, %v2679_v35 }
 0xe14   : > { %v2763_v52 = vsel %vm908_vm12, %v5720_v21, inf }
 0xe15   : > { %v5724_v12 = vpop.f32.mrf.mxu2  ;;  %v2725_v49 = vpop.f32.mrf.mxu3  ;;  %2764 = vmin.xlane.f32.xlu2 %v2763_v52 }
 0xe16   : > { %v4396_v7 = vpack.i.bf16 %v5724_v12, %v5714_v23  ;;  %v5728_v2 = vadd.f32 %v4255_v34, %v2725_v49 }
 0xe18   : > { %v2772_v31 = vsel %vm908_vm12, %v5728_v2, inf }
 0xe1d   : > { %2773 = vmin.xlane.f32.xlu2 %v2772_v31  ;;  %v2701_v5 = vpop.f32.mrf.mxu2  ;;  %v2727_v40 = vpop.f32.mrf.mxu3 }
 0xe1e   : > { %v5732_v32 = vadd.f32 %v4255_v34, %v2701_v5  ;;  %v5736_v38 = vadd.f32 %v4256_v51, %v2727_v40 }
 0xe20   : > { %v2766_v28 = vsel %vm908_vm12, %v5732_v32, inf  ;;  %v2775_v25 = vsel %vm908_vm12, %v5736_v38, inf }
 0xe21   : > { %2767 = vmin.xlane.f32.xlu0 %v2766_v28 }
 0xe25   : > { %v2703_v24 = vpop.f32.mrf.mxu2 }
 0xe26   : > { %v5738_v46 = vadd.f32 %v4256_v51, %v2703_v24 }
 0xe28   : > { %v2769_v14 = vsel %vm908_vm12, %v5738_v46, inf }
 0xe29   : > { %2770 = vmin.xlane.f32.xlu1 %v2769_v14  ;;  %2776 = vmin.xlane.f32.xlu0 %v2775_v25 }
 0xe48   : > { %v2756_v62 = vpop.xlane.xlu2 %2755 }
 0xe49   : > { %vm2778_vm6 = vcmp.le.f32.partialorder %v5691_v19, %v2756_v62 }
 0xe4a   : > { %v2786_v37 = vsel %vm2778_vm6, 1e+30, %v5691_v19 }
 0xe4b   : > { %v2794_v34 = vsel %vm908_vm12, %v2786_v37, inf }
 0xe4c   : > { %2795 = vmin.xlane.f32.xlu1 %v2794_v34 }
 0xe50   : > { %v2759_v3 = vpop.xlane.xlu0 %2758 }
 0xe51   : > { %vm2779_vm7 = vcmp.le.f32.partialorder %v5698_v15, %v2759_v3 }
 0xe52   : > { %v2787_v16 = vsel %vm2779_vm7, 1e+30, %v5698_v15 }
 0xe53   : > { %v2797_v51 = vsel %vm908_vm12, %v2787_v16, inf }
 0xe54   : > { %2798 = vmin.xlane.f32.xlu2 %v2797_v51 }
 0xe80   : > { %v2762_v42 = vpop.xlane.xlu1 %2761 }
 0xe81   : > { %vm2780_vm8 = vcmp.le.f32.partialorder %v5710_v0, %v2762_v42 }
 0xe82   : > { %v2788_v1 = vsel %vm2780_vm8, 1e+30, %v5710_v0 }
 0xe83   : > { %v2800_v45 = vsel %vm908_vm12, %v2788_v1, inf }
 0xe84   : > { %2801 = vmin.xlane.f32.xlu0 %v2800_v45 }
 0xe88   : > { %v2765_v26 = vpop.xlane.xlu2 %2764 }
 0xe89   : > { %vm2781_vm9 = vcmp.le.f32.partialorder %v5720_v21, %v2765_v26 }
 0xe8a   : > { %v2789_v35 = vsel %vm2781_vm9, 1e+30, %v5720_v21 }
 0xe8b   : > { %v2803_v52 = vsel %vm908_vm12, %v2789_v35, inf }
 0xe8c   : > { %2804 = vmin.xlane.f32.xlu1 %v2803_v52 }
 0xe90   : > { %v2774_v49 = vpop.xlane.xlu2 %2773 }
 0xe91   : > { %vm2784_vm10 = vcmp.le.f32.partialorder %v5728_v2, %v2774_v49 }
 0xe92   : > { %v2792_v31 = vsel %vm2784_vm10, 1e+30, %v5728_v2 }
 0xe93   : > { %v2812_v5 = vsel %vm908_vm12, %v2792_v31, inf }
 0xe94   : > { %v2768_v28 = vpop.xlane.xlu0 %2767  ;;  %2813 = vmin.xlane.f32.xlu1 %v2812_v5 }
 0xe95   : > { %vm2782_vm13 = vcmp.le.f32.partialorder %v5732_v32, %v2768_v28 }
 0xe96   : > { %v2790_v40 = vsel %vm2782_vm13, 1e+30, %v5732_v32 }
 0xe97   : > { %v2806_v24 = vsel %vm908_vm12, %v2790_v40, inf }
 0xe98   : > { %2807 = vmin.xlane.f32.xlu2 %v2806_v24 }
 0xe9c   : > { %v2771_v14 = vpop.xlane.xlu1 %2770  ;;  %v2777_v25 = vpop.xlane.xlu0 %2776 }
 0xe9d   : > { %vm2783_vm14 = vcmp.le.f32.partialorder %v5738_v46, %v2771_v14  ;;  %vm2785_vm15 = vcmp.le.f32.partialorder %v5736_v38, %v2777_v25 }
 0xe9e   : > { %v2791_v62 = vsel %vm2783_vm14, 1e+30, %v5738_v46  ;;  %v2793_v34 = vsel %vm2785_vm15, 1e+30, %v5736_v38 }
 0xe9f   : > { %v2809_v3 = vsel %vm908_vm12, %v2791_v62, inf  ;;  %v2815_v51 = vsel %vm908_vm12, %v2793_v34, inf }
 0xea0   : > { %2810 = vmin.xlane.f32.xlu0 %v2809_v3  ;;  %2816 = vmin.xlane.f32.xlu2 %v2815_v51 }
 0xebf   : > { %v2796_v42 = vpop.xlane.xlu1 %2795 }
 0xec0   : > { %vm2818_vm1 = vcmp.le.f32.partialorder %v2786_v37, %v2796_v42 }
 0xec1   : > { %v2826_v45 = vsel %vm2818_vm1, 1e+30, %v2786_v37 }
 0xec2   : > { %v2834_v26 = vsel %vm908_vm12, %v2826_v45, inf }
 0xec3   : > { %2835 = vmin.xlane.f32.xlu0 %v2834_v26 }
 0xec7   : > { %v2799_v52 = vpop.xlane.xlu2 %2798 }
 0xec8   : > { %vm2819_vm2 = vcmp.le.f32.partialorder %v2787_v16, %v2799_v52 }
 0xec9   : > { %v2827_v49 = vsel %vm2819_vm2, 1e+30, %v2787_v16 }
 0xeca   : > { %v2837_v5 = vsel %vm908_vm12, %v2827_v49, inf }
 0xecb   : > { %2838 = vmin.xlane.f32.xlu1 %v2837_v5 }
 0xef7   : > { %v2802_v28 = vpop.xlane.xlu0 %2801 }
 0xef8   : > { %vm2820_vm3 = vcmp.le.f32.partialorder %v2788_v1, %v2802_v28 }
 0xef9   : > { %v2828_v24 = vsel %vm2820_vm3, 1e+30, %v2788_v1 }
 0xefa   : > { %v2840_v14 = vsel %vm908_vm12, %v2828_v24, inf }
 0xefb   : > { %2841 = vmin.xlane.f32.xlu2 %v2840_v14 }
 0xeff   : > { %v2805_v25 = vpop.xlane.xlu1 %2804 }
 0xf00   : > { %vm2821_vm4 = vcmp.le.f32.partialorder %v2789_v35, %v2805_v25 }
 0xf01   : > { %v2829_v3 = vsel %vm2821_vm4, 1e+30, %v2789_v35 }
 0xf02   : > { %v2843_v37 = vsel %vm908_vm12, %v2829_v3, inf }
 0xf03   : > { %2844 = vmin.xlane.f32.xlu0 %v2843_v37 }
 0xf07   : > { %v2814_v51 = vpop.xlane.xlu1 %2813 }
 0xf08   : > { %vm2824_vm5 = vcmp.le.f32.partialorder %v2792_v31, %v2814_v51 }
 0xf09   : > { %v2832_v42 = vsel %vm2824_vm5, 1e+30, %v2792_v31 }
 0xf0a   : > { %v2852_v16 = vsel %vm908_vm12, %v2832_v42, inf }
 0xf0b   : > { %2853 = vmin.xlane.f32.xlu0 %v2852_v16  ;;  %v2808_v26 = vpop.xlane.xlu2 %2807 }
 0xf0c   : > { %vm2822_vm6 = vcmp.le.f32.partialorder %v2790_v40, %v2808_v26 }
 0xf0d   : > { %v2830_v52 = vsel %vm2822_vm6, 1e+30, %v2790_v40 }
 0xf0e   : > { %v2846_v1 = vsel %vm908_vm12, %v2830_v52, inf }
 0xf0f   : > { %2847 = vmin.xlane.f32.xlu1 %v2846_v1 }
 0xf13   : > { %v2811_v5 = vpop.xlane.xlu0 %2810  ;;  %v2817_v28 = vpop.xlane.xlu2 %2816 }
 0xf14   : > { %vm2823_vm7 = vcmp.le.f32.partialorder %v2791_v62, %v2811_v5  ;;  %vm2825_vm8 = vcmp.le.f32.partialorder %v2793_v34, %v2817_v28 }
 0xf15   : > { %v5774_v35 = vsel %vm2823_vm7, 1e+30, %v2791_v62  ;;  %v2833_v14 = vsel %vm2825_vm8, 1e+30, %v2793_v34  ;;  %v2733_v34 = vsel %vm908_vm12, %v5698_v15, -inf }
 0xf16   : > { %v2849_v25 = vsel %vm908_vm12, %v5774_v35, inf  ;;  %v2855_v31 = vsel %vm908_vm12, %v2833_v14, inf }
 0xf17   : > { %2850 = vmin.xlane.f32.xlu2 %v2849_v25  ;;  %2856 = vmin.xlane.f32.xlu1 %v2855_v31 }
 0xf36   : > { %v2836_v37 = vpop.xlane.xlu0 %2835 }
 0xf37   : > { %vm2858_vm9 = vcmp.le.f32.partialorder %v2826_v45, %v2836_v37 }
 0xf38   : > { %v2866_v40 = vsel %vm2858_vm9, 1e+30, %v2826_v45 }
 0xf39   : > { %v2874_v51 = vsel %vm908_vm12, %v2866_v40, inf }
 0xf3a   : > { %2875 = vmin.xlane.f32.xlu2 %v2874_v51  ;;  %v2730_v51 = vsel %vm908_vm12, %v5691_v19, -inf }
 0xf3e   : > { %v2839_v16 = vpop.xlane.xlu1 %2838 }
 0xf3f   : > { %vm2859_vm10 = vcmp.le.f32.partialorder %v2827_v49, %v2839_v16 }
 0xf40   : > { %v2867_v26 = vsel %vm2859_vm10, 1e+30, %v2827_v49 }
 0xf41   : > { %v2877_v62 = vsel %vm908_vm12, %v2867_v26, inf }
 0xf42   : > { %2878 = vmin.xlane.f32.xlu0 %v2877_v62 }
 0xf4a   : > { %2734 = vmax.xlane.f32.xlu0 %v2733_v34 }
 0xf6e   : > { %v2842_v1 = vpop.xlane.xlu2 %2841 }
 0xf6f   : > { %vm2860_vm13 = vcmp.le.f32.partialorder %v2828_v24, %v2842_v1 }
 0xf70   : > { %v2868_v5 = vsel %vm2860_vm13, 1e+30, %v2828_v24 }
 0xf71   : > { %v2880_v28 = vsel %vm908_vm12, %v2868_v5, inf }
 0xf72   : > { %2881 = vmin.xlane.f32.xlu1 %v2880_v28 }
 0xf76   : > { %v2845_v45 = vpop.xlane.xlu0 %2844 }
 0xf77   : > { %vm2861_vm14 = vcmp.le.f32.partialorder %v2829_v3, %v2845_v45  ;;  %v2751_v45 = vsel %vm908_vm12, %v5736_v38, -inf }
 0xf78   : > { %v2869_v25 = vsel %vm2861_vm14, 1e+30, %v2829_v3 }
 0xf79   : > { %v2883_v31 = vsel %vm908_vm12, %v2869_v25, inf }
 0xf7a   : > { %2884 = vmin.xlane.f32.xlu2 %v2883_v31 }
 0xf7e   : > { %v2854_v49 = vpop.xlane.xlu0 %2853 }
 0xf7f   : > { %vm2864_vm15 = vcmp.le.f32.partialorder %v2832_v42, %v2854_v49 }
 0xf80   : > { %v2872_v37 = vsel %vm2864_vm15, 1e+30, %v2832_v42  ;;  %v2736_v42 = vsel %vm908_vm12, %v5710_v0, -inf }
 0xf81   : > { %v2892_v16 = vsel %vm908_vm12, %v2872_v37, inf }
 0xf82   : > { %2731 = vmax.xlane.f32.xlu2 %v2730_v51  ;;  %v2848_v62 = vpop.xlane.xlu1 %2847  ;;  %2893 = vmin.xlane.f32.xlu1 %v2892_v16 }
 0xf83   : > { %vm2862_vm1 = vcmp.le.f32.partialorder %v2830_v52, %v2848_v62 }
 0xf84   : > { %v2870_v24 = vsel %vm2862_vm1, 1e+30, %v2830_v52 }
 0xf85   : > { %v2886_v34 = vsel %vm908_vm12, %v2870_v24, inf }
 0xf86   : > { %2887 = vmin.xlane.f32.xlu0 %v2886_v34  ;;  %v2739_v34 = vsel %vm908_vm12, %v5720_v21, -inf }
 0xf8a   : > { %v2857_v3 = vpop.xlane.xlu1 %2856  ;;  %v2851_v31 = vpop.xlane.xlu2 %2850 }
 0xf8b   : > { %vm2865_vm2 = vcmp.le.f32.partialorder %v2833_v14, %v2857_v3  ;;  %v2745_v3 = vsel %vm908_vm12, %v5738_v46, -inf  ;;  %vm2863_vm5 = vcmp.le.f32.partialorder %v5774_v35, %v2851_v31 }
 0xf8c   : > { %v2873_v1 = vsel %vm2865_vm2, 1e+30, %v2833_v14 }
 0xf8d   : > { %v2895_v28 = vsel %vm908_vm12, %v2873_v1, inf }
 0xf8e   : > { %2896 = vmin.xlane.f32.xlu2 %v2895_v28  ;;  %v2742_v28 = vsel %vm908_vm12, %v5732_v32, -inf }
 0xf96   : > { %2737 = vmax.xlane.f32.xlu2 %v2736_v42 }
 0xf9e   : > { %2752 = vmax.xlane.f32.xlu2 %v2751_v45 }
 0xfad   : > { %v2876_v49 = vpop.xlane.xlu2 %2875 }
 0xfae   : > { %vm2898_vm3 = vcmp.le.f32.partialorder %v2866_v40, %v2876_v49 }
 0xfaf   : > { %v2906_v52 = vsel %vm2898_vm3, 1e+30, %v2866_v40  ;;  %v2748_v40 = vsel %vm908_vm12, %v5728_v2, -inf }
 0xfb0   : > { %v2914_v51 = vsel %vm908_vm12, %v2906_v52, inf }
 0xfb1   : > { %2915 = vmin.xlane.f32.xlu0 %v2914_v51 }
 0xfb5   : > { %v2879_v16 = vpop.xlane.xlu0 %2878 }
 0xfb6   : > { %vm2899_vm4 = vcmp.le.f32.partialorder %v2867_v26, %v2879_v16 }
 0xfb7   : > { %v2907_v14 = vsel %vm2899_vm4, 1e+30, %v2867_v26  ;;  %v2871_v26 = vsel %vm2863_vm5, 1e+30, %v5774_v35 }
 0xfb8   : > { %v2917_v62 = vsel %vm908_vm12, %v2907_v14, inf  ;;  %v2889_v42 = vsel %vm908_vm12, %v2871_v26, inf }
 0xfb9   : > { %2918 = vmin.xlane.f32.xlu1 %v2917_v62  ;;  %2740 = vmax.xlane.f32.xlu0 %v2739_v34 }
 0xfbd   : > { %v2735_v62 = vpop.xlane.xlu0 %2734 }
 0xfc1   : > { %2746 = vmax.xlane.f32.xlu1 %v2745_v3  ;;  %2743 = vmax.xlane.f32.xlu0 %v2742_v28 }
 0xfc9   : > { %2749 = vmax.xlane.f32.xlu1 %v2748_v40 }
 0xfd1   : > { %2890 = vmin.xlane.f32.xlu1 %v2889_v42 }
 0xfe5   : > { %v2882_v45 = vpop.xlane.xlu1 %2881 }
 0xfe6   : > { %vm2900_vm6 = vcmp.le.f32.partialorder %v2868_v5, %v2882_v45 }
 0xfe7   : > { %v2908_v49 = vsel %vm2900_vm6, 1e+30, %v2868_v5 }
 0xfe8   : > { %v2920_v52 = vsel %vm908_vm12, %v2908_v49, inf }
 0xfe9   : > { %2921 = vmin.xlane.f32.xlu1 %v2920_v52 }
 0xfed   : > { %v2885_v51 = vpop.xlane.xlu2 %2884 }
 0xfee   : > { %vm2901_vm7 = vcmp.le.f32.partialorder %v2869_v25, %v2885_v51 }
 0xfef   : > { %v2909_v16 = vsel %vm2901_vm7, 1e+30, %v2869_v25 }
 0xff0   : > { %v2923_v14 = vsel %vm908_vm12, %v2909_v16, inf }
 0xff1   : > { %2924 = vmin.xlane.f32.xlu2 %v2923_v14 }
 0xff5   : > { %v2894_v34 = vpop.xlane.xlu1 %2893  ;;  %v2732_v3 = vpop.xlane.xlu2 %2731 }
 0xff6   : > { %vm2904_vm8 = vcmp.le.f32.partialorder %v2872_v37, %v2894_v34  ;;  %v2954_v49 = vsub.f32 %v5691_v19, %v2732_v3 }
 0xff7   : > { %v2912_v31 = vsel %vm2904_vm8, 1e+30, %v2872_v37  ;;  %v2955_v37 = vsub.f32 %v5698_v15, %v2735_v62 }
 0xff8   : > { %v2932_v35 = vsel %vm908_vm12, %v2912_v31, inf  ;;  %v2962_v52 = vmul.f32 1.442695, %v2954_v49 }
 0xff9   : > { %v2888_v28 = vpop.xlane.xlu0 %2887  ;;  %2933 = vmin.xlane.f32.xlu0 %v2932_v35  ;;  %v2964_v51 = vmul.f32 1.442695, %v2955_v37 }
 0xffa   : > { %vm2902_vm9 = vcmp.le.f32.partialorder %v2870_v24, %v2888_v28  ;;  %4543 = vpow2.f32 %v2962_v52 }
 0xffb   : > { %v2910_v5 = vsel %vm2902_vm9, 1e+30, %v2870_v24  ;;  %4545 = vpow2.f32 %v2964_v51 }
 0xffc   : > { %v2926_v40 = vsel %vm908_vm12, %v2910_v5, inf }
 0xffd   : > { %2927 = vmin.xlane.f32.xlu2 %v2926_v40 }
0x1000   : > { %v4544_v14 = vpop.eup %4543 }
0x1001   : > { %v2897_v42 = vpop.xlane.xlu2 %2896  ;;  %v4546_v28 = vpop.eup %4545 }
0x1002   : > { %vm2905_vm10 = vcmp.le.f32.partialorder %v2873_v1, %v2897_v42 }
0x1003   : > { %v2913_v25 = vsel %vm2905_vm10, 1e+30, %v2873_v1 }
0x1004   : > { %v2935_v45 = vsel %vm908_vm12, %v2913_v25, inf }
0x1005   : > { %2936 = vmin.xlane.f32.xlu1 %v2935_v45 }
0x1009   : > { %v2738_v45 = vpop.xlane.xlu2 %2737 }
0x1011   : > { %v2753_v37 = vpop.xlane.xlu2 %2752 }
0x101e   : > { %3168 = vrot.lane.b32.xlu1 %v4885_v22, %s4642_s20 }
0x1024   : > { %v2916_v24 = vpop.xlane.xlu0 %2915 }
0x1025   : > { %v2938_v16 = vmin.f32 %v2916_v24, %v2732_v3 }
0x1027   : > { %vm2946_vm13 = vcmp.ge.f32.partialorder %v5691_v19, %v2938_v16 }
0x1028   : > { %v5817_v1 = vsel %vm2946_vm13, %v4544_v14, 0.0 }
0x1029   : > { %v2986_v34 = vsel %vm908_vm12, %v5817_v1, 0.0 }
0x102a   : > { %2987 = vadd.xlane.f32.xlu2 %v2986_v34 }
0x102c   : > { %v2919_v31 = vpop.xlane.xlu1 %2918 }
0x102d   : > { %v2939_v35 = vmin.f32 %v2919_v31, %v2735_v62  ;;  %v2956_v62 = vsub.f32 %v5710_v0, %v2738_v45 }
0x102f   : > { %vm2947_vm14 = vcmp.ge.f32.partialorder %v5698_v15, %v2939_v35  ;;  %v2966_v49 = vmul.f32 1.442695, %v2956_v62  ;;  %v2741_v15 = vpop.xlane.xlu0 %2740 }
0x1030   : > { %v5822_v22 = vsel %vm2947_vm14, %v4546_v28, 0.0  ;;  %v2957_v52 = vsub.f32 %v5720_v21, %v2741_v15 }
0x1031   : > { %v2989_v3 = vsel %vm908_vm12, %v5822_v22, 0.0  ;;  %4547 = vpow2.f32 %v2966_v49 }
0x1032   : > { %2990 = vadd.xlane.f32.xlu0 %v2989_v3  ;;  %v2968_v51 = vmul.f32 1.442695, %v2957_v52 }
0x1034   : > { %v5826_v5 = vpop.xlane.xlu1 %2746  ;;  %4549 = vpow2.f32 %v2968_v51 }
0x1037   : > { %v4548_v14 = vpop.eup %4547  ;;  %v2744_v35 = vpop.xlane.xlu0 %2743 }
0x1038   : > { %v2958_v3 = vsub.f32 %v5732_v32, %v2744_v35 }
0x103c   : > { %v2750_v19 = vpop.xlane.xlu1 %2749 }
0x103d   : > { %v2960_v34 = vsub.f32 %v5728_v2, %v2750_v19 }
0x1044   : > { %v2891_v40 = vpop.xlane.xlu1 %2890 }
0x1045   : > { %vm2903_vm15 = vcmp.le.f32.partialorder %v2871_v26, %v2891_v40  ;;  %v2974_v40 = vmul.f32 1.442695, %v2960_v34 }
0x1046   : > { %v2911_v42 = vsel %vm2903_vm15, 1e+30, %v2871_v26 }
0x1047   : > { %v2929_v25 = vsel %vm908_vm12, %v2911_v42, inf  ;;  %v4550_v42 = vpop.eup %4549  ;;  %4551 = vpow2.f32 %v2974_v40 }
0x1048   : > { %2930 = vmin.xlane.f32.xlu0 %v2929_v25 }
0x104d   : > { %v4552_v52 = vpop.eup %4551 }
0x105c   : > { %v2922_v24 = vpop.xlane.xlu1 %2921  ;;  %3143 = vrot.lane.b32.xlu0 %v4879_v6, %s4642_s20 }
0x105d   : > { %v2940_v16 = vmin.f32 %v2922_v24, %v2738_v45 }
0x105f   : > { %vm2948_vm1 = vcmp.ge.f32.partialorder %v5710_v0, %v2940_v16  ;;  %v2970_v0 = vmul.f32 1.442695, %v2958_v3 }
0x1060   : > { %v5834_v26 = vsel %vm2948_vm1, %v4548_v14, 0.0  ;;  %v2961_v14 = vsub.f32 %v5736_v38, %v2753_v37 }
0x1061   : > { %v2992_v31 = vsel %vm908_vm12, %v5834_v26, 0.0  ;;  %4553 = vpow2.f32 %v2970_v0 }
0x1062   : > { %2993 = vadd.xlane.f32.xlu1 %v2992_v31 }
0x1064   : > { %v2925_v28 = vpop.xlane.xlu2 %2924 }
0x1065   : > { %v2941_v6 = vmin.f32 %v2925_v28, %v2741_v15 }
0x1067   : > { %vm2949_vm2 = vcmp.ge.f32.partialorder %v5720_v21, %v2941_v6  ;;  %v4554_v16 = vpop.eup %4553  ;;  %v4366_v6 = vpack.i.bf16 %v5686_v63, %v5684_v50 }
0x1068   : > { %v5841_v25 = vsel %vm2949_vm2, %v4550_v42, 0.0  ;;  %v2959_v42 = vsub.f32 %v5738_v46, %v5826_v5 }
0x1069   : > { %v2995_v45 = vsel %vm908_vm12, %v5841_v25, 0.0 }
0x106a   : > { %2996 = vadd.xlane.f32.xlu2 %v2995_v45 }
0x106c   : > { %v2934_v62 = vpop.xlane.xlu0 %2933 }
0x106d   : > { %v2944_v49 = vmin.f32 %v2934_v62, %v2750_v19  ;;  %v2972_v62 = vmul.f32 1.442695, %v2959_v42 }
0x106f   : > { %vm2952_vm3 = vcmp.ge.f32.partialorder %v5728_v2, %v2944_v49  ;;  %v2976_v2 = vmul.f32 1.442695, %v2961_v14 }
0x1070   : > { %v2928_v24 = vpop.xlane.xlu2 %2927  ;;  %v5846_v51 = vsel %vm2952_vm3, %v4552_v52, 0.0 }
0x1071   : > { %v2942_v15 = vmin.f32 %v2928_v24, %v2744_v35  ;;  %v3004_v21 = vsel %vm908_vm12, %v5846_v51, 0.0  ;;  %4555 = vpow2.f32 %v2976_v2 }
0x1072   : > { %3005 = vadd.xlane.f32.xlu2 %v3004_v21 }
0x1073   : > { %vm2950_vm4 = vcmp.ge.f32.partialorder %v5732_v32, %v2942_v15 }
0x1074   : > { %v5852_v34 = vsel %vm2950_vm4, %v4554_v16, 0.0 }
0x1075   : > { %v2998_v19 = vsel %vm908_vm12, %v5852_v34, 0.0 }
0x1076   : > { %2999 = vadd.xlane.f32.xlu1 %v2998_v19 }
0x1077   : > { %v4556_v35 = vpop.eup %4555 }
0x1078   : > { %v2937_v31 = vpop.xlane.xlu1 %2936 }
0x1079   : > { %v2945_v28 = vmin.f32 %v2937_v31, %v2753_v37 }
0x107b   : > { %vm2953_vm5 = vcmp.ge.f32.partialorder %v5736_v38, %v2945_v28 }
0x107c   : > { %v5857_v3 = vsel %vm2953_vm5, %v4556_v35, 0.0 }
0x107d   : > { %v3007_v40 = vsel %vm908_vm12, %v5857_v3, 0.0 }
0x1086   : > { %3008 = vadd.xlane.f32.xlu0 %v3007_v40 }
0x108f   : > { %3218 = vrot.lane.b32.xlu1 %v4899_v8, %s4642_s20 }
0x1090   : > { %v3169_v32 = vpop.permute.xlu1 %3168 }
0x1091   : > { %3181 = vmatpush.bf16.msrb.mxu1 %v3169_v32 }
0x1097   : > { %4367 = vrot.lane.b32.xlu1 %v4366_v6, %s4643_s21 }
0x109a   : > { %4392 = vrot.lane.b32.xlu0 %v4391_v18, %s4644_s22 }
0x109d   : > { %v2988_v8 = vpop.xlane.xlu2 %2987 }
0x109e   : > { %v3021_v15 = vand.u32 2147483648, %v2988_v8  ;;  %vm3015_vm10 = vweird.f32 %v2988_v8  ;;  %v3019_v16 = vand.u32 2147483647, %v2988_v8 }
0x109f   : > { %4377 = vrot.lane.b32.xlu1 %v4376_v56, %s4644_s22 }
0x10a0   : > { %v3022_v35 = vor.u32 1.1754944e-38, %v3021_v15  ;;  %vm3020_vm1 = vcmp.eq.f32.partialorder %v3019_v16, 8.507059e+37 }
0x10a5   : > { %v2991_v38 = vpop.xlane.xlu0 %2990 }
0x10a6   : > { %4557 = vrcp.f32 %v2991_v38  ;;  %v3036_v43 = vand.u32 2147483648, %v2991_v38  ;;  %vm3030_vm8 = vweird.f32 %v2991_v38  ;;  %v3034_v52 = vand.u32 2147483647, %v2991_v38 }
0x10a7   : > { %4559 = vrcp.f32 %v2988_v8 }
0x10a8   : > { %4561 = vpow2.f32 %v2972_v62  ;;  %v3037_v19 = vor.u32 1.1754944e-38, %v3036_v43  ;;  %vm3035_vm15 = vcmp.eq.f32.partialorder %v3034_v52, 8.507059e+37 }
0x10ac   : > { %v4558_v37 = vpop.eup %4557 }
0x10ad   : > { %v4560_v50 = vpop.eup %4559  ;;  %v3026_v63 = vmul.f32 %v4558_v37, %v2991_v38  ;;  %vm3031_vm6 = vweird.f32 %v4558_v37 }
0x10ae   : > { %v3011_v0 = vmul.f32 %v4560_v50, %v2988_v8  ;;  %vm3016_vm7 = vweird.f32 %v4560_v50  ;;  %vm3032_vm9 = vmor %vm3030_vm8, %vm3031_vm6  ;;  %v4562_v21 = vpop.eup %4561 }
0x10af   : > { %v3027_v45 = vsub.f32 1.0, %v3026_v63  ;;  %vm3017_vm14 = vmor %vm3015_vm10, %vm3016_vm7 }
0x10b0   : > { %v3012_v58 = vsub.f32 1.0, %v3011_v0 }
0x10b1   : > { %v3028_v10 = vmul.f32 %v4558_v37, %v3027_v45 }
0x10b2   : > { %v3013_v18 = vmul.f32 %v4560_v50, %v3012_v58 }
0x10b3   : > { %v3029_v49 = vadd.f32 %v4558_v37, %v3028_v10 }
0x10b4   : > { %v3014_v56 = vadd.f32 %v4560_v50, %v3013_v18 }
0x10b5   : > { %v3033_v14 = vsel %vm3032_vm9, %v4558_v37, %v3029_v49 }
0x10b6   : > { %v3018_v31 = vsel %vm3017_vm14, %v4560_v50, %v3014_v56  ;;  %v3038_v40 = vsel %vm3035_vm15, %v3037_v19, %v3033_v14 }
0x10b7   : > { %v3039_v32 = vmul.f32 %v3038_v40, %v5822_v22 }
0x10b9   : > { %v3131_v8 = vpack.c.bf16 %v3039_v32, %v3039_v32 }
0x10bb   : > { %v2931_v55 = vpop.xlane.xlu0 %2930  ;;  %v3141_v38 = vunpack.c.l.b16 %v3131_v8 }
0x10bc   : > { %v2943_v24 = vmin.f32 %v2931_v55, %v5826_v5  ;;  %v3023_v5 = vsel %vm3020_vm1, %v3022_v35, %v3018_v31 }
0x10bd   : > { %v3024_v6 = vmul.f32 %v3023_v5, %v5817_v1 }
0x10be   : > { %vm2951_vm13 = vcmp.ge.f32.partialorder %v5738_v46, %v2943_v24 }
0x10bf   : > { %v5878_v2 = vsel %vm2951_vm13, %v4562_v21, 0.0  ;;  %v3130_v46 = vpack.c.bf16 %v3024_v6, %v3024_v6 }
0x10c0   : > { %v3001_v28 = vsel %vm908_vm12, %v5878_v2, 0.0 }
0x10c1   : > { %3002 = vadd.xlane.f32.xlu2 %v3001_v28  ;;  %v3140_v37 = vunpack.c.l.b16 %v3130_v46 }
0x10c3   : > { %v3142_v50 = vpack.c.b16 %v3141_v38, %v3140_v37 }
0x10ce   : > { %v3144_v63 = vpop.permute.xlu0 %3143 }
0x10cf   : > { %3156 = vmatpush.bf16.msra.mxu0 %v3144_v63 }
0x10d2   : > { %4261 = vmatmul.msk.bf16.vlgmr.msra.gmra.mxu0 %vm908_vm12, %v3142_v50 }
0x10d3   : > { %3401 = vmatpush.bf16.msrb.mxu0 %v4326_v9 }
0x10d5   : > { %v2994_v42 = vpop.xlane.xlu1 %2993 }
0x10d6   : > { %4563 = vrcp.f32 %v2994_v42  ;;  %v3051_v58 = vand.u32 2147483648, %v2994_v42  ;;  %vm3045_vm3 = vweird.f32 %v2994_v42  ;;  %v3049_v18 = vand.u32 2147483647, %v2994_v42 }
0x10d8   : > { %v3052_v56 = vor.u32 1.1754944e-38, %v3051_v58  ;;  %vm3050_vm5 = vcmp.eq.f32.partialorder %v3049_v18, 8.507059e+37 }
0x10d9   : > { %3193 = vrot.lane.b32.xlu2 %v4891_v41, %s4642_s20 }
0x10dc   : > { %v4564_v0 = vpop.eup %4563 }
0x10dd   : > { %v3041_v45 = vmul.f32 %v4564_v0, %v2994_v42  ;;  %v2997_v62 = vpop.xlane.xlu2 %2996  ;;  %vm3046_vm2 = vweird.f32 %v4564_v0 }
0x10de   : > { %4565 = vrcp.f32 %v2997_v62  ;;  %vm3047_vm4 = vmor %vm3045_vm3, %vm3046_vm2  ;;  %v3066_v15 = vand.u32 2147483648, %v2997_v62  ;;  %v3064_v16 = vand.u32 2147483647, %v2997_v62  ;;  %vm3060_vm7 = vweird.f32 %v2997_v62 }
0x10df   : > { %v3042_v22 = vsub.f32 1.0, %v3041_v45 }
0x10e0   : > { %vm3065_vm9 = vcmp.eq.f32.partialorder %v3064_v16, 8.507059e+37 }
0x10e1   : > { %v3043_v1 = vmul.f32 %v4564_v0, %v3042_v22  ;;  %4362 = vrot.lane.b32.xlu2 %v4361_v13, %s4644_s22  ;;  %v3067_v13 = vor.u32 1.1754944e-38, %v3066_v15 }
0x10e3   : > { %v3044_v10 = vadd.f32 %v4564_v0, %v3043_v1 }
0x10e4   : > { %v4566_v49 = vpop.eup %4565 }
0x10e5   : > { %v3048_v43 = vsel %vm3047_vm4, %v4564_v0, %v3044_v10  ;;  %v3056_v41 = vmul.f32 %v4566_v49, %v2997_v62  ;;  %v3006_v55 = vpop.xlane.xlu2 %3005  ;;  %vm3061_vm6 = vweird.f32 %v4566_v49 }
0x10e6   : > { %v3053_v24 = vsel %vm3050_vm5, %v3052_v56, %v3048_v43  ;;  %4567 = vrcp.f32 %v3006_v55  ;;  %vm3062_vm8 = vmor %vm3060_vm7, %vm3061_vm6  ;;  %v3111_v50 = vand.u32 2147483648, %v3006_v55  ;;  %vm3105_vm13 = vweird.f32 %v3006_v55 }
0x10e7   : > { %v3057_v52 = vsub.f32 1.0, %v3056_v41  ;;  %v3054_v30 = vmul.f32 %v3053_v24, %v5834_v26  ;;  %v3109_v42 = vand.u32 2147483647, %v3006_v55 }
0x10e8   : > { %v3112_v22 = vor.u32 1.1754944e-38, %v3111_v50 }
0x10e9   : > { %v3058_v21 = vmul.f32 %v4566_v49, %v3057_v52  ;;  %v3132_v28 = vpack.c.bf16 %v3054_v30, %v3054_v30  ;;  %v3000_v38 = vpop.xlane.xlu1 %2999  ;;  %vm3110_vm15 = vcmp.eq.f32.partialorder %v3109_v42, 8.507059e+37 }
0x10ea   : > { %vm3075_vm6 = vweird.f32 %v3000_v38 }
0x10eb   : > { %v3059_v29 = vadd.f32 %v4566_v49, %v3058_v21  ;;  %v3165_v32 = vunpack.c.l.b16 %v3132_v28 }
0x10ec   : > { %v4568_v19 = vpop.eup %4567 }
0x10ed   : > { %v3063_v14 = vsel %vm3062_vm8, %v4566_v49, %v3059_v29  ;;  %v3101_v5 = vmul.f32 %v4568_v19, %v3006_v55  ;;  %vm3106_vm10 = vweird.f32 %v4568_v19 }
0x10ee   : > { %v3068_v31 = vsel %vm3065_vm9, %v3067_v13, %v3063_v14  ;;  %vm3107_vm14 = vmor %vm3105_vm13, %vm3106_vm10 }
0x10ef   : > { %v3069_v35 = vmul.f32 %v3068_v31, %v5841_v25  ;;  %v3102_v8 = vsub.f32 1.0, %v3101_v5 }
0x10f1   : > { %v3133_v40 = vpack.c.bf16 %v3069_v35, %v3069_v35  ;;  %v3103_v26 = vmul.f32 %v4568_v19, %v3102_v8  ;;  %v3081_v35 = vand.u32 2147483648, %v3000_v38 }
0x10f3   : > { %v3166_v6 = vunpack.c.l.b16 %v3133_v40  ;;  %v3104_v63 = vadd.f32 %v4568_v19, %v3103_v26  ;;  %v3079_v40 = vand.u32 2147483647, %v3000_v38  ;;  %v3082_v8 = vor.u32 1.1754944e-38, %v3081_v35 }
0x10f5   : > { %v3167_v46 = vpack.c.b16 %v3166_v6, %v3165_v32  ;;  %v3108_v25 = vsel %vm3107_vm14, %v4568_v19, %v3104_v63  ;;  %vm3080_vm8 = vcmp.eq.f32.partialorder %v3079_v40, 8.507059e+37 }
0x10f6   : > { %v3113_v58 = vsel %vm3110_vm15, %v3112_v22, %v3108_v25  ;;  %vm3350_vm15 = vcmask 195584  }
0x10f7   : > { %4262 = vmatmul.msk.bf16.vlgmr.msrb.gmra.mxu1 %vm908_vm12, %v3167_v46  ;;  %v3114_v43 = vmul.f32 %v3113_v58, %v5846_v51 }
0x10f9   : > { %v3009_v37 = vpop.xlane.xlu0 %3008  ;;  %v3136_v24 = vpack.c.bf16 %v3114_v43, %v3114_v43 }
0x10fa   : > { %4569 = vrcp.f32 %v3009_v37  ;;  %v3126_v10 = vand.u32 2147483648, %v3009_v37  ;;  %v3124_v49 = vand.u32 2147483647, %v3009_v37  ;;  %vm3120_vm2 = vweird.f32 %v3009_v37 }
0x10fb   : > { %v3215_v16 = vunpack.c.l.b16 %v3136_v24  ;;  %4571 = vrcp.f32 %v3000_v38 }
0x10fc   : > { %v3127_v55 = vor.u32 1.1754944e-38, %v3126_v10  ;;  %vm3125_vm4 = vcmp.eq.f32.partialorder %v3124_v49, 8.507059e+37 }
0x1100   : > { %v4570_v0 = vpop.eup %4569 }
0x1101   : > { %v3116_v45 = vmul.f32 %v4570_v0, %v3009_v37  ;;  %v3219_v62 = vpop.permute.xlu1 %3218  ;;  %vm3121_vm1 = vweird.f32 %v4570_v0  ;;  %v4572_v13 = vpop.eup %4571 }
0x1102   : > { %3231 = vmatpush.bf16.msrb.mxu3 %v3219_v62  ;;  %vm3122_vm3 = vmor %vm3120_vm2, %vm3121_vm1  ;;  %v3071_v14 = vmul.f32 %v4572_v13, %v3000_v38  ;;  %vm3076_vm5 = vweird.f32 %v4572_v13 }
0x1103   : > { %v3117_v1 = vsub.f32 1.0, %v3116_v45  ;;  %vm3077_vm7 = vmor %vm3075_vm6, %vm3076_vm5 }
0x1104   : > { %v3072_v51 = vsub.f32 1.0, %v3071_v14 }
0x1105   : > { %v3118_v18 = vmul.f32 %v4570_v0, %v3117_v1 }
0x1106   : > { %v3073_v19 = vmul.f32 %v4572_v13, %v3072_v51 }
0x1107   : > { %v3119_v41 = vadd.f32 %v4570_v0, %v3118_v18 }
0x1108   : > { %v3074_v28 = vadd.f32 %v4572_v13, %v3073_v19 }
0x1109   : > { %v3123_v56 = vsel %vm3122_vm3, %v4570_v0, %v3119_v41 }
0x110a   : > { %v3128_v52 = vsel %vm3125_vm4, %v3127_v55, %v3123_v56 }
0x110b   : > { %v3129_v15 = vmul.f32 %v3128_v52, %v5857_v3  ;;  %v3078_v3 = vsel %vm3077_vm7, %v4572_v13, %v3074_v28 }
0x110c   : > { %v3083_v26 = vsel %vm3080_vm8, %v3082_v8, %v3078_v3 }
0x110d   : > { %v3137_v21 = vpack.c.bf16 %v3129_v15, %v3129_v15  ;;  %v3084_v42 = vmul.f32 %v3083_v26, %v5852_v34 }
0x110f   : > { %v3216_v30 = vunpack.c.l.b16 %v3137_v21  ;;  %v3134_v62 = vpack.c.bf16 %v3084_v42, %v3084_v42  ;;  %v3424_v42 = vld [vmem:[%s4738_s19] sm:$0xff] }
0x1111   : > { %v3217_v29 = vpack.c.b16 %v3216_v30, %v3215_v16  ;;  %v3190_v58 = vunpack.c.l.b16 %v3134_v62  ;;  %v3425_v62 = vld [vmem:[%s4738_s19 + $0x8] sm:$0xff] }
0x1113   : > { %4264 = vmatmul.msk.bf16.vlgmr.msrb.gmra.mxu3 %vm908_vm12, %v3217_v29 }
0x1134   : > { %v3003_v31 = vpop.xlane.xlu2 %3002 }
0x1135   : > { %4573 = vrcp.f32 %v3003_v31  ;;  %v3096_v37 = vand.u32 2147483648, %v3003_v31  ;;  %v3094_v50 = vand.u32 2147483647, %v3003_v31  ;;  %vm3090_vm10 = vweird.f32 %v3003_v31 }
0x1137   : > { %v3097_v38 = vor.u32 1.1754944e-38, %v3096_v37  ;;  %vm3095_vm14 = vcmp.eq.f32.partialorder %v3094_v50, 8.507059e+37 }
0x113b   : > { %v4574_v5 = vpop.eup %4573 }
0x113c   : > { %v3086_v32 = vmul.f32 %v4574_v5, %v3003_v31  ;;  %v3194_v6 = vpop.permute.xlu2 %3193  ;;  %vm3091_vm9 = vweird.f32 %v4574_v5 }
0x113d   : > { %3206 = vmatpush.bf16.msrb.mxu2 %v3194_v6  ;;  %vm3092_vm13 = vmor %vm3090_vm10, %vm3091_vm9 }
0x113e   : > { %v3087_v46 = vsub.f32 1.0, %v3086_v32 }
0x1140   : > { %v3088_v63 = vmul.f32 %v4574_v5, %v3087_v46 }
0x1142   : > { %v3089_v0 = vadd.f32 %v4574_v5, %v3088_v63 }
0x1144   : > { %v3093_v25 = vsel %vm3092_vm13, %v4574_v5, %v3089_v0  ;;  %v4363_v17 = vpop.permute.xlu2 %4362 }
0x1145   : > { %v3098_v45 = vsel %vm3095_vm14, %v3097_v38, %v3093_v25  ;;  %v4365_v27 = vunpack.i.h.bf16 %v4363_v17 }
0x1146   : > { %v3099_v22 = vmul.f32 %v3098_v45, %v5878_v2 }
0x1147   : > { %v3335_v56 = vsel %vm791_vm11, %v5139_v36, %v4365_v27 }
0x1148   : > { %v3135_v1 = vpack.c.bf16 %v3099_v22, %v3099_v22 }
0x114a   : > { %v3191_v10 = vunpack.c.l.b16 %v3135_v1 }
0x114c   : > { %v3192_v18 = vpack.c.b16 %v3191_v10, %v3190_v58  ;;  %v4393_v10 = vpop.permute.xlu0 %4392 }
0x114e   : > { %4263 = vmatmul.msk.bf16.vlgmr.msrb.gmra.mxu2 %vm908_vm12, %v3192_v18 }
0x114f   : > { %v3158_v49 = vpop.f32.mrf.mxu0 }
0x1157   : > { %v3160_v43 = vpop.f32.mrf.mxu0 }
0x1158   : > { %v4371_v41 = vpack.i.bf16 %v3160_v43, %v3158_v49  ;;  %v4395_v49 = vunpack.i.h.bf16 %v4393_v10  ;;  %v4394_v43 = vunpack.i.l.bf16 %v4393_v10 }
0x115a   : > { %4372 = vrot.lane.b32.xlu2 %v4371_v41, %s4645_s23  ;;  %v3338_v9 = vsel %vm791_vm11, %v5134_v33, %v4394_v43  ;;  %v3430_v43 = vld [vmem:[%s4738_s19 + $0x30] sm:$0xff] }
0x1162   : > { %4382 = vrot.lane.b32.xlu2 %v4381_v54, %s4643_s21  ;;  %v4325_v54 = vld [vmem:[%s6307_s6] sm:$0xff] }
0x1163   : > { %3402 = vmatpush.bf16.msrb.mxu0 %v4325_v54 }
0x116a   : > { %4397 = vrot.lane.b32.xlu2 %v4396_v7, %s4643_s21  ;;  %v4368_v7 = vpop.permute.xlu1 %4367 }
0x116b   : > { %v4370_v24 = vunpack.i.h.bf16 %v4368_v7  ;;  %v4369_v15 = vunpack.i.l.bf16 %v4368_v7 }
0x116d   : > { %v3343_v13 = vsel %vm908_vm12, %v3335_v56, %v4370_v24 }
0x1172   : > { %4407 = vrot.lane.b32.xlu2 %v4406_v47, %s4644_s22  ;;  %v4364_v47 = vunpack.i.l.bf16 %v4363_v17  ;;  %v4378_v28 = vpop.permute.xlu1 %4377 }
0x1173   : > { %v4380_v40 = vunpack.i.h.bf16 %v4378_v28  ;;  %v4379_v5 = vunpack.i.l.bf16 %v4378_v28 }
0x1174   : > { %v3183_v34 = vpop.f32.mrf.mxu1  ;;  %v3334_v52 = vsel %vm791_vm11, %v5130_v39, %v4364_v47 }
0x1175   : > { %v3342_v29 = vsel %vm908_vm12, %v3334_v52, %v4369_v15  ;;  %v3337_v8 = vsel %vm791_vm11, %v5132_v4, %v4380_v40  ;;  %v3336_v46 = vsel %vm791_vm11, %v5128_v61, %v4379_v5  ;;  %v5947_v4 = vld [vmem:[%s6308_s7] ss:$0 sm:$0xff]  ;;  %v3427_v40 = vld [vmem:[%s4738_s19 + $0x18] sm:$0xff] }
0x117c   : > { %v3185_v2 = vpop.f32.mrf.mxu1 }
0x117d   : > { %v4386_v55 = vpack.i.bf16 %v3185_v2, %v3183_v34 }
0x117f   : > { %4387 = vrot.lane.b32.xlu1 %v4386_v55, %s4645_s23  ;;  %v3339_v55 = vsel %vm791_vm11, %v5143_v44, %v4395_v49 }
0x1196   : > { %v3233_v57 = vpop.f32.mrf.mxu3 }
0x119e   : > { %v3235_v23 = vpop.f32.mrf.mxu3 }
0x119f   : > { %v4416_v12 = vpack.i.bf16 %v3235_v23, %v3233_v57 }
0x11a1   : > { %4417 = vrot.lane.b32.xlu0 %v4416_v12, %s4645_s23 }
0x11b4   : > { %v4373_v21 = vpop.permute.xlu2 %4372 }
0x11b5   : > { %v4375_v16 = vunpack.i.h.bf16 %v4373_v21  ;;  %v4374_v30 = vunpack.i.l.bf16 %v4373_v21 }
0x11b7   : > { %v3351_v14 = vsel %vm3350_vm15, %v3342_v29, %v4374_v30  ;;  %v3352_v51 = vsel %vm3350_vm15, %v3343_v13, %v4375_v16 }
0x11b8   : > { %v3359_v19 = vpack.c.bf16 %v3352_v51, %v3351_v14 }
0x11ba   : > { %4273 = vmatmul.msk.bf16.vlgmr.msrb.gmra.mxu0 %vm482_vm0, %v3359_v19 }
0x11bc   : > { %v4383_v35 = vpop.permute.xlu2 %4382 }
0x11bd   : > { %v4385_v3 = vunpack.i.h.bf16 %v4383_v35  ;;  %v4384_v32 = vunpack.i.l.bf16 %v4383_v35 }
0x11bf   : > { %v3345_v48 = vsel %vm908_vm12, %v3337_v8, %v4385_v3  ;;  %v3344_v11 = vsel %vm908_vm12, %v3336_v46, %v4384_v32 }
0x11c4   : > { %v4398_v18 = vpop.permute.xlu2 %4397 }
0x11c5   : > { %v4400_v41 = vunpack.i.h.bf16 %v4398_v18  ;;  %v4399_v34 = vunpack.i.l.bf16 %v4398_v18 }
0x11c7   : > { %v3347_v23 = vsel %vm908_vm12, %v3339_v55, %v4400_v41  ;;  %v3346_v12 = vsel %vm908_vm12, %v3338_v9, %v4399_v34  ;;  %v3431_v9 = vld [vmem:[%s4738_s19 + $0x38] sm:$0xff] }
0x11cc   : > { %v4408_v7 = vpop.permute.xlu2 %4407 }
0x11cd   : > { %v4410_v52 = vunpack.i.h.bf16 %v4408_v7  ;;  %v4409_v44 = vunpack.i.l.bf16 %v4408_v7 }
0x11cf   : > { %v3341_v21 = vsel %vm791_vm11, %v5158_v60, %v4410_v52  ;;  %v3340_v16 = vsel %vm791_vm11, %v5152_v53, %v4409_v44 }
0x11d1   : > { %v3208_v36 = vpop.f32.mrf.mxu2 }
0x11d9   : > { %v3210_v31 = vpop.f32.mrf.mxu2 }
0x11da   : > { %v4401_v39 = vpack.i.bf16 %v3210_v31, %v3208_v36 }
0x11dc   : > { %4402 = vrot.lane.b32.xlu1 %v4401_v39, %s4645_s23  ;;  %v3426_v39 = vld [vmem:[%s4738_s19 + $0x10] sm:$0xff] }
0x11e4   : > { %4412 = vrot.lane.b32.xlu1 %v4411_v59, %s4643_s21  ;;  %s6273_s21 = scalar_lea.vmem %s6315_s14, %s4212_s16 }
0x11f1   : > { %v4388_v6 = vpop.permute.xlu1 %4387 }
0x11f2   : > { %v4390_v26 = vunpack.i.h.bf16 %v4388_v6  ;;  %v4389_v37 = vunpack.i.l.bf16 %v4388_v6 }
0x11f4   : > { %v3353_v59 = vsel %vm3350_vm15, %v3344_v11, %v4389_v37  ;;  %v3354_v63 = vsel %vm3350_vm15, %v3345_v48, %v4390_v26 }
0x11f5   : > { %v3360_v50 = vpack.c.bf16 %v3354_v63, %v3353_v59  ;;  %v3428_v59 = vld [vmem:[%s4738_s19 + $0x20] sm:$0xff] }
0x11f7   : > { %4274 = vmatmul.msk.bf16.gmra.mxu0 %vm482_vm0, %v3360_v50 }
0x1213   : > { %v4418_v15 = vpop.permute.xlu0 %4417 }
0x1214   : > { %v4420_v13 = vunpack.i.h.bf16 %v4418_v15  ;;  %v4419_v14 = vunpack.i.l.bf16 %v4418_v15 }
0x1237   : > { %v3404_v61 = vpop.f32.mrf.mxu0 }
0x1238   : > { %v3405_v0 = vadd.f32 %v5947_v4, %v3404_v61 }
0x123a   : > { %v5951_v38 = vadd.f32 %v3424_v42, %v3405_v0 }
0x123c   : > { %v3442_v25 = vsel %vm482_vm0, %v5951_v38, 0.0 }
0x123d   : > { %3443 = vadd.xlane.f32.xlu2 %v3442_v25 }
0x123f   : > { %v3406_v45 = vpop.f32.mrf.mxu0 }
0x1240   : > { %v3407_v22 = vadd.f32 %v5947_v4, %v3406_v45  ;;  %v3429_v45 = vld [vmem:[%s4738_s19 + $0x28] sm:$0xff] }
0x1242   : > { %v5957_v1 = vadd.f32 %v3425_v62, %v3407_v22 }
0x1244   : > { %v3445_v58 = vsel %vm482_vm0, %v5957_v1, 0.0 }
0x1245   : > { %3446 = vadd.xlane.f32.xlu1 %v3445_v58 }
0x124e   : > { %v4403_v2 = vpop.permute.xlu1 %4402 }
0x124f   : > { %v4405_v57 = vunpack.i.h.bf16 %v4403_v2  ;;  %v4404_v54 = vunpack.i.l.bf16 %v4403_v2 }
0x1251   : > { %v3355_v17 = vsel %vm3350_vm15, %v3346_v12, %v4404_v54  ;;  %v3356_v27 = vsel %vm3350_vm15, %v3347_v23, %v4405_v57 }
0x1252   : > { %v3361_v47 = vpack.c.bf16 %v3356_v27, %v3355_v17 }
0x1254   : > { %4275 = vmatmul.msk.bf16.gmra.mxu0 %vm482_vm0, %v3361_v47 }
0x1256   : > { %v4413_v56 = vpop.permute.xlu1 %4412 }
0x1257   : > { %v4415_v24 = vunpack.i.h.bf16 %v4413_v56  ;;  %v4414_v33 = vunpack.i.l.bf16 %v4413_v56 }
0x1259   : > { %v3348_v30 = vsel %vm908_vm12, %v3340_v16, %v4414_v33  ;;  %v3349_v29 = vsel %vm908_vm12, %v3341_v21, %v4415_v24  ;;  %v4328_v16 = vld [vmem:[%s6311_s10 + $0x8] sm:$0xff] }
0x125a   : > { %v3357_v51 = vsel %vm3350_vm15, %v3348_v30, %v4419_v14  ;;  %v3358_v19 = vsel %vm3350_vm15, %v3349_v29, %v4420_v13  ;;  %3682 = vmatpush.bf16.msra.mxu1 %v4328_v16 }
0x125b   : > { %v3362_v36 = vpack.c.bf16 %v3358_v19, %v3357_v51  ;;  %v4327_v51 = vld [vmem:[%s6311_s10] sm:$0xff] }
0x125e   : > { %3683 = vmatpush.bf16.msra.mxu1 %v4327_v51 }
0x1264   : > { %4276 = vmatmul.msk.bf16.gmra.mxu0 %vm482_vm0, %v3362_v36 }
0x1274   : > { %v3409_v31 = vpop.f32.mrf.mxu0 }
0x1275   : > { %v3410_v60 = vadd.f32 %v5947_v4, %v3409_v31 }
0x1277   : > { %v5981_v28 = vadd.f32 %v3426_v39, %v3410_v60 }
0x1279   : > { %v3448_v53 = vsel %vm482_vm0, %v5981_v28, 0.0 }
0x127a   : > { %3449 = vadd.xlane.f32.xlu0 %v3448_v53 }
0x127c   : > { %v3411_v35 = vpop.f32.mrf.mxu0 }
0x127d   : > { %v3412_v5 = vadd.f32 %v5947_v4, %v3411_v35 }
0x127f   : > { %v5987_v3 = vadd.f32 %v3427_v40, %v3412_v5 }
0x1281   : > { %v3451_v32 = vsel %vm482_vm0, %v5987_v3, 0.0 }
0x1282   : > { %3452 = vadd.xlane.f32.xlu2 %v3451_v32 }
0x12b0   : > { %v3444_v6 = vpop.xlane.xlu2 %3443 }
0x12b1   : > { %v3466_v8 = vmul.f32 %v3444_v6, %v4754_v20 }
0x12b3   : > { %v5993_v46 = vsub.f32 %v5951_v38, %v3466_v8 }
0x12b5   : > { %v3482_v26 = vmul.f32 %v5993_v46, %v5993_v46 }
0x12b7   : > { %v3490_v37 = vsel %vm482_vm0, %v3482_v26, 0.0 }
0x12b8   : > { %3491 = vadd.xlane.f32.xlu2 %v3490_v37  ;;  %v3447_v48 = vpop.xlane.xlu1 %3446 }
0x12b9   : > { %v3467_v63 = vmul.f32 %v3447_v48, %v4754_v20 }
0x12bb   : > { %v6004_v42 = vsub.f32 %v5957_v1, %v3467_v63 }
0x12bd   : > { %v3483_v22 = vmul.f32 %v6004_v42, %v6004_v42 }
0x12bf   : > { %v3493_v18 = vsel %vm482_vm0, %v3483_v22, 0.0 }
0x12d1   : > { %v3414_v11 = vpop.f32.mrf.mxu0 }
0x12d2   : > { %v3415_v50 = vadd.f32 %v5947_v4, %v3414_v11 }
0x12d4   : > { %v6001_v61 = vadd.f32 %v3428_v59, %v3415_v50 }
0x12d6   : > { %v3454_v0 = vsel %vm482_vm0, %v6001_v61, 0.0 }
0x12d7   : > { %3455 = vadd.xlane.f32.xlu1 %v3454_v0 }
0x12d9   : > { %v3416_v25 = vpop.f32.mrf.mxu0 }
0x12da   : > { %v3417_v62 = vadd.f32 %v5947_v4, %v3416_v25 }
0x12dc   : > { %v6012_v58 = vadd.f32 %v3429_v45, %v3417_v62 }
0x12de   : > { %v3457_v10 = vsel %vm482_vm0, %v6012_v58, 0.0 }
0x12df   : > { %3458 = vadd.xlane.f32.xlu0 %v3457_v10  ;;  %3494 = vadd.xlane.f32.xlu1 %v3493_v18 }
0x12e1   : > { %v3419_v49 = vpop.f32.mrf.mxu0 }
0x12e2   : > { %v3420_v41 = vadd.f32 %v5947_v4, %v3419_v49 }
0x12e4   : > { %v6019_v34 = vadd.f32 %v3430_v43, %v3420_v41  ;;  %v6076_v41 = vld [vmem:[%s6309_s8] ss:$0 sm:$0xff] }
0x12e6   : > { %v3460_v2 = vsel %vm482_vm0, %v6019_v34, 0.0 }
0x12e7   : > { %3461 = vadd.xlane.f32.xlu0 %v3460_v2 }
0x12e9   : > { %v3421_v55 = vpop.f32.mrf.mxu0 }
0x12ea   : > { %v3422_v57 = vadd.f32 %v5947_v4, %v3421_v55 }
0x12ec   : > { %v6025_v54 = vadd.f32 %v3431_v9, %v3422_v57 }
0x12ed   : > { %v3450_v23 = vpop.xlane.xlu0 %3449 }
0x12ee   : > { %v3468_v12 = vmul.f32 %v3450_v23, %v4754_v20  ;;  %v3463_v17 = vsel %vm482_vm0, %v6025_v54, 0.0 }
0x12ef   : > { %3464 = vadd.xlane.f32.xlu2 %v3463_v17  ;;  %v6087_v17 = vld [vmem:[%s6310_s9] ss:$0 sm:$0xff] }
0x12f0   : > { %v6031_v27 = vsub.f32 %v5981_v28, %v3468_v12 }
0x12f2   : > { %v3484_v47 = vmul.f32 %v6031_v27, %v6031_v27 }
0x12f4   : > { %v3496_v7 = vsel %vm482_vm0, %v3484_v47, 0.0 }
0x12f5   : > { %3497 = vadd.xlane.f32.xlu1 %v3496_v7  ;;  %v3453_v56 = vpop.xlane.xlu2 %3452 }
0x12f6   : > { %v3469_v4 = vmul.f32 %v3453_v56, %v4754_v20 }
0x12f8   : > { %v6038_v52 = vsub.f32 %v5987_v3, %v3469_v4 }
0x12fa   : > { %v3485_v44 = vmul.f32 %v6038_v52, %v6038_v52 }
0x12fc   : > { %v3499_v24 = vsel %vm482_vm0, %v3485_v44, 0.0 }
0x12fd   : > { %3500 = vadd.xlane.f32.xlu0 %v3499_v24 }
0x132b   : > { %v3492_v33 = vpop.xlane.xlu2 %3491 }
0x132c   : > { %v3514_v15 = vmul.f32 %v3492_v33, %v4754_v20 }
0x132e   : > { %v3522_v21 = vadd.f32 1e-05, %v3514_v15 }
0x1330   : > { %4575 = vrsqrt.f32 %v3522_v21  ;;  %vm3536_vm12 = vweird.f32 %v3522_v21 }
0x1336   : > { %v4576_v29 = vpop.eup %4575 }
0x1337   : > { %v3531_v19 = vmul.f32 %v4576_v29, %v3522_v21  ;;  %vm3537_vm11 = vweird.f32 %v4576_v29 }
0x1338   : > { %vm3538_vm1 = vmor %vm3536_vm12, %vm3537_vm11 }
0x1339   : > { %v3532_v39 = vmul.f32 %v4576_v29, %v3531_v19 }
0x133b   : > { %v3533_v6 = vmul.f32 0.5, %v3532_v39 }
0x133d   : > { %v3534_v37 = vsub.f32 1.5, %v3533_v6 }
0x133f   : > { %v3535_v50 = vmul.f32 %v4576_v29, %v3534_v37 }
0x1341   : > { %v3539_v22 = vsel %vm3538_vm1, %v4576_v29, %v3535_v50 }
0x1342   : > { %v3610_v2 = vmul.f32 %v3539_v22, %v5993_v46 }
0x1344   : > { %v3621_v47 = vmul.f32 %v6076_v41, %v3610_v2 }
0x1346   : > { %v3632_v24 = vadd.f32 %v6087_v17, %v3621_v47 }
0x134a   : > { %v3456_v30 = vpop.xlane.xlu1 %3455 }
0x134b   : > { %v3470_v13 = vmul.f32 %v3456_v30, %v4754_v20 }
0x134d   : > { %v6049_v14 = vsub.f32 %v6001_v61, %v3470_v13 }
0x134f   : > { %v3486_v36 = vmul.f32 %v6049_v14, %v6049_v14 }
0x1351   : > { %v3502_v31 = vsel %vm482_vm0, %v3486_v36, 0.0 }
0x1352   : > { %v3459_v60 = vpop.xlane.xlu0 %3458  ;;  %v3495_v53 = vpop.xlane.xlu1 %3494  ;;  %3503 = vadd.xlane.f32.xlu2 %v3502_v31 }
0x1353   : > { %v3471_v35 = vmul.f32 %v3459_v60, %v4754_v20  ;;  %v3515_v40 = vmul.f32 %v3495_v53, %v4754_v20 }
0x1355   : > { %v6060_v5 = vsub.f32 %v6012_v58, %v3471_v35  ;;  %v3523_v32 = vadd.f32 1e-05, %v3515_v40 }
0x1357   : > { %4577 = vrsqrt.f32 %v3523_v32  ;;  %v3487_v8 = vmul.f32 %v6060_v5, %v6060_v5  ;;  %vm3546_vm3 = vweird.f32 %v3523_v32 }
0x1359   : > { %v3505_v26 = vsel %vm482_vm0, %v3487_v8, 0.0 }
0x135a   : > { %v3462_v48 = vpop.xlane.xlu0 %3461  ;;  %3506 = vadd.xlane.f32.xlu1 %v3505_v26 }
0x135b   : > { %v3472_v11 = vmul.f32 %v3462_v48, %v4754_v20 }
0x135d   : > { %v4578_v59 = vpop.eup %4577  ;;  %v6067_v63 = vsub.f32 %v6019_v34, %v3472_v11 }
0x135e   : > { %v3541_v0 = vmul.f32 %v4578_v59, %v3523_v32  ;;  %vm3547_vm2 = vweird.f32 %v4578_v59 }
0x135f   : > { %v3488_v25 = vmul.f32 %v6067_v63, %v6067_v63  ;;  %vm3548_vm4 = vmor %vm3546_vm3, %vm3547_vm2 }
0x1360   : > { %v3542_v45 = vmul.f32 %v4578_v59, %v3541_v0 }
0x1361   : > { %v3508_v62 = vsel %vm482_vm0, %v3488_v25, 0.0 }
0x1362   : > { %v3543_v10 = vmul.f32 0.5, %v3542_v45  ;;  %3509 = vadd.xlane.f32.xlu0 %v3508_v62  ;;  %v3465_v18 = vpop.xlane.xlu2 %3464 }
0x1363   : > { %v3473_v49 = vmul.f32 %v3465_v18, %v4754_v20 }
0x1364   : > { %v3544_v43 = vsub.f32 1.5, %v3543_v10 }
0x1365   : > { %v6080_v55 = vsub.f32 %v6025_v54, %v3473_v49 }
0x1366   : > { %v3545_v9 = vmul.f32 %v4578_v59, %v3544_v43 }
0x1367   : > { %v3489_v57 = vmul.f32 %v6080_v55, %v6080_v55 }
0x1368   : > { %v3549_v23 = vsel %vm3548_vm4, %v4578_v59, %v3545_v9  ;;  %v3498_v12 = vpop.xlane.xlu1 %3497 }
0x1369   : > { %v3611_v46 = vmul.f32 %v3549_v23, %v6004_v42  ;;  %v3516_v7 = vmul.f32 %v3498_v12, %v4754_v20  ;;  %v3511_v56 = vsel %vm482_vm0, %v3489_v57, 0.0 }
0x136a   : > { %3512 = vadd.xlane.f32.xlu2 %v3511_v56 }
0x136b   : > { %v3622_v4 = vmul.f32 %v6076_v41, %v3611_v46  ;;  %v3524_v44 = vadd.f32 1e-05, %v3516_v7 }
0x136d   : > { %v3633_v33 = vadd.f32 %v6087_v17, %v3622_v4  ;;  %4579 = vrsqrt.f32 %v3524_v44  ;;  %vm3556_vm6 = vweird.f32 %v3524_v44 }
0x136f   : > { %v3640_v15 = vpack.c.bf16 %v3633_v33, %v3632_v24 }
0x1370   : > { %v3501_v21 = vpop.xlane.xlu0 %3500 }
0x1371   : > { %v3517_v16 = vmul.f32 %v3501_v21, %v4754_v20  ;;  %4285 = vmatmul.msk.bf16.vlgmr.msra.gmra.mxu1 %vm482_vm0, %v3640_v15 }
0x1373   : > { %v4580_v42 = vpop.eup %4579  ;;  %v3525_v30 = vadd.f32 1e-05, %v3517_v16 }
0x1374   : > { %v3551_v29 = vmul.f32 %v4580_v42, %v3524_v44  ;;  %vm3557_vm5 = vweird.f32 %v4580_v42 }
0x1375   : > { %4581 = vrsqrt.f32 %v3525_v30  ;;  %vm3558_vm7 = vmor %vm3556_vm6, %vm3557_vm5  ;;  %vm3566_vm9 = vweird.f32 %v3525_v30 }
0x1376   : > { %v3552_v13 = vmul.f32 %v4580_v42, %v3551_v29 }
0x1378   : > { %v3553_v51 = vmul.f32 0.5, %v3552_v13 }
0x137a   : > { %v3554_v19 = vsub.f32 1.5, %v3553_v51 }
0x137b   : > { %v4582_v36 = vpop.eup %4581 }
0x137c   : > { %v3555_v31 = vmul.f32 %v4580_v42, %v3554_v19  ;;  %v3561_v39 = vmul.f32 %v4582_v36, %v3525_v30  ;;  %vm3567_vm8 = vweird.f32 %v4582_v36 }
0x137d   : > { %vm3568_vm10 = vmor %vm3566_vm9, %vm3567_vm8 }
0x137e   : > { %v3562_v60 = vmul.f32 %v4582_v36, %v3561_v39  ;;  %v3559_v53 = vsel %vm3558_vm7, %v4580_v42, %v3555_v31 }
0x137f   : > { %v3612_v32 = vmul.f32 %v3559_v53, %v6031_v27 }
0x1380   : > { %v3563_v35 = vmul.f32 0.5, %v3562_v60 }
0x1381   : > { %v3623_v37 = vmul.f32 %v6076_v41, %v3612_v32 }
0x1382   : > { %v3564_v40 = vsub.f32 1.5, %v3563_v35 }
0x1383   : > { %v3634_v11 = vadd.f32 %v6087_v17, %v3623_v37 }
0x1384   : > { %v3565_v6 = vmul.f32 %v4582_v36, %v3564_v40 }
0x1386   : > { %v3569_v8 = vsel %vm3568_vm10, %v4582_v36, %v3565_v6 }
0x1387   : > { %v3613_v26 = vmul.f32 %v3569_v8, %v6038_v52 }
0x1389   : > { %v3624_v48 = vmul.f32 %v6076_v41, %v3613_v26 }
0x138b   : > { %v3635_v59 = vadd.f32 %v6087_v17, %v3624_v48 }
0x138d   : > { %v3641_v50 = vpack.c.bf16 %v3635_v59, %v3634_v11 }
0x138f   : > { %4286 = vmatmul.msk.bf16.gmra.mxu1 %vm482_vm0, %v3641_v50  ;;  %v4336_v50 = vld [vmem:[%s6313_s12 + $0x38] sm:$0xff] }
0x1390   : > { %4093 = vmatpush.bf16.msra.mxu2 %v4336_v50 }
0x13c5   : > { %v3504_v0 = vpop.xlane.xlu2 %3503 }
0x13c6   : > { %v3518_v27 = vmul.f32 %v3504_v0, %v4754_v20 }
0x13c8   : > { %v3526_v25 = vadd.f32 1e-05, %v3518_v27 }
0x13ca   : > { %4583 = vrsqrt.f32 %v3526_v25  ;;  %vm3576_vm14 = vweird.f32 %v3526_v25 }
0x13cd   : > { %v3507_v45 = vpop.xlane.xlu1 %3506 }
0x13ce   : > { %v3519_v62 = vmul.f32 %v3507_v45, %v4754_v20 }
0x13d0   : > { %v4584_v52 = vpop.eup %4583  ;;  %v3527_v22 = vadd.f32 1e-05, %v3519_v62 }
0x13d1   : > { %v3571_v10 = vmul.f32 %v4584_v52, %v3526_v25  ;;  %vm3577_vm13 = vweird.f32 %v4584_v52 }
0x13d2   : > { %4585 = vrsqrt.f32 %v3527_v22  ;;  %vm3578_vm15 = vmor %vm3576_vm14, %vm3577_vm13  ;;  %vm3586_vm12 = vweird.f32 %v3527_v22 }
0x13d3   : > { %v3572_v18 = vmul.f32 %v4584_v52, %v3571_v10 }
0x13d5   : > { %v3573_v49 = vmul.f32 0.5, %v3572_v18  ;;  %v3510_v43 = vpop.xlane.xlu0 %3509 }
0x13d6   : > { %v3520_v2 = vmul.f32 %v3510_v43, %v4754_v20 }
0x13d7   : > { %v3574_v9 = vsub.f32 1.5, %v3573_v49 }
0x13d8   : > { %v4586_v57 = vpop.eup %4585  ;;  %v3528_v23 = vadd.f32 1e-05, %v3520_v2 }
0x13d9   : > { %v3575_v12 = vmul.f32 %v4584_v52, %v3574_v9  ;;  %v3581_v47 = vmul.f32 %v4586_v57, %v3527_v22  ;;  %vm3587_vm11 = vweird.f32 %v4586_v57 }
0x13da   : > { %4587 = vrsqrt.f32 %v3528_v23  ;;  %vm3588_vm1 = vmor %vm3586_vm12, %vm3587_vm11  ;;  %vm3596_vm3 = vweird.f32 %v3528_v23 }
0x13db   : > { %v3582_v46 = vmul.f32 %v4586_v57, %v3581_v47  ;;  %v3579_v7 = vsel %vm3578_vm15, %v4584_v52, %v3575_v12 }
0x13dc   : > { %v3614_v15 = vmul.f32 %v3579_v7, %v6049_v14 }
0x13dd   : > { %v3583_v56 = vmul.f32 0.5, %v3582_v46  ;;  %v3513_v4 = vpop.xlane.xlu2 %3512  ;;  %v4332_v46 = vld [vmem:[%s6313_s12 + $0x18] sm:$0xff] }
0x13de   : > { %v3521_v44 = vmul.f32 %v3513_v4, %v4754_v20  ;;  %v3625_v51 = vmul.f32 %v6076_v41, %v3614_v15 }
0x13df   : > { %v3584_v24 = vsub.f32 1.5, %v3583_v56 }
0x13e0   : > { %v4588_v33 = vpop.eup %4587  ;;  %v3529_v21 = vadd.f32 1e-05, %v3521_v44  ;;  %v3636_v39 = vadd.f32 %v6087_v17, %v3625_v51 }
0x13e1   : > { %v3585_v16 = vmul.f32 %v4586_v57, %v3584_v24  ;;  %v3591_v42 = vmul.f32 %v4588_v33, %v3528_v23  ;;  %vm3597_vm2 = vweird.f32 %v4588_v33  ;;  %v4331_v24 = vld [vmem:[%s6313_s12 + $0x10] sm:$0xff] }
0x13e2   : > { %4589 = vrsqrt.f32 %v3529_v21  ;;  %vm3598_vm4 = vmor %vm3596_vm3, %vm3597_vm2  ;;  %vm3606_vm6 = vweird.f32 %v3529_v21 }
0x13e3   : > { %v3589_v30 = vsel %vm3588_vm1, %v4586_v57, %v3585_v16  ;;  %v3592_v29 = vmul.f32 %v4588_v33, %v3591_v42  ;;  %v4333_v57 = vld [vmem:[%s6313_s12 + $0x20] sm:$0xff] }
0x13e4   : > { %v3615_v13 = vmul.f32 %v3589_v30, %v6060_v5  ;;  %v6118_v5 = vld [vmem:[%s6312_s11] ss:$0 sm:$0xff] }
0x13e5   : > { %v3593_v19 = vmul.f32 0.5, %v3592_v29  ;;  %v4330_v29 = vld [vmem:[%s6313_s12 + $0x8] sm:$0xff] }
0x13e6   : > { %v3626_v20 = vmul.f32 %v6076_v41, %v3615_v13 }
0x13e7   : > { %v3594_v36 = vsub.f32 1.5, %v3593_v19 }
0x13e8   : > { %v4590_v31 = vpop.eup %4589  ;;  %v3637_v14 = vadd.f32 %v6087_v17, %v3626_v20 }
0x13e9   : > { %v3595_v60 = vmul.f32 %v4588_v33, %v3594_v36  ;;  %v3601_v53 = vmul.f32 %v4590_v31, %v3529_v21  ;;  %vm3607_vm5 = vweird.f32 %v4590_v31 }
0x13ea   : > { %v3642_v35 = vpack.c.bf16 %v3637_v14, %v3636_v39  ;;  %vm3608_vm7 = vmor %vm3606_vm6, %vm3607_vm5 }
0x13eb   : > { %v3602_v40 = vmul.f32 %v4590_v31, %v3601_v53  ;;  %v3599_v32 = vsel %vm3598_vm4, %v4588_v33, %v3595_v60  ;;  %v4329_v53 = vld [vmem:[%s6313_s12] sm:$0xff] }
0x13ec   : > { %4287 = vmatmul.msk.bf16.gmra.mxu1 %vm482_vm0, %v3642_v35  ;;  %v3616_v48 = vmul.f32 %v3599_v32, %v6067_v63  ;;  %v4335_v63 = vld [vmem:[%s6313_s12 + $0x30] sm:$0xff] }
0x13ed   : > { %v3603_v6 = vmul.f32 0.5, %v3602_v40  ;;  %4094 = vmatpush.bf16.msra.mxu2 %v4335_v63 }
0x13ee   : > { %v3685_v8 = vpop.f32.mrf.mxu1  ;;  %v3627_v45 = vmul.f32 %v6076_v41, %v3616_v48 }
0x13ef   : > { %v3604_v26 = vsub.f32 1.5, %v3603_v6  ;;  %v6122_v37 = vadd.f32 %v6118_v5, %v3685_v8 }
0x13f0   : > { %v3638_v49 = vadd.f32 %v6087_v17, %v3627_v45 }
0x13f1   : > { %v3605_v11 = vmul.f32 %v4590_v31, %v3604_v26  ;;  %v6126_v59 = vmul.f32 0.70710677, %v6122_v37 }
0x13f3   : > { %v3609_v0 = vsel %vm3608_vm7, %v4590_v31, %v3605_v11  ;;  %v3737_v27 = vand.u32 2147483647, %v6126_v59  ;;  %vm3721_vm1 = vcmp.ge.f32.partialorder %v6126_v59, 0.0 }
0x13f4   : > { %v3617_v25 = vmul.f32 %v3609_v0, %v6080_v55  ;;  %v4334_v55 = vld [vmem:[%s6313_s12 + $0x28] sm:$0xff] }
0x13f5   : > { %v3745_v62 = vmul.f32 0.3275911, %v3737_v27  ;;  %4095 = vmatpush.bf16.msra.mxu2 %v4334_v55  ;;  %v3953_v51 = vsub.f32 0.0, %v3737_v27 }
0x13f6   : > { %v3687_v52 = vpop.f32.mrf.mxu1  ;;  %v3628_v22 = vmul.f32 %v6076_v41, %v3617_v25 }
0x13f7   : > { %v3753_v10 = vadd.f32 1.0, %v3745_v62  ;;  %v6139_v18 = vadd.f32 %v6118_v5, %v3687_v52  ;;  %v3961_v40 = vmul.f32 %v3953_v51, %v3737_v27 }
0x13f8   : > { %v3639_v43 = vadd.f32 %v6087_v17, %v3628_v22 }
0x13f9   : > { %4591 = vrcp.f32 %v3753_v10  ;;  %v6147_v2 = vmul.f32 0.70710677, %v6139_v18  ;;  %4096 = vmatpush.bf16.msra.mxu2 %v4333_v57  ;;  %v3772_v56 = vand.u32 2147483648, %v3753_v10  ;;  %v3770_v44 = vand.u32 2147483647, %v3753_v10 }
0x13fa   : > { %v3643_v9 = vpack.c.bf16 %v3639_v43, %v3638_v49  ;;  %vm3766_vm9 = vweird.f32 %v3753_v10  ;;  %v3969_v0 = vmul.f32 1.442695, %v3961_v40 }
0x13fb   : > { %v6150_v41 = vand.u32 2147483647, %v6147_v2  ;;  %v3773_v15 = vor.u32 1.1754944e-38, %v3772_v56  ;;  %vm3771_vm13 = vcmp.eq.f32.partialorder %v3770_v44, 8.507059e+37  ;;  %vm3722_vm4 = vcmp.ge.f32.partialorder %v6147_v2, 0.0 }
0x13fc   : > { %4288 = vmatmul.msk.bf16.gmra.mxu1 %vm482_vm0, %v3643_v9  ;;  %v3706_v2 = vmul.f32 0.5, %v6139_v18 }
0x13fd   : > { %v3746_v17 = vmul.f32 0.3275911, %v6150_v41  ;;  %4097 = vmatpush.bf16.msra.mxu2 %v4332_v46  ;;  %v3954_v45 = vsub.f32 0.0, %v6150_v41 }
0x13ff   : > { %v4592_v23 = vpop.eup %4591  ;;  %v3754_v47 = vadd.f32 1.0, %v3746_v17  ;;  %v3962_v55 = vmul.f32 %v3954_v45, %v6150_v41 }
0x1400   : > { %v3762_v12 = vmul.f32 %v4592_v23, %v3753_v10  ;;  %vm3767_vm8 = vweird.f32 %v4592_v23 }
0x1401   : > { %4593 = vrcp.f32 %v3754_v47  ;;  %vm3768_vm10 = vmor %vm3766_vm9, %vm3767_vm8  ;;  %4098 = vmatpush.bf16.msra.mxu2 %v4331_v24  ;;  %v3787_v36 = vand.u32 2147483648, %v3754_v47  ;;  %v3785_v14 = vand.u32 2147483647, %v3754_v47  ;;  %vm3781_vm15 = vweird.f32 %v3754_v47 }
0x1402   : > { %v3763_v7 = vsub.f32 1.0, %v3762_v12  ;;  %4595 = vpow2.f32 %v3969_v0 }
0x1403   : > { %v3788_v26 = vor.u32 1.1754944e-38, %v3787_v36  ;;  %vm3786_vm12 = vcmp.eq.f32.partialorder %v3785_v14, 8.507059e+37  ;;  %v4646_v36 = vmov -1.0  }
0x1404   : > { %v3764_v4 = vmul.f32 %v4592_v23, %v3763_v7 }
0x1405   : > { %4099 = vmatpush.bf16.msra.mxu2 %v4330_v29 }
0x1406   : > { %v3765_v33 = vadd.f32 %v4592_v23, %v3764_v4 }
0x1407   : > { %v4594_v21 = vpop.eup %4593 }
0x1408   : > { %v3769_v16 = vsel %vm3768_vm10, %v4592_v23, %v3765_v33  ;;  %v3777_v30 = vmul.f32 %v4594_v21, %v3754_v47  ;;  %vm3782_vm14 = vweird.f32 %v4594_v21  ;;  %v3971_v47 = vmul.f32 1.442695, %v3962_v55  ;;  %v4596_v56 = vpop.eup %4595 }
0x1409   : > { %v3774_v42 = vsel %vm3771_vm13, %v3773_v15, %v3769_v16  ;;  %4100 = vmatpush.bf16.msra.mxu2 %v4329_v53  ;;  %vm3783_vm11 = vmor %vm3781_vm15, %vm3782_vm14 }
0x140a   : > { %v3881_v13 = vmul.f32 1.0614054, %v3774_v42  ;;  %v3778_v19 = vsub.f32 1.0, %v3777_v30 }
0x140c   : > { %v3889_v20 = vadd.f32 -1.4531521, %v3881_v13  ;;  %v3690_v31 = vpop.f32.mrf.mxu1  ;;  %v3779_v39 = vmul.f32 %v4594_v21, %v3778_v19 }
0x140d   : > { %v6167_v60 = vadd.f32 %v6118_v5, %v3690_v31  ;;  %v3729_v31 = vsel %vm3721_vm1, 1.0, %v4646_v36 }
0x140e   : > { %v3897_v35 = vmul.f32 %v3889_v20, %v3774_v42  ;;  %v3780_v32 = vadd.f32 %v4594_v21, %v3779_v39 }
0x140f   : > { %v6173_v6 = vmul.f32 0.70710677, %v6167_v60 }
0x1410   : > { %v3905_v8 = vadd.f32 1.4214138, %v3897_v35  ;;  %v3784_v48 = vsel %vm3783_vm11, %v4594_v21, %v3780_v32 }
0x1411   : > { %v6176_v11 = vand.u32 2147483647, %v6173_v6  ;;  %v3789_v25 = vsel %vm3786_vm12, %v3788_v26, %v3784_v48  ;;  %v3730_v48 = vsel %vm3722_vm4, 1.0, %v4646_v36  ;;  %vm3723_vm13 = vcmp.ge.f32.partialorder %v6173_v6, 0.0 }
0x1412   : > { %v3913_v50 = vmul.f32 %v3905_v8, %v3774_v42  ;;  %v3882_v27 = vmul.f32 1.0614054, %v3789_v25 }
0x1413   : > { %v3747_v62 = vmul.f32 0.3275911, %v6176_v11 }
0x1414   : > { %v3921_v63 = vadd.f32 -0.28449672, %v3913_v50  ;;  %v3692_v52 = vpop.f32.mrf.mxu1  ;;  %v3890_v22 = vadd.f32 -1.4531521, %v3882_v27  ;;  %v3955_v50 = vsub.f32 0.0, %v6176_v11 }
0x1415   : > { %v3755_v10 = vadd.f32 1.0, %v3747_v62  ;;  %v6181_v49 = vadd.f32 %v6118_v5, %v3692_v52  ;;  %v3705_v62 = vmul.f32 0.5, %v6122_v37 }
0x1416   : > { %v3929_v43 = vmul.f32 %v3921_v63, %v3774_v42  ;;  %v3898_v9 = vmul.f32 %v3890_v22, %v3789_v25  ;;  %v3963_v55 = vmul.f32 %v3955_v50, %v6176_v11 }
0x1417   : > { %4597 = vrcp.f32 %v3755_v10  ;;  %v6185_v17 = vmul.f32 0.70710677, %v6181_v49  ;;  %v3802_v29 = vand.u32 2147483648, %v3755_v10  ;;  %v3800_v51 = vand.u32 2147483647, %v3755_v10 }
0x1418   : > { %v3937_v57 = vadd.f32 0.2548296, %v3929_v43  ;;  %v3906_v23 = vadd.f32 1.4214138, %v3898_v9  ;;  %4599 = vpow2.f32 %v3971_v47  ;;  %vm3796_vm3 = vweird.f32 %v3755_v10 }
0x1419   : > { %v6188_v46 = vand.u32 2147483647, %v6185_v17  ;;  %v3803_v35 = vor.u32 1.1754944e-38, %v3802_v29  ;;  %vm3801_vm6 = vcmp.eq.f32.partialorder %v3800_v51, 8.507059e+37  ;;  %v3973_v18 = vmul.f32 1.442695, %v3963_v55 }
0x141a   : > { %v3945_v12 = vmul.f32 %v3937_v57, %v3774_v42  ;;  %v3914_v7 = vmul.f32 %v3906_v23, %v3789_v25  ;;  %vm3724_vm14 = vcmp.ge.f32.partialorder %v6185_v17, 0.0 }
0x141b   : > { %v3748_v4 = vmul.f32 0.3275911, %v6188_v46 }
0x141c   : > { %v3985_v24 = vmul.f32 %v4596_v56, %v3945_v12  ;;  %v3922_v33 = vadd.f32 -0.28449672, %v3914_v7 }
0x141d   : > { %v4598_v44 = vpop.eup %4597  ;;  %v3756_v15 = vadd.f32 1.0, %v3748_v4  ;;  %v3956_v4 = vsub.f32 0.0, %v6188_v46 }
0x141e   : > { %v3792_v41 = vmul.f32 %v4598_v44, %v3755_v10  ;;  %v3930_v21 = vmul.f32 %v3922_v33, %v3789_v25  ;;  %v3993_v42 = vsub.f32 1.0, %v3985_v24  ;;  %vm3797_vm2 = vweird.f32 %v4598_v44  ;;  %v4600_v20 = vpop.eup %4599 }
0x141f   : > { %4601 = vrcp.f32 %v3756_v15  ;;  %vm3798_vm5 = vmor %vm3796_vm3, %vm3797_vm2  ;;  %v3817_v63 = vand.u32 2147483648, %v3756_v15  ;;  %v3815_v43 = vand.u32 2147483647, %v3756_v15  ;;  %vm3811_vm8 = vweird.f32 %v3756_v15 }
0x1420   : > { %v3793_v16 = vsub.f32 1.0, %v3792_v41  ;;  %v3938_v30 = vadd.f32 0.2548296, %v3930_v21  ;;  %v4001_v14 = vmul.f32 %v3993_v42, %v3729_v31  ;;  %4603 = vpow2.f32 %v3973_v18 }
0x1421   : > { %v3818_v47 = vor.u32 1.1754944e-38, %v3817_v63  ;;  %vm3816_vm10 = vcmp.eq.f32.partialorder %v3815_v43, 8.507059e+37  ;;  %v3964_v21 = vmul.f32 %v3956_v4, %v6188_v46  ;;  %v3731_v46 = vsel %vm3723_vm13, 1.0, %v4646_v36 }
0x1422   : > { %v3794_v13 = vmul.f32 %v4598_v44, %v3793_v16  ;;  %v3946_v19 = vmul.f32 %v3938_v30, %v3789_v25  ;;  %v4009_v25 = vadd.f32 1.0, %v4001_v14 }
0x1423   : > { %v3975_v29 = vmul.f32 1.442695, %v3964_v21 }
0x1424   : > { %v3795_v39 = vadd.f32 %v4598_v44, %v3794_v13  ;;  %v3986_v53 = vmul.f32 %v4600_v20, %v3946_v19  ;;  %v4017_v57 = vmul.f32 %v4009_v25, %v3705_v62  ;;  %v3708_v25 = vmul.f32 0.5, %v6181_v49 }
0x1425   : > { %v4602_v59 = vpop.eup %4601  ;;  %4605 = vpow2.f32 %v3975_v29 }
0x1426   : > { %v3799_v40 = vsel %vm3798_vm5, %v4598_v44, %v3795_v39  ;;  %v3994_v32 = vsub.f32 1.0, %v3986_v53  ;;  %v3807_v8 = vmul.f32 %v4602_v59, %v3756_v15  ;;  %vm3812_vm7 = vweird.f32 %v4602_v59  ;;  %v4604_v19 = vpop.eup %4603 }
0x1427   : > { %v3804_v26 = vsel %vm3801_vm6, %v3803_v35, %v3799_v40  ;;  %vm3813_vm9 = vmor %vm3811_vm8, %vm3812_vm7 }
0x1428   : > { %v3883_v0 = vmul.f32 1.0614054, %v3804_v26  ;;  %v4002_v45 = vmul.f32 %v3994_v32, %v3730_v48  ;;  %v3808_v27 = vsub.f32 1.0, %v3807_v8 }
0x142a   : > { %v3891_v52 = vadd.f32 -1.4531521, %v3883_v0  ;;  %v4010_v22 = vadd.f32 1.0, %v4002_v45  ;;  %v3809_v10 = vmul.f32 %v4602_v59, %v3808_v27  ;;  %v3707_v0 = vmul.f32 0.5, %v6167_v60 }
0x142c   : > { %v3899_v9 = vmul.f32 %v3891_v52, %v3804_v26  ;;  %v4018_v23 = vmul.f32 %v4010_v22, %v3706_v2  ;;  %v3810_v12 = vadd.f32 %v4602_v59, %v3809_v10 }
0x142e   : > { %v3907_v7 = vadd.f32 1.4214138, %v3899_v9  ;;  %v4025_v56 = vpack.c.bf16 %v4018_v23, %v4017_v57  ;;  %v3814_v37 = vsel %vm3813_vm9, %v4602_v59, %v3810_v12  ;;  %v4606_v59 = vpop.eup %4605 }
0x142f   : > { %v3819_v44 = vsel %vm3816_vm10, %v3818_v47, %v3814_v37 }
0x1430   : > { %v3915_v24 = vmul.f32 %v3907_v7, %v3804_v26  ;;  %4101 = vmatmul.bf16.vlgmr.msra.gmra.mxu2 %v4025_v56  ;;  %v3884_v33 = vmul.f32 1.0614054, %v3819_v44 }
0x1432   : > { %v3923_v41 = vadd.f32 -0.28449672, %v3915_v24  ;;  %v3892_v11 = vadd.f32 -1.4531521, %v3884_v33 }
0x1434   : > { %v3931_v15 = vmul.f32 %v3923_v41, %v3804_v26  ;;  %v3900_v16 = vmul.f32 %v3892_v11, %v3819_v44 }
0x1436   : > { %v3939_v42 = vadd.f32 0.2548296, %v3931_v15  ;;  %v3908_v30 = vadd.f32 1.4214138, %v3900_v16 }
0x1438   : > { %v3947_v13 = vmul.f32 %v3939_v42, %v3804_v26  ;;  %v3916_v51 = vmul.f32 %v3908_v30, %v3819_v44  ;;  %v3732_v26 = vsel %vm3724_vm14, 1.0, %v4646_v36 }
0x143a   : > { %v3924_v20 = vadd.f32 -0.28449672, %v3916_v51  ;;  %v3987_v31 = vmul.f32 %v4604_v19, %v3947_v13 }
0x143c   : > { %v3932_v39 = vmul.f32 %v3924_v20, %v3819_v44  ;;  %v3995_v53 = vsub.f32 1.0, %v3987_v31 }
0x143e   : > { %v3940_v14 = vadd.f32 0.2548296, %v3932_v39  ;;  %v4003_v32 = vmul.f32 %v3995_v53, %v3731_v46 }
0x1440   : > { %v3948_v35 = vmul.f32 %v3940_v14, %v3819_v44  ;;  %v4011_v50 = vadd.f32 1.0, %v4003_v32 }
0x1442   : > { %v3988_v40 = vmul.f32 %v4606_v59, %v3948_v35  ;;  %v4019_v45 = vmul.f32 %v4011_v50, %v3707_v0 }
0x1444   : > { %v3996_v8 = vsub.f32 1.0, %v3988_v40 }
0x1446   : > { %v4004_v48 = vmul.f32 %v3996_v8, %v3732_v26 }
0x1448   : > { %v4012_v6 = vadd.f32 1.0, %v4004_v48 }
0x144a   : > { %v4020_v27 = vmul.f32 %v4012_v6, %v3708_v25 }
0x144c   : > { %v4026_v62 = vpack.c.bf16 %v4020_v27, %v4019_v45 }
0x144e   : > { %4106 = vmatmul.bf16.gmra.mxu2 %v4026_v62 }
0x1469   : > { %v3695_v2 = vpop.f32.mrf.mxu1 }
0x146a   : > { %v6208_v63 = vadd.f32 %v6118_v5, %v3695_v2 }
0x146c   : > { %v6211_v17 = vmul.f32 0.70710677, %v6208_v63 }
0x146e   : > { %v3741_v52 = vand.u32 2147483647, %v6211_v17  ;;  %vm3725_vm14 = vcmp.ge.f32.partialorder %v6211_v17, 0.0 }
0x1470   : > { %v3749_v22 = vmul.f32 0.3275911, %v3741_v52  ;;  %v3957_v13 = vsub.f32 0.0, %v3741_v52 }
0x1471   : > { %v3697_v10 = vpop.f32.mrf.mxu1 }
0x1472   : > { %v3757_v43 = vadd.f32 1.0, %v3749_v22  ;;  %v6215_v60 = vadd.f32 %v6118_v5, %v3697_v10  ;;  %v3965_v35 = vmul.f32 %v3957_v13, %v3741_v52 }
0x1474   : > { %4607 = vrcp.f32 %v3757_v43  ;;  %v6218_v49 = vmul.f32 0.70710677, %v6215_v60  ;;  %v3832_v44 = vand.u32 2147483648, %v3757_v43  ;;  %v3830_v33 = vand.u32 2147483647, %v3757_v43 }
0x1475   : > { %vm3826_vm11 = vweird.f32 %v3757_v43  ;;  %v3977_v6 = vmul.f32 1.442695, %v3965_v35 }
0x1476   : > { %v6221_v55 = vand.u32 2147483647, %v6218_v49  ;;  %v3833_v30 = vor.u32 1.1754944e-38, %v3832_v44  ;;  %vm3831_vm1 = vcmp.eq.f32.partialorder %v3830_v33, 8.507059e+37 }
0x1478   : > { %v3750_v9 = vmul.f32 0.3275911, %v6221_v55  ;;  %v3958_v27 = vsub.f32 0.0, %v6221_v55 }
0x1479   : > { %v3700_v57 = vpop.f32.mrf.mxu1 }
0x147a   : > { %v4608_v23 = vpop.eup %4607  ;;  %v6225_v12 = vadd.f32 %v6118_v5, %v3700_v57  ;;  %v3758_v7 = vadd.f32 1.0, %v3750_v9 }
0x147b   : > { %v3822_v47 = vmul.f32 %v4608_v23, %v3757_v43  ;;  %vm3827_vm15 = vweird.f32 %v4608_v23 }
0x147c   : > { %v6228_v56 = vmul.f32 0.70710677, %v6225_v12  ;;  %4609 = vrcp.f32 %v3758_v7  ;;  %vm3828_vm12 = vmor %vm3826_vm11, %vm3827_vm15  ;;  %v3845_v46 = vand.u32 2147483647, %v3758_v7  ;;  %vm3841_vm3 = vweird.f32 %v3758_v7 }
0x147d   : > { %v3823_v37 = vsub.f32 1.0, %v3822_v47  ;;  %v3966_v47 = vmul.f32 %v3958_v27, %v6221_v55 }
0x147e   : > { %v6231_v18 = vand.u32 2147483647, %v6228_v56  ;;  %vm3846_vm5 = vcmp.eq.f32.partialorder %v3845_v46, 8.507059e+37 }
0x147f   : > { %v3824_v4 = vmul.f32 %v4608_v23, %v3823_v37 }
0x1480   : > { %v3751_v24 = vmul.f32 0.3275911, %v6231_v18  ;;  %v3959_v33 = vsub.f32 0.0, %v6231_v18 }
0x1481   : > { %v3702_v41 = vpop.f32.mrf.mxu1  ;;  %v3825_v11 = vadd.f32 %v4608_v23, %v3824_v4 }
0x1482   : > { %v3759_v21 = vadd.f32 1.0, %v3751_v24  ;;  %v6235_v15 = vadd.f32 %v6118_v5, %v3702_v41  ;;  %v4610_v16 = vpop.eup %4609  ;;  %v3847_v5 = vand.u32 2147483648, %v3758_v7 }
0x1483   : > { %v3829_v42 = vsel %vm3828_vm12, %v4608_v23, %v3825_v11  ;;  %v3837_v29 = vmul.f32 %v4610_v16, %v3758_v7  ;;  %vm3842_vm2 = vweird.f32 %v4610_v16  ;;  %vm3726_vm12 = vcmp.ge.f32.partialorder %v6218_v49, 0.0 }
0x1484   : > { %4611 = vrcp.f32 %v3759_v21  ;;  %v6238_v51 = vmul.f32 0.70710677, %v6235_v15  ;;  %v3834_v19 = vsel %vm3831_vm1, %v3833_v30, %v3829_v42  ;;  %vm3843_vm4 = vmor %vm3841_vm3, %vm3842_vm2  ;;  %v3848_v0 = vor.u32 1.1754944e-38, %v3847_v5 }
0x1485   : > { %v3838_v20 = vsub.f32 1.0, %v3837_v29  ;;  %v3885_v31 = vmul.f32 1.0614054, %v3834_v19  ;;  %v3862_v52 = vand.u32 2147483648, %v3759_v21  ;;  %v3860_v43 = vand.u32 2147483647, %v3759_v21 }
0x1486   : > { %v6241_v39 = vand.u32 2147483647, %v6238_v51  ;;  %vm3856_vm7 = vweird.f32 %v3759_v21  ;;  %v3967_v5 = vmul.f32 %v3959_v33, %v6231_v18  ;;  %v3709_v49 = vmul.f32 0.5, %v6208_v63 }
0x1487   : > { %v3839_v14 = vmul.f32 %v4610_v16, %v3838_v20  ;;  %v3893_v53 = vadd.f32 -1.4531521, %v3885_v31  ;;  %v3863_v37 = vor.u32 1.1754944e-38, %v3862_v52  ;;  %vm3861_vm9 = vcmp.eq.f32.partialorder %v3860_v43, 8.507059e+37 }
0x1488   : > { %v3752_v59 = vmul.f32 0.3275911, %v6241_v39  ;;  %vm3727_vm1 = vcmp.ge.f32.partialorder %v6228_v56, 0.0  ;;  %vm3728_vm2 = vcmp.ge.f32.partialorder %v6238_v51, 0.0 }
0x1489   : > { %v3840_v32 = vadd.f32 %v4610_v16, %v3839_v14  ;;  %v3901_v8 = vmul.f32 %v3893_v53, %v3834_v19  ;;  %v3735_v63 = vsel %vm3727_vm1, 1.0, %v4646_v36 }
0x148a   : > { %v4612_v40 = vpop.eup %4611  ;;  %v3760_v48 = vadd.f32 1.0, %v3752_v59 }
0x148b   : > { %v3852_v26 = vmul.f32 %v4612_v40, %v3759_v21  ;;  %v3844_v50 = vsel %vm3843_vm4, %v4610_v16, %v3840_v32  ;;  %v3909_v25 = vadd.f32 1.4214138, %v3901_v8  ;;  %vm3857_vm6 = vweird.f32 %v4612_v40 }
0x148c   : > { %4613 = vrcp.f32 %v3760_v48  ;;  %v3849_v62 = vsel %vm3846_vm5, %v3848_v0, %v3844_v50  ;;  %vm3858_vm8 = vmor %vm3856_vm7, %vm3857_vm6  ;;  %v3979_v21 = vmul.f32 1.442695, %v3966_v47  ;;  %v3877_v31 = vand.u32 2147483648, %v3760_v48 }
0x148d   : > { %v3853_v45 = vsub.f32 1.0, %v3852_v26  ;;  %v3917_v2 = vmul.f32 %v3909_v25, %v3834_v19  ;;  %v3886_v10 = vmul.f32 1.0614054, %v3849_v62  ;;  %4615 = vpow2.f32 %v3977_v6 }
0x148e   : > { %v3875_v35 = vand.u32 2147483647, %v3760_v48  ;;  %4617 = vpow2.f32 %v3979_v21  ;;  %vm3871_vm13 = vweird.f32 %v3760_v48  ;;  %v3981_v50 = vmul.f32 1.442695, %v3967_v5 }
0x148f   : > { %v3854_v22 = vmul.f32 %v4612_v40, %v3853_v45  ;;  %v3925_v9 = vadd.f32 -0.28449672, %v3917_v2  ;;  %v3894_v57 = vadd.f32 -1.4531521, %v3886_v10  ;;  %v3960_v0 = vsub.f32 0.0, %v6241_v39 }
0x1490   : > { %vm3876_vm11 = vcmp.eq.f32.partialorder %v3875_v35, 8.507059e+37  ;;  %v3733_v10 = vsel %vm3725_vm14, 1.0, %v4646_v36  ;;  %4619 = vpow2.f32 %v3981_v50  ;;  %v3712_v50 = vmul.f32 0.5, %v6235_v15 }
0x1491   : > { %v3855_v23 = vadd.f32 %v4612_v40, %v3854_v22  ;;  %v3933_v7 = vmul.f32 %v3925_v9, %v3834_v19  ;;  %v3902_v44 = vmul.f32 %v3894_v57, %v3849_v62  ;;  %v3968_v9 = vmul.f32 %v3960_v0, %v6241_v39 }
0x1492   : > { %v4614_v4 = vpop.eup %4613 }
0x1493   : > { %v3859_v24 = vsel %vm3858_vm8, %v4612_v40, %v3855_v23  ;;  %v3867_v41 = vmul.f32 %v4614_v4, %v3760_v48  ;;  %v3941_v11 = vadd.f32 0.2548296, %v3933_v7  ;;  %v3910_v42 = vadd.f32 1.4214138, %v3902_v44  ;;  %v4616_v14 = vpop.eup %4615 }
0x1494   : > { %v3864_v16 = vsel %vm3861_vm9, %v3863_v37, %v3859_v24  ;;  %vm3872_vm10 = vweird.f32 %v4614_v4  ;;  %v4618_v48 = vpop.eup %4617  ;;  %v3983_v24 = vmul.f32 1.442695, %v3968_v9 }
0x1495   : > { %v3887_v30 = vmul.f32 1.0614054, %v3864_v16  ;;  %v3868_v29 = vsub.f32 1.0, %v3867_v41  ;;  %v3949_v13 = vmul.f32 %v3941_v11, %v3834_v19  ;;  %v3918_v20 = vmul.f32 %v3910_v42, %v3849_v62  ;;  %vm3873_vm15 = vmor %vm3871_vm13, %vm3872_vm10 }
0x1496   : > { %v3878_v19 = vor.u32 1.1754944e-38, %v3877_v31  ;;  %v4620_v11 = vpop.eup %4619  ;;  %4621 = vpow2.f32 %v3983_v24 }
0x1497   : > { %v3895_v55 = vadd.f32 -1.4531521, %v3887_v30  ;;  %v3869_v53 = vmul.f32 %v4614_v4, %v3868_v29  ;;  %v3926_v59 = vadd.f32 -0.28449672, %v3918_v20  ;;  %v3989_v46 = vmul.f32 %v4616_v14, %v3949_v13 }
0x1498   : > { %v3710_v30 = vmul.f32 0.5, %v6215_v60 }
0x1499   : > { %v3903_v40 = vmul.f32 %v3895_v55, %v3864_v16  ;;  %v3870_v32 = vadd.f32 %v4614_v4, %v3869_v53  ;;  %v3934_v8 = vmul.f32 %v3926_v59, %v3849_v62  ;;  %v3997_v6 = vsub.f32 1.0, %v3989_v46 }
0x149a   : > { %v3736_v46 = vsel %vm3728_vm2, 1.0, %v4646_v36 }
0x149b   : > { %v3911_v26 = vadd.f32 1.4214138, %v3903_v40  ;;  %v3874_v25 = vsel %vm3873_vm15, %v4614_v4, %v3870_v32  ;;  %v3942_v18 = vadd.f32 0.2548296, %v3934_v8  ;;  %v4005_v23 = vmul.f32 %v3997_v6, %v3733_v10  ;;  %v4428_v40 = vld [vmem:[%s6314_s13] ss:$0 sm:$0xff] }
0x149c   : > { %v3879_v45 = vsel %vm3876_vm11, %v3878_v19, %v3874_v25  ;;  %v4622_v53 = vpop.eup %4621 }
0x149d   : > { %v3919_v27 = vmul.f32 %v3911_v26, %v3864_v16  ;;  %v3888_v2 = vmul.f32 1.0614054, %v3879_v45  ;;  %v3950_v52 = vmul.f32 %v3942_v18, %v3849_v62  ;;  %v3734_v62 = vsel %vm3726_vm12, 1.0, %v4646_v36 }
0x149e   : > { %v4013_v41 = vadd.f32 1.0, %v4005_v23  ;;  %v3711_v26 = vmul.f32 0.5, %v6225_v12 }
0x149f   : > { %v3927_v22 = vadd.f32 -0.28449672, %v3919_v27  ;;  %v3896_v43 = vadd.f32 -1.4531521, %v3888_v2  ;;  %v3990_v57 = vmul.f32 %v4618_v48, %v3950_v52 }
0x14a0   : > { %v4021_v13 = vmul.f32 %v4013_v41, %v3709_v49 }
0x14a1   : > { %v3935_v47 = vmul.f32 %v3927_v22, %v3864_v16  ;;  %v3904_v7 = vmul.f32 %v3896_v43, %v3879_v45  ;;  %v3998_v37 = vsub.f32 1.0, %v3990_v57 }
0x14a3   : > { %v3943_v4 = vadd.f32 0.2548296, %v3935_v47  ;;  %v3912_v44 = vadd.f32 1.4214138, %v3904_v7  ;;  %v4006_v33 = vmul.f32 %v3998_v37, %v3734_v62 }
0x14a5   : > { %v3951_v17 = vmul.f32 %v3943_v4, %v3864_v16  ;;  %v3920_v42 = vmul.f32 %v3912_v44, %v3879_v45  ;;  %v4014_v39 = vadd.f32 1.0, %v4006_v33 }
0x14a7   : > { %v3928_v21 = vadd.f32 -0.28449672, %v3920_v42  ;;  %v3991_v29 = vmul.f32 %v4620_v11, %v3951_v17  ;;  %v4022_v20 = vmul.f32 %v4014_v39, %v3710_v30 }
0x14a9   : > { %v3936_v31 = vmul.f32 %v3928_v21, %v3879_v45  ;;  %v4027_v55 = vpack.c.bf16 %v4022_v20, %v4021_v13  ;;  %v3999_v5 = vsub.f32 1.0, %v3991_v29 }
0x14ab   : > { %v3944_v14 = vadd.f32 0.2548296, %v3936_v31  ;;  %4111 = vmatmul.bf16.gmra.mxu2 %v4027_v55  ;;  %v4007_v35 = vmul.f32 %v3999_v5, %v3735_v63 }
0x14ad   : > { %v3952_v16 = vmul.f32 %v3944_v14, %v3879_v45  ;;  %v4015_v8 = vadd.f32 1.0, %v4007_v35 }
0x14af   : > { %v3992_v60 = vmul.f32 %v4622_v53, %v3952_v16  ;;  %v4023_v0 = vmul.f32 %v4015_v8, %v3711_v26 }
0x14b1   : > { %v4000_v59 = vsub.f32 1.0, %v3992_v60 }
0x14b3   : > { %v4102_v56 = vpop.f32.mrf.mxu2  ;;  %v4008_v32 = vmul.f32 %v4000_v59, %v3736_v46 }
0x14b4   : > { %v4122_v19 = vadd.f32 %v4102_v56, %v5951_v38 }
0x14b5   : > { %v4016_v36 = vadd.f32 1.0, %v4008_v32 }
0x14b6   : > { %v4134_v51 = vadd.f32 %v4428_v40, %v4122_v19 }
0x14b7   : > { %v4024_v25 = vmul.f32 %v4016_v36, %v3712_v50 }
0x14b8   : > { %4142 = vst.msk [vmem:[%s6273_s21] sm:$0xff] %vm482_vm0, %v4134_v51 }
0x14b9   : > { %v4028_v38 = vpack.c.bf16 %v4024_v25, %v4023_v0 }
0x14bb   : > { %v4104_v12 = vpop.f32.mrf.mxu2  ;;  %4116 = vmatmul.bf16.gmra.mxu2 %v4028_v38 }
0x14bc   : > { %v4123_v15 = vadd.f32 %v4104_v12, %v5957_v1 }
0x14be   : > { %v4135_v18 = vadd.f32 %v4428_v40, %v4123_v15 }
0x14c0   : > { %4143 = vst.msk [vmem:[%s6273_s21 + $0x8] sm:$0xff] %vm482_vm0, %v4135_v18 }
0x14d1   : > { %v4107_v6 = vpop.f32.mrf.mxu2 }
0x14d2   : > { %v4124_v45 = vadd.f32 %v4107_v6, %v5981_v28 }
0x14d4   : > { %v4136_v27 = vadd.f32 %v4428_v40, %v4124_v45 }
0x14d6   : > { %4144 = vst.msk [vmem:[%s6273_s21 + $0x10] sm:$0xff] %vm482_vm0, %v4136_v27 }
0x14d9   : > { %v4109_v2 = vpop.f32.mrf.mxu2 }
0x14da   : > { %v4125_v52 = vadd.f32 %v4109_v2, %v5987_v3 }
0x14dc   : > { %v4137_v22 = vadd.f32 %v4428_v40, %v4125_v52 }
0x14de   : > { %4145 = vst.msk [vmem:[%s6273_s21 + $0x18] sm:$0xff] %vm482_vm0, %v4137_v22 }
0x152e   : > { %v4112_v1 = vpop.f32.mrf.mxu2 }
0x152f   : > { %v4126_v48 = vadd.f32 %v4112_v1, %v6001_v61 }
0x1531   : > { %v4138_v10 = vadd.f32 %v4428_v40, %v4126_v48 }
0x1533   : > { %4146 = vst.msk [vmem:[%s6273_s21 + $0x20] sm:$0xff] %vm482_vm0, %v4138_v10 }
0x1536   : > { %v4114_v43 = vpop.f32.mrf.mxu2 }
0x1537   : > { %v4127_v28 = vadd.f32 %v4114_v43, %v6012_v58 }
0x1539   : > { %v4139_v9 = vadd.f32 %v4428_v40, %v4127_v28 }
0x153b   : > { %4147 = vst.msk [vmem:[%s6273_s21 + $0x28] sm:$0xff] %vm482_vm0, %v4139_v9 }
0x153e   : > { %v4117_v57 = vpop.f32.mrf.mxu2 }
0x153f   : > { %v4128_v23 = vadd.f32 %v4117_v57, %v6019_v34 }
0x1541   : > { %v4140_v3 = vadd.f32 %v4428_v40, %v4128_v23 }
0x1543   : > { %4148 = vst.msk [vmem:[%s6273_s21 + $0x30] sm:$0xff] %vm482_vm0, %v4140_v3 }
0x1546   : > { %v4119_v47 = vpop.f32.mrf.mxu2 }
0x1547   : > { %v4129_v7 = vadd.f32 %v4119_v47, %v6025_v54 }
0x1549   : > { %v4141_v37 = vadd.f32 %v4428_v40, %v4129_v7 }
0x154b   : > { %4149 = vst.msk [vmem:[%s6273_s21 + $0x38] sm:$0xff] %vm482_vm0, %v4141_v37 }
0x154c PF: > { %s24_s29 = sadd.s32 1, %s4629_s29  }
0x154d   : > { %p21_p4 = scmp.ge.s32.totalorder %s24_s29, 4  }
0x154f   :  { %23 = sbr.rel (!%p21_p4) target bundleno = 1 (0x1), region = 109 }

</bundles_post_ra>
